<compile_context>
chip_gen: v7x
topology: tpu7x:2x2x1
jax: 0.10.0
libtpu: 0.0.40
codegen_flags: <defaults>
</compile_context>

<pallas_src>
import functools
import numpy as np

import jax
import jax.numpy as jnp
from jax.experimental import pallas as pl
from jax.experimental.pallas import tpu as pltpu


def _round_up(x, m):
    return ((x + m - 1) // m) * m


# ------------------------------------------------------------------ kernel 1: IoU + NMS
def _iou_nms_kernel(s_col_ref, e_col_ref, s_row_ref, e_row_ref,
                    sup_ref, sel_ref, mask_scr, nb_scr,
                    *, thresh, topk, neighbor, n_real):
    """Fused pairwise temporal-IoU + NMS-style suppression for one batch element."""
    n_pad = mask_scr.shape[0]
    s_i = s_col_ref[0]                       # (N_pad, 1)  reference moment (row i)
    e_i = e_col_ref[0]
    s_j = s_row_ref[0]                       # (1, N_pad)  candidate moment (col j)
    e_j = e_row_ref[0]

    inter = jnp.minimum(e_i, e_j) - jnp.maximum(s_i, s_j)
    union = jnp.maximum(e_i, e_j) - jnp.minimum(s_i, s_j)
    row = jax.lax.broadcasted_iota(jnp.int32, (n_pad, n_pad), 0)
    col = jax.lax.broadcasted_iota(jnp.int32, (n_pad, n_pad), 1)
    # IoU > thresh without the divide (union > 0 for every real pair), strict upper tri.
    m = jnp.logical_and(jnp.maximum(inter, 0.0) > thresh * union, col > row)
    mf = m.astype(jnp.float32)
    mask_scr[...] = mf

    # Inclusive prefix-sum along j in one MXU pass (exact: 0/1 operands, f32 accumulate).
    triu_inc = (row <= col).astype(jnp.float32)
    cs = jnp.dot(mf, triu_inc, preferred_element_type=jnp.float32)
    nb_scr[...] = mf * (cs <= float(neighbor)).astype(jnp.float32)

    lane = jax.lax.broadcasted_iota(jnp.int32, (1, n_pad), 1)
    sup0 = (lane >= n_real).astype(jnp.float32)      # padded lanes start "suppressed"
    sel0 = jnp.zeros((1, n_pad), jnp.float32)

    def body(i, carry):
        sup, sel, count = carry
        onehot = (lane == i).astype(jnp.float32)
        sup_i = jnp.sum(onehot * sup)                # suppressed[i] as a scalar
        act = (sup_i < 0.5).astype(jnp.float32) * (count < topk).astype(jnp.float32)
        m_row = mask_scr[pl.ds(i, 1), :]             # (1, N_pad)
        nb_row = nb_scr[pl.ds(i, 1), :]
        new_sup = jnp.maximum(sup, jnp.maximum(m_row, onehot))
        new_sel = jnp.maximum(sel, jnp.maximum(nb_row, onehot))
        sup = sup + act * (new_sup - sup)
        sel = sel + act * (new_sel - sel)
        count = count + act.astype(jnp.int32)
        return sup, sel, count

    sup, sel, _ = jax.lax.fori_loop(0, n_real - 1, body,
                                    (sup0, sel0, jnp.int32(0)))
    sup_ref[0] = sup
    sel_ref[0] = sel


def iou_nms(s_sorted, e_sorted, *, thresh, topk, neighbor, n_real):
    """Batched fused kernel. Inputs (B, N_pad) f32; returns (sup, sel) as (B, N_pad) 0/1 f32."""
    B, n_pad = s_sorted.shape
    s_col = s_sorted.reshape(B, n_pad, 1)
    e_col = e_sorted.reshape(B, n_pad, 1)
    s_row = s_sorted.reshape(B, 1, n_pad)
    e_row = e_sorted.reshape(B, 1, n_pad)
    kern = functools.partial(_iou_nms_kernel, thresh=float(thresh), topk=int(topk),
                             neighbor=int(neighbor), n_real=int(n_real))
    col_spec = pl.BlockSpec((1, n_pad, 1), lambda b: (b, 0, 0))
    row_spec = pl.BlockSpec((1, 1, n_pad), lambda b: (b, 0, 0))
    vec_spec = pl.BlockSpec((1, 1, n_pad), lambda b: (b, 0, 0))
    sup, sel = pl.pallas_call(
        kern,
        out_shape=(jax.ShapeDtypeStruct((B, 1, n_pad), jnp.float32),
                   jax.ShapeDtypeStruct((B, 1, n_pad), jnp.float32)),
        grid_spec=pltpu.PrefetchScalarGridSpec(
            num_scalar_prefetch=0,
            grid=(B,),
            in_specs=[col_spec, col_spec, row_spec, row_spec],
            out_specs=(vec_spec, vec_spec),
            scratch_shapes=[pltpu.VMEM((n_pad, n_pad), jnp.float32),
                            pltpu.VMEM((n_pad, n_pad), jnp.float32)]),
        compiler_params=pltpu.CompilerParams(dimension_semantics=("parallel",)),
    )(s_col, e_col, s_row, e_row)
    return sup[:, 0, :], sel[:, 0, :]


# ------------------------------------------------------------------ kernel 2: row gather
def _gather_rows_kernel(idx_ref, table_ref, out_ref):
    """Bit-exact batched row gather: out[b, k, :] = table[b, idx[b, k], :]."""
    b = pl.program_id(0)
    k_pad = out_ref.shape[1]
    for k in range(k_pad):                    # static unroll; store offsets are static
        r = idx_ref[b, k]                     # scalar read from SMEM (prefetched)
        out_ref[0, pl.ds(k, 1), :] = table_ref[0, pl.ds(r, 1), :]


def gather_rows(idx, table):
    """idx (B, K_pad) int32, table (B, TT, C_pad) f32 -> (B, K_pad, C_pad) f32."""
    B, k_pad = idx.shape
    _, tt, c_pad = table.shape
    return pl.pallas_call(
        _gather_rows_kernel,
        out_shape=jax.ShapeDtypeStruct((B, k_pad, c_pad), jnp.float32),
        grid_spec=pltpu.PrefetchScalarGridSpec(
            num_scalar_prefetch=1,
            grid=(B,),
            in_specs=[pl.BlockSpec((1, tt, c_pad), lambda b, idx_ref: (b, 0, 0))],
            out_specs=pl.BlockSpec((1, k_pad, c_pad), lambda b, idx_ref: (b, 0, 0))),
        compiler_params=pltpu.CompilerParams(dimension_semantics=("parallel",)),
    )(idx, table)


# -------------------------------------------------------------------------- jitted forward
@functools.partial(jax.jit, static_argnames=("topk", "neighbor", "negative",
                                             "thresh", "n_real"))
def _forward(score_pred, map2d, offset_gt, tmap, starts, ends, flat,
             *, topk, neighbor, negative, thresh, n_real):
    B, T, _ = score_pred.shape
    D = map2d.shape[-1]
    c_off = offset_gt.shape[-1]
    TT = T * T
    n_pad = max(_round_up(n_real, 128), 128)

    # ---- per-batch descending sort by score (plain JAX, batched over B) ----
    scores = score_pred.reshape(B, TT)[:, flat]              # (B, n_real)
    ranks = jnp.argsort(-scores, axis=-1)                    # descending
    s_sorted = jnp.take(starts, ranks).astype(jnp.float32)   # (B, n_real)
    e_sorted = jnp.take(ends, ranks).astype(jnp.float32)
    flat_sorted = jnp.take(flat, ranks)                      # (B, n_real) int32

    pad = n_pad - n_real
    big = 4.0 * T                                            # inert padded moments: IoU == 0
    s_padded = jnp.pad(s_sorted, ((0, 0), (0, pad)), constant_values=big)
    e_padded = jnp.pad(e_sorted, ((0, 0), (0, pad)), constant_values=big)
    flat_padded = jnp.pad(flat_sorted, ((0, 0), (0, pad)))

    # ---- fused IoU + NMS suppression (Pallas, grid over batch) ----
    sup, sel = iou_nms(s_padded, e_padded, thresh=thresh, topk=topk,
                       neighbor=neighbor, n_real=n_real)

    # ---- assemble fixed-size index list [negatives | positive padding | selected] ----
    total_num = topk * (neighbor + 1)
    K = negative + total_num
    select = sel > 0.5                                       # (B, n_pad)
    unsup = sup < 0.5                                        # padded lanes excluded (sup=1)
    ar = jnp.arange(n_pad)[None, :]
    sel_order = jnp.argsort(jnp.where(select, ar, ar + n_pad), axis=-1)
    unsup_order = jnp.argsort(jnp.where(unsup, ar, ar + n_pad), axis=-1)
    sel_count = jnp.sum(select, axis=-1).astype(jnp.int32)   # (B,)
    unsup_count = jnp.sum(unsup, axis=-1).astype(jnp.int32)
    pad_count = total_num - sel_count                        # (B,), always >= 0

    kk = jnp.broadcast_to(jnp.arange(total_num)[None, :], (B, total_num))
    pad_idx = jnp.take_along_axis(unsup_order, jnp.minimum(kk, n_pad - 1), axis=-1)
    sel_idx = jnp.take_along_axis(
        sel_order, jnp.clip(kk - pad_count[:, None], 0, n_pad - 1), axis=-1)
    main_idx = jnp.where(kk < pad_count[:, None], pad_idx, sel_idx)

    kn = jnp.arange(negative)[None, :]
    neg_pos = jnp.clip(unsup_count[:, None] - 1 - kn, 0, n_pad - 1)
    neg_idx = jnp.take_along_axis(unsup_order, neg_pos, axis=-1)

    # TODO(synk): output size is fixed (indices clipped); the PyTorch version returns a
    # shorter tensor when there are not enough un-suppressed proposals for padding/negatives.
    sel_all = jnp.concatenate([neg_idx, main_idx], axis=-1)          # (B, K)
    final_flat = jnp.take_along_axis(flat_padded, sel_all, axis=-1)  # (B, K), flat i*T + j

    pred_s_e = jnp.stack([final_flat // T, final_flat % T + 1], axis=-1).astype(jnp.int32)

    # ---- bit-exact batched gather of [map2d | offset_gt | tmap] (Pallas) ----
    k_pad = _round_up(K, 128)
    c = D + c_off + 1
    c_pad = _round_up(c, 128)
    idx_padded = jnp.pad(final_flat.astype(jnp.int32), ((0, 0), (0, k_pad - K)))
    table = jnp.concatenate(
        [map2d.reshape(B, TT, D).astype(jnp.float32),
         offset_gt.reshape(B, TT, c_off).astype(jnp.float32),
         tmap.reshape(B, TT, 1).astype(jnp.float32)], axis=-1)
    table = jnp.pad(table, ((0, 0), (0, 0), (0, c_pad - c)))

    gathered = gather_rows(idx_padded, table)                        # (B, k_pad, c_pad)
    gathered = gathered[:, :K, :]

    prop_feature = gathered[:, :, :D].reshape(B * K, D)
    offset_out = gathered[:, :, D:D + c_off].reshape(B * K, c_off)
    pred_score = gathered[:, :, D + c_off].reshape(B * K)
    return prop_feature, pred_s_e.reshape(B * K, 2), offset_out, pred_score


# ------------------------------------------------------------------------------ wrapper
def adaptive_proposal_sampling(score_pred, map2d_mask_np, map2d, offset_gt, tmap,
                               topk=5, neighbor=16, negative=16, thresh=0.5):
    T = score_pred.shape[1]
    rows_np, cols_np = np.nonzero(np.asarray(map2d_mask_np))
    flat_np = (rows_np * T + cols_np).astype(np.int32)                # original (i, j)
    starts = jnp.asarray(rows_np.astype(np.int32))                    # grids[:, 0]
    ends = jnp.asarray((cols_np + 1).astype(np.int32))                # grids[:, 1] + 1
    flat = jnp.asarray(flat_np)
    n_real = int(flat_np.shape[0])
    return _forward(score_pred, map2d, offset_gt, tmap, starts, ends, flat,
                    topk=int(topk), neighbor=int(neighbor), negative=int(negative),
                    thresh=float(thresh), n_real=n_real)


if __name__ == "__main__":
    B, T, D = 2, 24, 32
    key = jax.random.PRNGKey(0)
    k1, k2, k3, k4 = jax.random.split(key, 4)
    score_pred = jax.random.uniform(k1, (B, T, T), jnp.float32)
    map2d = jax.random.normal(k2, (B, T, T, D), jnp.float32)
    offset_gt = jax.random.normal(k3, (B, T, T, 2), jnp.float32)
    tmap = jax.random.uniform(k4, (B, T, T), jnp.float32)
    map2d_mask = np.triu(np.ones((T, T), dtype=bool))                 # valid: end >= start

    out = adaptive_proposal_sampling(score_pred, map2d_mask, map2d, offset_gt, tmap,
                                     topk=5, neighbor=16, negative=16, thresh=0.5)
    prop_feature, pred_s_e, offset_out, pred_score = jax.block_until_ready(out)

    K = 16 + 5 * 17
    assert prop_feature.shape == (B * K, D)
    assert pred_s_e.shape == (B * K, 2)
    assert offset_out.shape == (B * K, 2)
    assert pred_score.shape == (B * K,)
    print("KERNEL_OK")
</pallas_src>

<mosaic_0001>
module attributes {stable_mosaic.version = 11 : i64} {
  func.func @_iou_nms_kernel(%arg0: i32, %arg1: memref<1x384x1xf32, #tpu.memory_space<vmem>>, %arg2: memref<1x384x1xf32, #tpu.memory_space<vmem>>, %arg3: memref<1x1x384xf32, #tpu.memory_space<vmem>>, %arg4: memref<1x1x384xf32, #tpu.memory_space<vmem>>, %arg5: memref<1x1x384xf32, #tpu.memory_space<vmem>>, %arg6: memref<1x1x384xf32, #tpu.memory_space<vmem>>, %arg7: memref<384x384xf32, #tpu.memory_space<vmem>>, %arg8: memref<384x384xf32, #tpu.memory_space<vmem>>) attributes {dimension_semantics = [#tpu.dimension_semantics<parallel>], iteration_bounds = array<i64: 2>, scalar_prefetch = 0 : i64, scratch_operands = 2 : i64, tpu.core_type = #tpu.core_type<tc>, window_params = [{transform_indices = @transform_0, window_bounds = array<i64: 1, 384, 1>}, {transform_indices = @transform_1, window_bounds = array<i64: 1, 384, 1>}, {transform_indices = @transform_2, window_bounds = array<i64: 1, 1, 384>}, {transform_indices = @transform_3, window_bounds = array<i64: 1, 1, 384>}, {transform_indices = @transform_4, window_bounds = array<i64: 1, 1, 384>}, {transform_indices = @transform_5, window_bounds = array<i64: 1, 1, 384>}]} {
    %c0 = arith.constant 0 : index
    %c0_0 = arith.constant 0 : index
    %c0_1 = arith.constant 0 : index
    %0 = vector.load %arg1[%c0, %c0_0, %c0_1] : memref<1x384x1xf32, #tpu.memory_space<vmem>>, vector<1x384x1xf32>
    %1 = vector.shape_cast %0 : vector<1x384x1xf32> to vector<384x1xf32>
    %c0_2 = arith.constant 0 : index
    %c0_3 = arith.constant 0 : index
    %c0_4 = arith.constant 0 : index
    %2 = vector.load %arg2[%c0_2, %c0_3, %c0_4] : memref<1x384x1xf32, #tpu.memory_space<vmem>>, vector<1x384x1xf32>
    %3 = vector.shape_cast %2 : vector<1x384x1xf32> to vector<384x1xf32>
    %c0_5 = arith.constant 0 : index
    %c0_6 = arith.constant 0 : index
    %c0_7 = arith.constant 0 : index
    %4 = vector.load %arg3[%c0_5, %c0_6, %c0_7] : memref<1x1x384xf32, #tpu.memory_space<vmem>>, vector<1x1x384xf32>
    %5 = vector.shape_cast %4 : vector<1x1x384xf32> to vector<1x384xf32>
    %c0_8 = arith.constant 0 : index
    %c0_9 = arith.constant 0 : index
    %c0_10 = arith.constant 0 : index
    %6 = vector.load %arg4[%c0_8, %c0_9, %c0_10] : memref<1x1x384xf32, #tpu.memory_space<vmem>>, vector<1x1x384xf32>
    %7 = vector.shape_cast %6 : vector<1x1x384xf32> to vector<1x384xf32>
    %8 = vector.broadcast %3 : vector<384x1xf32> to vector<384x384xf32>
    %9 = vector.broadcast %7 : vector<1x384xf32> to vector<384x384xf32>
    %10 = arith.minimumf %8, %9 : vector<384x384xf32>
    %11 = vector.broadcast %1 : vector<384x1xf32> to vector<384x384xf32>
    %12 = vector.broadcast %5 : vector<1x384xf32> to vector<384x384xf32>
    %13 = arith.maximumf %11, %12 : vector<384x384xf32>
    %14 = arith.subf %10, %13 : vector<384x384xf32>
    %15 = vector.broadcast %3 : vector<384x1xf32> to vector<384x384xf32>
    %16 = vector.broadcast %7 : vector<1x384xf32> to vector<384x384xf32>
    %17 = arith.maximumf %15, %16 : vector<384x384xf32>
    %18 = vector.broadcast %1 : vector<384x1xf32> to vector<384x384xf32>
    %19 = vector.broadcast %5 : vector<1x384xf32> to vector<384x384xf32>
    %20 = arith.minimumf %18, %19 : vector<384x384xf32>
    %21 = arith.subf %17, %20 : vector<384x384xf32>
    %22 = tpu.iota {dimensions = array<i32: 0>} : vector<384x384xi32>
    %23 = tpu.iota {dimensions = array<i32: 1>} : vector<384x384xi32>
    %cst = arith.constant 0.000000e+00 : f32
    %24 = vector.broadcast %cst : f32 to vector<384x384xf32>
    %25 = arith.maximumf %14, %24 : vector<384x384xf32>
    %cst_11 = arith.constant 5.000000e-01 : f32
    %26 = vector.broadcast %cst_11 : f32 to vector<384x384xf32>
    %27 = arith.mulf %26, %21 : vector<384x384xf32>
    %28 = arith.cmpf ogt, %25, %27 : vector<384x384xf32>
    %29 = arith.cmpi sgt, %23, %22 : vector<384x384xi32>
    %30 = arith.andi %28, %29 : vector<384x384xi1>
    %31 = arith.extui %30 : vector<384x384xi1> to vector<384x384xi32>
    %32 = arith.sitofp %31 : vector<384x384xi32> to vector<384x384xf32>
    %c0_12 = arith.constant 0 : index
    %c0_13 = arith.constant 0 : index
    %33 = vector.load %arg7[%c0_12, %c0_13] : memref<384x384xf32, #tpu.memory_space<vmem>>, vector<384x384xf32>
    tpu.vector_store %arg7[%c0_12, %c0_13], %32 {strides = array<i32>} : memref<384x384xf32, #tpu.memory_space<vmem>>, vector<384x384xf32>,
    %34 = arith.cmpi sle, %22, %23 : vector<384x384xi32>
    %35 = arith.extui %34 : vector<384x384xi1> to vector<384x384xi32>
    %36 = arith.sitofp %35 : vector<384x384xi32> to vector<384x384xf32>
    %cst_14 = arith.constant dense<0.000000e+00> : vector<384x384xf32>
    %37 = tpu.matmul %32, %36, %cst_14 {dimension_numbers = #tpu.dot_dimension_numbers<[1], [0], [0], [1], [0, 0, 1, 1], [], []>} : vector<384x384xf32>, vector<384x384xf32>, vector<384x384xf32> -> vector<384x384xf32>
    %cst_15 = arith.constant 1.600000e+01 : f32
    %38 = vector.broadcast %cst_15 : f32 to vector<384x384xf32>
    %39 = arith.cmpf ole, %37, %38 : vector<384x384xf32>
    %40 = arith.extui %39 : vector<384x384xi1> to vector<384x384xi32>
    %41 = arith.sitofp %40 : vector<384x384xi32> to vector<384x384xf32>
    %42 = arith.mulf %32, %41 : vector<384x384xf32>
    %c0_16 = arith.constant 0 : index
    %c0_17 = arith.constant 0 : index
    %43 = vector.load %arg8[%c0_16, %c0_17] : memref<384x384xf32, #tpu.memory_space<vmem>>, vector<384x384xf32>
    tpu.vector_store %arg8[%c0_16, %c0_17], %42 {strides = array<i32>} : memref<384x384xf32, #tpu.memory_space<vmem>>, vector<384x384xf32>,
    %44 = tpu.iota {dimensions = array<i32: 1>} : vector<1x384xi32>
    %c300_i32 = arith.constant 300 : i32
    %45 = vector.broadcast %c300_i32 : i32 to vector<1x384xi32>
    %46 = arith.cmpi sge, %44, %45 : vector<1x384xi32>
    %47 = arith.extui %46 : vector<1x384xi1> to vector<1x384xi32>
    %48 = arith.sitofp %47 : vector<1x384xi32> to vector<1x384xf32>
    %cst_18 = arith.constant 0.000000e+00 : f32
    %49 = vector.broadcast %cst_18 : f32 to vector<1x384xf32>
    %c0_i32 = arith.constant 0 : i32
    %c0_i32_19 = arith.constant 0 : i32
    %c299_i32 = arith.constant 299 : i32
    %50 = arith.addi %c0_i32_19, %c299_i32 : i32
    %c1_i32 = arith.constant 1 : i32
    %51:3 = scf.for %arg9 = %c0_i32_19 to %50 step %c1_i32 iter_args(%arg10 = %48, %arg11 = %49, %arg12 = %c0_i32) -> (vector<1x384xf32>, vector<1x384xf32>, i32)  : i32 {
      %58 = vector.broadcast %arg9 : i32 to vector<1x384xi32>
      %59 = arith.cmpi eq, %44, %58 : vector<1x384xi32>
      %60 = arith.extui %59 : vector<1x384xi1> to vector<1x384xi32>
      %61 = arith.sitofp %60 : vector<1x384xi32> to vector<1x384xf32>
      %62 = arith.mulf %61, %arg10 : vector<1x384xf32>
      %63 = vector.shape_cast %62 : vector<1x384xf32> to vector<1x1x384xf32>
      %cst_27 = arith.constant dense<0.000000e+00> : vector<1xf32>
      %64 = vector.multi_reduction <add>, %63, %cst_27 [1, 2] : vector<1x1x384xf32> to vector<1xf32>
      %65 = vector.shape_cast %64 : vector<1xf32> to vector<1x1x1xf32>
      %66 = vector.extract %65[0, 0, 0] : f32 from vector<1x1x1xf32>
      %cst_28 = arith.constant 5.000000e-01 : f32
      %67 = arith.cmpf olt, %66, %cst_28 : f32
      %68 = arith.extui %67 : i1 to i32
      %69 = arith.sitofp %68 : i32 to f32
      %c5_i32 = arith.constant 5 : i32
      %70 = arith.cmpi slt, %arg12, %c5_i32 : i32
      %71 = arith.extui %70 : i1 to i32
      %72 = arith.sitofp %71 : i32 to f32
      %73 = arith.mulf %69, %72 : f32
      %74 = arith.index_cast %arg9 : i32 to index
      %c0_29 = arith.constant 0 : index
      %75 = vector.load %arg7[%74, %c0_29] : memref<384x384xf32, #tpu.memory_space<vmem>>, vector<1x384xf32>
      %76 = arith.index_cast %arg9 : i32 to index
      %c0_30 = arith.constant 0 : index
      %77 = vector.load %arg8[%76, %c0_30] : memref<384x384xf32, #tpu.memory_space<vmem>>, vector<1x384xf32>
      %78 = arith.maximumf %75, %61 : vector<1x384xf32>
      %79 = arith.maximumf %arg10, %78 : vector<1x384xf32>
      %80 = arith.maximumf %77, %61 : vector<1x384xf32>
      %81 = arith.maximumf %arg11, %80 : vector<1x384xf32>
      %82 = arith.subf %79, %arg10 : vector<1x384xf32>
      %83 = vector.broadcast %73 : f32 to vector<1x384xf32>
      %84 = arith.mulf %83, %82 : vector<1x384xf32>
      %85 = arith.addf %arg10, %84 : vector<1x384xf32>
      %86 = arith.subf %81, %arg11 : vector<1x384xf32>
      %87 = vector.broadcast %73 : f32 to vector<1x384xf32>
      %88 = arith.mulf %87, %86 : vector<1x384xf32>
      %89 = arith.addf %arg11, %88 : vector<1x384xf32>
      %90 = arith.fptosi %73 : f32 to i32
      %91 = arith.addi %arg12, %90 : i32
      scf.yield %85, %89, %91 : vector<1x384xf32>, vector<1x384xf32>, i32
    }
    %c299_i32_20 = arith.constant 299 : i32
    %c0_21 = arith.constant 0 : index
    %c0_22 = arith.constant 0 : index
    %c0_23 = arith.constant 0 : index
    %52 = vector.load %arg5[%c0_21, %c0_22, %c0_23] : memref<1x1x384xf32, #tpu.memory_space<vmem>>, vector<1x1x384xf32>
    %53 = vector.shape_cast %52 : vector<1x1x384xf32> to vector<1x384xf32>
    %54 = vector.shape_cast %51#0 : vector<1x384xf32> to vector<1x1x384xf32>
    tpu.vector_store %arg5[%c0_21, %c0_22, %c0_23], %54 {strides = array<i32>} : memref<1x1x384xf32, #tpu.memory_space<vmem>>, vector<1x1x384xf32>,
    %c0_24 = arith.constant 0 : index
    %c0_25 = arith.constant 0 : index
    %c0_26 = arith.constant 0 : index
    %55 = vector.load %arg6[%c0_24, %c0_25, %c0_26] : memref<1x1x384xf32, #tpu.memory_space<vmem>>, vector<1x1x384xf32>
    %56 = vector.shape_cast %55 : vector<1x1x384xf32> to vector<1x384xf32>
    %57 = vector.shape_cast %51#1 : vector<1x384xf32> to vector<1x1x384xf32>
    tpu.vector_store %arg6[%c0_24, %c0_25, %c0_26], %57 {strides = array<i32>} : memref<1x1x384xf32, #tpu.memory_space<vmem>>, vector<1x1x384xf32>,
    return
  }
  func.func @transform_0(%arg0: i32) -> (i32, i32, i32) {
    %c0_i32 = arith.constant 0 : i32
    %c0_i32_0 = arith.constant 0 : i32
    %c0_i32_1 = arith.constant 0 : i32
    return %arg0, %c0_i32, %c0_i32_0 : i32, i32, i32
  }
  func.func @transform_1(%arg0: i32) -> (i32, i32, i32) {
    %c0_i32 = arith.constant 0 : i32
    %c0_i32_0 = arith.constant 0 : i32
    %c0_i32_1 = arith.constant 0 : i32
    return %arg0, %c0_i32, %c0_i32_0 : i32, i32, i32
  }
  func.func @transform_2(%arg0: i32) -> (i32, i32, i32) {
    %c0_i32 = arith.constant 0 : i32
    %c0_i32_0 = arith.constant 0 : i32
    %c0_i32_1 = arith.constant 0 : i32
    return %arg0, %c0_i32, %c0_i32_0 : i32, i32, i32
  }
  func.func @transform_3(%arg0: i32) -> (i32, i32, i32) {
    %c0_i32 = arith.constant 0 : i32
    %c0_i32_0 = arith.constant 0 : i32
    %c0_i32_1 = arith.constant 0 : i32
    return %arg0, %c0_i32, %c0_i32_0 : i32, i32, i32
  }
  func.func @transform_4(%arg0: i32) -> (i32, i32, i32) {
    %c0_i32 = arith.constant 0 : i32
    %c0_i32_0 = arith.constant 0 : i32
    %c0_i32_1 = arith.constant 0 : i32
    return %arg0, %c0_i32, %c0_i32_0 : i32, i32, i32
  }
  func.func @transform_5(%arg0: i32) -> (i32, i32, i32) {
    %c0_i32 = arith.constant 0 : i32
    %c0_i32_0 = arith.constant 0 : i32
    %c0_i32_1 = arith.constant 0 : i32
    return %arg0, %c0_i32, %c0_i32_0 : i32, i32, i32
  }
}

module attributes {stable_mosaic.version = 11 : i64} {
  func.func @_gather_rows_kernel(%arg0: i32, %arg1: memref<2x128xi32, #tpu.memory_space<smem>>, %arg2: memref<1x576x128xf32, #tpu.memory_space<vmem>>, %arg3: memref<1x128x128xf32, #tpu.memory_space<vmem>>) attributes {dimension_semantics = [#tpu.dimension_semantics<parallel>], iteration_bounds = array<i64: 2>, scalar_prefetch = 1 : i64, scratch_operands = 0 : i64, tpu.core_type = #tpu.core_type<tc>, window_params = [{transform_indices = @transform_0, window_bounds = array<i64: 1, 576, 128>}, {transform_indices = @transform_1, window_bounds = array<i64: 1, 128, 128>}]} {
    %0 = arith.index_cast %arg0 : i32 to index
    %c0 = arith.constant 0 : index
    %1 = memref.load %arg1[%0, %c0] : memref<2x128xi32, #tpu.memory_space<smem>>
    %c0_0 = arith.constant 0 : index
    %2 = arith.index_cast %1 : i32 to index
    %c0_1 = arith.constant 0 : index
    %3 = vector.load %arg2[%c0_0, %2, %c0_1] : memref<1x576x128xf32, #tpu.memory_space<vmem>>, vector<1x1x128xf32>
    %4 = vector.shape_cast %3 : vector<1x1x128xf32> to vector<1x128xf32>
    %c0_2 = arith.constant 0 : index
    %c0_3 = arith.constant 0 : index
    %c0_4 = arith.constant 0 : index
    %5 = vector.load %arg3[%c0_2, %c0_3, %c0_4] : memref<1x128x128xf32, #tpu.memory_space<vmem>>, vector<1x1x128xf32>
    %6 = vector.shape_cast %5 : vector<1x1x128xf32> to vector<1x128xf32>
    %7 = vector.shape_cast %4 : vector<1x128xf32> to vector<1x1x128xf32>
    tpu.vector_store %arg3[%c0_2, %c0_3, %c0_4], %7 {strides = array<i32>} : memref<1x128x128xf32, #tpu.memory_space<vmem>>, vector<1x1x128xf32>,
    %8 = arith.index_cast %arg0 : i32 to index
    %c1 = arith.constant 1 : index
    %9 = memref.load %arg1[%8, %c1] : memref<2x128xi32, #tpu.memory_space<smem>>
    %c0_5 = arith.constant 0 : index
    %10 = arith.index_cast %9 : i32 to index
    %c0_6 = arith.constant 0 : index
    %11 = vector.load %arg2[%c0_5, %10, %c0_6] : memref<1x576x128xf32, #tpu.memory_space<vmem>>, vector<1x1x128xf32>
    %12 = vector.shape_cast %11 : vector<1x1x128xf32> to vector<1x128xf32>
    %c0_7 = arith.constant 0 : index
    %c1_8 = arith.constant 1 : index
    %c0_9 = arith.constant 0 : index
    %13 = vector.load %arg3[%c0_7, %c1_8, %c0_9] : memref<1x128x128xf32, #tpu.memory_space<vmem>>, vector<1x1x128xf32>
    %14 = vector.shape_cast %13 : vector<1x1x128xf32> to vector<1x128xf32>
    %15 = vector.shape_cast %12 : vector<1x128xf32> to vector<1x1x128xf32>
    tpu.vector_store %arg3[%c0_7, %c1_8, %c0_9], %15 {strides = array<i32>} : memref<1x128x128xf32, #tpu.memory_space<vmem>>, vector<1x1x128xf32>,
    %16 = arith.index_cast %arg0 : i32 to index
    %c2 = arith.constant 2 : index
    %17 = memref.load %arg1[%16, %c2] : memref<2x128xi32, #tpu.memory_space<smem>>
    %c0_10 = arith.constant 0 : index
    %18 = arith.index_cast %17 : i32 to index
    %c0_11 = arith.constant 0 : index
    %19 = vector.load %arg2[%c0_10, %18, %c0_11] : memref<1x576x128xf32, #tpu.memory_space<vmem>>, vector<1x1x128xf32>
    %20 = vector.shape_cast %19 : vector<1x1x128xf32> to vector<1x128xf32>
    %c0_12 = arith.constant 0 : index
    %c2_13 = arith.constant 2 : index
    %c0_14 = arith.constant 0 : index
    %21 = vector.load %arg3[%c0_12, %c2_13, %c0_14] : memref<1x128x128xf32, #tpu.memory_space<vmem>>, vector<1x1x128xf32>
    %22 = vector.shape_cast %21 : vector<1x1x128xf32> to vector<1x128xf32>
    %23 = vector.shape_cast %20 : vector<1x128xf32> to vector<1x1x128xf32>
    tpu.vector_store %arg3[%c0_12, %c2_13, %c0_14], %23 {strides = array<i32>} : memref<1x128x128xf32, #tpu.memory_space<vmem>>, vector<1x1x128xf32>,
    %24 = arith.index_cast %arg0 : i32 to index
    %c3 = arith.constant 3 : index
    %25 = memref.load %arg1[%24, %c3] : memref<2x128xi32, #tpu.memory_space<smem>>
    %c0_15 = arith.constant 0 : index
    %26 = arith.index_cast %25 : i32 to index
    %c0_16 = arith.constant 0 : index
    %27 = vector.load %arg2[%c0_15, %26, %c0_16] : memref<1x576x128xf32, #tpu.memory_space<vmem>>, vector<1x1x128xf32>
    %28 = vector.shape_cast %27 : vector<1x1x128xf32> to vector<1x128xf32>
    %c0_17 = arith.constant 0 : index
    %c3_18 = arith.constant 3 : index
    %c0_19 = arith.constant 0 : index
    %29 = vector.load %arg3[%c0_17, %c3_18, %c0_19] : memref<1x128x128xf32, #tpu.memory_space<vmem>>, vector<1x1x128xf32>
    %30 = vector.shape_cast %29 : vector<1x1x128xf32> to vector<1x128xf32>
    %31 = vector.shape_cast %28 : vector<1x128xf32> to vector<1x1x128xf32>
    tpu.vector_store %arg3[%c0_17, %c3_18, %c0_19], %31 {strides = array<i32>} : memref<1x128x128xf32, #tpu.memory_space<vmem>>, vector<1x1x128xf32>,
    %32 = arith.index_cast %arg0 : i32 to index
    %c4 = arith.constant 4 : index
    %33 = memref.load %arg1[%32, %c4] : memref<2x128xi32, #tpu.memory_space<smem>>
    %c0_20 = arith.constant 0 : index
    %34 = arith.index_cast %33 : i32 to index
    %c0_21 = arith.constant 0 : index
    %35 = vector.load %arg2[%c0_20, %34, %c0_21] : memref<1x576x128xf32, #tpu.memory_space<vmem>>, vector<1x1x128xf32>
    %36 = vector.shape_cast %35 : vector<1x1x128xf32> to vector<1x128xf32>
    %c0_22 = arith.constant 0 : index
    %c4_23 = arith.constant 4 : index
    %c0_24 = arith.constant 0 : index
    %37 = vector.load %arg3[%c0_22, %c4_23, %c0_24] : memref<1x128x128xf32, #tpu.memory_space<vmem>>, vector<1x1x128xf32>
    %38 = vector.shape_cast %37 : vector<1x1x128xf32> to vector<1x128xf32>
    %39 = vector.shape_cast %36 : vector<1x128xf32> to vector<1x1x128xf32>
    tpu.vector_store %arg3[%c0_22, %c4_23, %c0_24], %39 {strides = array<i32>} : memref<1x128x128xf32, #tpu.memory_space<vmem>>, vector<1x1x128xf32>,
    %40 = arith.index_cast %arg0 : i32 to index
    %c5 = arith.constant 5 : index
    %41 = memref.load %arg1[%40, %c5] : memref<2x128xi32, #tpu.memory_space<smem>>
    %c0_25 = arith.constant 0 : index
    %42 = arith.index_cast %41 : i32 to index
    %c0_26 = arith.constant 0 : index
    %43 = vector.load %arg2[%c0_25, %42, %c0_26] : memref<1x576x128xf32, #tpu.memory_space<vmem>>, vector<1x1x128xf32>
    %44 = vector.shape_cast %43 : vector<1x1x128xf32> to vector<1x128xf32>
    %c0_27 = arith.constant 0 : index
    %c5_28 = arith.constant 5 : index
    %c0_29 = arith.constant 0 : index
    %45 = vector.load %arg3[%c0_27, %c5_28, %c0_29] : memref<1x128x128xf32, #tpu.memory_space<vmem>>, vector<1x1x128xf32>
    %46 = vector.shape_cast %45 : vector<1x1x128xf32> to vector<1x128xf32>
    %47 = vector.shape_cast %44 : vector<1x128xf32> to vector<1x1x128xf32>
    tpu.vector_store %arg3[%c0_27, %c5_28, %c0_29], %47 {strides = array<i32>} : memref<1x128x128xf32, #tpu.memory_space<vmem>>, vector<1x1x128xf32>,
    %48 = arith.index_cast %arg0 : i32 to index
    %c6 = arith.constant 6 : index
    %49 = memref.load %arg1[%48, %c6] : memref<2x128xi32, #tpu.memory_space<smem>>
    %c0_30 = arith.constant 0 : index
    %50 = arith.index_cast %49 : i32 to index
    %c0_31 = arith.constant 0 : index
    %51 = vector.load %arg2[%c0_30, %50, %c0_31] : memref<1x576x128xf32, #tpu.memory_space<vmem>>, vector<1x1x128xf32>
    %52 = vector.shape_cast %51 : vector<1x1x128xf32> to vector<1x128xf32>
    %c0_32 = arith.constant 0 : index
    %c6_33 = arith.constant 6 : index
    %c0_34 = arith.constant 0 : index
    %53 = vector.load %arg3[%c0_32, %c6_33, %c0_34] : memref<1x128x128xf32, #tpu.memory_space<vmem>>, vector<1x1x128xf32>
    %54 = vector.shape_cast %53 : vector<1x1x128xf32> to vector<1x128xf32>
    %55 = vector.shape_cast %52 : vector<1x128xf32> to vector<1x1x128xf32>
    tpu.vector_store %arg3[%c0_32, %c6_33, %c0_34], %55 {strides = array<i32>} : memref<1x128x128xf32, #tpu.memory_space<vmem>>, vector<1x1x128xf32>,
    %56 = arith.index_cast %arg0 : i32 to index
    %c7 = arith.constant 7 : index
    %57 = memref.load %arg1[%56, %c7] : memref<2x128xi32, #tpu.memory_space<smem>>
    %c0_35 = arith.constant 0 : index
    %58 = arith.index_cast %57 : i32 to index
    %c0_36 = arith.constant 0 : index
    %59 = vector.load %arg2[%c0_35, %58, %c0_36] : memref<1x576x128xf32, #tpu.memory_space<vmem>>, vector<1x1x128xf32>
    %60 = vector.shape_cast %59 : vector<1x1x128xf32> to vector<1x128xf32>
    %c0_37 = arith.constant 0 : index
    %c7_38 = arith.constant 7 : index
    %c0_39 = arith.constant 0 : index
    %61 = vector.load %arg3[%c0_37, %c7_38, %c0_39] : memref<1x128x128xf32, #tpu.memory_space<vmem>>, vector<1x1x128xf32>
    %62 = vector.shape_cast %61 : vector<1x1x128xf32> to vector<1x128xf32>
    %63 = vector.shape_cast %60 : vector<1x128xf32> to vector<1x1x128xf32>
    tpu.vector_store %arg3[%c0_37, %c7_38, %c0_39], %63 {strides = array<i32>} : memref<1x128x128xf32, #tpu.memory_space<vmem>>, vector<1x1x128xf32>,
    %64 = arith.index_cast %arg0 : i32 to index
    %c8 = arith.constant 8 : index
    %65 = memref.load %arg1[%64, %c8] : memref<2x128xi32, #tpu.memory_space<smem>>
    %c0_40 = arith.constant 0 : index
    %66 = arith.index_cast %65 : i32 to index
    %c0_41 = arith.constant 0 : index
    %67 = vector.load %arg2[%c0_40, %66, %c0_41] : memref<1x576x128xf32, #tpu.memory_space<vmem>>, vector<1x1x128xf32>
    %68 = vector.shape_cast %67 : vector<1x1x128xf32> to vector<1x128xf32>
    %c0_42 = arith.constant 0 : index
    %c8_43 = arith.constant 8 : index
    %c0_44 = arith.constant 0 : index
    %69 = vector.load %arg3[%c0_42, %c8_43, %c0_44] : memref<1x128x128xf32, #tpu.memory_space<vmem>>, vector<1x1x128xf32>
    %70 = vector.shape_cast %69 : vector<1x1x128xf32> to vector<1x128xf32>
    %71 = vector.shape_cast %68 : vector<1x128xf32> to vector<1x1x128xf32>
    tpu.vector_store %arg3[%c0_42, %c8_43, %c0_44], %71 {strides = array<i32>} : memref<1x128x128xf32, #tpu.memory_space<vmem>>, vector<1x1x128xf32>,
    %72 = arith.index_cast %arg0 : i32 to index
    %c9 = arith.constant 9 : index
    %73 = memref.load %arg1[%72, %c9] : memref<2x128xi32, #tpu.memory_space<smem>>
    %c0_45 = arith.constant 0 : index
    %74 = arith.index_cast %73 : i32 to index
    %c0_46 = arith.constant 0 : index
    %75 = vector.load %arg2[%c0_45, %74, %c0_46] : memref<1x576x128xf32, #tpu.memory_space<vmem>>, vector<1x1x128xf32>
    %76 = vector.shape_cast %75 : vector<1x1x128xf32> to vector<1x128xf32>
    %c0_47 = arith.constant 0 : index
    %c9_48 = arith.constant 9 : index
    %c0_49 = arith.constant 0 : index
    %77 = vector.load %arg3[%c0_47, %c9_48, %c0_49] : memref<1x128x128xf32, #tpu.memory_space<vmem>>, vector<1x1x128xf32>
    %78 = vector.shape_cast %77 : vector<1x1x128xf32> to vector<1x128xf32>
    %79 = vector.shape_cast %76 : vector<1x128xf32> to vector<1x1x128xf32>
    tpu.vector_store %arg3[%c0_47, %c9_48, %c0_49], %79 {strides = array<i32>} : memref<1x128x128xf32, #tpu.memory_space<vmem>>, vector<1x1x128xf32>,
    %80 = arith.index_cast %arg0 : i32 to index
    %c10 = arith.constant 10 : index
    %81 = memref.load %arg1[%80, %c10] : memref<2x128xi32, #tpu.memory_space<smem>>
    %c0_50 = arith.constant 0 : index
    %82 = arith.index_cast %81 : i32 to index
    %c0_51 = arith.constant 0 : index
    %83 = vector.load %arg2[%c0_50, %82, %c0_51] : memref<1x576x128xf32, #tpu.memory_space<vmem>>, vector<1x1x128xf32>
    %84 = vector.shape_cast %83 : vector<1x1x128xf32> to vector<1x128xf32>
    %c0_52 = arith.constant 0 : index
    %c10_53 = arith.constant 10 : index
    %c0_54 = arith.constant 0 : index
    %85 = vector.load %arg3[%c0_52, %c10_53, %c0_54] : memref<1x128x128xf32, #tpu.memory_space<vmem>>, vector<1x1x128xf32>
    %86 = vector.shape_cast %85 : vector<1x1x128xf32> to vector<1x128xf32>
    %87 = vector.shape_cast %84 : vector<1x128xf32> to vector<1x1x128xf32>
    tpu.vector_store %arg3[%c0_52, %c10_53, %c0_54], %87 {strides = array<i32>} : memref<1x128x128xf32, #tpu.memory_space<vmem>>, vector<1x1x128xf32>,
    %88 = arith.index_cast %arg0 : i32 to index
    %c11 = arith.constant 11 : index
    %89 = memref.load %arg1[%88, %c11] : memref<2x128xi32, #tpu.memory_space<smem>>
    %c0_55 = arith.constant 0 : index
    %90 = arith.index_cast %89 : i32 to index
    %c0_56 = arith.constant 0 : index
    %91 = vector.load %arg2[%c0_55, %90, %c0_56] : memref<1x576x128xf32, #tpu.memory_space<vmem>>, vector<1x1x128xf32>
    %92 = vector.shape_cast %91 : vector<1x1x128xf32> to vector<1x128xf32>
    %c0_57 = arith.constant 0 : index
    %c11_58 = arith.constant 11 : index
    %c0_59 = arith.constant 0 : index
    %93 = vector.load %arg3[%c0_57, %c11_58, %c0_59] : memref<1x128x128xf32, #tpu.memory_space<vmem>>, vector<1x1x128xf32>
    %94 = vector.shape_cast %93 : vector<1x1x128xf32> to vector<1x128xf32>
    %95 = vector.shape_cast %92 : vector<1x128xf32> to vector<1x1x128xf32>
    tpu.vector_store %arg3[%c0_57, %c11_58, %c0_59], %95 {strides = array<i32>} : memref<1x128x128xf32, #tpu.memory_space<vmem>>, vector<1x1x128xf32>,
    %96 = arith.index_cast %arg0 : i32 to index
    %c12 = arith.constant 12 : index
    %97 = memref.load %arg1[%96, %c12] : memref<2x128xi32, #tpu.memory_space<smem>>
    %c0_60 = arith.constant 0 : index
    %98 = arith.index_cast %97 : i32 to index
    %c0_61 = arith.constant 0 : index
    %99 = vector.load %arg2[%c0_60, %98, %c0_61] : memref<1x576x128xf32, #tpu.memory_space<vmem>>, vector<1x1x128xf32>
    %100 = vector.shape_cast %99 : vector<1x1x128xf32> to vector<1x128xf32>
    %c0_62 = arith.constant 0 : index
    %c12_63 = arith.constant 12 : index
    %c0_64 = arith.constant 0 : index
    %101 = vector.load %arg3[%c0_62, %c12_63, %c0_64] : memref<1x128x128xf32, #tpu.memory_space<vmem>>, vector<1x1x128xf32>
    %102 = vector.shape_cast %101 : vector<1x1x128xf32> to vector<1x128xf32>
    %103 = vector.shape_cast %100 : vector<1x128xf32> to vector<1x1x128xf32>
    tpu.vector_store %arg3[%c0_62, %c12_63, %c0_64], %103 {strides = array<i32>} : memref<1x128x128xf32, #tpu.memory_space<vmem>>, vector<1x1x128xf32>,
    %104 = arith.index_cast %arg0 : i32 to index
    %c13 = arith.constant 13 : index
    %105 = memref.load %arg1[%104, %c13] : memref<2x128xi32, #tpu.memory_space<smem>>
    %c0_65 = arith.constant 0 : index
    %106 = arith.index_cast %105 : i32 to index
    %c0_66 = arith.constant 0 : index
    %107 = vector.load %arg2[%c0_65, %106, %c0_66] : memref<1x576x128xf32, #tpu.memory_space<vmem>>, vector<1x1x128xf32>
    %108 = vector.shape_cast %107 : vector<1x1x128xf32> to vector<1x128xf32>
    %c0_67 = arith.constant 0 : index
    %c13_68 = arith.constant 13 : index
    %c0_69 = arith.constant 0 : index
    %109 = vector.load %arg3[%c0_67, %c13_68, %c0_69] : memref<1x128x128xf32, #tpu.memory_space<vmem>>, vector<1x1x128xf32>
    %110 = vector.shape_cast %109 : vector<1x1x128xf32> to vector<1x128xf32>
    %111 = vector.shape_cast %108 : vector<1x128xf32> to vector<1x1x128xf32>
    tpu.vector_store %arg3[%c0_67, %c13_68, %c0_69], %111 {strides = array<i32>} : memref<1x128x128xf32, #tpu.memory_space<vmem>>, vector<1x1x128xf32>,
    %112 = arith.index_cast %arg0 : i32 to index
    %c14 = arith.constant 14 : index
    %113 = memref.load %arg1[%112, %c14] : memref<2x128xi32, #tpu.memory_space<smem>>
    %c0_70 = arith.constant 0 : index
    %114 = arith.index_cast %113 : i32 to index
    %c0_71 = arith.constant 0 : index
    %115 = vector.load %arg2[%c0_70, %114, %c0_71] : memref<1x576x128xf32, #tpu.memory_space<vmem>>, vector<1x1x128xf32>
    %116 = vector.shape_cast %115 : vector<1x1x128xf32> to vector<1x128xf32>
    %c0_72 = arith.constant 0 : index
    %c14_73 = arith.constant 14 : index
    %c0_74 = arith.constant 0 : index
    %117 = vector.load %arg3[%c0_72, %c14_73, %c0_74] : memref<1x128x128xf32, #tpu.memory_space<vmem>>, vector<1x1x128xf32>
    %118 = vector.shape_cast %117 : vector<1x1x128xf32> to vector<1x128xf32>
    %119 = vector.shape_cast %116 : vector<1x128xf32> to vector<1x1x128xf32>
    tpu.vector_store %arg3[%c0_72, %c14_73, %c0_74], %119 {strides = array<i32>} : memref<1x128x128xf32, #tpu.memory_space<vmem>>, vector<1x1x128xf32>,
    %120 = arith.index_cast %arg0 : i32 to index
    %c15 = arith.constant 15 : index
    %121 = memref.load %arg1[%120, %c15] : memref<2x128xi32, #tpu.memory_space<smem>>
    %c0_75 = arith.constant 0 : index
    %122 = arith.index_cast %121 : i32 to index
    %c0_76 = arith.constant 0 : index
    %123 = vector.load %arg2[%c0_75, %122, %c0_76] : memref<1x576x128xf32, #tpu.memory_space<vmem>>, vector<1x1x128xf32>
    %124 = vector.shape_cast %123 : vector<1x1x128xf32> to vector<1x128xf32>
    %c0_77 = arith.constant 0 : index
    %c15_78 = arith.constant 15 : index
    %c0_79 = arith.constant 0 : index
    %125 = vector.load %arg3[%c0_77, %c15_78, %c0_79] : memref<1x128x128xf32, #tpu.memory_space<vmem>>, vector<1x1x128xf32>
    %126 = vector.shape_cast %125 : vector<1x1x128xf32> to vector<1x128xf32>
    %127 = vector.shape_cast %124 : vector<1x128xf32> to vector<1x1x128xf32>
    tpu.vector_store %arg3[%c0_77, %c15_78, %c0_79], %127 {strides = array<i32>} : memref<1x128x128xf32, #tpu.memory_space<vmem>>, vector<1x1x128xf32>,
    %128 = arith.index_cast %arg0 : i32 to index
    %c16 = arith.constant 16 : index
    %129 = memref.load %arg1[%128, %c16] : memref<2x128xi32, #tpu.memory_space<smem>>
    %c0_80 = arith.constant 0 : index
    %130 = arith.index_cast %129 : i32 to index
    %c0_81 = arith.constant 0 : index
    %131 = vector.load %arg2[%c0_80, %130, %c0_81] : memref<1x576x128xf32, #tpu.memory_space<vmem>>, vector<1x1x128xf32>
    %132 = vector.shape_cast %131 : vector<1x1x128xf32> to vector<1x128xf32>
    %c0_82 = arith.constant 0 : index
    %c16_83 = arith.constant 16 : index
    %c0_84 = arith.constant 0 : index
    %133 = vector.load %arg3[%c0_82, %c16_83, %c0_84] : memref<1x128x128xf32, #tpu.memory_space<vmem>>, vector<1x1x128xf32>
    %134 = vector.shape_cast %133 : vector<1x1x128xf32> to vector<1x128xf32>
    %135 = vector.shape_cast %132 : vector<1x128xf32> to vector<1x1x128xf32>
    tpu.vector_store %arg3[%c0_82, %c16_83, %c0_84], %135 {strides = array<i32>} : memref<1x128x128xf32, #tpu.memory_space<vmem>>, vector<1x1x128xf32>,
    %136 = arith.index_cast %arg0 : i32 to index
    %c17 = arith.constant 17 : index
    %137 = memref.load %arg1[%136, %c17] : memref<2x128xi32, #tpu.memory_space<smem>>
    %c0_85 = arith.constant 0 : index
    %138 = arith.index_cast %137 : i32 to index
    %c0_86 = arith.constant 0 : index
    %139 = vector.load %arg2[%c0_85, %138, %c0_86] : memref<1x576x128xf32, #tpu.memory_space<vmem>>, vector<1x1x128xf32>
    %140 = vector.shape_cast %139 : vector<1x1x128xf32> to vector<1x128xf32>
    %c0_87 = arith.constant 0 : index
    %c17_88 = arith.constant 17 : index
    %c0_89 = arith.constant 0 : index
    %141 = vector.load %arg3[%c0_87, %c17_88, %c0_89] : memref<1x128x128xf32, #tpu.memory_space<vmem>>, vector<1x1x128xf32>
    %142 = vector.shape_cast %141 : vector<1x1x128xf32> to vector<1x128xf32>
    %143 = vector.shape_cast %140 : vector<1x128xf32> to vector<1x1x128xf32>
    tpu.vector_store %arg3[%c0_87, %c17_88, %c0_89], %143 {strides = array<i32>} : memref<1x128x128xf32, #tpu.memory_space<vmem>>, vector<1x1x128xf32>,
    %144 = arith.index_cast %arg0 : i32 to index
    %c18 = arith.constant 18 : index
    %145 = memref.load %arg1[%144, %c18] : memref<2x128xi32, #tpu.memory_space<smem>>
    %c0_90 = arith.constant 0 : index
    %146 = arith.index_cast %145 : i32 to index
    %c0_91 = arith.constant 0 : index
    %147 = vector.load %arg2[%c0_90, %146, %c0_91] : memref<1x576x128xf32, #tpu.memory_space<vmem>>, vector<1x1x128xf32>
    %148 = vector.shape_cast %147 : vector<1x1x128xf32> to vector<1x128xf32>
    %c0_92 = arith.constant 0 : index
    %c18_93 = arith.constant 18 : index
    %c0_94 = arith.constant 0 : index
    %149 = vector.load %arg3[%c0_92, %c18_93, %c0_94] : memref<1x128x128xf32, #tpu.memory_space<vmem>>, vector<1x1x128xf32>
    %150 = vector.shape_cast %149 : vector<1x1x128xf32> to vector<1x128xf32>
    %151 = vector.shape_cast %148 : vector<1x128xf32> to vector<1x1x128xf32>
    tpu.vector_store %arg3[%c0_92, %c18_93, %c0_94], %151 {strides = array<i32>} : memref<1x128x128xf32, #tpu.memory_space<vmem>>, vector<1x1x128xf32>,
    %152 = arith.index_cast %arg0 : i32 to index
    %c19 = arith.constant 19 : index
    %153 = memref.load %arg1[%152, %c19] : memref<2x128xi32, #tpu.memory_space<smem>>
    %c0_95 = arith.constant 0 : index
    %154 = arith.index_cast %153 : i32 to index
    %c0_96 = arith.constant 0 : index
    %155 = vector.load %arg2[%c0_95, %154, %c0_96] : memref<1x576x128xf32, #tpu.memory_space<vmem>>, vector<1x1x128xf32>
    %156 = vector.shape_cast %155 : vector<1x1x128xf32> to vector<1x128xf32>
    %c0_97 = arith.constant 0 : index
    %c19_98 = arith.constant 19 : index
    %c0_99 = arith.constant 0 : index
    %157 = vector.load %arg3[%c0_97, %c19_98, %c0_99] : memref<1x128x128xf32, #tpu.memory_space<vmem>>, vector<1x1x128xf32>
    %158 = vector.shape_cast %157 : vector<1x1x128xf32> to vector<1x128xf32>
    %159 = vector.shape_cast %156 : vector<1x128xf32> to vector<1x1x128xf32>
    tpu.vector_store %arg3[%c0_97, %c19_98, %c0_99], %159 {strides = array<i32>} : memref<1x128x128xf32, #tpu.memory_space<vmem>>, vector<1x1x128xf32>,
    %160 = arith.index_cast %arg0 : i32 to index
    %c20 = arith.constant 20 : index
    %161 = memref.load %arg1[%160, %c20] : memref<2x128xi32, #tpu.memory_space<smem>>
    %c0_100 = arith.constant 0 : index
    %162 = arith.index_cast %161 : i32 to index
    %c0_101 = arith.constant 0 : index
    %163 = vector.load %arg2[%c0_100, %162, %c0_101] : memref<1x576x128xf32, #tpu.memory_space<vmem>>, vector<1x1x128xf32>
    %164 = vector.shape_cast %163 : vector<1x1x128xf32> to vector<1x128xf32>
    %c0_102 = arith.constant 0 : index
    %c20_103 = arith.constant 20 : index
    %c0_104 = arith.constant 0 : index
    %165 = vector.load %arg3[%c0_102, %c20_103, %c0_104] : memref<1x128x128xf32, #tpu.memory_space<vmem>>, vector<1x1x128xf32>
    %166 = vector.shape_cast %165 : vector<1x1x128xf32> to vector<1x128xf32>
    %167 = vector.shape_cast %164 : vector<1x128xf32> to vector<1x1x128xf32>
    tpu.vector_store %arg3[%c0_102, %c20_103, %c0_104], %167 {strides = array<i32>} : memref<1x128x128xf32, #tpu.memory_space<vmem>>, vector<1x1x128xf32>,
    %168 = arith.index_cast %arg0 : i32 to index
    %c21 = arith.constant 21 : index
    %169 = memref.load %arg1[%168, %c21] : memref<2x128xi32, #tpu.memory_space<smem>>
    %c0_105 = arith.constant 0 : index
    %170 = arith.index_cast %169 : i32 to index
    %c0_106 = arith.constant 0 : index
    %171 = vector.load %arg2[%c0_105, %170, %c0_106] : memref<1x576x128xf32, #tpu.memory_space<vmem>>, vector<1x1x128xf32>
    %172 = vector.shape_cast %171 : vector<1x1x128xf32> to vector<1x128xf32>
    %c0_107 = arith.constant 0 : index
    %c21_108 = arith.constant 21 : index
    %c0_109 = arith.constant 0 : index
    %173 = vector.load %arg3[%c0_107, %c21_108, %c0_109] : memref<1x128x128xf32, #tpu.memory_space<vmem>>, vector<1x1x128xf32>
    %174 = vector.shape_cast %173 : vector<1x1x128xf32> to vector<1x128xf32>
    %175 = vector.shape_cast %172 : vector<1x128xf32> to vector<1x1x128xf32>
    tpu.vector_store %arg3[%c0_107, %c21_108, %c0_109], %175 {strides = array<i32>} : memref<1x128x128xf32, #tpu.memory_space<vmem>>, vector<1x1x128xf32>,
    %176 = arith.index_cast %arg0 : i32 to index
    %c22 = arith.constant 22 : index
    %177 = memref.load %arg1[%176, %c22] : memref<2x128xi32, #tpu.memory_space<smem>>
    %c0_110 = arith.constant 0 : index
    %178 = arith.index_cast %177 : i32 to index
    %c0_111 = arith.constant 0 : index
    %179 = vector.load %arg2[%c0_110, %178, %c0_111] : memref<1x576x128xf32, #tpu.memory_space<vmem>>, vector<1x1x128xf32>
    %180 = vector.shape_cast %179 : vector<1x1x128xf32> to vector<1x128xf32>
    %c0_112 = arith.constant 0 : index
    %c22_113 = arith.constant 22 : index
    %c0_114 = arith.constant 0 : index
    %181 = vector.load %arg3[%c0_112, %c22_113, %c0_114] : memref<1x128x128xf32, #tpu.memory_space<vmem>>, vector<1x1x128xf32>
    %182 = vector.shape_cast %181 : vector<1x1x128xf32> to vector<1x128xf32>
    %183 = vector.shape_cast %180 : vector<1x128xf32> to vector<1x1x128xf32>
    tpu.vector_store %arg3[%c0_112, %c22_113, %c0_114], %183 {strides = array<i32>} : memref<1x128x128xf32, #tpu.memory_space<vmem>>, vector<1x1x128xf32>,
    %184 = arith.index_cast %arg0 : i32 to index
    %c23 = arith.constant 23 : index
    %185 = memref.load %arg1[%184, %c23] : memref<2x128xi32, #tpu.memory_space<smem>>
    %c0_115 = arith.constant 0 : index
    %186 = arith.index_cast %185 : i32 to index
    %c0_116 = arith.constant 0 : index
    %187 = vector.load %arg2[%c0_115, %186, %c0_116] : memref<1x576x128xf32, #tpu.memory_space<vmem>>, vector<1x1x128xf32>
    %188 = vector.shape_cast %187 : vector<1x1x128xf32> to vector<1x128xf32>
    %c0_117 = arith.constant 0 : index
    %c23_118 = arith.constant 23 : index
    %c0_119 = arith.constant 0 : index
    %189 = vector.load %arg3[%c0_117, %c23_118, %c0_119] : memref<1x128x128xf32, #tpu.memory_space<vmem>>, vector<1x1x128xf32>
    %190 = vector.shape_cast %189 : vector<1x1x128xf32> to vector<1x128xf32>
    %191 = vector.shape_cast %188 : vector<1x128xf32> to vector<1x1x128xf32>
    tpu.vector_store %arg3[%c0_117, %c23_118, %c0_119], %191 {strides = array<i32>} : memref<1x128x128xf32, #tpu.memory_space<vmem>>, vector<1x1x128xf32>,
    %192 = arith.index_cast %arg0 : i32 to index
    %c24 = arith.constant 24 : index
    %193 = memref.load %arg1[%192, %c24] : memref<2x128xi32, #tpu.memory_space<smem>>
    %c0_120 = arith.constant 0 : index
    %194 = arith.index_cast %193 : i32 to index
    %c0_121 = arith.constant 0 : index
    %195 = vector.load %arg2[%c0_120, %194, %c0_121] : memref<1x576x128xf32, #tpu.memory_space<vmem>>, vector<1x1x128xf32>
    %196 = vector.shape_cast %195 : vector<1x1x128xf32> to vector<1x128xf32>
    %c0_122 = arith.constant 0 : index
    %c24_123 = arith.constant 24 : index
    %c0_124 = arith.constant 0 : index
    %197 = vector.load %arg3[%c0_122, %c24_123, %c0_124] : memref<1x128x128xf32, #tpu.memory_space<vmem>>, vector<1x1x128xf32>
    %198 = vector.shape_cast %197 : vector<1x1x128xf32> to vector<1x128xf32>
    %199 = vector.shape_cast %196 : vector<1x128xf32> to vector<1x1x128xf32>
    tpu.vector_store %arg3[%c0_122, %c24_123, %c0_124], %199 {strides = array<i32>} : memref<1x128x128xf32, #tpu.memory_space<vmem>>, vector<1x1x128xf32>,
    %200 = arith.index_cast %arg0 : i32 to index
    %c25 = arith.constant 25 : index
    %201 = memref.load %arg1[%200, %c25] : memref<2x128xi32, #tpu.memory_space<smem>>
    %c0_125 = arith.constant 0 : index
    %202 = arith.index_cast %201 : i32 to index
    %c0_126 = arith.constant 0 : index
    %203 = vector.load %arg2[%c0_125, %202, %c0_126] : memref<1x576x128xf32, #tpu.memory_space<vmem>>, vector<1x1x128xf32>
    %204 = vector.shape_cast %203 : vector<1x1x128xf32> to vector<1x128xf32>
    %c0_127 = arith.constant 0 : index
    %c25_128 = arith.constant 25 : index
    %c0_129 = arith.constant 0 : index
    %205 = vector.load %arg3[%c0_127, %c25_128, %c0_129] : memref<1x128x128xf32, #tpu.memory_space<vmem>>, vector<1x1x128xf32>
    %206 = vector.shape_cast %205 : vector<1x1x128xf32> to vector<1x128xf32>
    %207 = vector.shape_cast %204 : vector<1x128xf32> to vector<1x1x128xf32>
    tpu.vector_store %arg3[%c0_127, %c25_128, %c0_129], %207 {strides = array<i32>} : memref<1x128x128xf32, #tpu.memory_space<vmem>>, vector<1x1x128xf32>,
    %208 = arith.index_cast %arg0 : i32 to index
    %c26 = arith.constant 26 : index
    %209 = memref.load %arg1[%208, %c26] : memref<2x128xi32, #tpu.memory_space<smem>>
    %c0_130 = arith.constant 0 : index
    %210 = arith.index_cast %209 : i32 to index
    %c0_131 = arith.constant 0 : index
    %211 = vector.load %arg2[%c0_130, %210, %c0_131] : memref<1x576x128xf32, #tpu.memory_space<vmem>>, vector<1x1x128xf32>
    %212 = vector.shape_cast %211 : vector<1x1x128xf32> to vector<1x128xf32>
    %c0_132 = arith.constant 0 : index
    %c26_133 = arith.constant 26 : index
    %c0_134 = arith.constant 0 : index
    %213 = vector.load %arg3[%c0_132, %c26_133, %c0_134] : memref<1x128x128xf32, #tpu.memory_space<vmem>>, vector<1x1x128xf32>
    %214 = vector.shape_cast %213 : vector<1x1x128xf32> to vector<1x128xf32>
    %215 = vector.shape_cast %212 : vector<1x128xf32> to vector<1x1x128xf32>
    tpu.vector_store %arg3[%c0_132, %c26_133, %c0_134], %215 {strides = array<i32>} : memref<1x128x128xf32, #tpu.memory_space<vmem>>, vector<1x1x128xf32>,
    %216 = arith.index_cast %arg0 : i32 to index
    %c27 = arith.constant 27 : index
    %217 = memref.load %arg1[%216, %c27] : memref<2x128xi32, #tpu.memory_space<smem>>
    %c0_135 = arith.constant 0 : index
    %218 = arith.index_cast %217 : i32 to index
    %c0_136 = arith.constant 0 : index
    %219 = vector.load %arg2[%c0_135, %218, %c0_136] : memref<1x576x128xf32, #tpu.memory_space<vmem>>, vector<1x1x128xf32>
    %220 = vector.shape_cast %219 : vector<1x1x128xf32> to vector<1x128xf32>
    %c0_137 = arith.constant 0 : index
    %c27_138 = arith.constant 27 : index
    %c0_139 = arith.constant 0 : index
    %221 = vector.load %arg3[%c0_137, %c27_138, %c0_139] : memref<1x128x128xf32, #tpu.memory_space<vmem>>, vector<1x1x128xf32>
    %222 = vector.shape_cast %221 : vector<1x1x128xf32> to vector<1x128xf32>
    %223 = vector.shape_cast %220 : vector<1x128xf32> to vector<1x1x128xf32>
    tpu.vector_store %arg3[%c0_137, %c27_138, %c0_139], %223 {strides = array<i32>} : memref<1x128x128xf32, #tpu.memory_space<vmem>>, vector<1x1x128xf32>,
    %224 = arith.index_cast %arg0 : i32 to index
    %c28 = arith.constant 28 : index
    %225 = memref.load %arg1[%224, %c28] : memref<2x128xi32, #tpu.memory_space<smem>>
    %c0_140 = arith.constant 0 : index
    %226 = arith.index_cast %225 : i32 to index
    %c0_141 = arith.constant 0 : index
    %227 = vector.load %arg2[%c0_140, %226, %c0_141] : memref<1x576x128xf32, #tpu.memory_space<vmem>>, vector<1x1x128xf32>
    %228 = vector.shape_cast %227 : vector<1x1x128xf32> to vector<1x128xf32>
    %c0_142 = arith.constant 0 : index
    %c28_143 = arith.constant 28 : index
    %c0_144 = arith.constant 0 : index
    %229 = vector.load %arg3[%c0_142, %c28_143, %c0_144] : memref<1x128x128xf32, #tpu.memory_space<vmem>>, vector<1x1x128xf32>
    %230 = vector.shape_cast %229 : vector<1x1x128xf32> to vector<1x128xf32>
    %231 = vector.shape_cast %228 : vector<1x128xf32> to vector<1x1x128xf32>
    tpu.vector_store %arg3[%c0_142, %c28_143, %c0_144], %231 {strides = array<i32>} : memref<1x128x128xf32, #tpu.memory_space<vmem>>, vector<1x1x128xf32>,
    %232 = arith.index_cast %arg0 : i32 to index
    %c29 = arith.constant 29 : index
    %233 = memref.load %arg1[%232, %c29] : memref<2x128xi32, #tpu.memory_space<smem>>
    %c0_145 = arith.constant 0 : index
    %234 = arith.index_cast %233 : i32 to index
    %c0_146 = arith.constant 0 : index
    %235 = vector.load %arg2[%c0_145, %234, %c0_146] : memref<1x576x128xf32, #tpu.memory_space<vmem>>, vector<1x1x128xf32>
    %236 = vector.shape_cast %235 : vector<1x1x128xf32> to vector<1x128xf32>
    %c0_147 = arith.constant 0 : index
    %c29_148 = arith.constant 29 : index
    %c0_149 = arith.constant 0 : index
    %237 = vector.load %arg3[%c0_147, %c29_148, %c0_149] : memref<1x128x128xf32, #tpu.memory_space<vmem>>, vector<1x1x128xf32>
    %238 = vector.shape_cast %237 : vector<1x1x128xf32> to vector<1x128xf32>
    %239 = vector.shape_cast %236 : vector<1x128xf32> to vector<1x1x128xf32>
    tpu.vector_store %arg3[%c0_147, %c29_148, %c0_149], %239 {strides = array<i32>} : memref<1x128x128xf32, #tpu.memory_space<vmem>>, vector<1x1x128xf32>,
    %240 = arith.index_cast %arg0 : i32 to index
    %c30 = arith.constant 30 : index
    %241 = memref.load %arg1[%240, %c30] : memref<2x128xi32, #tpu.memory_space<smem>>
    %c0_150 = arith.constant 0 : index
    %242 = arith.index_cast %241 : i32 to index
    %c0_151 = arith.constant 0 : index
    %243 = vector.load %arg2[%c0_150, %242, %c0_151] : memref<1x576x128xf32, #tpu.memory_space<vmem>>, vector<1x1x128xf32>
    %244 = vector.shape_cast %243 : vector<1x1x128xf32> to vector<1x128xf32>
    %c0_152 = arith.constant 0 : index
    %c30_153 = arith.constant 30 : index
    %c0_154 = arith.constant 0 : index
    %245 = vector.load %arg3[%c0_152, %c30_153, %c0_154] : memref<1x128x128xf32, #tpu.memory_space<vmem>>, vector<1x1x128xf32>
    %246 = vector.shape_cast %245 : vector<1x1x128xf32> to vector<1x128xf32>
    %247 = vector.shape_cast %244 : vector<1x128xf32> to vector<1x1x128xf32>
    tpu.vector_store %arg3[%c0_152, %c30_153, %c0_154], %247 {strides = array<i32>} : memref<1x128x128xf32, #tpu.memory_space<vmem>>, vector<1x1x128xf32>,
    %248 = arith.index_cast %arg0 : i32 to index
    %c31 = arith.constant 31 : index
    %249 = memref.load %arg1[%248, %c31] : memref<2x128xi32, #tpu.memory_space<smem>>
    %c0_155 = arith.constant 0 : index
    %250 = arith.index_cast %249 : i32 to index
    %c0_156 = arith.constant 0 : index
    %251 = vector.load %arg2[%c0_155, %250, %c0_156] : memref<1x576x128xf32, #tpu.memory_space<vmem>>, vector<1x1x128xf32>
    %252 = vector.shape_cast %251 : vector<1x1x128xf32> to vector<1x128xf32>
    %c0_157 = arith.constant 0 : index
    %c31_158 = arith.constant 31 : index
    %c0_159 = arith.constant 0 : index
    %253 = vector.load %arg3[%c0_157, %c31_158, %c0_159] : memref<1x128x128xf32, #tpu.memory_space<vmem>>, vector<1x1x128xf32>
    %254 = vector.shape_cast %253 : vector<1x1x128xf32> to vector<1x128xf32>
    %255 = vector.shape_cast %252 : vector<1x128xf32> to vector<1x1x128xf32>
    tpu.vector_store %arg3[%c0_157, %c31_158, %c0_159], %255 {strides = array<i32>} : memref<1x128x128xf32, #tpu.memory_space<vmem>>, vector<1x1x128xf32>,
    %256 = arith.index_cast %arg0 : i32 to index
    %c32 = arith.constant 32 : index
    %257 = memref.load %arg1[%256, %c32] : memref<2x128xi32, #tpu.memory_space<smem>>
    %c0_160 = arith.constant 0 : index
    %258 = arith.index_cast %257 : i32 to index
    %c0_161 = arith.constant 0 : index
    %259 = vector.load %arg2[%c0_160, %258, %c0_161] : memref<1x576x128xf32, #tpu.memory_space<vmem>>, vector<1x1x128xf32>
    %260 = vector.shape_cast %259 : vector<1x1x128xf32> to vector<1x128xf32>
    %c0_162 = arith.constant 0 : index
    %c32_163 = arith.constant 32 : index
    %c0_164 = arith.constant 0 : index
    %261 = vector.load %arg3[%c0_162, %c32_163, %c0_164] : memref<1x128x128xf32, #tpu.memory_space<vmem>>, vector<1x1x128xf32>
    %262 = vector.shape_cast %261 : vector<1x1x128xf32> to vector<1x128xf32>
    %263 = vector.shape_cast %260 : vector<1x128xf32> to vector<1x1x128xf32>
    tpu.vector_store %arg3[%c0_162, %c32_163, %c0_164], %263 {strides = array<i32>} : memref<1x128x128xf32, #tpu.memory_space<vmem>>, vector<1x1x128xf32>,
    %264 = arith.index_cast %arg0 : i32 to index
    %c33 = arith.constant 33 : index
    %265 = memref.load %arg1[%264, %c33] : memref<2x128xi32, #tpu.memory_space<smem>>
    %c0_165 = arith.constant 0 : index
    %266 = arith.index_cast %265 : i32 to index
    %c0_166 = arith.constant 0 : index
    %267 = vector.load %arg2[%c0_165, %266, %c0_166] : memref<1x576x128xf32, #tpu.memory_space<vmem>>, vector<1x1x128xf32>
    %268 = vector.shape_cast %267 : vector<1x1x128xf32> to vector<1x128xf32>
    %c0_167 = arith.constant 0 : index
    %c33_168 = arith.constant 33 : index
    %c0_169 = arith.constant 0 : index
    %269 = vector.load %arg3[%c0_167, %c33_168, %c0_169] : memref<1x128x128xf32, #tpu.memory_space<vmem>>, vector<1x1x128xf32>
    %270 = vector.shape_cast %269 : vector<1x1x128xf32> to vector<1x128xf32>
    %271 = vector.shape_cast %268 : vector<1x128xf32> to vector<1x1x128xf32>
    tpu.vector_store %arg3[%c0_167, %c33_168, %c0_169], %271 {strides = array<i32>} : memref<1x128x128xf32, #tpu.memory_space<vmem>>, vector<1x1x128xf32>,
    %272 = arith.index_cast %arg0 : i32 to index
    %c34 = arith.constant 34 : index
    %273 = memref.load %arg1[%272, %c34] : memref<2x128xi32, #tpu.memory_space<smem>>
    %c0_170 = arith.constant 0 : index
    %274 = arith.index_cast %273 : i32 to index
    %c0_171 = arith.constant 0 : index
    %275 = vector.load %arg2[%c0_170, %274, %c0_171] : memref<1x576x128xf32, #tpu.memory_space<vmem>>, vector<1x1x128xf32>
    %276 = vector.shape_cast %275 : vector<1x1x128xf32> to vector<1x128xf32>
    %c0_172 = arith.constant 0 : index
    %c34_173 = arith.constant 34 : index
    %c0_174 = arith.constant 0 : index
    %277 = vector.load %arg3[%c0_172, %c34_173, %c0_174] : memref<1x128x128xf32, #tpu.memory_space<vmem>>, vector<1x1x128xf32>
    %278 = vector.shape_cast %277 : vector<1x1x128xf32> to vector<1x128xf32>
    %279 = vector.shape_cast %276 : vector<1x128xf32> to vector<1x1x128xf32>
    tpu.vector_store %arg3[%c0_172, %c34_173, %c0_174], %279 {strides = array<i32>} : memref<1x128x128xf32, #tpu.memory_space<vmem>>, vector<1x1x128xf32>,
    %280 = arith.index_cast %arg0 : i32 to index
    %c35 = arith.constant 35 : index
    %281 = memref.load %arg1[%280, %c35] : memref<2x128xi32, #tpu.memory_space<smem>>
    %c0_175 = arith.constant 0 : index
    %282 = arith.index_cast %281 : i32 to index
    %c0_176 = arith.constant 0 : index
    %283 = vector.load %arg2[%c0_175, %282, %c0_176] : memref<1x576x128xf32, #tpu.memory_space<vmem>>, vector<1x1x128xf32>
    %284 = vector.shape_cast %283 : vector<1x1x128xf32> to vector<1x128xf32>
    %c0_177 = arith.constant 0 : index
    %c35_178 = arith.constant 35 : index
    %c0_179 = arith.constant 0 : index
    %285 = vector.load %arg3[%c0_177, %c35_178, %c0_179] : memref<1x128x128xf32, #tpu.memory_space<vmem>>, vector<1x1x128xf32>
    %286 = vector.shape_cast %285 : vector<1x1x128xf32> to vector<1x128xf32>
    %287 = vector.shape_cast %284 : vector<1x128xf32> to vector<1x1x128xf32>
    tpu.vector_store %arg3[%c0_177, %c35_178, %c0_179], %287 {strides = array<i32>} : memref<1x128x128xf32, #tpu.memory_space<vmem>>, vector<1x1x128xf32>,
    %288 = arith.index_cast %arg0 : i32 to index
    %c36 = arith.constant 36 : index
    %289 = memref.load %arg1[%288, %c36] : memref<2x128xi32, #tpu.memory_space<smem>>
    %c0_180 = arith.constant 0 : index
    %290 = arith.index_cast %289 : i32 to index
    %c0_181 = arith.constant 0 : index
    %291 = vector.load %arg2[%c0_180, %290, %c0_181] : memref<1x576x128xf32, #tpu.memory_space<vmem>>, vector<1x1x128xf32>
    %292 = vector.shape_cast %291 : vector<1x1x128xf32> to vector<1x128xf32>
    %c0_182 = arith.constant 0 : index
    %c36_183 = arith.constant 36 : index
    %c0_184 = arith.constant 0 : index
    %293 = vector.load %arg3[%c0_182, %c36_183, %c0_184] : memref<1x128x128xf32, #tpu.memory_space<vmem>>, vector<1x1x128xf32>
    %294 = vector.shape_cast %293 : vector<1x1x128xf32> to vector<1x128xf32>
    %295 = vector.shape_cast %292 : vector<1x128xf32> to vector<1x1x128xf32>
    tpu.vector_store %arg3[%c0_182, %c36_183, %c0_184], %295 {strides = array<i32>} : memref<1x128x128xf32, #tpu.memory_space<vmem>>, vector<1x1x128xf32>,
    %296 = arith.index_cast %arg0 : i32 to index
    %c37 = arith.constant 37 : index
    %297 = memref.load %arg1[%296, %c37] : memref<2x128xi32, #tpu.memory_space<smem>>
    %c0_185 = arith.constant 0 : index
    %298 = arith.index_cast %297 : i32 to index
    %c0_186 = arith.constant 0 : index
    %299 = vector.load %arg2[%c0_185, %298, %c0_186] : memref<1x576x128xf32, #tpu.memory_space<vmem>>, vector<1x1x128xf32>
    %300 = vector.shape_cast %299 : vector<1x1x128xf32> to vector<1x128xf32>
    %c0_187 = arith.constant 0 : index
    %c37_188 = arith.constant 37 : index
    %c0_189 = arith.constant 0 : index
    %301 = vector.load %arg3[%c0_187, %c37_188, %c0_189] : memref<1x128x128xf32, #tpu.memory_space<vmem>>, vector<1x1x128xf32>
    %302 = vector.shape_cast %301 : vector<1x1x128xf32> to vector<1x128xf32>
    %303 = vector.shape_cast %300 : vector<1x128xf32> to vector<1x1x128xf32>
    tpu.vector_store %arg3[%c0_187, %c37_188, %c0_189], %303 {strides = array<i32>} : memref<1x128x128xf32, #tpu.memory_space<vmem>>, vector<1x1x128xf32>,
    %304 = arith.index_cast %arg0 : i32 to index
    %c38 = arith.constant 38 : index
    %305 = memref.load %arg1[%304, %c38] : memref<2x128xi32, #tpu.memory_space<smem>>
    %c0_190 = arith.constant 0 : index
    %306 = arith.index_cast %305 : i32 to index
    %c0_191 = arith.constant 0 : index
    %307 = vector.load %arg2[%c0_190, %306, %c0_191] : memref<1x576x128xf32, #tpu.memory_space<vmem>>, vector<1x1x128xf32>
    %308 = vector.shape_cast %307 : vector<1x1x128xf32> to vector<1x128xf32>
    %c0_192 = arith.constant 0 : index
    %c38_193 = arith.constant 38 : index
    %c0_194 = arith.constant 0 : index
    %309 = vector.load %arg3[%c0_192, %c38_193, %c0_194] : memref<1x128x128xf32, #tpu.memory_space<vmem>>, vector<1x1x128xf32>
    %310 = vector.shape_cast %309 : vector<1x1x128xf32> to vector<1x128xf32>
    %311 = vector.shape_cast %308 : vector<1x128xf32> to vector<1x1x128xf32>
    tpu.vector_store %arg3[%c0_192, %c38_193, %c0_194], %311 {strides = array<i32>} : memref<1x128x128xf32, #tpu.memory_space<vmem>>, vector<1x1x128xf32>,
    %312 = arith.index_cast %arg0 : i32 to index
    %c39 = arith.constant 39 : index
    %313 = memref.load %arg1[%312, %c39] : memref<2x128xi32, #tpu.memory_space<smem>>
    %c0_195 = arith.constant 0 : index
    %314 = arith.index_cast %313 : i32 to index
    %c0_196 = arith.constant 0 : index
    %315 = vector.load %arg2[%c0_195, %314, %c0_196] : memref<1x576x128xf32, #tpu.memory_space<vmem>>, vector<1x1x128xf32>
    %316 = vector.shape_cast %315 : vector<1x1x128xf32> to vector<1x128xf32>
    %c0_197 = arith.constant 0 : index
    %c39_198 = arith.constant 39 : index
    %c0_199 = arith.constant 0 : index
    %317 = vector.load %arg3[%c0_197, %c39_198, %c0_199] : memref<1x128x128xf32, #tpu.memory_space<vmem>>, vector<1x1x128xf32>
    %318 = vector.shape_cast %317 : vector<1x1x128xf32> to vector<1x128xf32>
    %319 = vector.shape_cast %316 : vector<1x128xf32> to vector<1x1x128xf32>
    tpu.vector_store %arg3[%c0_197, %c39_198, %c0_199], %319 {strides = array<i32>} : memref<1x128x128xf32, #tpu.memory_space<vmem>>, vector<1x1x128xf32>,
    %320 = arith.index_cast %arg0 : i32 to index
    %c40 = arith.constant 40 : index
    %321 = memref.load %arg1[%320, %c40] : memref<2x128xi32, #tpu.memory_space<smem>>
    %c0_200 = arith.constant 0 : index
    %322 = arith.index_cast %321 : i32 to index
    %c0_201 = arith.constant 0 : index
    %323 = vector.load %arg2[%c0_200, %322, %c0_201] : memref<1x576x128xf32, #tpu.memory_space<vmem>>, vector<1x1x128xf32>
    %324 = vector.shape_cast %323 : vector<1x1x128xf32> to vector<1x128xf32>
    %c0_202 = arith.constant 0 : index
    %c40_203 = arith.constant 40 : index
    %c0_204 = arith.constant 0 : index
    %325 = vector.load %arg3[%c0_202, %c40_203, %c0_204] : memref<1x128x128xf32, #tpu.memory_space<vmem>>, vector<1x1x128xf32>
    %326 = vector.shape_cast %325 : vector<1x1x128xf32> to vector<1x128xf32>
    %327 = vector.shape_cast %324 : vector<1x128xf32> to vector<1x1x128xf32>
    tpu.vector_store %arg3[%c0_202, %c40_203, %c0_204], %327 {strides = array<i32>} : memref<1x128x128xf32, #tpu.memory_space<vmem>>, vector<1x1x128xf32>,
    %328 = arith.index_cast %arg0 : i32 to index
    %c41 = arith.constant 41 : index
    %329 = memref.load %arg1[%328, %c41] : memref<2x128xi32, #tpu.memory_space<smem>>
    %c0_205 = arith.constant 0 : index
    %330 = arith.index_cast %329 : i32 to index
    %c0_206 = arith.constant 0 : index
    %331 = vector.load %arg2[%c0_205, %330, %c0_206] : memref<1x576x128xf32, #tpu.memory_space<vmem>>, vector<1x1x128xf32>
    %332 = vector.shape_cast %331 : vector<1x1x128xf32> to vector<1x128xf32>
    %c0_207 = arith.constant 0 : index
    %c41_208 = arith.constant 41 : index
    %c0_209 = arith.constant 0 : index
    %333 = vector.load %arg3[%c0_207, %c41_208, %c0_209] : memref<1x128x128xf32, #tpu.memory_space<vmem>>, vector<1x1x128xf32>
    %334 = vector.shape_cast %333 : vector<1x1x128xf32> to vector<1x128xf32>
    %335 = vector.shape_cast %332 : vector<1x128xf32> to vector<1x1x128xf32>
    tpu.vector_store %arg3[%c0_207, %c41_208, %c0_209], %335 {strides = array<i32>} : memref<1x128x128xf32, #tpu.memory_space<vmem>>, vector<1x1x128xf32>,
    %336 = arith.index_cast %arg0 : i32 to index
    %c42 = arith.constant 42 : index
    %337 = memref.load %arg1[%336, %c42] : memref<2x128xi32, #tpu.memory_space<smem>>
    %c0_210 = arith.constant 0 : index
    %338 = arith.index_cast %337 : i32 to index
    %c0_211 = arith.constant 0 : index
    %339 = vector.load %arg2[%c0_210, %338, %c0_211] : memref<1x576x128xf32, #tpu.memory_space<vmem>>, vector<1x1x128xf32>
    %340 = vector.shape_cast %339 : vector<1x1x128xf32> to vector<1x128xf32>
    %c0_212 = arith.constant 0 : index
    %c42_213 = arith.constant 42 : index
    %c0_214 = arith.constant 0 : index
    %341 = vector.load %arg3[%c0_212, %c42_213, %c0_214] : memref<1x128x128xf32, #tpu.memory_space<vmem>>, vector<1x1x128xf32>
    %342 = vector.shape_cast %341 : vector<1x1x128xf32> to vector<1x128xf32>
    %343 = vector.shape_cast %340 : vector<1x128xf32> to vector<1x1x128xf32>
    tpu.vector_store %arg3[%c0_212, %c42_213, %c0_214], %343 {strides = array<i32>} : memref<1x128x128xf32, #tpu.memory_space<vmem>>, vector<1x1x128xf32>,
    %344 = arith.index_cast %arg0 : i32 to index
    %c43 = arith.constant 43 : index
    %345 = memref.load %arg1[%344, %c43] : memref<2x128xi32, #tpu.memory_space<smem>>
    %c0_215 = arith.constant 0 : index
    %346 = arith.index_cast %345 : i32 to index
    %c0_216 = arith.constant 0 : index
    %347 = vector.load %arg2[%c0_215, %346, %c0_216] : memref<1x576x128xf32, #tpu.memory_space<vmem>>, vector<1x1x128xf32>
    %348 = vector.shape_cast %347 : vector<1x1x128xf32> to vector<1x128xf32>
    %c0_217 = arith.constant 0 : index
    %c43_218 = arith.constant 43 : index
    %c0_219 = arith.constant 0 : index
    %349 = vector.load %arg3[%c0_217, %c43_218, %c0_219] : memref<1x128x128xf32, #tpu.memory_space<vmem>>, vector<1x1x128xf32>
    %350 = vector.shape_cast %349 : vector<1x1x128xf32> to vector<1x128xf32>
    %351 = vector.shape_cast %348 : vector<1x128xf32> to vector<1x1x128xf32>
    tpu.vector_store %arg3[%c0_217, %c43_218, %c0_219], %351 {strides = array<i32>} : memref<1x128x128xf32, #tpu.memory_space<vmem>>, vector<1x1x128xf32>,
    %352 = arith.index_cast %arg0 : i32 to index
    %c44 = arith.constant 44 : index
    %353 = memref.load %arg1[%352, %c44] : memref<2x128xi32, #tpu.memory_space<smem>>
    %c0_220 = arith.constant 0 : index
    %354 = arith.index_cast %353 : i32 to index
    %c0_221 = arith.constant 0 : index
    %355 = vector.load %arg2[%c0_220, %354, %c0_221] : memref<1x576x128xf32, #tpu.memory_space<vmem>>, vector<1x1x128xf32>
    %356 = vector.shape_cast %355 : vector<1x1x128xf32> to vector<1x128xf32>
    %c0_222 = arith.constant 0 : index
    %c44_223 = arith.constant 44 : index
    %c0_224 = arith.constant 0 : index
    %357 = vector.load %arg3[%c0_222, %c44_223, %c0_224] : memref<1x128x128xf32, #tpu.memory_space<vmem>>, vector<1x1x128xf32>
    %358 = vector.shape_cast %357 : vector<1x1x128xf32> to vector<1x128xf32>
    %359 = vector.shape_cast %356 : vector<1x128xf32> to vector<1x1x128xf32>
    tpu.vector_store %arg3[%c0_222, %c44_223, %c0_224], %359 {strides = array<i32>} : memref<1x128x128xf32, #tpu.memory_space<vmem>>, vector<1x1x128xf32>,
    %360 = arith.index_cast %arg0 : i32 to index
    %c45 = arith.constant 45 : index
    %361 = memref.load %arg1[%360, %c45] : memref<2x128xi32, #tpu.memory_space<smem>>
    %c0_225 = arith.constant 0 : index
    %362 = arith.index_cast %361 : i32 to index
    %c0_226 = arith.constant 0 : index
    %363 = vector.load %arg2[%c0_225, %362, %c0_226] : memref<1x576x128xf32, #tpu.memory_space<vmem>>, vector<1x1x128xf32>
    %364 = vector.shape_cast %363 : vector<1x1x128xf32> to vector<1x128xf32>
    %c0_227 = arith.constant 0 : index
    %c45_228 = arith.constant 45 : index
    %c0_229 = arith.constant 0 : index
    %365 = vector.load %arg3[%c0_227, %c45_228, %c0_229] : memref<1x128x128xf32, #tpu.memory_space<vmem>>, vector<1x1x128xf32>
    %366 = vector.shape_cast %365 : vector<1x1x128xf32> to vector<1x128xf32>
    %367 = vector.shape_cast %364 : vector<1x128xf32> to vector<1x1x128xf32>
    tpu.vector_store %arg3[%c0_227, %c45_228, %c0_229], %367 {strides = array<i32>} : memref<1x128x128xf32, #tpu.memory_space<vmem>>, vector<1x1x128xf32>,
    %368 = arith.index_cast %arg0 : i32 to index
    %c46 = arith.constant 46 : index
    %369 = memref.load %arg1[%368, %c46] : memref<2x128xi32, #tpu.memory_space<smem>>
    %c0_230 = arith.constant 0 : index
    %370 = arith.index_cast %369 : i32 to index
    %c0_231 = arith.constant 0 : index
    %371 = vector.load %arg2[%c0_230, %370, %c0_231] : memref<1x576x128xf32, #tpu.memory_space<vmem>>, vector<1x1x128xf32>
    %372 = vector.shape_cast %371 : vector<1x1x128xf32> to vector<1x128xf32>
    %c0_232 = arith.constant 0 : index
    %c46_233 = arith.constant 46 : index
    %c0_234 = arith.constant 0 : index
    %373 = vector.load %arg3[%c0_232, %c46_233, %c0_234] : memref<1x128x128xf32, #tpu.memory_space<vmem>>, vector<1x1x128xf32>
    %374 = vector.shape_cast %373 : vector<1x1x128xf32> to vector<1x128xf32>
    %375 = vector.shape_cast %372 : vector<1x128xf32> to vector<1x1x128xf32>
    tpu.vector_store %arg3[%c0_232, %c46_233, %c0_234], %375 {strides = array<i32>} : memref<1x128x128xf32, #tpu.memory_space<vmem>>, vector<1x1x128xf32>,
    %376 = arith.index_cast %arg0 : i32 to index
    %c47 = arith.constant 47 : index
    %377 = memref.load %arg1[%376, %c47] : memref<2x128xi32, #tpu.memory_space<smem>>
    %c0_235 = arith.constant 0 : index
    %378 = arith.index_cast %377 : i32 to index
    %c0_236 = arith.constant 0 : index
    %379 = vector.load %arg2[%c0_235, %378, %c0_236] : memref<1x576x128xf32, #tpu.memory_space<vmem>>, vector<1x1x128xf32>
    %380 = vector.shape_cast %379 : vector<1x1x128xf32> to vector<1x128xf32>
    %c0_237 = arith.constant 0 : index
    %c47_238 = arith.constant 47 : index
    %c0_239 = arith.constant 0 : index
    %381 = vector.load %arg3[%c0_237, %c47_238, %c0_239] : memref<1x128x128xf32, #tpu.memory_space<vmem>>, vector<1x1x128xf32>
    %382 = vector.shape_cast %381 : vector<1x1x128xf32> to vector<1x128xf32>
    %383 = vector.shape_cast %380 : vector<1x128xf32> to vector<1x1x128xf32>
    tpu.vector_store %arg3[%c0_237, %c47_238, %c0_239], %383 {strides = array<i32>} : memref<1x128x128xf32, #tpu.memory_space<vmem>>, vector<1x1x128xf32>,
    %384 = arith.index_cast %arg0 : i32 to index
    %c48 = arith.constant 48 : index
    %385 = memref.load %arg1[%384, %c48] : memref<2x128xi32, #tpu.memory_space<smem>>
    %c0_240 = arith.constant 0 : index
    %386 = arith.index_cast %385 : i32 to index
    %c0_241 = arith.constant 0 : index
    %387 = vector.load %arg2[%c0_240, %386, %c0_241] : memref<1x576x128xf32, #tpu.memory_space<vmem>>, vector<1x1x128xf32>
    %388 = vector.shape_cast %387 : vector<1x1x128xf32> to vector<1x128xf32>
    %c0_242 = arith.constant 0 : index
    %c48_243 = arith.constant 48 : index
    %c0_244 = arith.constant 0 : index
    %389 = vector.load %arg3[%c0_242, %c48_243, %c0_244] : memref<1x128x128xf32, #tpu.memory_space<vmem>>, vector<1x1x128xf32>
    %390 = vector.shape_cast %389 : vector<1x1x128xf32> to vector<1x128xf32>
    %391 = vector.shape_cast %388 : vector<1x128xf32> to vector<1x1x128xf32>
    tpu.vector_store %arg3[%c0_242, %c48_243, %c0_244], %391 {strides = array<i32>} : memref<1x128x128xf32, #tpu.memory_space<vmem>>, vector<1x1x128xf32>,
    %392 = arith.index_cast %arg0 : i32 to index
    %c49 = arith.constant 49 : index
    %393 = memref.load %arg1[%392, %c49] : memref<2x128xi32, #tpu.memory_space<smem>>
    %c0_245 = arith.constant 0 : index
    %394 = arith.index_cast %393 : i32 to index
    %c0_246 = arith.constant 0 : index
    %395 = vector.load %arg2[%c0_245, %394, %c0_246] : memref<1x576x128xf32, #tpu.memory_space<vmem>>, vector<1x1x128xf32>
    %396 = vector.shape_cast %395 : vector<1x1x128xf32> to vector<1x128xf32>
    %c0_247 = arith.constant 0 : index
    %c49_248 = arith.constant 49 : index
    %c0_249 = arith.constant 0 : index
    %397 = vector.load %arg3[%c0_247, %c49_248, %c0_249] : memref<1x128x128xf32, #tpu.memory_space<vmem>>, vector<1x1x128xf32>
    %398 = vector.shape_cast %397 : vector<1x1x128xf32> to vector<1x128xf32>
    %399 = vector.shape_cast %396 : vector<1x128xf32> to vector<1x1x128xf32>
    tpu.vector_store %arg3[%c0_247, %c49_248, %c0_249], %399 {strides = array<i32>} : memref<1x128x128xf32, #tpu.memory_space<vmem>>, vector<1x1x128xf32>,
    %400 = arith.index_cast %arg0 : i32 to index
    %c50 = arith.constant 50 : index
    %401 = memref.load %arg1[%400, %c50] : memref<2x128xi32, #tpu.memory_space<smem>>
    %c0_250 = arith.constant 0 : index
    %402 = arith.index_cast %401 : i32 to index
    %c0_251 = arith.constant 0 : index
    %403 = vector.load %arg2[%c0_250, %402, %c0_251] : memref<1x576x128xf32, #tpu.memory_space<vmem>>, vector<1x1x128xf32>
    %404 = vector.shape_cast %403 : vector<1x1x128xf32> to vector<1x128xf32>
    %c0_252 = arith.constant 0 : index
    %c50_253 = arith.constant 50 : index
    %c0_254 = arith.constant 0 : index
    %405 = vector.load %arg3[%c0_252, %c50_253, %c0_254] : memref<1x128x128xf32, #tpu.memory_space<vmem>>, vector<1x1x128xf32>
    %406 = vector.shape_cast %405 : vector<1x1x128xf32> to vector<1x128xf32>
    %407 = vector.shape_cast %404 : vector<1x128xf32> to vector<1x1x128xf32>
    tpu.vector_store %arg3[%c0_252, %c50_253, %c0_254], %407 {strides = array<i32>} : memref<1x128x128xf32, #tpu.memory_space<vmem>>, vector<1x1x128xf32>,
    %408 = arith.index_cast %arg0 : i32 to index
    %c51 = arith.constant 51 : index
    %409 = memref.load %arg1[%408, %c51] : memref<2x128xi32, #tpu.memory_space<smem>>
    %c0_255 = arith.constant 0 : index
    %410 = arith.index_cast %409 : i32 to index
    %c0_256 = arith.constant 0 : index
    %411 = vector.load %arg2[%c0_255, %410, %c0_256] : memref<1x576x128xf32, #tpu.memory_space<vmem>>, vector<1x1x128xf32>
    %412 = vector.shape_cast %411 : vector<1x1x128xf32> to vector<1x128xf32>
    %c0_257 = arith.constant 0 : index
    %c51_258 = arith.constant 51 : index
    %c0_259 = arith.constant 0 : index
    %413 = vector.load %arg3[%c0_257, %c51_258, %c0_259] : memref<1x128x128xf32, #tpu.memory_space<vmem>>, vector<1x1x128xf32>
    %414 = vector.shape_cast %413 : vector<1x1x128xf32> to vector<1x128xf32>
    %415 = vector.shape_cast %412 : vector<1x128xf32> to vector<1x1x128xf32>
    tpu.vector_store %arg3[%c0_257, %c51_258, %c0_259], %415 {strides = array<i32>} : memref<1x128x128xf32, #tpu.memory_space<vmem>>, vector<1x1x128xf32>,
    %416 = arith.index_cast %arg0 : i32 to index
    %c52 = arith.constant 52 : index
    %417 = memref.load %arg1[%416, %c52] : memref<2x128xi32, #tpu.memory_space<smem>>
    %c0_260 = arith.constant 0 : index
    %418 = arith.index_cast %417 : i32 to index
    %c0_261 = arith.constant 0 : index
    %419 = vector.load %arg2[%c0_260, %418, %c0_261] : memref<1x576x128xf32, #tpu.memory_space<vmem>>, vector<1x1x128xf32>
    %420 = vector.shape_cast %419 : vector<1x1x128xf32> to vector<1x128xf32>
    %c0_262 = arith.constant 0 : index
    %c52_263 = arith.constant 52 : index
    %c0_264 = arith.constant 0 : index
    %421 = vector.load %arg3[%c0_262, %c52_263, %c0_264] : memref<1x128x128xf32, #tpu.memory_space<vmem>>, vector<1x1x128xf32>
    %422 = vector.shape_cast %421 : vector<1x1x128xf32> to vector<1x128xf32>
    %423 = vector.shape_cast %420 : vector<1x128xf32> to vector<1x1x128xf32>
    tpu.vector_store %arg3[%c0_262, %c52_263, %c0_264], %423 {strides = array<i32>} : memref<1x128x128xf32, #tpu.memory_space<vmem>>, vector<1x1x128xf32>,
    %424 = arith.index_cast %arg0 : i32 to index
    %c53 = arith.constant 53 : index
    %425 = memref.load %arg1[%424, %c53] : memref<2x128xi32, #tpu.memory_space<smem>>
    %c0_265 = arith.constant 0 : index
    %426 = arith.index_cast %425 : i32 to index
    %c0_266 = arith.constant 0 : index
    %427 = vector.load %arg2[%c0_265, %426, %c0_266] : memref<1x576x128xf32, #tpu.memory_space<vmem>>, vector<1x1x128xf32>
    %428 = vector.shape_cast %427 : vector<1x1x128xf32> to vector<1x128xf32>
    %c0_267 = arith.constant 0 : index
    %c53_268 = arith.constant 53 : index
    %c0_269 = arith.constant 0 : index
    %429 = vector.load %arg3[%c0_267, %c53_268, %c0_269] : memref<1x128x128xf32, #tpu.memory_space<vmem>>, vector<1x1x128xf32>
    %430 = vector.shape_cast %429 : vector<1x1x128xf32> to vector<1x128xf32>
    %431 = vector.shape_cast %428 : vector<1x128xf32> to vector<1x1x128xf32>
    tpu.vector_store %arg3[%c0_267, %c53_268, %c0_269], %431 {strides = array<i32>} : memref<1x128x128xf32, #tpu.memory_space<vmem>>, vector<1x1x128xf32>,
    %432 = arith.index_cast %arg0 : i32 to index
    %c54 = arith.constant 54 : index
    %433 = memref.load %arg1[%432, %c54] : memref<2x128xi32, #tpu.memory_space<smem>>
    %c0_270 = arith.constant 0 : index
    %434 = arith.index_cast %433 : i32 to index
    %c0_271 = arith.constant 0 : index
    %435 = vector.load %arg2[%c0_270, %434, %c0_271] : memref<1x576x128xf32, #tpu.memory_space<vmem>>, vector<1x1x128xf32>
    %436 = vector.shape_cast %435 : vector<1x1x128xf32> to vector<1x128xf32>
    %c0_272 = arith.constant 0 : index
    %c54_273 = arith.constant 54 : index
    %c0_274 = arith.constant 0 : index
    %437 = vector.load %arg3[%c0_272, %c54_273, %c0_274] : memref<1x128x128xf32, #tpu.memory_space<vmem>>, vector<1x1x128xf32>
    %438 = vector.shape_cast %437 : vector<1x1x128xf32> to vector<1x128xf32>
    %439 = vector.shape_cast %436 : vector<1x128xf32> to vector<1x1x128xf32>
    tpu.vector_store %arg3[%c0_272, %c54_273, %c0_274], %439 {strides = array<i32>} : memref<1x128x128xf32, #tpu.memory_space<vmem>>, vector<1x1x128xf32>,
    %440 = arith.index_cast %arg0 : i32 to index
    %c55 = arith.constant 55 : index
    %441 = memref.load %arg1[%440, %c55] : memref<2x128xi32, #tpu.memory_space<smem>>
    %c0_275 = arith.constant 0 : index
    %442 = arith.index_cast %441 : i32 to index
    %c0_276 = arith.constant 0 : index
    %443 = vector.load %arg2[%c0_275, %442, %c0_276] : memref<1x576x128xf32, #tpu.memory_space<vmem>>, vector<1x1x128xf32>
    %444 = vector.shape_cast %443 : vector<1x1x128xf32> to vector<1x128xf32>
    %c0_277 = arith.constant 0 : index
    %c55_278 = arith.constant 55 : index
    %c0_279 = arith.constant 0 : index
    %445 = vector.load %arg3[%c0_277, %c55_278, %c0_279] : memref<1x128x128xf32, #tpu.memory_space<vmem>>, vector<1x1x128xf32>
    %446 = vector.shape_cast %445 : vector<1x1x128xf32> to vector<1x128xf32>
    %447 = vector.shape_cast %444 : vector<1x128xf32> to vector<1x1x128xf32>
    tpu.vector_store %arg3[%c0_277, %c55_278, %c0_279], %447 {strides = array<i32>} : memref<1x128x128xf32, #tpu.memory_space<vmem>>, vector<1x1x128xf32>,
    %448 = arith.index_cast %arg0 : i32 to index
    %c56 = arith.constant 56 : index
    %449 = memref.load %arg1[%448, %c56] : memref<2x128xi32, #tpu.memory_space<smem>>
    %c0_280 = arith.constant 0 : index
    %450 = arith.index_cast %449 : i32 to index
    %c0_281 = arith.constant 0 : index
    %451 = vector.load %arg2[%c0_280, %450, %c0_281] : memref<1x576x128xf32, #tpu.memory_space<vmem>>, vector<1x1x128xf32>
    %452 = vector.shape_cast %451 : vector<1x1x128xf32> to vector<1x128xf32>
    %c0_282 = arith.constant 0 : index
    %c56_283 = arith.constant 56 : index
    %c0_284 = arith.constant 0 : index
    %453 = vector.load %arg3[%c0_282, %c56_283, %c0_284] : memref<1x128x128xf32, #tpu.memory_space<vmem>>, vector<1x1x128xf32>
    %454 = vector.shape_cast %453 : vector<1x1x128xf32> to vector<1x128xf32>
    %455 = vector.shape_cast %452 : vector<1x128xf32> to vector<1x1x128xf32>
    tpu.vector_store %arg3[%c0_282, %c56_283, %c0_284], %455 {strides = array<i32>} : memref<1x128x128xf32, #tpu.memory_space<vmem>>, vector<1x1x128xf32>,
    %456 = arith.index_cast %arg0 : i32 to index
    %c57 = arith.constant 57 : index
    %457 = memref.load %arg1[%456, %c57] : memref<2x128xi32, #tpu.memory_space<smem>>
    %c0_285 = arith.constant 0 : index
    %458 = arith.index_cast %457 : i32 to index
    %c0_286 = arith.constant 0 : index
    %459 = vector.load %arg2[%c0_285, %458, %c0_286] : memref<1x576x128xf32, #tpu.memory_space<vmem>>, vector<1x1x128xf32>
    %460 = vector.shape_cast %459 : vector<1x1x128xf32> to vector<1x128xf32>
    %c0_287 = arith.constant 0 : index
    %c57_288 = arith.constant 57 : index
    %c0_289 = arith.constant 0 : index
    %461 = vector.load %arg3[%c0_287, %c57_288, %c0_289] : memref<1x128x128xf32, #tpu.memory_space<vmem>>, vector<1x1x128xf32>
    %462 = vector.shape_cast %461 : vector<1x1x128xf32> to vector<1x128xf32>
    %463 = vector.shape_cast %460 : vector<1x128xf32> to vector<1x1x128xf32>
    tpu.vector_store %arg3[%c0_287, %c57_288, %c0_289], %463 {strides = array<i32>} : memref<1x128x128xf32, #tpu.memory_space<vmem>>, vector<1x1x128xf32>,
    %464 = arith.index_cast %arg0 : i32 to index
    %c58 = arith.constant 58 : index
    %465 = memref.load %arg1[%464, %c58] : memref<2x128xi32, #tpu.memory_space<smem>>
    %c0_290 = arith.constant 0 : index
    %466 = arith.index_cast %465 : i32 to index
    %c0_291 = arith.constant 0 : index
    %467 = vector.load %arg2[%c0_290, %466, %c0_291] : memref<1x576x128xf32, #tpu.memory_space<vmem>>, vector<1x1x128xf32>
    %468 = vector.shape_cast %467 : vector<1x1x128xf32> to vector<1x128xf32>
    %c0_292 = arith.constant 0 : index
    %c58_293 = arith.constant 58 : index
    %c0_294 = arith.constant 0 : index
    %469 = vector.load %arg3[%c0_292, %c58_293, %c0_294] : memref<1x128x128xf32, #tpu.memory_space<vmem>>, vector<1x1x128xf32>
    %470 = vector.shape_cast %469 : vector<1x1x128xf32> to vector<1x128xf32>
    %471 = vector.shape_cast %468 : vector<1x128xf32> to vector<1x1x128xf32>
    tpu.vector_store %arg3[%c0_292, %c58_293, %c0_294], %471 {strides = array<i32>} : memref<1x128x128xf32, #tpu.memory_space<vmem>>, vector<1x1x128xf32>,
    %472 = arith.index_cast %arg0 : i32 to index
    %c59 = arith.constant 59 : index
    %473 = memref.load %arg1[%472, %c59] : memref<2x128xi32, #tpu.memory_space<smem>>
    %c0_295 = arith.constant 0 : index
    %474 = arith.index_cast %473 : i32 to index
    %c0_296 = arith.constant 0 : index
    %475 = vector.load %arg2[%c0_295, %474, %c0_296] : memref<1x576x128xf32, #tpu.memory_space<vmem>>, vector<1x1x128xf32>
    %476 = vector.shape_cast %475 : vector<1x1x128xf32> to vector<1x128xf32>
    %c0_297 = arith.constant 0 : index
    %c59_298 = arith.constant 59 : index
    %c0_299 = arith.constant 0 : index
    %477 = vector.load %arg3[%c0_297, %c59_298, %c0_299] : memref<1x128x128xf32, #tpu.memory_space<vmem>>, vector<1x1x128xf32>
    %478 = vector.shape_cast %477 : vector<1x1x128xf32> to vector<1x128xf32>
    %479 = vector.shape_cast %476 : vector<1x128xf32> to vector<1x1x128xf32>
    tpu.vector_store %arg3[%c0_297, %c59_298, %c0_299], %479 {strides = array<i32>} : memref<1x128x128xf32, #tpu.memory_space<vmem>>, vector<1x1x128xf32>,
    %480 = arith.index_cast %arg0 : i32 to index
    %c60 = arith.constant 60 : index
    %481 = memref.load %arg1[%480, %c60] : memref<2x128xi32, #tpu.memory_space<smem>>
    %c0_300 = arith.constant 0 : index
    %482 = arith.index_cast %481 : i32 to index
    %c0_301 = arith.constant 0 : index
    %483 = vector.load %arg2[%c0_300, %482, %c0_301] : memref<1x576x128xf32, #tpu.memory_space<vmem>>, vector<1x1x128xf32>
    %484 = vector.shape_cast %483 : vector<1x1x128xf32> to vector<1x128xf32>
    %c0_302 = arith.constant 0 : index
    %c60_303 = arith.constant 60 : index
    %c0_304 = arith.constant 0 : index
    %485 = vector.load %arg3[%c0_302, %c60_303, %c0_304] : memref<1x128x128xf32, #tpu.memory_space<vmem>>, vector<1x1x128xf32>
    %486 = vector.shape_cast %485 : vector<1x1x128xf32> to vector<1x128xf32>
    %487 = vector.shape_cast %484 : vector<1x128xf32> to vector<1x1x128xf32>
    tpu.vector_store %arg3[%c0_302, %c60_303, %c0_304], %487 {strides = array<i32>} : memref<1x128x128xf32, #tpu.memory_space<vmem>>, vector<1x1x128xf32>,
    %488 = arith.index_cast %arg0 : i32 to index
    %c61 = arith.constant 61 : index
    %489 = memref.load %arg1[%488, %c61] : memref<2x128xi32, #tpu.memory_space<smem>>
    %c0_305 = arith.constant 0 : index
    %490 = arith.index_cast %489 : i32 to index
    %c0_306 = arith.constant 0 : index
    %491 = vector.load %arg2[%c0_305, %490, %c0_306] : memref<1x576x128xf32, #tpu.memory_space<vmem>>, vector<1x1x128xf32>
    %492 = vector.shape_cast %491 : vector<1x1x128xf32> to vector<1x128xf32>
    %c0_307 = arith.constant 0 : index
    %c61_308 = arith.constant 61 : index
    %c0_309 = arith.constant 0 : index
    %493 = vector.load %arg3[%c0_307, %c61_308, %c0_309] : memref<1x128x128xf32, #tpu.memory_space<vmem>>, vector<1x1x128xf32>
    %494 = vector.shape_cast %493 : vector<1x1x128xf32> to vector<1x128xf32>
    %495 = vector.shape_cast %492 : vector<1x128xf32> to vector<1x1x128xf32>
    tpu.vector_store %arg3[%c0_307, %c61_308, %c0_309], %495 {strides = array<i32>} : memref<1x128x128xf32, #tpu.memory_space<vmem>>, vector<1x1x128xf32>,
    %496 = arith.index_cast %arg0 : i32 to index
    %c62 = arith.constant 62 : index
    %497 = memref.load %arg1[%496, %c62] : memref<2x128xi32, #tpu.memory_space<smem>>
    %c0_310 = arith.constant 0 : index
    %498 = arith.index_cast %497 : i32 to index
    %c0_311 = arith.constant 0 : index
    %499 = vector.load %arg2[%c0_310, %498, %c0_311] : memref<1x576x128xf32, #tpu.memory_space<vmem>>, vector<1x1x128xf32>
    %500 = vector.shape_cast %499 : vector<1x1x128xf32> to vector<1x128xf32>
    %c0_312 = arith.constant 0 : index
    %c62_313 = arith.constant 62 : index
    %c0_314 = arith.constant 0 : index
    %501 = vector.load %arg3[%c0_312, %c62_313, %c0_314] : memref<1x128x128xf32, #tpu.memory_space<vmem>>, vector<1x1x128xf32>
    %502 = vector.shape_cast %501 : vector<1x1x128xf32> to vector<1x128xf32>
    %503 = vector.shape_cast %500 : vector<1x128xf32> to vector<1x1x128xf32>
    tpu.vector_store %arg3[%c0_312, %c62_313, %c0_314], %503 {strides = array<i32>} : memref<1x128x128xf32, #tpu.memory_space<vmem>>, vector<1x1x128xf32>,
    %504 = arith.index_cast %arg0 : i32 to index
    %c63 = arith.constant 63 : index
    %505 = memref.load %arg1[%504, %c63] : memref<2x128xi32, #tpu.memory_space<smem>>
    %c0_315 = arith.constant 0 : index
    %506 = arith.index_cast %505 : i32 to index
    %c0_316 = arith.constant 0 : index
    %507 = vector.load %arg2[%c0_315, %506, %c0_316] : memref<1x576x128xf32, #tpu.memory_space<vmem>>, vector<1x1x128xf32>
    %508 = vector.shape_cast %507 : vector<1x1x128xf32> to vector<1x128xf32>
    %c0_317 = arith.constant 0 : index
    %c63_318 = arith.constant 63 : index
    %c0_319 = arith.constant 0 : index
    %509 = vector.load %arg3[%c0_317, %c63_318, %c0_319] : memref<1x128x128xf32, #tpu.memory_space<vmem>>, vector<1x1x128xf32>
    %510 = vector.shape_cast %509 : vector<1x1x128xf32> to vector<1x128xf32>
    %511 = vector.shape_cast %508 : vector<1x128xf32> to vector<1x1x128xf32>
    tpu.vector_store %arg3[%c0_317, %c63_318, %c0_319], %511 {strides = array<i32>} : memref<1x128x128xf32, #tpu.memory_space<vmem>>, vector<1x1x128xf32>,
    %512 = arith.index_cast %arg0 : i32 to index
    %c64 = arith.constant 64 : index
    %513 = memref.load %arg1[%512, %c64] : memref<2x128xi32, #tpu.memory_space<smem>>
    %c0_320 = arith.constant 0 : index
    %514 = arith.index_cast %513 : i32 to index
    %c0_321 = arith.constant 0 : index
    %515 = vector.load %arg2[%c0_320, %514, %c0_321] : memref<1x576x128xf32, #tpu.memory_space<vmem>>, vector<1x1x128xf32>
    %516 = vector.shape_cast %515 : vector<1x1x128xf32> to vector<1x128xf32>
    %c0_322 = arith.constant 0 : index
    %c64_323 = arith.constant 64 : index
    %c0_324 = arith.constant 0 : index
    %517 = vector.load %arg3[%c0_322, %c64_323, %c0_324] : memref<1x128x128xf32, #tpu.memory_space<vmem>>, vector<1x1x128xf32>
    %518 = vector.shape_cast %517 : vector<1x1x128xf32> to vector<1x128xf32>
    %519 = vector.shape_cast %516 : vector<1x128xf32> to vector<1x1x128xf32>
    tpu.vector_store %arg3[%c0_322, %c64_323, %c0_324], %519 {strides = array<i32>} : memref<1x128x128xf32, #tpu.memory_space<vmem>>, vector<1x1x128xf32>,
    %520 = arith.index_cast %arg0 : i32 to index
    %c65 = arith.constant 65 : index
    %521 = memref.load %arg1[%520, %c65] : memref<2x128xi32, #tpu.memory_space<smem>>
    %c0_325 = arith.constant 0 : index
    %522 = arith.index_cast %521 : i32 to index
    %c0_326 = arith.constant 0 : index
    %523 = vector.load %arg2[%c0_325, %522, %c0_326] : memref<1x576x128xf32, #tpu.memory_space<vmem>>, vector<1x1x128xf32>
    %524 = vector.shape_cast %523 : vector<1x1x128xf32> to vector<1x128xf32>
    %c0_327 = arith.constant 0 : index
    %c65_328 = arith.constant 65 : index
    %c0_329 = arith.constant 0 : index
    %525 = vector.load %arg3[%c0_327, %c65_328, %c0_329] : memref<1x128x128xf32, #tpu.memory_space<vmem>>, vector<1x1x128xf32>
    %526 = vector.shape_cast %525 : vector<1x1x128xf32> to vector<1x128xf32>
    %527 = vector.shape_cast %524 : vector<1x128xf32> to vector<1x1x128xf32>
    tpu.vector_store %arg3[%c0_327, %c65_328, %c0_329], %527 {strides = array<i32>} : memref<1x128x128xf32, #tpu.memory_space<vmem>>, vector<1x1x128xf32>,
    %528 = arith.index_cast %arg0 : i32 to index
    %c66 = arith.constant 66 : index
    %529 = memref.load %arg1[%528, %c66] : memref<2x128xi32, #tpu.memory_space<smem>>
    %c0_330 = arith.constant 0 : index
    %530 = arith.index_cast %529 : i32 to index
    %c0_331 = arith.constant 0 : index
    %531 = vector.load %arg2[%c0_330, %530, %c0_331] : memref<1x576x128xf32, #tpu.memory_space<vmem>>, vector<1x1x128xf32>
    %532 = vector.shape_cast %531 : vector<1x1x128xf32> to vector<1x128xf32>
    %c0_332 = arith.constant 0 : index
    %c66_333 = arith.constant 66 : index
    %c0_334 = arith.constant 0 : index
    %533 = vector.load %arg3[%c0_332, %c66_333, %c0_334] : memref<1x128x128xf32, #tpu.memory_space<vmem>>, vector<1x1x128xf32>
    %534 = vector.shape_cast %533 : vector<1x1x128xf32> to vector<1x128xf32>
    %535 = vector.shape_cast %532 : vector<1x128xf32> to vector<1x1x128xf32>
    tpu.vector_store %arg3[%c0_332, %c66_333, %c0_334], %535 {strides = array<i32>} : memref<1x128x128xf32, #tpu.memory_space<vmem>>, vector<1x1x128xf32>,
    %536 = arith.index_cast %arg0 : i32 to index
    %c67 = arith.constant 67 : index
    %537 = memref.load %arg1[%536, %c67] : memref<2x128xi32, #tpu.memory_space<smem>>
    %c0_335 = arith.constant 0 : index
    %538 = arith.index_cast %537 : i32 to index
    %c0_336 = arith.constant 0 : index
    %539 = vector.load %arg2[%c0_335, %538, %c0_336] : memref<1x576x128xf32, #tpu.memory_space<vmem>>, vector<1x1x128xf32>
    %540 = vector.shape_cast %539 : vector<1x1x128xf32> to vector<1x128xf32>
    %c0_337 = arith.constant 0 : index
    %c67_338 = arith.constant 67 : index
    %c0_339 = arith.constant 0 : index
    %541 = vector.load %arg3[%c0_337, %c67_338, %c0_339] : memref<1x128x128xf32, #tpu.memory_space<vmem>>, vector<1x1x128xf32>
    %542 = vector.shape_cast %541 : vector<1x1x128xf32> to vector<1x128xf32>
    %543 = vector.shape_cast %540 : vector<1x128xf32> to vector<1x1x128xf32>
    tpu.vector_store %arg3[%c0_337, %c67_338, %c0_339], %543 {strides = array<i32>} : memref<1x128x128xf32, #tpu.memory_space<vmem>>, vector<1x1x128xf32>,
    %544 = arith.index_cast %arg0 : i32 to index
    %c68 = arith.constant 68 : index
    %545 = memref.load %arg1[%544, %c68] : memref<2x128xi32, #tpu.memory_space<smem>>
    %c0_340 = arith.constant 0 : index
    %546 = arith.index_cast %545 : i32 to index
    %c0_341 = arith.constant 0 : index
    %547 = vector.load %arg2[%c0_340, %546, %c0_341] : memref<1x576x128xf32, #tpu.memory_space<vmem>>, vector<1x1x128xf32>
    %548 = vector.shape_cast %547 : vector<1x1x128xf32> to vector<1x128xf32>
    %c0_342 = arith.constant 0 : index
    %c68_343 = arith.constant 68 : index
    %c0_344 = arith.constant 0 : index
    %549 = vector.load %arg3[%c0_342, %c68_343, %c0_344] : memref<1x128x128xf32, #tpu.memory_space<vmem>>, vector<1x1x128xf32>
    %550 = vector.shape_cast %549 : vector<1x1x128xf32> to vector<1x128xf32>
    %551 = vector.shape_cast %548 : vector<1x128xf32> to vector<1x1x128xf32>
    tpu.vector_store %arg3[%c0_342, %c68_343, %c0_344], %551 {strides = array<i32>} : memref<1x128x128xf32, #tpu.memory_space<vmem>>, vector<1x1x128xf32>,
    %552 = arith.index_cast %arg0 : i32 to index
    %c69 = arith.constant 69 : index
    %553 = memref.load %arg1[%552, %c69] : memref<2x128xi32, #tpu.memory_space<smem>>
    %c0_345 = arith.constant 0 : index
    %554 = arith.index_cast %553 : i32 to index
    %c0_346 = arith.constant 0 : index
    %555 = vector.load %arg2[%c0_345, %554, %c0_346] : memref<1x576x128xf32, #tpu.memory_space<vmem>>, vector<1x1x128xf32>
    %556 = vector.shape_cast %555 : vector<1x1x128xf32> to vector<1x128xf32>
    %c0_347 = arith.constant 0 : index
    %c69_348 = arith.constant 69 : index
    %c0_349 = arith.constant 0 : index
    %557 = vector.load %arg3[%c0_347, %c69_348, %c0_349] : memref<1x128x128xf32, #tpu.memory_space<vmem>>, vector<1x1x128xf32>
    %558 = vector.shape_cast %557 : vector<1x1x128xf32> to vector<1x128xf32>
    %559 = vector.shape_cast %556 : vector<1x128xf32> to vector<1x1x128xf32>
    tpu.vector_store %arg3[%c0_347, %c69_348, %c0_349], %559 {strides = array<i32>} : memref<1x128x128xf32, #tpu.memory_space<vmem>>, vector<1x1x128xf32>,
    %560 = arith.index_cast %arg0 : i32 to index
    %c70 = arith.constant 70 : index
    %561 = memref.load %arg1[%560, %c70] : memref<2x128xi32, #tpu.memory_space<smem>>
    %c0_350 = arith.constant 0 : index
    %562 = arith.index_cast %561 : i32 to index
    %c0_351 = arith.constant 0 : index
    %563 = vector.load %arg2[%c0_350, %562, %c0_351] : memref<1x576x128xf32, #tpu.memory_space<vmem>>, vector<1x1x128xf32>
    %564 = vector.shape_cast %563 : vector<1x1x128xf32> to vector<1x128xf32>
    %c0_352 = arith.constant 0 : index
    %c70_353 = arith.constant 70 : index
    %c0_354 = arith.constant 0 : index
    %565 = vector.load %arg3[%c0_352, %c70_353, %c0_354] : memref<1x128x128xf32, #tpu.memory_space<vmem>>, vector<1x1x128xf32>
    %566 = vector.shape_cast %565 : vector<1x1x128xf32> to vector<1x128xf32>
    %567 = vector.shape_cast %564 : vector<1x128xf32> to vector<1x1x128xf32>
    tpu.vector_store %arg3[%c0_352, %c70_353, %c0_354], %567 {strides = array<i32>} : memref<1x128x128xf32, #tpu.memory_space<vmem>>, vector<1x1x128xf32>,
    %568 = arith.index_cast %arg0 : i32 to index
    %c71 = arith.constant 71 : index
    %569 = memref.load %arg1[%568, %c71] : memref<2x128xi32, #tpu.memory_space<smem>>
    %c0_355 = arith.constant 0 : index
    %570 = arith.index_cast %569 : i32 to index
    %c0_356 = arith.constant 0 : index
    %571 = vector.load %arg2[%c0_355, %570, %c0_356] : memref<1x576x128xf32, #tpu.memory_space<vmem>>, vector<1x1x128xf32>
    %572 = vector.shape_cast %571 : vector<1x1x128xf32> to vector<1x128xf32>
    %c0_357 = arith.constant 0 : index
    %c71_358 = arith.constant 71 : index
    %c0_359 = arith.constant 0 : index
    %573 = vector.load %arg3[%c0_357, %c71_358, %c0_359] : memref<1x128x128xf32, #tpu.memory_space<vmem>>, vector<1x1x128xf32>
    %574 = vector.shape_cast %573 : vector<1x1x128xf32> to vector<1x128xf32>
    %575 = vector.shape_cast %572 : vector<1x128xf32> to vector<1x1x128xf32>
    tpu.vector_store %arg3[%c0_357, %c71_358, %c0_359], %575 {strides = array<i32>} : memref<1x128x128xf32, #tpu.memory_space<vmem>>, vector<1x1x128xf32>,
    %576 = arith.index_cast %arg0 : i32 to index
    %c72 = arith.constant 72 : index
    %577 = memref.load %arg1[%576, %c72] : memref<2x128xi32, #tpu.memory_space<smem>>
    %c0_360 = arith.constant 0 : index
    %578 = arith.index_cast %577 : i32 to index
    %c0_361 = arith.constant 0 : index
    %579 = vector.load %arg2[%c0_360, %578, %c0_361] : memref<1x576x128xf32, #tpu.memory_space<vmem>>, vector<1x1x128xf32>
    %580 = vector.shape_cast %579 : vector<1x1x128xf32> to vector<1x128xf32>
    %c0_362 = arith.constant 0 : index
    %c72_363 = arith.constant 72 : index
    %c0_364 = arith.constant 0 : index
    %581 = vector.load %arg3[%c0_362, %c72_363, %c0_364] : memref<1x128x128xf32, #tpu.memory_space<vmem>>, vector<1x1x128xf32>
    %582 = vector.shape_cast %581 : vector<1x1x128xf32> to vector<1x128xf32>
    %583 = vector.shape_cast %580 : vector<1x128xf32> to vector<1x1x128xf32>
    tpu.vector_store %arg3[%c0_362, %c72_363, %c0_364], %583 {strides = array<i32>} : memref<1x128x128xf32, #tpu.memory_space<vmem>>, vector<1x1x128xf32>,
    %584 = arith.index_cast %arg0 : i32 to index
    %c73 = arith.constant 73 : index
    %585 = memref.load %arg1[%584, %c73] : memref<2x128xi32, #tpu.memory_space<smem>>
    %c0_365 = arith.constant 0 : index
    %586 = arith.index_cast %585 : i32 to index
    %c0_366 = arith.constant 0 : index
    %587 = vector.load %arg2[%c0_365, %586, %c0_366] : memref<1x576x128xf32, #tpu.memory_space<vmem>>, vector<1x1x128xf32>
    %588 = vector.shape_cast %587 : vector<1x1x128xf32> to vector<1x128xf32>
    %c0_367 = arith.constant 0 : index
    %c73_368 = arith.constant 73 : index
    %c0_369 = arith.constant 0 : index
    %589 = vector.load %arg3[%c0_367, %c73_368, %c0_369] : memref<1x128x128xf32, #tpu.memory_space<vmem>>, vector<1x1x128xf32>
    %590 = vector.shape_cast %589 : vector<1x1x128xf32> to vector<1x128xf32>
    %591 = vector.shape_cast %588 : vector<1x128xf32> to vector<1x1x128xf32>
    tpu.vector_store %arg3[%c0_367, %c73_368, %c0_369], %591 {strides = array<i32>} : memref<1x128x128xf32, #tpu.memory_space<vmem>>, vector<1x1x128xf32>,
    %592 = arith.index_cast %arg0 : i32 to index
    %c74 = arith.constant 74 : index
    %593 = memref.load %arg1[%592, %c74] : memref<2x128xi32, #tpu.memory_space<smem>>
    %c0_370 = arith.constant 0 : index
    %594 = arith.index_cast %593 : i32 to index
    %c0_371 = arith.constant 0 : index
    %595 = vector.load %arg2[%c0_370, %594, %c0_371] : memref<1x576x128xf32, #tpu.memory_space<vmem>>, vector<1x1x128xf32>
    %596 = vector.shape_cast %595 : vector<1x1x128xf32> to vector<1x128xf32>
    %c0_372 = arith.constant 0 : index
    %c74_373 = arith.constant 74 : index
    %c0_374 = arith.constant 0 : index
    %597 = vector.load %arg3[%c0_372, %c74_373, %c0_374] : memref<1x128x128xf32, #tpu.memory_space<vmem>>, vector<1x1x128xf32>
    %598 = vector.shape_cast %597 : vector<1x1x128xf32> to vector<1x128xf32>
    %599 = vector.shape_cast %596 : vector<1x128xf32> to vector<1x1x128xf32>
    tpu.vector_store %arg3[%c0_372, %c74_373, %c0_374], %599 {strides = array<i32>} : memref<1x128x128xf32, #tpu.memory_space<vmem>>, vector<1x1x128xf32>,
    %600 = arith.index_cast %arg0 : i32 to index
    %c75 = arith.constant 75 : index
    %601 = memref.load %arg1[%600, %c75] : memref<2x128xi32, #tpu.memory_space<smem>>
    %c0_375 = arith.constant 0 : index
    %602 = arith.index_cast %601 : i32 to index
    %c0_376 = arith.constant 0 : index
    %603 = vector.load %arg2[%c0_375, %602, %c0_376] : memref<1x576x128xf32, #tpu.memory_space<vmem>>, vector<1x1x128xf32>
    %604 = vector.shape_cast %603 : vector<1x1x128xf32> to vector<1x128xf32>
    %c0_377 = arith.constant 0 : index
    %c75_378 = arith.constant 75 : index
    %c0_379 = arith.constant 0 : index
    %605 = vector.load %arg3[%c0_377, %c75_378, %c0_379] : memref<1x128x128xf32, #tpu.memory_space<vmem>>, vector<1x1x128xf32>
    %606 = vector.shape_cast %605 : vector<1x1x128xf32> to vector<1x128xf32>
    %607 = vector.shape_cast %604 : vector<1x128xf32> to vector<1x1x128xf32>
    tpu.vector_store %arg3[%c0_377, %c75_378, %c0_379], %607 {strides = array<i32>} : memref<1x128x128xf32, #tpu.memory_space<vmem>>, vector<1x1x128xf32>,
    %608 = arith.index_cast %arg0 : i32 to index
    %c76 = arith.constant 76 : index
    %609 = memref.load %arg1[%608, %c76] : memref<2x128xi32, #tpu.memory_space<smem>>
    %c0_380 = arith.constant 0 : index
    %610 = arith.index_cast %609 : i32 to index
    %c0_381 = arith.constant 0 : index
    %611 = vector.load %arg2[%c0_380, %610, %c0_381] : memref<1x576x128xf32, #tpu.memory_space<vmem>>, vector<1x1x128xf32>
    %612 = vector.shape_cast %611 : vector<1x1x128xf32> to vector<1x128xf32>
    %c0_382 = arith.constant 0 : index
    %c76_383 = arith.constant 76 : index
    %c0_384 = arith.constant 0 : index
    %613 = vector.load %arg3[%c0_382, %c76_383, %c0_384] : memref<1x128x128xf32, #tpu.memory_space<vmem>>, vector<1x1x128xf32>
    %614 = vector.shape_cast %613 : vector<1x1x128xf32> to vector<1x128xf32>
    %615 = vector.shape_cast %612 : vector<1x128xf32> to vector<1x1x128xf32>
    tpu.vector_store %arg3[%c0_382, %c76_383, %c0_384], %615 {strides = array<i32>} : memref<1x128x128xf32, #tpu.memory_space<vmem>>, vector<1x1x128xf32>,
    %616 = arith.index_cast %arg0 : i32 to index
    %c77 = arith.constant 77 : index
    %617 = memref.load %arg1[%616, %c77] : memref<2x128xi32, #tpu.memory_space<smem>>
    %c0_385 = arith.constant 0 : index
    %618 = arith.index_cast %617 : i32 to index
    %c0_386 = arith.constant 0 : index
    %619 = vector.load %arg2[%c0_385, %618, %c0_386] : memref<1x576x128xf32, #tpu.memory_space<vmem>>, vector<1x1x128xf32>
    %620 = vector.shape_cast %619 : vector<1x1x128xf32> to vector<1x128xf32>
    %c0_387 = arith.constant 0 : index
    %c77_388 = arith.constant 77 : index
    %c0_389 = arith.constant 0 : index
    %621 = vector.load %arg3[%c0_387, %c77_388, %c0_389] : memref<1x128x128xf32, #tpu.memory_space<vmem>>, vector<1x1x128xf32>
    %622 = vector.shape_cast %621 : vector<1x1x128xf32> to vector<1x128xf32>
    %623 = vector.shape_cast %620 : vector<1x128xf32> to vector<1x1x128xf32>
    tpu.vector_store %arg3[%c0_387, %c77_388, %c0_389], %623 {strides = array<i32>} : memref<1x128x128xf32, #tpu.memory_space<vmem>>, vector<1x1x128xf32>,
    %624 = arith.index_cast %arg0 : i32 to index
    %c78 = arith.constant 78 : index
    %625 = memref.load %arg1[%624, %c78] : memref<2x128xi32, #tpu.memory_space<smem>>
    %c0_390 = arith.constant 0 : index
    %626 = arith.index_cast %625 : i32 to index
    %c0_391 = arith.constant 0 : index
    %627 = vector.load %arg2[%c0_390, %626, %c0_391] : memref<1x576x128xf32, #tpu.memory_space<vmem>>, vector<1x1x128xf32>
    %628 = vector.shape_cast %627 : vector<1x1x128xf32> to vector<1x128xf32>
    %c0_392 = arith.constant 0 : index
    %c78_393 = arith.constant 78 : index
    %c0_394 = arith.constant 0 : index
    %629 = vector.load %arg3[%c0_392, %c78_393, %c0_394] : memref<1x128x128xf32, #tpu.memory_space<vmem>>, vector<1x1x128xf32>
    %630 = vector.shape_cast %629 : vector<1x1x128xf32> to vector<1x128xf32>
    %631 = vector.shape_cast %628 : vector<1x128xf32> to vector<1x1x128xf32>
    tpu.vector_store %arg3[%c0_392, %c78_393, %c0_394], %631 {strides = array<i32>} : memref<1x128x128xf32, #tpu.memory_space<vmem>>, vector<1x1x128xf32>,
    %632 = arith.index_cast %arg0 : i32 to index
    %c79 = arith.constant 79 : index
    %633 = memref.load %arg1[%632, %c79] : memref<2x128xi32, #tpu.memory_space<smem>>
    %c0_395 = arith.constant 0 : index
    %634 = arith.index_cast %633 : i32 to index
    %c0_396 = arith.constant 0 : index
    %635 = vector.load %arg2[%c0_395, %634, %c0_396] : memref<1x576x128xf32, #tpu.memory_space<vmem>>, vector<1x1x128xf32>
    %636 = vector.shape_cast %635 : vector<1x1x128xf32> to vector<1x128xf32>
    %c0_397 = arith.constant 0 : index
    %c79_398 = arith.constant 79 : index
    %c0_399 = arith.constant 0 : index
    %637 = vector.load %arg3[%c0_397, %c79_398, %c0_399] : memref<1x128x128xf32, #tpu.memory_space<vmem>>, vector<1x1x128xf32>
    %638 = vector.shape_cast %637 : vector<1x1x128xf32> to vector<1x128xf32>
    %639 = vector.shape_cast %636 : vector<1x128xf32> to vector<1x1x128xf32>
    tpu.vector_store %arg3[%c0_397, %c79_398, %c0_399], %639 {strides = array<i32>} : memref<1x128x128xf32, #tpu.memory_space<vmem>>, vector<1x1x128xf32>,
    %640 = arith.index_cast %arg0 : i32 to index
    %c80 = arith.constant 80 : index
    %641 = memref.load %arg1[%640, %c80] : memref<2x128xi32, #tpu.memory_space<smem>>
    %c0_400 = arith.constant 0 : index
    %642 = arith.index_cast %641 : i32 to index
    %c0_401 = arith.constant 0 : index
    %643 = vector.load %arg2[%c0_400, %642, %c0_401] : memref<1x576x128xf32, #tpu.memory_space<vmem>>, vector<1x1x128xf32>
    %644 = vector.shape_cast %643 : vector<1x1x128xf32> to vector<1x128xf32>
    %c0_402 = arith.constant 0 : index
    %c80_403 = arith.constant 80 : index
    %c0_404 = arith.constant 0 : index
    %645 = vector.load %arg3[%c0_402, %c80_403, %c0_404] : memref<1x128x128xf32, #tpu.memory_space<vmem>>, vector<1x1x128xf32>
    %646 = vector.shape_cast %645 : vector<1x1x128xf32> to vector<1x128xf32>
    %647 = vector.shape_cast %644 : vector<1x128xf32> to vector<1x1x128xf32>
    tpu.vector_store %arg3[%c0_402, %c80_403, %c0_404], %647 {strides = array<i32>} : memref<1x128x128xf32, #tpu.memory_space<vmem>>, vector<1x1x128xf32>,
    %648 = arith.index_cast %arg0 : i32 to index
    %c81 = arith.constant 81 : index
    %649 = memref.load %arg1[%648, %c81] : memref<2x128xi32, #tpu.memory_space<smem>>
    %c0_405 = arith.constant 0 : index
    %650 = arith.index_cast %649 : i32 to index
    %c0_406 = arith.constant 0 : index
    %651 = vector.load %arg2[%c0_405, %650, %c0_406] : memref<1x576x128xf32, #tpu.memory_space<vmem>>, vector<1x1x128xf32>
    %652 = vector.shape_cast %651 : vector<1x1x128xf32> to vector<1x128xf32>
    %c0_407 = arith.constant 0 : index
    %c81_408 = arith.constant 81 : index
    %c0_409 = arith.constant 0 : index
    %653 = vector.load %arg3[%c0_407, %c81_408, %c0_409] : memref<1x128x128xf32, #tpu.memory_space<vmem>>, vector<1x1x128xf32>
    %654 = vector.shape_cast %653 : vector<1x1x128xf32> to vector<1x128xf32>
    %655 = vector.shape_cast %652 : vector<1x128xf32> to vector<1x1x128xf32>
    tpu.vector_store %arg3[%c0_407, %c81_408, %c0_409], %655 {strides = array<i32>} : memref<1x128x128xf32, #tpu.memory_space<vmem>>, vector<1x1x128xf32>,
    %656 = arith.index_cast %arg0 : i32 to index
    %c82 = arith.constant 82 : index
    %657 = memref.load %arg1[%656, %c82] : memref<2x128xi32, #tpu.memory_space<smem>>
    %c0_410 = arith.constant 0 : index
    %658 = arith.index_cast %657 : i32 to index
    %c0_411 = arith.constant 0 : index
    %659 = vector.load %arg2[%c0_410, %658, %c0_411] : memref<1x576x128xf32, #tpu.memory_space<vmem>>, vector<1x1x128xf32>
    %660 = vector.shape_cast %659 : vector<1x1x128xf32> to vector<1x128xf32>
    %c0_412 = arith.constant 0 : index
    %c82_413 = arith.constant 82 : index
    %c0_414 = arith.constant 0 : index
    %661 = vector.load %arg3[%c0_412, %c82_413, %c0_414] : memref<1x128x128xf32, #tpu.memory_space<vmem>>, vector<1x1x128xf32>
    %662 = vector.shape_cast %661 : vector<1x1x128xf32> to vector<1x128xf32>
    %663 = vector.shape_cast %660 : vector<1x128xf32> to vector<1x1x128xf32>
    tpu.vector_store %arg3[%c0_412, %c82_413, %c0_414], %663 {strides = array<i32>} : memref<1x128x128xf32, #tpu.memory_space<vmem>>, vector<1x1x128xf32>,
    %664 = arith.index_cast %arg0 : i32 to index
    %c83 = arith.constant 83 : index
    %665 = memref.load %arg1[%664, %c83] : memref<2x128xi32, #tpu.memory_space<smem>>
    %c0_415 = arith.constant 0 : index
    %666 = arith.index_cast %665 : i32 to index
    %c0_416 = arith.constant 0 : index
    %667 = vector.load %arg2[%c0_415, %666, %c0_416] : memref<1x576x128xf32, #tpu.memory_space<vmem>>, vector<1x1x128xf32>
    %668 = vector.shape_cast %667 : vector<1x1x128xf32> to vector<1x128xf32>
    %c0_417 = arith.constant 0 : index
    %c83_418 = arith.constant 83 : index
    %c0_419 = arith.constant 0 : index
    %669 = vector.load %arg3[%c0_417, %c83_418, %c0_419] : memref<1x128x128xf32, #tpu.memory_space<vmem>>, vector<1x1x128xf32>
    %670 = vector.shape_cast %669 : vector<1x1x128xf32> to vector<1x128xf32>
    %671 = vector.shape_cast %668 : vector<1x128xf32> to vector<1x1x128xf32>
    tpu.vector_store %arg3[%c0_417, %c83_418, %c0_419], %671 {strides = array<i32>} : memref<1x128x128xf32, #tpu.memory_space<vmem>>, vector<1x1x128xf32>,
    %672 = arith.index_cast %arg0 : i32 to index
    %c84 = arith.constant 84 : index
    %673 = memref.load %arg1[%672, %c84] : memref<2x128xi32, #tpu.memory_space<smem>>
    %c0_420 = arith.constant 0 : index
    %674 = arith.index_cast %673 : i32 to index
    %c0_421 = arith.constant 0 : index
    %675 = vector.load %arg2[%c0_420, %674, %c0_421] : memref<1x576x128xf32, #tpu.memory_space<vmem>>, vector<1x1x128xf32>
    %676 = vector.shape_cast %675 : vector<1x1x128xf32> to vector<1x128xf32>
    %c0_422 = arith.constant 0 : index
    %c84_423 = arith.constant 84 : index
    %c0_424 = arith.constant 0 : index
    %677 = vector.load %arg3[%c0_422, %c84_423, %c0_424] : memref<1x128x128xf32, #tpu.memory_space<vmem>>, vector<1x1x128xf32>
    %678 = vector.shape_cast %677 : vector<1x1x128xf32> to vector<1x128xf32>
    %679 = vector.shape_cast %676 : vector<1x128xf32> to vector<1x1x128xf32>
    tpu.vector_store %arg3[%c0_422, %c84_423, %c0_424], %679 {strides = array<i32>} : memref<1x128x128xf32, #tpu.memory_space<vmem>>, vector<1x1x128xf32>,
    %680 = arith.index_cast %arg0 : i32 to index
    %c85 = arith.constant 85 : index
    %681 = memref.load %arg1[%680, %c85] : memref<2x128xi32, #tpu.memory_space<smem>>
    %c0_425 = arith.constant 0 : index
    %682 = arith.index_cast %681 : i32 to index
    %c0_426 = arith.constant 0 : index
    %683 = vector.load %arg2[%c0_425, %682, %c0_426] : memref<1x576x128xf32, #tpu.memory_space<vmem>>, vector<1x1x128xf32>
    %684 = vector.shape_cast %683 : vector<1x1x128xf32> to vector<1x128xf32>
    %c0_427 = arith.constant 0 : index
    %c85_428 = arith.constant 85 : index
    %c0_429 = arith.constant 0 : index
    %685 = vector.load %arg3[%c0_427, %c85_428, %c0_429] : memref<1x128x128xf32, #tpu.memory_space<vmem>>, vector<1x1x128xf32>
    %686 = vector.shape_cast %685 : vector<1x1x128xf32> to vector<1x128xf32>
    %687 = vector.shape_cast %684 : vector<1x128xf32> to vector<1x1x128xf32>
    tpu.vector_store %arg3[%c0_427, %c85_428, %c0_429], %687 {strides = array<i32>} : memref<1x128x128xf32, #tpu.memory_space<vmem>>, vector<1x1x128xf32>,
    %688 = arith.index_cast %arg0 : i32 to index
    %c86 = arith.constant 86 : index
    %689 = memref.load %arg1[%688, %c86] : memref<2x128xi32, #tpu.memory_space<smem>>
    %c0_430 = arith.constant 0 : index
    %690 = arith.index_cast %689 : i32 to index
    %c0_431 = arith.constant 0 : index
    %691 = vector.load %arg2[%c0_430, %690, %c0_431] : memref<1x576x128xf32, #tpu.memory_space<vmem>>, vector<1x1x128xf32>
    %692 = vector.shape_cast %691 : vector<1x1x128xf32> to vector<1x128xf32>
    %c0_432 = arith.constant 0 : index
    %c86_433 = arith.constant 86 : index
    %c0_434 = arith.constant 0 : index
    %693 = vector.load %arg3[%c0_432, %c86_433, %c0_434] : memref<1x128x128xf32, #tpu.memory_space<vmem>>, vector<1x1x128xf32>
    %694 = vector.shape_cast %693 : vector<1x1x128xf32> to vector<1x128xf32>
    %695 = vector.shape_cast %692 : vector<1x128xf32> to vector<1x1x128xf32>
    tpu.vector_store %arg3[%c0_432, %c86_433, %c0_434], %695 {strides = array<i32>} : memref<1x128x128xf32, #tpu.memory_space<vmem>>, vector<1x1x128xf32>,
    %696 = arith.index_cast %arg0 : i32 to index
    %c87 = arith.constant 87 : index
    %697 = memref.load %arg1[%696, %c87] : memref<2x128xi32, #tpu.memory_space<smem>>
    %c0_435 = arith.constant 0 : index
    %698 = arith.index_cast %697 : i32 to index
    %c0_436 = arith.constant 0 : index
    %699 = vector.load %arg2[%c0_435, %698, %c0_436] : memref<1x576x128xf32, #tpu.memory_space<vmem>>, vector<1x1x128xf32>
    %700 = vector.shape_cast %699 : vector<1x1x128xf32> to vector<1x128xf32>
    %c0_437 = arith.constant 0 : index
    %c87_438 = arith.constant 87 : index
    %c0_439 = arith.constant 0 : index
    %701 = vector.load %arg3[%c0_437, %c87_438, %c0_439] : memref<1x128x128xf32, #tpu.memory_space<vmem>>, vector<1x1x128xf32>
    %702 = vector.shape_cast %701 : vector<1x1x128xf32> to vector<1x128xf32>
    %703 = vector.shape_cast %700 : vector<1x128xf32> to vector<1x1x128xf32>
    tpu.vector_store %arg3[%c0_437, %c87_438, %c0_439], %703 {strides = array<i32>} : memref<1x128x128xf32, #tpu.memory_space<vmem>>, vector<1x1x128xf32>,
    %704 = arith.index_cast %arg0 : i32 to index
    %c88 = arith.constant 88 : index
    %705 = memref.load %arg1[%704, %c88] : memref<2x128xi32, #tpu.memory_space<smem>>
    %c0_440 = arith.constant 0 : index
    %706 = arith.index_cast %705 : i32 to index
    %c0_441 = arith.constant 0 : index
    %707 = vector.load %arg2[%c0_440, %706, %c0_441] : memref<1x576x128xf32, #tpu.memory_space<vmem>>, vector<1x1x128xf32>
    %708 = vector.shape_cast %707 : vector<1x1x128xf32> to vector<1x128xf32>
    %c0_442 = arith.constant 0 : index
    %c88_443 = arith.constant 88 : index
    %c0_444 = arith.constant 0 : index
    %709 = vector.load %arg3[%c0_442, %c88_443, %c0_444] : memref<1x128x128xf32, #tpu.memory_space<vmem>>, vector<1x1x128xf32>
    %710 = vector.shape_cast %709 : vector<1x1x128xf32> to vector<1x128xf32>
    %711 = vector.shape_cast %708 : vector<1x128xf32> to vector<1x1x128xf32>
    tpu.vector_store %arg3[%c0_442, %c88_443, %c0_444], %711 {strides = array<i32>} : memref<1x128x128xf32, #tpu.memory_space<vmem>>, vector<1x1x128xf32>,
    %712 = arith.index_cast %arg0 : i32 to index
    %c89 = arith.constant 89 : index
    %713 = memref.load %arg1[%712, %c89] : memref<2x128xi32, #tpu.memory_space<smem>>
    %c0_445 = arith.constant 0 : index
    %714 = arith.index_cast %713 : i32 to index
    %c0_446 = arith.constant 0 : index
    %715 = vector.load %arg2[%c0_445, %714, %c0_446] : memref<1x576x128xf32, #tpu.memory_space<vmem>>, vector<1x1x128xf32>
    %716 = vector.shape_cast %715 : vector<1x1x128xf32> to vector<1x128xf32>
    %c0_447 = arith.constant 0 : index
    %c89_448 = arith.constant 89 : index
    %c0_449 = arith.constant 0 : index
    %717 = vector.load %arg3[%c0_447, %c89_448, %c0_449] : memref<1x128x128xf32, #tpu.memory_space<vmem>>, vector<1x1x128xf32>
    %718 = vector.shape_cast %717 : vector<1x1x128xf32> to vector<1x128xf32>
    %719 = vector.shape_cast %716 : vector<1x128xf32> to vector<1x1x128xf32>
    tpu.vector_store %arg3[%c0_447, %c89_448, %c0_449], %719 {strides = array<i32>} : memref<1x128x128xf32, #tpu.memory_space<vmem>>, vector<1x1x128xf32>,
    %720 = arith.index_cast %arg0 : i32 to index
    %c90 = arith.constant 90 : index
    %721 = memref.load %arg1[%720, %c90] : memref<2x128xi32, #tpu.memory_space<smem>>
    %c0_450 = arith.constant 0 : index
    %722 = arith.index_cast %721 : i32 to index
    %c0_451 = arith.constant 0 : index
    %723 = vector.load %arg2[%c0_450, %722, %c0_451] : memref<1x576x128xf32, #tpu.memory_space<vmem>>, vector<1x1x128xf32>
    %724 = vector.shape_cast %723 : vector<1x1x128xf32> to vector<1x128xf32>
    %c0_452 = arith.constant 0 : index
    %c90_453 = arith.constant 90 : index
    %c0_454 = arith.constant 0 : index
    %725 = vector.load %arg3[%c0_452, %c90_453, %c0_454] : memref<1x128x128xf32, #tpu.memory_space<vmem>>, vector<1x1x128xf32>
    %726 = vector.shape_cast %725 : vector<1x1x128xf32> to vector<1x128xf32>
    %727 = vector.shape_cast %724 : vector<1x128xf32> to vector<1x1x128xf32>
    tpu.vector_store %arg3[%c0_452, %c90_453, %c0_454], %727 {strides = array<i32>} : memref<1x128x128xf32, #tpu.memory_space<vmem>>, vector<1x1x128xf32>,
    %728 = arith.index_cast %arg0 : i32 to index
    %c91 = arith.constant 91 : index
    %729 = memref.load %arg1[%728, %c91] : memref<2x128xi32, #tpu.memory_space<smem>>
    %c0_455 = arith.constant 0 : index
    %730 = arith.index_cast %729 : i32 to index
    %c0_456 = arith.constant 0 : index
    %731 = vector.load %arg2[%c0_455, %730, %c0_456] : memref<1x576x128xf32, #tpu.memory_space<vmem>>, vector<1x1x128xf32>
    %732 = vector.shape_cast %731 : vector<1x1x128xf32> to vector<1x128xf32>
    %c0_457 = arith.constant 0 : index
    %c91_458 = arith.constant 91 : index
    %c0_459 = arith.constant 0 : index
    %733 = vector.load %arg3[%c0_457, %c91_458, %c0_459] : memref<1x128x128xf32, #tpu.memory_space<vmem>>, vector<1x1x128xf32>
    %734 = vector.shape_cast %733 : vector<1x1x128xf32> to vector<1x128xf32>
    %735 = vector.shape_cast %732 : vector<1x128xf32> to vector<1x1x128xf32>
    tpu.vector_store %arg3[%c0_457, %c91_458, %c0_459], %735 {strides = array<i32>} : memref<1x128x128xf32, #tpu.memory_space<vmem>>, vector<1x1x128xf32>,
    %736 = arith.index_cast %arg0 : i32 to index
    %c92 = arith.constant 92 : index
    %737 = memref.load %arg1[%736, %c92] : memref<2x128xi32, #tpu.memory_space<smem>>
    %c0_460 = arith.constant 0 : index
    %738 = arith.index_cast %737 : i32 to index
    %c0_461 = arith.constant 0 : index
    %739 = vector.load %arg2[%c0_460, %738, %c0_461] : memref<1x576x128xf32, #tpu.memory_space<vmem>>, vector<1x1x128xf32>
    %740 = vector.shape_cast %739 : vector<1x1x128xf32> to vector<1x128xf32>
    %c0_462 = arith.constant 0 : index
    %c92_463 = arith.constant 92 : index
    %c0_464 = arith.constant 0 : index
    %741 = vector.load %arg3[%c0_462, %c92_463, %c0_464] : memref<1x128x128xf32, #tpu.memory_space<vmem>>, vector<1x1x128xf32>
    %742 = vector.shape_cast %741 : vector<1x1x128xf32> to vector<1x128xf32>
    %743 = vector.shape_cast %740 : vector<1x128xf32> to vector<1x1x128xf32>
    tpu.vector_store %arg3[%c0_462, %c92_463, %c0_464], %743 {strides = array<i32>} : memref<1x128x128xf32, #tpu.memory_space<vmem>>, vector<1x1x128xf32>,
    %744 = arith.index_cast %arg0 : i32 to index
    %c93 = arith.constant 93 : index
    %745 = memref.load %arg1[%744, %c93] : memref<2x128xi32, #tpu.memory_space<smem>>
    %c0_465 = arith.constant 0 : index
    %746 = arith.index_cast %745 : i32 to index
    %c0_466 = arith.constant 0 : index
    %747 = vector.load %arg2[%c0_465, %746, %c0_466] : memref<1x576x128xf32, #tpu.memory_space<vmem>>, vector<1x1x128xf32>
    %748 = vector.shape_cast %747 : vector<1x1x128xf32> to vector<1x128xf32>
    %c0_467 = arith.constant 0 : index
    %c93_468 = arith.constant 93 : index
    %c0_469 = arith.constant 0 : index
    %749 = vector.load %arg3[%c0_467, %c93_468, %c0_469] : memref<1x128x128xf32, #tpu.memory_space<vmem>>, vector<1x1x128xf32>
    %750 = vector.shape_cast %749 : vector<1x1x128xf32> to vector<1x128xf32>
    %751 = vector.shape_cast %748 : vector<1x128xf32> to vector<1x1x128xf32>
    tpu.vector_store %arg3[%c0_467, %c93_468, %c0_469], %751 {strides = array<i32>} : memref<1x128x128xf32, #tpu.memory_space<vmem>>, vector<1x1x128xf32>,
    %752 = arith.index_cast %arg0 : i32 to index
    %c94 = arith.constant 94 : index
    %753 = memref.load %arg1[%752, %c94] : memref<2x128xi32, #tpu.memory_space<smem>>
    %c0_470 = arith.constant 0 : index
    %754 = arith.index_cast %753 : i32 to index
    %c0_471 = arith.constant 0 : index
    %755 = vector.load %arg2[%c0_470, %754, %c0_471] : memref<1x576x128xf32, #tpu.memory_space<vmem>>, vector<1x1x128xf32>
    %756 = vector.shape_cast %755 : vector<1x1x128xf32> to vector<1x128xf32>
    %c0_472 = arith.constant 0 : index
    %c94_473 = arith.constant 94 : index
    %c0_474 = arith.constant 0 : index
    %757 = vector.load %arg3[%c0_472, %c94_473, %c0_474] : memref<1x128x128xf32, #tpu.memory_space<vmem>>, vector<1x1x128xf32>
    %758 = vector.shape_cast %757 : vector<1x1x128xf32> to vector<1x128xf32>
    %759 = vector.shape_cast %756 : vector<1x128xf32> to vector<1x1x128xf32>
    tpu.vector_store %arg3[%c0_472, %c94_473, %c0_474], %759 {strides = array<i32>} : memref<1x128x128xf32, #tpu.memory_space<vmem>>, vector<1x1x128xf32>,
    %760 = arith.index_cast %arg0 : i32 to index
    %c95 = arith.constant 95 : index
    %761 = memref.load %arg1[%760, %c95] : memref<2x128xi32, #tpu.memory_space<smem>>
    %c0_475 = arith.constant 0 : index
    %762 = arith.index_cast %761 : i32 to index
    %c0_476 = arith.constant 0 : index
    %763 = vector.load %arg2[%c0_475, %762, %c0_476] : memref<1x576x128xf32, #tpu.memory_space<vmem>>, vector<1x1x128xf32>
    %764 = vector.shape_cast %763 : vector<1x1x128xf32> to vector<1x128xf32>
    %c0_477 = arith.constant 0 : index
    %c95_478 = arith.constant 95 : index
    %c0_479 = arith.constant 0 : index
    %765 = vector.load %arg3[%c0_477, %c95_478, %c0_479] : memref<1x128x128xf32, #tpu.memory_space<vmem>>, vector<1x1x128xf32>
    %766 = vector.shape_cast %765 : vector<1x1x128xf32> to vector<1x128xf32>
    %767 = vector.shape_cast %764 : vector<1x128xf32> to vector<1x1x128xf32>
    tpu.vector_store %arg3[%c0_477, %c95_478, %c0_479], %767 {strides = array<i32>} : memref<1x128x128xf32, #tpu.memory_space<vmem>>, vector<1x1x128xf32>,
    %768 = arith.index_cast %arg0 : i32 to index
    %c96 = arith.constant 96 : index
    %769 = memref.load %arg1[%768, %c96] : memref<2x128xi32, #tpu.memory_space<smem>>
    %c0_480 = arith.constant 0 : index
    %770 = arith.index_cast %769 : i32 to index
    %c0_481 = arith.constant 0 : index
    %771 = vector.load %arg2[%c0_480, %770, %c0_481] : memref<1x576x128xf32, #tpu.memory_space<vmem>>, vector<1x1x128xf32>
    %772 = vector.shape_cast %771 : vector<1x1x128xf32> to vector<1x128xf32>
    %c0_482 = arith.constant 0 : index
    %c96_483 = arith.constant 96 : index
    %c0_484 = arith.constant 0 : index
    %773 = vector.load %arg3[%c0_482, %c96_483, %c0_484] : memref<1x128x128xf32, #tpu.memory_space<vmem>>, vector<1x1x128xf32>
    %774 = vector.shape_cast %773 : vector<1x1x128xf32> to vector<1x128xf32>
    %775 = vector.shape_cast %772 : vector<1x128xf32> to vector<1x1x128xf32>
    tpu.vector_store %arg3[%c0_482, %c96_483, %c0_484], %775 {strides = array<i32>} : memref<1x128x128xf32, #tpu.memory_space<vmem>>, vector<1x1x128xf32>,
    %776 = arith.index_cast %arg0 : i32 to index
    %c97 = arith.constant 97 : index
    %777 = memref.load %arg1[%776, %c97] : memref<2x128xi32, #tpu.memory_space<smem>>
    %c0_485 = arith.constant 0 : index
    %778 = arith.index_cast %777 : i32 to index
    %c0_486 = arith.constant 0 : index
    %779 = vector.load %arg2[%c0_485, %778, %c0_486] : memref<1x576x128xf32, #tpu.memory_space<vmem>>, vector<1x1x128xf32>
    %780 = vector.shape_cast %779 : vector<1x1x128xf32> to vector<1x128xf32>
    %c0_487 = arith.constant 0 : index
    %c97_488 = arith.constant 97 : index
    %c0_489 = arith.constant 0 : index
    %781 = vector.load %arg3[%c0_487, %c97_488, %c0_489] : memref<1x128x128xf32, #tpu.memory_space<vmem>>, vector<1x1x128xf32>
    %782 = vector.shape_cast %781 : vector<1x1x128xf32> to vector<1x128xf32>
    %783 = vector.shape_cast %780 : vector<1x128xf32> to vector<1x1x128xf32>
    tpu.vector_store %arg3[%c0_487, %c97_488, %c0_489], %783 {strides = array<i32>} : memref<1x128x128xf32, #tpu.memory_space<vmem>>, vector<1x1x128xf32>,
    %784 = arith.index_cast %arg0 : i32 to index
    %c98 = arith.constant 98 : index
    %785 = memref.load %arg1[%784, %c98] : memref<2x128xi32, #tpu.memory_space<smem>>
    %c0_490 = arith.constant 0 : index
    %786 = arith.index_cast %785 : i32 to index
    %c0_491 = arith.constant 0 : index
    %787 = vector.load %arg2[%c0_490, %786, %c0_491] : memref<1x576x128xf32, #tpu.memory_space<vmem>>, vector<1x1x128xf32>
    %788 = vector.shape_cast %787 : vector<1x1x128xf32> to vector<1x128xf32>
    %c0_492 = arith.constant 0 : index
    %c98_493 = arith.constant 98 : index
    %c0_494 = arith.constant 0 : index
    %789 = vector.load %arg3[%c0_492, %c98_493, %c0_494] : memref<1x128x128xf32, #tpu.memory_space<vmem>>, vector<1x1x128xf32>
    %790 = vector.shape_cast %789 : vector<1x1x128xf32> to vector<1x128xf32>
    %791 = vector.shape_cast %788 : vector<1x128xf32> to vector<1x1x128xf32>
    tpu.vector_store %arg3[%c0_492, %c98_493, %c0_494], %791 {strides = array<i32>} : memref<1x128x128xf32, #tpu.memory_space<vmem>>, vector<1x1x128xf32>,
    %792 = arith.index_cast %arg0 : i32 to index
    %c99 = arith.constant 99 : index
    %793 = memref.load %arg1[%792, %c99] : memref<2x128xi32, #tpu.memory_space<smem>>
    %c0_495 = arith.constant 0 : index
    %794 = arith.index_cast %793 : i32 to index
    %c0_496 = arith.constant 0 : index
    %795 = vector.load %arg2[%c0_495, %794, %c0_496] : memref<1x576x128xf32, #tpu.memory_space<vmem>>, vector<1x1x128xf32>
    %796 = vector.shape_cast %795 : vector<1x1x128xf32> to vector<1x128xf32>
    %c0_497 = arith.constant 0 : index
    %c99_498 = arith.constant 99 : index
    %c0_499 = arith.constant 0 : index
    %797 = vector.load %arg3[%c0_497, %c99_498, %c0_499] : memref<1x128x128xf32, #tpu.memory_space<vmem>>, vector<1x1x128xf32>
    %798 = vector.shape_cast %797 : vector<1x1x128xf32> to vector<1x128xf32>
    %799 = vector.shape_cast %796 : vector<1x128xf32> to vector<1x1x128xf32>
    tpu.vector_store %arg3[%c0_497, %c99_498, %c0_499], %799 {strides = array<i32>} : memref<1x128x128xf32, #tpu.memory_space<vmem>>, vector<1x1x128xf32>,
    %800 = arith.index_cast %arg0 : i32 to index
    %c100 = arith.constant 100 : index
    %801 = memref.load %arg1[%800, %c100] : memref<2x128xi32, #tpu.memory_space<smem>>
    %c0_500 = arith.constant 0 : index
    %802 = arith.index_cast %801 : i32 to index
    %c0_501 = arith.constant 0 : index
    %803 = vector.load %arg2[%c0_500, %802, %c0_501] : memref<1x576x128xf32, #tpu.memory_space<vmem>>, vector<1x1x128xf32>
    %804 = vector.shape_cast %803 : vector<1x1x128xf32> to vector<1x128xf32>
    %c0_502 = arith.constant 0 : index
    %c100_503 = arith.constant 100 : index
    %c0_504 = arith.constant 0 : index
    %805 = vector.load %arg3[%c0_502, %c100_503, %c0_504] : memref<1x128x128xf32, #tpu.memory_space<vmem>>, vector<1x1x128xf32>
    %806 = vector.shape_cast %805 : vector<1x1x128xf32> to vector<1x128xf32>
    %807 = vector.shape_cast %804 : vector<1x128xf32> to vector<1x1x128xf32>
    tpu.vector_store %arg3[%c0_502, %c100_503, %c0_504], %807 {strides = array<i32>} : memref<1x128x128xf32, #tpu.memory_space<vmem>>, vector<1x1x128xf32>,
    %808 = arith.index_cast %arg0 : i32 to index
    %c101 = arith.constant 101 : index
    %809 = memref.load %arg1[%808, %c101] : memref<2x128xi32, #tpu.memory_space<smem>>
    %c0_505 = arith.constant 0 : index
    %810 = arith.index_cast %809 : i32 to index
    %c0_506 = arith.constant 0 : index
    %811 = vector.load %arg2[%c0_505, %810, %c0_506] : memref<1x576x128xf32, #tpu.memory_space<vmem>>, vector<1x1x128xf32>
    %812 = vector.shape_cast %811 : vector<1x1x128xf32> to vector<1x128xf32>
    %c0_507 = arith.constant 0 : index
    %c101_508 = arith.constant 101 : index
    %c0_509 = arith.constant 0 : index
    %813 = vector.load %arg3[%c0_507, %c101_508, %c0_509] : memref<1x128x128xf32, #tpu.memory_space<vmem>>, vector<1x1x128xf32>
    %814 = vector.shape_cast %813 : vector<1x1x128xf32> to vector<1x128xf32>
    %815 = vector.shape_cast %812 : vector<1x128xf32> to vector<1x1x128xf32>
    tpu.vector_store %arg3[%c0_507, %c101_508, %c0_509], %815 {strides = array<i32>} : memref<1x128x128xf32, #tpu.memory_space<vmem>>, vector<1x1x128xf32>,
    %816 = arith.index_cast %arg0 : i32 to index
    %c102 = arith.constant 102 : index
    %817 = memref.load %arg1[%816, %c102] : memref<2x128xi32, #tpu.memory_space<smem>>
    %c0_510 = arith.constant 0 : index
    %818 = arith.index_cast %817 : i32 to index
    %c0_511 = arith.constant 0 : index
    %819 = vector.load %arg2[%c0_510, %818, %c0_511] : memref<1x576x128xf32, #tpu.memory_space<vmem>>, vector<1x1x128xf32>
    %820 = vector.shape_cast %819 : vector<1x1x128xf32> to vector<1x128xf32>
    %c0_512 = arith.constant 0 : index
    %c102_513 = arith.constant 102 : index
    %c0_514 = arith.constant 0 : index
    %821 = vector.load %arg3[%c0_512, %c102_513, %c0_514] : memref<1x128x128xf32, #tpu.memory_space<vmem>>, vector<1x1x128xf32>
    %822 = vector.shape_cast %821 : vector<1x1x128xf32> to vector<1x128xf32>
    %823 = vector.shape_cast %820 : vector<1x128xf32> to vector<1x1x128xf32>
    tpu.vector_store %arg3[%c0_512, %c102_513, %c0_514], %823 {strides = array<i32>} : memref<1x128x128xf32, #tpu.memory_space<vmem>>, vector<1x1x128xf32>,
    %824 = arith.index_cast %arg0 : i32 to index
    %c103 = arith.constant 103 : index
    %825 = memref.load %arg1[%824, %c103] : memref<2x128xi32, #tpu.memory_space<smem>>
    %c0_515 = arith.constant 0 : index
    %826 = arith.index_cast %825 : i32 to index
    %c0_516 = arith.constant 0 : index
    %827 = vector.load %arg2[%c0_515, %826, %c0_516] : memref<1x576x128xf32, #tpu.memory_space<vmem>>, vector<1x1x128xf32>
    %828 = vector.shape_cast %827 : vector<1x1x128xf32> to vector<1x128xf32>
    %c0_517 = arith.constant 0 : index
    %c103_518 = arith.constant 103 : index
    %c0_519 = arith.constant 0 : index
    %829 = vector.load %arg3[%c0_517, %c103_518, %c0_519] : memref<1x128x128xf32, #tpu.memory_space<vmem>>, vector<1x1x128xf32>
    %830 = vector.shape_cast %829 : vector<1x1x128xf32> to vector<1x128xf32>
    %831 = vector.shape_cast %828 : vector<1x128xf32> to vector<1x1x128xf32>
    tpu.vector_store %arg3[%c0_517, %c103_518, %c0_519], %831 {strides = array<i32>} : memref<1x128x128xf32, #tpu.memory_space<vmem>>, vector<1x1x128xf32>,
    %832 = arith.index_cast %arg0 : i32 to index
    %c104 = arith.constant 104 : index
    %833 = memref.load %arg1[%832, %c104] : memref<2x128xi32, #tpu.memory_space<smem>>
    %c0_520 = arith.constant 0 : index
    %834 = arith.index_cast %833 : i32 to index
    %c0_521 = arith.constant 0 : index
    %835 = vector.load %arg2[%c0_520, %834, %c0_521] : memref<1x576x128xf32, #tpu.memory_space<vmem>>, vector<1x1x128xf32>
    %836 = vector.shape_cast %835 : vector<1x1x128xf32> to vector<1x128xf32>
    %c0_522 = arith.constant 0 : index
    %c104_523 = arith.constant 104 : index
    %c0_524 = arith.constant 0 : index
    %837 = vector.load %arg3[%c0_522, %c104_523, %c0_524] : memref<1x128x128xf32, #tpu.memory_space<vmem>>, vector<1x1x128xf32>
    %838 = vector.shape_cast %837 : vector<1x1x128xf32> to vector<1x128xf32>
    %839 = vector.shape_cast %836 : vector<1x128xf32> to vector<1x1x128xf32>
    tpu.vector_store %arg3[%c0_522, %c104_523, %c0_524], %839 {strides = array<i32>} : memref<1x128x128xf32, #tpu.memory_space<vmem>>, vector<1x1x128xf32>,
    %840 = arith.index_cast %arg0 : i32 to index
    %c105 = arith.constant 105 : index
    %841 = memref.load %arg1[%840, %c105] : memref<2x128xi32, #tpu.memory_space<smem>>
    %c0_525 = arith.constant 0 : index
    %842 = arith.index_cast %841 : i32 to index
    %c0_526 = arith.constant 0 : index
    %843 = vector.load %arg2[%c0_525, %842, %c0_526] : memref<1x576x128xf32, #tpu.memory_space<vmem>>, vector<1x1x128xf32>
    %844 = vector.shape_cast %843 : vector<1x1x128xf32> to vector<1x128xf32>
    %c0_527 = arith.constant 0 : index
    %c105_528 = arith.constant 105 : index
    %c0_529 = arith.constant 0 : index
    %845 = vector.load %arg3[%c0_527, %c105_528, %c0_529] : memref<1x128x128xf32, #tpu.memory_space<vmem>>, vector<1x1x128xf32>
    %846 = vector.shape_cast %845 : vector<1x1x128xf32> to vector<1x128xf32>
    %847 = vector.shape_cast %844 : vector<1x128xf32> to vector<1x1x128xf32>
    tpu.vector_store %arg3[%c0_527, %c105_528, %c0_529], %847 {strides = array<i32>} : memref<1x128x128xf32, #tpu.memory_space<vmem>>, vector<1x1x128xf32>,
    %848 = arith.index_cast %arg0 : i32 to index
    %c106 = arith.constant 106 : index
    %849 = memref.load %arg1[%848, %c106] : memref<2x128xi32, #tpu.memory_space<smem>>
    %c0_530 = arith.constant 0 : index
    %850 = arith.index_cast %849 : i32 to index
    %c0_531 = arith.constant 0 : index
    %851 = vector.load %arg2[%c0_530, %850, %c0_531] : memref<1x576x128xf32, #tpu.memory_space<vmem>>, vector<1x1x128xf32>
    %852 = vector.shape_cast %851 : vector<1x1x128xf32> to vector<1x128xf32>
    %c0_532 = arith.constant 0 : index
    %c106_533 = arith.constant 106 : index
    %c0_534 = arith.constant 0 : index
    %853 = vector.load %arg3[%c0_532, %c106_533, %c0_534] : memref<1x128x128xf32, #tpu.memory_space<vmem>>, vector<1x1x128xf32>
    %854 = vector.shape_cast %853 : vector<1x1x128xf32> to vector<1x128xf32>
    %855 = vector.shape_cast %852 : vector<1x128xf32> to vector<1x1x128xf32>
    tpu.vector_store %arg3[%c0_532, %c106_533, %c0_534], %855 {strides = array<i32>} : memref<1x128x128xf32, #tpu.memory_space<vmem>>, vector<1x1x128xf32>,
    %856 = arith.index_cast %arg0 : i32 to index
    %c107 = arith.constant 107 : index
    %857 = memref.load %arg1[%856, %c107] : memref<2x128xi32, #tpu.memory_space<smem>>
    %c0_535 = arith.constant 0 : index
    %858 = arith.index_cast %857 : i32 to index
    %c0_536 = arith.constant 0 : index
    %859 = vector.load %arg2[%c0_535, %858, %c0_536] : memref<1x576x128xf32, #tpu.memory_space<vmem>>, vector<1x1x128xf32>
    %860 = vector.shape_cast %859 : vector<1x1x128xf32> to vector<1x128xf32>
    %c0_537 = arith.constant 0 : index
    %c107_538 = arith.constant 107 : index
    %c0_539 = arith.constant 0 : index
    %861 = vector.load %arg3[%c0_537, %c107_538, %c0_539] : memref<1x128x128xf32, #tpu.memory_space<vmem>>, vector<1x1x128xf32>
    %862 = vector.shape_cast %861 : vector<1x1x128xf32> to vector<1x128xf32>
    %863 = vector.shape_cast %860 : vector<1x128xf32> to vector<1x1x128xf32>
    tpu.vector_store %arg3[%c0_537, %c107_538, %c0_539], %863 {strides = array<i32>} : memref<1x128x128xf32, #tpu.memory_space<vmem>>, vector<1x1x128xf32>,
    %864 = arith.index_cast %arg0 : i32 to index
    %c108 = arith.constant 108 : index
    %865 = memref.load %arg1[%864, %c108] : memref<2x128xi32, #tpu.memory_space<smem>>
    %c0_540 = arith.constant 0 : index
    %866 = arith.index_cast %865 : i32 to index
    %c0_541 = arith.constant 0 : index
    %867 = vector.load %arg2[%c0_540, %866, %c0_541] : memref<1x576x128xf32, #tpu.memory_space<vmem>>, vector<1x1x128xf32>
    %868 = vector.shape_cast %867 : vector<1x1x128xf32> to vector<1x128xf32>
    %c0_542 = arith.constant 0 : index
    %c108_543 = arith.constant 108 : index
    %c0_544 = arith.constant 0 : index
    %869 = vector.load %arg3[%c0_542, %c108_543, %c0_544] : memref<1x128x128xf32, #tpu.memory_space<vmem>>, vector<1x1x128xf32>
    %870 = vector.shape_cast %869 : vector<1x1x128xf32> to vector<1x128xf32>
    %871 = vector.shape_cast %868 : vector<1x128xf32> to vector<1x1x128xf32>
    tpu.vector_store %arg3[%c0_542, %c108_543, %c0_544], %871 {strides = array<i32>} : memref<1x128x128xf32, #tpu.memory_space<vmem>>, vector<1x1x128xf32>,
    %872 = arith.index_cast %arg0 : i32 to index
    %c109 = arith.constant 109 : index
    %873 = memref.load %arg1[%872, %c109] : memref<2x128xi32, #tpu.memory_space<smem>>
    %c0_545 = arith.constant 0 : index
    %874 = arith.index_cast %873 : i32 to index
    %c0_546 = arith.constant 0 : index
    %875 = vector.load %arg2[%c0_545, %874, %c0_546] : memref<1x576x128xf32, #tpu.memory_space<vmem>>, vector<1x1x128xf32>
    %876 = vector.shape_cast %875 : vector<1x1x128xf32> to vector<1x128xf32>
    %c0_547 = arith.constant 0 : index
    %c109_548 = arith.constant 109 : index
    %c0_549 = arith.constant 0 : index
    %877 = vector.load %arg3[%c0_547, %c109_548, %c0_549] : memref<1x128x128xf32, #tpu.memory_space<vmem>>, vector<1x1x128xf32>
    %878 = vector.shape_cast %877 : vector<1x1x128xf32> to vector<1x128xf32>
    %879 = vector.shape_cast %876 : vector<1x128xf32> to vector<1x1x128xf32>
    tpu.vector_store %arg3[%c0_547, %c109_548, %c0_549], %879 {strides = array<i32>} : memref<1x128x128xf32, #tpu.memory_space<vmem>>, vector<1x1x128xf32>,
    %880 = arith.index_cast %arg0 : i32 to index
    %c110 = arith.constant 110 : index
    %881 = memref.load %arg1[%880, %c110] : memref<2x128xi32, #tpu.memory_space<smem>>
    %c0_550 = arith.constant 0 : index
    %882 = arith.index_cast %881 : i32 to index
    %c0_551 = arith.constant 0 : index
    %883 = vector.load %arg2[%c0_550, %882, %c0_551] : memref<1x576x128xf32, #tpu.memory_space<vmem>>, vector<1x1x128xf32>
    %884 = vector.shape_cast %883 : vector<1x1x128xf32> to vector<1x128xf32>
    %c0_552 = arith.constant 0 : index
    %c110_553 = arith.constant 110 : index
    %c0_554 = arith.constant 0 : index
    %885 = vector.load %arg3[%c0_552, %c110_553, %c0_554] : memref<1x128x128xf32, #tpu.memory_space<vmem>>, vector<1x1x128xf32>
    %886 = vector.shape_cast %885 : vector<1x1x128xf32> to vector<1x128xf32>
    %887 = vector.shape_cast %884 : vector<1x128xf32> to vector<1x1x128xf32>
    tpu.vector_store %arg3[%c0_552, %c110_553, %c0_554], %887 {strides = array<i32>} : memref<1x128x128xf32, #tpu.memory_space<vmem>>, vector<1x1x128xf32>,
    %888 = arith.index_cast %arg0 : i32 to index
    %c111 = arith.constant 111 : index
    %889 = memref.load %arg1[%888, %c111] : memref<2x128xi32, #tpu.memory_space<smem>>
    %c0_555 = arith.constant 0 : index
    %890 = arith.index_cast %889 : i32 to index
    %c0_556 = arith.constant 0 : index
    %891 = vector.load %arg2[%c0_555, %890, %c0_556] : memref<1x576x128xf32, #tpu.memory_space<vmem>>, vector<1x1x128xf32>
    %892 = vector.shape_cast %891 : vector<1x1x128xf32> to vector<1x128xf32>
    %c0_557 = arith.constant 0 : index
    %c111_558 = arith.constant 111 : index
    %c0_559 = arith.constant 0 : index
    %893 = vector.load %arg3[%c0_557, %c111_558, %c0_559] : memref<1x128x128xf32, #tpu.memory_space<vmem>>, vector<1x1x128xf32>
    %894 = vector.shape_cast %893 : vector<1x1x128xf32> to vector<1x128xf32>
    %895 = vector.shape_cast %892 : vector<1x128xf32> to vector<1x1x128xf32>
    tpu.vector_store %arg3[%c0_557, %c111_558, %c0_559], %895 {strides = array<i32>} : memref<1x128x128xf32, #tpu.memory_space<vmem>>, vector<1x1x128xf32>,
    %896 = arith.index_cast %arg0 : i32 to index
    %c112 = arith.constant 112 : index
    %897 = memref.load %arg1[%896, %c112] : memref<2x128xi32, #tpu.memory_space<smem>>
    %c0_560 = arith.constant 0 : index
    %898 = arith.index_cast %897 : i32 to index
    %c0_561 = arith.constant 0 : index
    %899 = vector.load %arg2[%c0_560, %898, %c0_561] : memref<1x576x128xf32, #tpu.memory_space<vmem>>, vector<1x1x128xf32>
    %900 = vector.shape_cast %899 : vector<1x1x128xf32> to vector<1x128xf32>
    %c0_562 = arith.constant 0 : index
    %c112_563 = arith.constant 112 : index
    %c0_564 = arith.constant 0 : index
    %901 = vector.load %arg3[%c0_562, %c112_563, %c0_564] : memref<1x128x128xf32, #tpu.memory_space<vmem>>, vector<1x1x128xf32>
    %902 = vector.shape_cast %901 : vector<1x1x128xf32> to vector<1x128xf32>
    %903 = vector.shape_cast %900 : vector<1x128xf32> to vector<1x1x128xf32>
    tpu.vector_store %arg3[%c0_562, %c112_563, %c0_564], %903 {strides = array<i32>} : memref<1x128x128xf32, #tpu.memory_space<vmem>>, vector<1x1x128xf32>,
    %904 = arith.index_cast %arg0 : i32 to index
    %c113 = arith.constant 113 : index
    %905 = memref.load %arg1[%904, %c113] : memref<2x128xi32, #tpu.memory_space<smem>>
    %c0_565 = arith.constant 0 : index
    %906 = arith.index_cast %905 : i32 to index
    %c0_566 = arith.constant 0 : index
    %907 = vector.load %arg2[%c0_565, %906, %c0_566] : memref<1x576x128xf32, #tpu.memory_space<vmem>>, vector<1x1x128xf32>
    %908 = vector.shape_cast %907 : vector<1x1x128xf32> to vector<1x128xf32>
    %c0_567 = arith.constant 0 : index
    %c113_568 = arith.constant 113 : index
    %c0_569 = arith.constant 0 : index
    %909 = vector.load %arg3[%c0_567, %c113_568, %c0_569] : memref<1x128x128xf32, #tpu.memory_space<vmem>>, vector<1x1x128xf32>
    %910 = vector.shape_cast %909 : vector<1x1x128xf32> to vector<1x128xf32>
    %911 = vector.shape_cast %908 : vector<1x128xf32> to vector<1x1x128xf32>
    tpu.vector_store %arg3[%c0_567, %c113_568, %c0_569], %911 {strides = array<i32>} : memref<1x128x128xf32, #tpu.memory_space<vmem>>, vector<1x1x128xf32>,
    %912 = arith.index_cast %arg0 : i32 to index
    %c114 = arith.constant 114 : index
    %913 = memref.load %arg1[%912, %c114] : memref<2x128xi32, #tpu.memory_space<smem>>
    %c0_570 = arith.constant 0 : index
    %914 = arith.index_cast %913 : i32 to index
    %c0_571 = arith.constant 0 : index
    %915 = vector.load %arg2[%c0_570, %914, %c0_571] : memref<1x576x128xf32, #tpu.memory_space<vmem>>, vector<1x1x128xf32>
    %916 = vector.shape_cast %915 : vector<1x1x128xf32> to vector<1x128xf32>
    %c0_572 = arith.constant 0 : index
    %c114_573 = arith.constant 114 : index
    %c0_574 = arith.constant 0 : index
    %917 = vector.load %arg3[%c0_572, %c114_573, %c0_574] : memref<1x128x128xf32, #tpu.memory_space<vmem>>, vector<1x1x128xf32>
    %918 = vector.shape_cast %917 : vector<1x1x128xf32> to vector<1x128xf32>
    %919 = vector.shape_cast %916 : vector<1x128xf32> to vector<1x1x128xf32>
    tpu.vector_store %arg3[%c0_572, %c114_573, %c0_574], %919 {strides = array<i32>} : memref<1x128x128xf32, #tpu.memory_space<vmem>>, vector<1x1x128xf32>,
    %920 = arith.index_cast %arg0 : i32 to index
    %c115 = arith.constant 115 : index
    %921 = memref.load %arg1[%920, %c115] : memref<2x128xi32, #tpu.memory_space<smem>>
    %c0_575 = arith.constant 0 : index
    %922 = arith.index_cast %921 : i32 to index
    %c0_576 = arith.constant 0 : index
    %923 = vector.load %arg2[%c0_575, %922, %c0_576] : memref<1x576x128xf32, #tpu.memory_space<vmem>>, vector<1x1x128xf32>
    %924 = vector.shape_cast %923 : vector<1x1x128xf32> to vector<1x128xf32>
    %c0_577 = arith.constant 0 : index
    %c115_578 = arith.constant 115 : index
    %c0_579 = arith.constant 0 : index
    %925 = vector.load %arg3[%c0_577, %c115_578, %c0_579] : memref<1x128x128xf32, #tpu.memory_space<vmem>>, vector<1x1x128xf32>
    %926 = vector.shape_cast %925 : vector<1x1x128xf32> to vector<1x128xf32>
    %927 = vector.shape_cast %924 : vector<1x128xf32> to vector<1x1x128xf32>
    tpu.vector_store %arg3[%c0_577, %c115_578, %c0_579], %927 {strides = array<i32>} : memref<1x128x128xf32, #tpu.memory_space<vmem>>, vector<1x1x128xf32>,
    %928 = arith.index_cast %arg0 : i32 to index
    %c116 = arith.constant 116 : index
    %929 = memref.load %arg1[%928, %c116] : memref<2x128xi32, #tpu.memory_space<smem>>
    %c0_580 = arith.constant 0 : index
    %930 = arith.index_cast %929 : i32 to index
    %c0_581 = arith.constant 0 : index
    %931 = vector.load %arg2[%c0_580, %930, %c0_581] : memref<1x576x128xf32, #tpu.memory_space<vmem>>, vector<1x1x128xf32>
    %932 = vector.shape_cast %931 : vector<1x1x128xf32> to vector<1x128xf32>
    %c0_582 = arith.constant 0 : index
    %c116_583 = arith.constant 116 : index
    %c0_584 = arith.constant 0 : index
    %933 = vector.load %arg3[%c0_582, %c116_583, %c0_584] : memref<1x128x128xf32, #tpu.memory_space<vmem>>, vector<1x1x128xf32>
    %934 = vector.shape_cast %933 : vector<1x1x128xf32> to vector<1x128xf32>
    %935 = vector.shape_cast %932 : vector<1x128xf32> to vector<1x1x128xf32>
    tpu.vector_store %arg3[%c0_582, %c116_583, %c0_584], %935 {strides = array<i32>} : memref<1x128x128xf32, #tpu.memory_space<vmem>>, vector<1x1x128xf32>,
    %936 = arith.index_cast %arg0 : i32 to index
    %c117 = arith.constant 117 : index
    %937 = memref.load %arg1[%936, %c117] : memref<2x128xi32, #tpu.memory_space<smem>>
    %c0_585 = arith.constant 0 : index
    %938 = arith.index_cast %937 : i32 to index
    %c0_586 = arith.constant 0 : index
    %939 = vector.load %arg2[%c0_585, %938, %c0_586] : memref<1x576x128xf32, #tpu.memory_space<vmem>>, vector<1x1x128xf32>
    %940 = vector.shape_cast %939 : vector<1x1x128xf32> to vector<1x128xf32>
    %c0_587 = arith.constant 0 : index
    %c117_588 = arith.constant 117 : index
    %c0_589 = arith.constant 0 : index
    %941 = vector.load %arg3[%c0_587, %c117_588, %c0_589] : memref<1x128x128xf32, #tpu.memory_space<vmem>>, vector<1x1x128xf32>
    %942 = vector.shape_cast %941 : vector<1x1x128xf32> to vector<1x128xf32>
    %943 = vector.shape_cast %940 : vector<1x128xf32> to vector<1x1x128xf32>
    tpu.vector_store %arg3[%c0_587, %c117_588, %c0_589], %943 {strides = array<i32>} : memref<1x128x128xf32, #tpu.memory_space<vmem>>, vector<1x1x128xf32>,
    %944 = arith.index_cast %arg0 : i32 to index
    %c118 = arith.constant 118 : index
    %945 = memref.load %arg1[%944, %c118] : memref<2x128xi32, #tpu.memory_space<smem>>
    %c0_590 = arith.constant 0 : index
    %946 = arith.index_cast %945 : i32 to index
    %c0_591 = arith.constant 0 : index
    %947 = vector.load %arg2[%c0_590, %946, %c0_591] : memref<1x576x128xf32, #tpu.memory_space<vmem>>, vector<1x1x128xf32>
    %948 = vector.shape_cast %947 : vector<1x1x128xf32> to vector<1x128xf32>
    %c0_592 = arith.constant 0 : index
    %c118_593 = arith.constant 118 : index
    %c0_594 = arith.constant 0 : index
    %949 = vector.load %arg3[%c0_592, %c118_593, %c0_594] : memref<1x128x128xf32, #tpu.memory_space<vmem>>, vector<1x1x128xf32>
    %950 = vector.shape_cast %949 : vector<1x1x128xf32> to vector<1x128xf32>
    %951 = vector.shape_cast %948 : vector<1x128xf32> to vector<1x1x128xf32>
    tpu.vector_store %arg3[%c0_592, %c118_593, %c0_594], %951 {strides = array<i32>} : memref<1x128x128xf32, #tpu.memory_space<vmem>>, vector<1x1x128xf32>,
    %952 = arith.index_cast %arg0 : i32 to index
    %c119 = arith.constant 119 : index
    %953 = memref.load %arg1[%952, %c119] : memref<2x128xi32, #tpu.memory_space<smem>>
    %c0_595 = arith.constant 0 : index
    %954 = arith.index_cast %953 : i32 to index
    %c0_596 = arith.constant 0 : index
    %955 = vector.load %arg2[%c0_595, %954, %c0_596] : memref<1x576x128xf32, #tpu.memory_space<vmem>>, vector<1x1x128xf32>
    %956 = vector.shape_cast %955 : vector<1x1x128xf32> to vector<1x128xf32>
    %c0_597 = arith.constant 0 : index
    %c119_598 = arith.constant 119 : index
    %c0_599 = arith.constant 0 : index
    %957 = vector.load %arg3[%c0_597, %c119_598, %c0_599] : memref<1x128x128xf32, #tpu.memory_space<vmem>>, vector<1x1x128xf32>
    %958 = vector.shape_cast %957 : vector<1x1x128xf32> to vector<1x128xf32>
    %959 = vector.shape_cast %956 : vector<1x128xf32> to vector<1x1x128xf32>
    tpu.vector_store %arg3[%c0_597, %c119_598, %c0_599], %959 {strides = array<i32>} : memref<1x128x128xf32, #tpu.memory_space<vmem>>, vector<1x1x128xf32>,
    %960 = arith.index_cast %arg0 : i32 to index
    %c120 = arith.constant 120 : index
    %961 = memref.load %arg1[%960, %c120] : memref<2x128xi32, #tpu.memory_space<smem>>
    %c0_600 = arith.constant 0 : index
    %962 = arith.index_cast %961 : i32 to index
    %c0_601 = arith.constant 0 : index
    %963 = vector.load %arg2[%c0_600, %962, %c0_601] : memref<1x576x128xf32, #tpu.memory_space<vmem>>, vector<1x1x128xf32>
    %964 = vector.shape_cast %963 : vector<1x1x128xf32> to vector<1x128xf32>
    %c0_602 = arith.constant 0 : index
    %c120_603 = arith.constant 120 : index
    %c0_604 = arith.constant 0 : index
    %965 = vector.load %arg3[%c0_602, %c120_603, %c0_604] : memref<1x128x128xf32, #tpu.memory_space<vmem>>, vector<1x1x128xf32>
    %966 = vector.shape_cast %965 : vector<1x1x128xf32> to vector<1x128xf32>
    %967 = vector.shape_cast %964 : vector<1x128xf32> to vector<1x1x128xf32>
    tpu.vector_store %arg3[%c0_602, %c120_603, %c0_604], %967 {strides = array<i32>} : memref<1x128x128xf32, #tpu.memory_space<vmem>>, vector<1x1x128xf32>,
    %968 = arith.index_cast %arg0 : i32 to index
    %c121 = arith.constant 121 : index
    %969 = memref.load %arg1[%968, %c121] : memref<2x128xi32, #tpu.memory_space<smem>>
    %c0_605 = arith.constant 0 : index
    %970 = arith.index_cast %969 : i32 to index
    %c0_606 = arith.constant 0 : index
    %971 = vector.load %arg2[%c0_605, %970, %c0_606] : memref<1x576x128xf32, #tpu.memory_space<vmem>>, vector<1x1x128xf32>
    %972 = vector.shape_cast %971 : vector<1x1x128xf32> to vector<1x128xf32>
    %c0_607 = arith.constant 0 : index
    %c121_608 = arith.constant 121 : index
    %c0_609 = arith.constant 0 : index
    %973 = vector.load %arg3[%c0_607, %c121_608, %c0_609] : memref<1x128x128xf32, #tpu.memory_space<vmem>>, vector<1x1x128xf32>
    %974 = vector.shape_cast %973 : vector<1x1x128xf32> to vector<1x128xf32>
    %975 = vector.shape_cast %972 : vector<1x128xf32> to vector<1x1x128xf32>
    tpu.vector_store %arg3[%c0_607, %c121_608, %c0_609], %975 {strides = array<i32>} : memref<1x128x128xf32, #tpu.memory_space<vmem>>, vector<1x1x128xf32>,
    %976 = arith.index_cast %arg0 : i32 to index
    %c122 = arith.constant 122 : index
    %977 = memref.load %arg1[%976, %c122] : memref<2x128xi32, #tpu.memory_space<smem>>
    %c0_610 = arith.constant 0 : index
    %978 = arith.index_cast %977 : i32 to index
    %c0_611 = arith.constant 0 : index
    %979 = vector.load %arg2[%c0_610, %978, %c0_611] : memref<1x576x128xf32, #tpu.memory_space<vmem>>, vector<1x1x128xf32>
    %980 = vector.shape_cast %979 : vector<1x1x128xf32> to vector<1x128xf32>
    %c0_612 = arith.constant 0 : index
    %c122_613 = arith.constant 122 : index
    %c0_614 = arith.constant 0 : index
    %981 = vector.load %arg3[%c0_612, %c122_613, %c0_614] : memref<1x128x128xf32, #tpu.memory_space<vmem>>, vector<1x1x128xf32>
    %982 = vector.shape_cast %981 : vector<1x1x128xf32> to vector<1x128xf32>
    %983 = vector.shape_cast %980 : vector<1x128xf32> to vector<1x1x128xf32>
    tpu.vector_store %arg3[%c0_612, %c122_613, %c0_614], %983 {strides = array<i32>} : memref<1x128x128xf32, #tpu.memory_space<vmem>>, vector<1x1x128xf32>,
    %984 = arith.index_cast %arg0 : i32 to index
    %c123 = arith.constant 123 : index
    %985 = memref.load %arg1[%984, %c123] : memref<2x128xi32, #tpu.memory_space<smem>>
    %c0_615 = arith.constant 0 : index
    %986 = arith.index_cast %985 : i32 to index
    %c0_616 = arith.constant 0 : index
    %987 = vector.load %arg2[%c0_615, %986, %c0_616] : memref<1x576x128xf32, #tpu.memory_space<vmem>>, vector<1x1x128xf32>
    %988 = vector.shape_cast %987 : vector<1x1x128xf32> to vector<1x128xf32>
    %c0_617 = arith.constant 0 : index
    %c123_618 = arith.constant 123 : index
    %c0_619 = arith.constant 0 : index
    %989 = vector.load %arg3[%c0_617, %c123_618, %c0_619] : memref<1x128x128xf32, #tpu.memory_space<vmem>>, vector<1x1x128xf32>
    %990 = vector.shape_cast %989 : vector<1x1x128xf32> to vector<1x128xf32>
    %991 = vector.shape_cast %988 : vector<1x128xf32> to vector<1x1x128xf32>
    tpu.vector_store %arg3[%c0_617, %c123_618, %c0_619], %991 {strides = array<i32>} : memref<1x128x128xf32, #tpu.memory_space<vmem>>, vector<1x1x128xf32>,
    %992 = arith.index_cast %arg0 : i32 to index
    %c124 = arith.constant 124 : index
    %993 = memref.load %arg1[%992, %c124] : memref<2x128xi32, #tpu.memory_space<smem>>
    %c0_620 = arith.constant 0 : index
    %994 = arith.index_cast %993 : i32 to index
    %c0_621 = arith.constant 0 : index
    %995 = vector.load %arg2[%c0_620, %994, %c0_621] : memref<1x576x128xf32, #tpu.memory_space<vmem>>, vector<1x1x128xf32>
    %996 = vector.shape_cast %995 : vector<1x1x128xf32> to vector<1x128xf32>
    %c0_622 = arith.constant 0 : index
    %c124_623 = arith.constant 124 : index
    %c0_624 = arith.constant 0 : index
    %997 = vector.load %arg3[%c0_622, %c124_623, %c0_624] : memref<1x128x128xf32, #tpu.memory_space<vmem>>, vector<1x1x128xf32>
    %998 = vector.shape_cast %997 : vector<1x1x128xf32> to vector<1x128xf32>
    %999 = vector.shape_cast %996 : vector<1x128xf32> to vector<1x1x128xf32>
    tpu.vector_store %arg3[%c0_622, %c124_623, %c0_624], %999 {strides = array<i32>} : memref<1x128x128xf32, #tpu.memory_space<vmem>>, vector<1x1x128xf32>,
    %1000 = arith.index_cast %arg0 : i32 to index
    %c125 = arith.constant 125 : index
    %1001 = memref.load %arg1[%1000, %c125] : memref<2x128xi32, #tpu.memory_space<smem>>
    %c0_625 = arith.constant 0 : index
    %1002 = arith.index_cast %1001 : i32 to index
    %c0_626 = arith.constant 0 : index
    %1003 = vector.load %arg2[%c0_625, %1002, %c0_626] : memref<1x576x128xf32, #tpu.memory_space<vmem>>, vector<1x1x128xf32>
    %1004 = vector.shape_cast %1003 : vector<1x1x128xf32> to vector<1x128xf32>
    %c0_627 = arith.constant 0 : index
    %c125_628 = arith.constant 125 : index
    %c0_629 = arith.constant 0 : index
    %1005 = vector.load %arg3[%c0_627, %c125_628, %c0_629] : memref<1x128x128xf32, #tpu.memory_space<vmem>>, vector<1x1x128xf32>
    %1006 = vector.shape_cast %1005 : vector<1x1x128xf32> to vector<1x128xf32>
    %1007 = vector.shape_cast %1004 : vector<1x128xf32> to vector<1x1x128xf32>
    tpu.vector_store %arg3[%c0_627, %c125_628, %c0_629], %1007 {strides = array<i32>} : memref<1x128x128xf32, #tpu.memory_space<vmem>>, vector<1x1x128xf32>,
    %1008 = arith.index_cast %arg0 : i32 to index
    %c126 = arith.constant 126 : index
    %1009 = memref.load %arg1[%1008, %c126] : memref<2x128xi32, #tpu.memory_space<smem>>
    %c0_630 = arith.constant 0 : index
    %1010 = arith.index_cast %1009 : i32 to index
    %c0_631 = arith.constant 0 : index
    %1011 = vector.load %arg2[%c0_630, %1010, %c0_631] : memref<1x576x128xf32, #tpu.memory_space<vmem>>, vector<1x1x128xf32>
    %1012 = vector.shape_cast %1011 : vector<1x1x128xf32> to vector<1x128xf32>
    %c0_632 = arith.constant 0 : index
    %c126_633 = arith.constant 126 : index
    %c0_634 = arith.constant 0 : index
    %1013 = vector.load %arg3[%c0_632, %c126_633, %c0_634] : memref<1x128x128xf32, #tpu.memory_space<vmem>>, vector<1x1x128xf32>
    %1014 = vector.shape_cast %1013 : vector<1x1x128xf32> to vector<1x128xf32>
    %1015 = vector.shape_cast %1012 : vector<1x128xf32> to vector<1x1x128xf32>
    tpu.vector_store %arg3[%c0_632, %c126_633, %c0_634], %1015 {strides = array<i32>} : memref<1x128x128xf32, #tpu.memory_space<vmem>>, vector<1x1x128xf32>,
    %1016 = arith.index_cast %arg0 : i32 to index
    %c127 = arith.constant 127 : index
    %1017 = memref.load %arg1[%1016, %c127] : memref<2x128xi32, #tpu.memory_space<smem>>
    %c0_635 = arith.constant 0 : index
    %1018 = arith.index_cast %1017 : i32 to index
    %c0_636 = arith.constant 0 : index
    %1019 = vector.load %arg2[%c0_635, %1018, %c0_636] : memref<1x576x128xf32, #tpu.memory_space<vmem>>, vector<1x1x128xf32>
    %1020 = vector.shape_cast %1019 : vector<1x1x128xf32> to vector<1x128xf32>
    %c0_637 = arith.constant 0 : index
    %c127_638 = arith.constant 127 : index
    %c0_639 = arith.constant 0 : index
    %1021 = vector.load %arg3[%c0_637, %c127_638, %c0_639] : memref<1x128x128xf32, #tpu.memory_space<vmem>>, vector<1x1x128xf32>
    %1022 = vector.shape_cast %1021 : vector<1x1x128xf32> to vector<1x128xf32>
    %1023 = vector.shape_cast %1020 : vector<1x128xf32> to vector<1x1x128xf32>
    tpu.vector_store %arg3[%c0_637, %c127_638, %c0_639], %1023 {strides = array<i32>} : memref<1x128x128xf32, #tpu.memory_space<vmem>>, vector<1x1x128xf32>,
    return
  }
  func.func @transform_0(%arg0: i32, %arg1: memref<2x128xi32, #tpu.memory_space<smem>>) -> (i32, i32, i32) {
    %c0_i32 = arith.constant 0 : i32
    %c0_i32_0 = arith.constant 0 : i32
    %c0_i32_1 = arith.constant 0 : i32
    return %arg0, %c0_i32, %c0_i32_0 : i32, i32, i32
  }
  func.func @transform_1(%arg0: i32, %arg1: memref<2x128xi32, #tpu.memory_space<smem>>) -> (i32, i32, i32) {
    %c0_i32 = arith.constant 0 : i32
    %c0_i32_0 = arith.constant 0 : i32
    %c0_i32_1 = arith.constant 0 : i32
    return %arg0, %c0_i32, %c0_i32_0 : i32, i32, i32
  }
}

</mosaic_0001>

<bundles_post_ra>
// kernel: _forward.2
= control target key start
LH: loop header
LB: loop body
LE: loop exit
PB: predicated region body
PF: predicated region fallthrough
CT: control target
= control target key end

     0   :  { %s6930_s18 = smov 0   ;;  %s10723_s0 = inlined_call_operand.vmem [shape: f32[2,384,1], index: 0, kind: input, shape index: {}]   ;;  %s10724_s1 = inlined_call_operand.vmem [shape: f32[2,384,1], index: 1, kind: input, shape index: {}]   ;;  %s10725_s2 = inlined_call_operand.vmem [shape: f32[2,1,384], index: 2, kind: input, shape index: {}]   ;;  %s10726_s3 = inlined_call_operand.vmem [shape: f32[2,1,384], index: 3, kind: input, shape index: {}]   ;;  %s10727_s4 = inlined_call_operand.vmem [shape: f32[2,1,384], index: 4, kind: output, shape index: {0}]   ;;  %s10728_s5 = inlined_call_operand.vmem [shape: f32[2,1,384], index: 5, kind: output, shape index: {1}]  }
   0x1 LB: > { %s5744_s19 = sadd.s32 4294967295, %s6867_s18   ;;  %p5748_p0 = scmp.ge.s32.totalorder %s6867_s18, 1  ;;  %s6867_s18 = sphi %s6930_s18, %s16_s18  }
   0x2   : > { %p218_p1 = scmp.lt.s32.totalorder %s6867_s18, 3 }
   0x4   : > { %p219_p2 = pnand %p5748_p0, %p218_p1 }
   0x6   : > { %222 = sbr.rel (%p219_p2) target bundleno = 1147 (0x47b), region = 36 }
   0xd   : > { %p262_p3 = scmp.lt.s32.totalorder %s5744_s19, 1  ;;  %v6893_v0 = vmov 0   ;;  %v10732_v1 = vmov 1.0|1.0   ;;  %v10729_v2 = vlaneseq  ;;  %v10734_v21 = vmov 0.0   ;;  %s10630_s15 = smov 0  }
   0xe   : > { %6778 = vset.pattern.permute.xlu1 %v6893_v0  ;;  %6777 = vset.pattern.permute.xlu0 %v6893_v0  ;;  %2871 = vst [vmem:[#allocation2 + $0x180] sm:$0xff] %v10734_v21  ;;  %2874 = vst [vmem:[#allocation2 + $0x198] sm:$0xff] %v10734_v21  ;;  %v10730_v26 = vmov 0.0|0.0   ;;  %s10641_s16 = smov 0  }
   0xf   : > { %s11899_s19 = smov (!%p262_p3, %s5744_s19), 1  ;;  %6577 = vmatprep.subr.bf16.mxu0 %v10732_v1  ;;  %v6964_v7 = vshrl.u32 %v10729_v2, 7  ;;  %v6972_v11 = vand.u32 127, %v10729_v2  ;;  %6399 = vmatprep.subr.mxu1 %v10734_v21  ;;  %2877 = vst [vmem:[#allocation2 + $0x1b0] sm:$0xff] %v10734_v21  ;;  %2880 = vst [vmem:[#allocation2 + $0x1c8] sm:$0xff] %v10734_v21 }
  0x10   : > { %s6705_s20 = smul.u32 384, %s11899_s19  ;;  %2883 = vst [vmem:[#allocation2 + $0x1e0] sm:$0xff] %v10734_v21  ;;  %2886 = vst [vmem:[#allocation2 + $0x1f8] sm:$0xff] %v10734_v21  ;;  %6400 = vmatpush3.msra.mxu1 %v10734_v21 }
  0x11   : > { %s6939_s21 = smul.u32 3, %s11899_s19  ;;  %11148 = vst [vmem:[#allocation4_spill] sm:$0xff] %v6964_v7  ;;  %v6969_v10 = vadd.s32 8, %v6964_v7  ;;  %11149 = vst [vmem:[#allocation5_spill] sm:$0xff] %v6972_v11  ;;  %v6975_v12 = vadd.s32 16, %v6964_v7  ;;  %v6978_v13 = vadd.s32 24, %v6964_v7  ;;  %vm2967_vm0 = vcmp.le.s32.totalorder %v6964_v7, %v6972_v11  ;;  %6625 = vmatprep.subr.bf16.mxu1 %v10730_v26 }
  0x12   : > { %s6944_s24 = scalar_lea.vmem %s10724_s1, %s6705_s20  ;;  %s6949_s27 = scalar_lea.vmem %s10723_s0, %s6705_s20  ;;  %v6991_v16 = vadd.s32 32, %v6964_v7  ;;  %v6994_v17 = vadd.s32 40, %v6964_v7  ;;  %2889 = vst [vmem:[#allocation2 + $0x210] sm:$0xff] %v10734_v21  ;;  %2892 = vst [vmem:[#allocation2 + $0x228] sm:$0xff] %v10734_v21  ;;  %v7058_v22 = vadd.s32 48, %v6964_v7  ;;  %v7061_v23 = vadd.s32 56, %v6964_v7 }
  0x13   : > { %v337_v3 = vld [vmem:[%s6944_s24 + $0x8] sm:$0xff]  ;;  %v336_v4 = vld [vmem:[%s6944_s24] sm:$0xff]  ;;  %s283_s30 = scalar_lea.vmem %s10727_s4, %s6939_s21  ;;  %s287_s8 = scalar_lea.vmem %s10728_s5, %s6939_s21  ;;  %v290_v8 = vld [vmem:[%s6949_s27 + $0x10] sm:$0xff]  ;;  %vm2970_vm1 = vcmp.le.s32.totalorder %v6969_v10, %v6972_v11  ;;  %vm2973_vm2 = vcmp.le.s32.totalorder %v6975_v12, %v6972_v11  ;;  %vm2976_vm3 = vcmp.le.s32.totalorder %v6978_v13, %v6972_v11  ;;  %2895 = vst [vmem:[#allocation2 + $0x240] sm:$0xff] %v10734_v21  ;;  %v7076_v27 = vadd.s32 64, %v6964_v7 }
  0x14   : > { %393 = vperm.xlu1 %6778, %v337_v3   ;;  %388 = vperm.xlu0 %6777, %v336_v4   ;;  %v289_v5 = vld [vmem:[%s6949_s27 + $0x8] sm:$0xff]  ;;  %v288_v6 = vld [vmem:[%s6949_s27] sm:$0xff]  ;;  %v338_v9 = vld [vmem:[%s6944_s24 + $0x10] sm:$0xff]  ;;  %2898 = vst [vmem:[#allocation2 + $0x258] sm:$0xff] %v10734_v21  ;;  %vm2979_vm6 = vcmp.le.s32.totalorder %v6991_v16, %v6972_v11  ;;  %vm2982_vm7 = vcmp.le.s32.totalorder %v6994_v17, %v6972_v11  ;;  %v7079_v28 = vadd.s32 72, %v6964_v7  ;;  %v7090_v31 = vadd.s32 80, %v6964_v7  ;;  %s279_s11 = scalar_lea.vmem %s10726_s3, %s6939_s21  ;;  %s275_s14 = scalar_lea.vmem %s10725_s2, %s6939_s21 }
  0x15   : > { %v291_v14 = vld [vmem:[%s6949_s27 + $0x18] sm:$0xff]  ;;  %v292_v18 = vld [vmem:[%s6949_s27 + $0x20] sm:$0xff]  ;;  %vm6578_vm4 = vmpackc.low %vm2970_vm1, %vm2967_vm0  ;;  %2901 = vst [vmem:[#allocation2 + $0x270] sm:$0xff] %v10734_v21  ;;  %vm2985_vm9 = vcmp.le.s32.totalorder %v7058_v22, %v6972_v11  ;;  %vm2988_vm10 = vcmp.le.s32.totalorder %v7061_v23, %v6972_v11  ;;  %vm2991_vm12 = vcmp.le.s32.totalorder %v7076_v27, %v6972_v11  ;;  %v7093_v32 = vadd.s32 88, %v6964_v7 }
  0x16   : > { %v339_v15 = vld [vmem:[%s6944_s24 + $0x18] sm:$0xff]  ;;  %v340_v19 = vld [vmem:[%s6944_s24 + $0x20] sm:$0xff]  ;;  %6579 = vmatpush1.bf16.msk.msra.mxu0 %vm6578_vm4, %v10732_v1  ;;  %vm7000_vm5 = vmpackc.low %vm2976_vm3, %vm2973_vm2  ;;  %2904 = vst [vmem:[#allocation2 + $0x288] sm:$0xff] %v10734_v21  ;;  %vm2994_vm13 = vcmp.le.s32.totalorder %v7079_v28, %v6972_v11  ;;  %vm2997_vm15 = vcmp.le.s32.totalorder %v7090_v31, %v6972_v11  ;;  %v7104_v35 = vadd.s32 96, %v6964_v7  ;;  %v7107_v36 = vadd.s32 104, %v6964_v7 }
  0x17   : > { %6580 = vmatprep.subr.bf16.mxu0 %v10732_v1  ;;  %2907 = vst [vmem:[#allocation2 + $0x2a0] sm:$0xff] %v10734_v21  ;;  %2910 = vst [vmem:[#allocation2 + $0x2b8] sm:$0xff] %v10734_v21  ;;  %v293_v24 = vld [vmem:[%s6949_s27 + $0x28] sm:$0xff]  ;;  %v294_v29 = vld [vmem:[%s6949_s27 + $0x30] sm:$0xff]  ;;  %vm3000_vm0 = vcmp.le.s32.totalorder %v7093_v32, %v6972_v11  ;;  %v7118_v39 = vadd.s32 112, %v6964_v7  ;;  %v7121_v40 = vadd.s32 120, %v6964_v7 }
  0x18   : > { %793 = vperm.xlu1 %6778, %v289_v5   ;;  %788 = vperm.xlu0 %6777, %v288_v6   ;;  %2913 = vst [vmem:[#allocation2 + $0x2d0] sm:$0xff] %v10734_v21  ;;  %2916 = vst [vmem:[#allocation2 + $0x2e8] sm:$0xff] %v10734_v21  ;;  %v341_v25 = vld [vmem:[%s6944_s24 + $0x28] sm:$0xff]  ;;  %v342_v30 = vld [vmem:[%s6944_s24 + $0x30] sm:$0xff]  ;;  %vm3003_vm2 = vcmp.le.s32.totalorder %v7104_v35, %v6972_v11  ;;  %vm3006_vm3 = vcmp.le.s32.totalorder %v7107_v36, %v6972_v11  ;;  %v7126_v43 = vadd.s32 128, %v6964_v7 }
  0x19   : > { %2919 = vst [vmem:[#allocation2 + $0x300] sm:$0xff] %v10734_v21  ;;  %2920 = vst [vmem:[#allocation2 + $0x308] sm:$0xff] %v10734_v21  ;;  %v295_v33 = vld [vmem:[%s6949_s27 + $0x38] sm:$0xff]  ;;  %v296_v37 = vld [vmem:[%s6949_s27 + $0x40] sm:$0xff]  ;;  %v7129_v44 = vadd.s32 136, %v6964_v7  ;;  %v7132_v45 = vadd.s32 128, %v6972_v11 }
  0x1a   : > { %2922 = vst [vmem:[#allocation2 + $0x318] sm:$0xff] %v10734_v21  ;;  %2923 = vst [vmem:[#allocation2 + $0x320] sm:$0xff] %v10734_v21  ;;  %6582 = vmatpush1.bf16.msk.msra.mxu0 %vm7000_vm5, %v10732_v1  ;;  %v343_v34 = vld [vmem:[%s6944_s24 + $0x38] sm:$0xff]  ;;  %v344_v38 = vld [vmem:[%s6944_s24 + $0x40] sm:$0xff]  ;;  %vm3009_vm5 = vcmp.le.s32.totalorder %v7118_v39, %v6972_v11  ;;  %v7147_v48 = vadd.s32 144, %v6964_v7  ;;  %v7150_v49 = vadd.s32 152, %v6964_v7 }
  0x1b   : > { %2925 = vst [vmem:[#allocation2 + $0x330] sm:$0xff] %v10734_v21  ;;  %2926 = vst [vmem:[#allocation2 + $0x338] sm:$0xff] %v10734_v21  ;;  %6583 = vmatprep.subr.bf16.mxu0 %v10732_v1  ;;  %v297_v41 = vld [vmem:[%s6949_s27 + $0x48] sm:$0xff]  ;;  %v298_v46 = vld [vmem:[%s6949_s27 + $0x50] sm:$0xff]  ;;  %v7161_v52 = vadd.s32 160, %v6964_v7  ;;  %v7164_v53 = vadd.s32 168, %v6964_v7 }
  0x1c   : > { %798 = vperm.xlu1 %6778, %v290_v8   ;;  %398 = vperm.xlu0 %6777, %v338_v9   ;;  %2928 = vst [vmem:[#allocation2 + $0x348] sm:$0xff] %v10734_v21  ;;  %2929 = vst [vmem:[#allocation2 + $0x350] sm:$0xff] %v10734_v21  ;;  %v345_v42 = vld [vmem:[%s6944_s24 + $0x48] sm:$0xff]  ;;  %v346_v47 = vld [vmem:[%s6944_s24 + $0x50] sm:$0xff]  ;;  %v7175_v56 = vadd.s32 176, %v6964_v7  ;;  %v7178_v57 = vadd.s32 184, %v6964_v7 }
  0x1d   : > { %2931 = vst [vmem:[#allocation2 + $0x360] sm:$0xff] %v10734_v21  ;;  %2932 = vst [vmem:[#allocation2 + $0x368] sm:$0xff] %v10734_v21  ;;  %v299_v50 = vld [vmem:[%s6949_s27 + $0x58] sm:$0xff]  ;;  %v300_v54 = vld [vmem:[%s6949_s27 + $0x60] sm:$0xff]  ;;  %v7189_v60 = vadd.s32 192, %v6964_v7  ;;  %v7192_v61 = vadd.s32 200, %v6964_v7 }
  0x1e   : > { %2934 = vst [vmem:[#allocation2 + $0x378] sm:$0xff] %v10734_v21  ;;  %2935 = vst [vmem:[#allocation2 + $0x380] sm:$0xff] %v10734_v21  ;;  %v347_v51 = vld [vmem:[%s6944_s24 + $0x58] sm:$0xff]  ;;  %v348_v55 = vld [vmem:[%s6944_s24 + $0x60] sm:$0xff]  ;;  %v7203_v0 = vadd.s32 208, %v6964_v7  ;;  %v7206_v3 = vadd.s32 216, %v6964_v7 }
  0x1f   : > { %2937 = vst [vmem:[#allocation2 + $0x390] sm:$0xff] %v10734_v21  ;;  %2938 = vst [vmem:[#allocation2 + $0x398] sm:$0xff] %v10734_v21  ;;  %v301_v58 = vld [vmem:[%s6949_s27 + $0x68] sm:$0xff]  ;;  %v302_v62 = vld [vmem:[%s6949_s27 + $0x70] sm:$0xff]  ;;  %v7217_v6 = vadd.s32 224, %v6964_v7  ;;  %v7220_v8 = vadd.s32 232, %v6964_v7 }
  0x20   : > { %803 = vperm.xlu1 %6778, %v291_v14   ;;  %403 = vperm.xlu0 %6777, %v339_v15   ;;  %2940 = vst [vmem:[#allocation2 + $0x3a8] sm:$0xff] %v10734_v21  ;;  %2941 = vst [vmem:[#allocation2 + $0x3b0] sm:$0xff] %v10734_v21  ;;  %v349_v59 = vld [vmem:[%s6944_s24 + $0x68] sm:$0xff]  ;;  %v350_v63 = vld [vmem:[%s6944_s24 + $0x70] sm:$0xff]  ;;  %v7231_v15 = vadd.s32 240, %v6964_v7 }
  0x21   : > { %2943 = vst [vmem:[#allocation2 + $0x3c0] sm:$0xff] %v10734_v21  ;;  %2944 = vst [vmem:[#allocation2 + $0x3c8] sm:$0xff] %v10734_v21  ;;  %v303_v4 = vld [vmem:[%s6949_s27 + $0x78] sm:$0xff]  ;;  %v304_v9 = vld [vmem:[%s6949_s27 + $0x80] sm:$0xff] }
  0x22   : > { %2946 = vst [vmem:[#allocation2 + $0x3d8] sm:$0xff] %v10734_v21  ;;  %2947 = vst [vmem:[#allocation2 + $0x3e0] sm:$0xff] %v10734_v21  ;;  %v351_v5 = vld [vmem:[%s6944_s24 + $0x78] sm:$0xff]  ;;  %v352_v14 = vld [vmem:[%s6944_s24 + $0x80] sm:$0xff] }
  0x23   : > { %2949 = vst [vmem:[#allocation2 + $0x3f0] sm:$0xff] %v10734_v21  ;;  %2950 = vst [vmem:[#allocation2 + $0x3f8] sm:$0xff] %v10734_v21  ;;  %v353_v20 = vld [vmem:[%s6944_s24 + $0x88] sm:$0xff] }
  0x24   : > { %2952 = vst [vmem:[#allocation2 + $0x408] sm:$0xff] %v10734_v21  ;;  %2953 = vst [vmem:[#allocation2 + $0x410] sm:$0xff] %v10734_v21  ;;  %808 = vperm.xlu1 %6778, %v292_v18   ;;  %408 = vperm.xlu0 %6777, %v340_v19   ;;  %v7234_v18 = vadd.s32 248, %v6964_v7  ;;  %v305_v19 = vld [vmem:[%s6949_s27 + $0x88] sm:$0xff] }
  0x25   : > { %2955 = vst [vmem:[#allocation2 + $0x420] sm:$0xff] %v10734_v21  ;;  %2956 = vst [vmem:[#allocation2 + $0x428] sm:$0xff] %v10734_v21 }
  0x26   : > { %2958 = vst [vmem:[#allocation2 + $0x438] sm:$0xff] %v10734_v21  ;;  %2959 = vst [vmem:[#allocation2 + $0x440] sm:$0xff] %v10734_v21 }
  0x27   : > { %2961 = vst [vmem:[#allocation2 + $0x450] sm:$0xff] %v10734_v21  ;;  %2962 = vst [vmem:[#allocation2 + $0x458] sm:$0xff] %v10734_v21 }
  0x28   : > { %2964 = vst [vmem:[#allocation2 + $0x468] sm:$0xff] %v10734_v21  ;;  %2965 = vst [vmem:[#allocation2 + $0x470] sm:$0xff] %v10734_v21  ;;  %813 = vperm.xlu1 %6778, %v293_v24   ;;  %413 = vperm.xlu0 %6777, %v341_v25   ;;  %v306_v24 = vld [vmem:[%s6949_s27 + $0x90] sm:$0xff] }
  0x29   : > { %vm6584_vm8 = vmpackc.low %vm2982_vm7, %vm2979_vm6  ;;  %11152 = vst [vmem:[#allocation6_spill] sm:$0xff] %v7132_v45  ;;  %vm3012_vm6 = vcmp.le.s32.totalorder %v7121_v40, %v6972_v11  ;;  %vm3016_vm7 = vcmp.le.s32.totalorder %v7126_v43, %v7132_v45  ;;  %v354_v25 = vld [vmem:[%s6944_s24 + $0x90] sm:$0xff] }
  0x2a   : > { %6585 = vmatpush1.bf16.msk.msra.mxu0 %vm6584_vm8, %v10732_v1  ;;  %vm6587_vm11 = vmpackc.low %vm2988_vm10, %vm2985_vm9  ;;  %vm3019_vm8 = vcmp.le.s32.totalorder %v7129_v44, %v7132_v45  ;;  %11153 = vst [vmem:[#allocation7_spill] sm:$0xff] %v7164_v53  ;;  %v322_v21 = vld [vmem:[%s6949_s27 + $0x110] sm:$0xff] }
  0x2b   : > { %6586 = vmatprep.subr.bf16.mxu0 %v10732_v1  ;;  %vm6590_vm14 = vmpackc.low %vm2994_vm13, %vm2991_vm12  ;;  %vm3025_vm12 = vcmp.le.s32.totalorder %v7150_v49, %v7132_v45  ;;  %11154 = vst [vmem:[#allocation8_spill] sm:$0xff] %v7175_v56 }
  0x2c   : > { %818 = vperm.xlu1 %6778, %v294_v29   ;;  %418 = vperm.xlu0 %6777, %v342_v30   ;;  %vm6593_vm1 = vmpackc.low %vm3000_vm0, %vm2997_vm15  ;;  %vm3031_vm15 = vcmp.le.s32.totalorder %v7164_v53, %v7132_v45  ;;  %11155 = vst [vmem:[#allocation9_spill] sm:$0xff] %v7178_v57  ;;  %v307_v29 = vld [vmem:[%s6949_s27 + $0x98] sm:$0xff]  ;;  %v11167_v53 = vmov 0 }
  0x2d   : > { %vm6596_vm4 = vmpackc.low %vm3006_vm3, %vm3003_vm2  ;;  %vm3037_vm2 = vcmp.le.s32.totalorder %v7178_v57, %v7132_v45  ;;  %11156 = vst [vmem:[#allocation10_spill] sm:$0xff] %v7189_v60  ;;  %v355_v30 = vld [vmem:[%s6944_s24 + $0x98] sm:$0xff] }
  0x2e   : > { %6588 = vmatpush1.bf16.msk.msra.mxu0 %vm6587_vm11, %v10732_v1  ;;  %vm6599_vm9 = vmpackc.low %vm3012_vm6, %vm3009_vm5  ;;  %vm3022_vm11 = vcmp.le.s32.totalorder %v7147_v48, %v7132_v45  ;;  %11157 = vst [vmem:[#allocation11_spill] sm:$0xff] %v7192_v61  ;;  %vm3043_vm5 = vcmp.le.s32.totalorder %v7192_v61, %v7132_v45 }
  0x2f   : > { %6589 = vmatprep.subr.bf16.mxu0 %v10732_v1  ;;  %vm6601_vm10 = vmpackc.low %vm3019_vm8, %vm3016_vm7  ;;  %11158 = vst [vmem:[#allocation12_spill] sm:$0xff] %v7203_v0  ;;  %vm3046_vm7 = vcmp.le.s32.totalorder %v7203_v0, %v7132_v45  ;;  %vm3049_vm8 = vcmp.le.s32.totalorder %v7206_v3, %v7132_v45 }
  0x30   : > { %823 = vperm.xlu1 %6778, %v295_v33   ;;  %423 = vperm.xlu0 %6777, %v343_v34   ;;  %vm6604_vm13 = vmpackc.low %vm3025_vm12, %vm3022_vm11  ;;  %11159 = vst [vmem:[#allocation13_spill] sm:$0xff] %v7206_v3  ;;  %vm3055_vm11 = vcmp.le.s32.totalorder %v7220_v8, %v7132_v45  ;;  %v308_v33 = vld [vmem:[%s6949_s27 + $0xa0] sm:$0xff] }
  0x31   : > { %11160 = vst [vmem:[#allocation14_spill] sm:$0xff] %v7217_v6  ;;  %11161 = vst [vmem:[#allocation15_spill] sm:$0xff] %v7220_v8  ;;  %v356_v34 = vld [vmem:[%s6944_s24 + $0xa0] sm:$0xff] }
  0x32   : > { %6591 = vmatpush1.bf16.msk.msra.mxu0 %vm6590_vm14, %v10732_v1  ;;  %vm3028_vm14 = vcmp.le.s32.totalorder %v7161_v52, %v7132_v45  ;;  %11162 = vst [vmem:[#allocation16_spill] sm:$0xff] %v7231_v15  ;;  %11163 = vst [vmem:[#allocation17_spill] sm:$0xff] %v7234_v18 }
  0x33   : > { %6592 = vmatprep.subr.bf16.mxu0 %v10732_v1  ;;  %vm6607_vm0 = vmpackc.low %vm3031_vm15, %vm3028_vm14  ;;  %vm3061_vm14 = vcmp.le.s32.totalorder %v7234_v18, %v7132_v45 }
  0x34   : > { %828 = vperm.xlu1 %6778, %v296_v37   ;;  %428 = vperm.xlu0 %6777, %v344_v38   ;;  %v309_v37 = vld [vmem:[%s6949_s27 + $0xa8] sm:$0xff] }
  0x35   : > { %v357_v38 = vld [vmem:[%s6944_s24 + $0xa8] sm:$0xff] }
  0x36   : > { %6594 = vmatpush1.bf16.msk.msra.mxu0 %vm6593_vm1, %v10732_v1  ;;  %vm3034_vm1 = vcmp.le.s32.totalorder %v7175_v56, %v7132_v45 }
  0x37   : > { %6595 = vmatprep.subr.bf16.mxu0 %v10732_v1  ;;  %vm6610_vm3 = vmpackc.low %vm3037_vm2, %vm3034_vm1  ;;  %vm2250_vm2 = vcmp.gt.s32.totalorder %v6972_v11, %v6969_v10 }
  0x38   : > { %833 = vperm.xlu1 %6778, %v297_v41   ;;  %433 = vperm.xlu0 %6777, %v345_v42   ;;  %v310_v41 = vld [vmem:[%s6949_s27 + $0xb0] sm:$0xff] }
  0x39   : > { %v358_v42 = vld [vmem:[%s6944_s24 + $0xb0] sm:$0xff] }
  0x3a   : > { %6597 = vmatpush1.bf16.msk.msra.mxu0 %vm6596_vm4, %v10732_v1  ;;  %vm3040_vm4 = vcmp.le.s32.totalorder %v7189_v60, %v7132_v45 }
  0x3b   : > { %6598 = vmatprep.subr.bf16.mxu0 %v10732_v1  ;;  %vm6613_vm6 = vmpackc.low %vm3043_vm5, %vm3040_vm4 }
  0x3c   : > { %838 = vperm.xlu1 %6778, %v298_v46   ;;  %438 = vperm.xlu0 %6777, %v346_v47   ;;  %v311_v46 = vld [vmem:[%s6949_s27 + $0xb8] sm:$0xff] }
  0x3d   : > { %v359_v47 = vld [vmem:[%s6944_s24 + $0xb8] sm:$0xff] }
  0x3e   : > { %6600 = vmatpush1.bf16.msk.msra.mxu0 %vm6599_vm9, %v10732_v1  ;;  %vm6616_vm9 = vmpackc.low %vm3049_vm8, %vm3046_vm7  ;;  %vm2253_vm8 = vcmp.gt.s32.totalorder %v6972_v11, %v6975_v12  ;;  %v11202_v12 = vmov 0 }
  0x3f   : > { %6602 = vmatprep.subr.msk.bf16.mxu0 %vm6601_vm10, %v10732_v1  ;;  %vm3052_vm10 = vcmp.le.s32.totalorder %v7217_v6, %v7132_v45 }
  0x40   : > { %843 = vperm.xlu1 %6778, %v299_v50   ;;  %443 = vperm.xlu0 %6777, %v347_v51   ;;  %vm6619_vm12 = vmpackc.low %vm3055_vm11, %vm3052_vm10  ;;  %v312_v50 = vld [vmem:[%s6949_s27 + $0xc0] sm:$0xff] }
  0x41   : > { %v360_v51 = vld [vmem:[%s6944_s24 + $0xc0] sm:$0xff] }
  0x42   : > { %6603 = vmatpush1.bf16.msra.mxu0 %v10730_v26 }
  0x43   : > { %6605 = vmatprep.subr.msk.bf16.mxu0 %vm6604_vm13, %v10732_v1  ;;  %vm3058_vm13 = vcmp.le.s32.totalorder %v7231_v15, %v7132_v45 }
  0x44   : > { %848 = vperm.xlu1 %6778, %v300_v54   ;;  %448 = vperm.xlu0 %6777, %v348_v55   ;;  %vm6622_vm15 = vmpackc.low %vm3061_vm14, %vm3058_vm13  ;;  %v313_v54 = vld [vmem:[%s6949_s27 + $0xc8] sm:$0xff]  ;;  %vm2256_vm13 = vcmp.gt.s32.totalorder %v6972_v11, %v6978_v13 }
  0x45   : > { %v361_v55 = vld [vmem:[%s6944_s24 + $0xc8] sm:$0xff] }
  0x46   : > { %6606 = vmatpush1.bf16.msra.mxu0 %v10730_v26 }
  0x47   : > { %6608 = vmatprep.subr.msk.bf16.mxu0 %vm6607_vm0, %v10732_v1  ;;  %vm2247_vm0 = vcmp.gt.s32.totalorder %v6972_v11, %v6964_v7 }
  0x48   : > { %853 = vperm.xlu1 %6778, %v301_v58   ;;  %453 = vperm.xlu0 %6777, %v349_v59   ;;  %v314_v58 = vld [vmem:[%s6949_s27 + $0xd0] sm:$0xff] }
  0x49   : > { %v362_v59 = vld [vmem:[%s6944_s24 + $0xd0] sm:$0xff] }
  0x4a   : > { %6609 = vmatpush1.bf16.msra.mxu0 %v10730_v26 }
  0x4b   : > { %6611 = vmatprep.subr.msk.bf16.mxu0 %vm6610_vm3, %v10732_v1 }
  0x4c   : > { %858 = vperm.xlu1 %6778, %v302_v62   ;;  %458 = vperm.xlu0 %6777, %v350_v63   ;;  %v315_v62 = vld [vmem:[%s6949_s27 + $0xd8] sm:$0xff] }
  0x4d   : > { %v363_v63 = vld [vmem:[%s6944_s24 + $0xd8] sm:$0xff] }
  0x4e   : > { %6612 = vmatpush1.bf16.msra.mxu0 %v10730_v26 }
  0x4f   : > { %6614 = vmatprep.subr.msk.bf16.mxu0 %vm6613_vm6, %v10732_v1 }
  0x50   : > { %863 = vperm.xlu1 %6778, %v303_v4   ;;  %463 = vperm.xlu0 %6777, %v351_v5   ;;  %v316_v4 = vld [vmem:[%s6949_s27 + $0xe0] sm:$0xff] }
  0x51   : > { %v364_v5 = vld [vmem:[%s6944_s24 + $0xe0] sm:$0xff] }
  0x52   : > { %6615 = vmatpush1.bf16.msra.mxu0 %v10730_v26 }
  0x53   : > { %6617 = vmatprep.subr.msk.bf16.mxu0 %vm6616_vm9, %v10732_v1 }
  0x54   : > { %868 = vperm.xlu1 %6778, %v304_v9   ;;  %468 = vperm.xlu0 %6777, %v352_v14   ;;  %v317_v9 = vld [vmem:[%s6949_s27 + $0xe8] sm:$0xff] }
  0x55   : > { %v365_v14 = vld [vmem:[%s6944_s24 + $0xe8] sm:$0xff] }
  0x56   : > { %6618 = vmatpush1.bf16.msra.mxu0 %v10730_v26 }
  0x57   : > { %6620 = vmatprep.subr.msk.bf16.mxu0 %vm6619_vm12, %v10732_v1 }
  0x58   : > { %873 = vperm.xlu1 %6778, %v305_v19   ;;  %473 = vperm.xlu0 %6777, %v353_v20   ;;  %v318_v19 = vld [vmem:[%s6949_s27 + $0xf0] sm:$0xff] }
  0x59   : > { %v366_v20 = vld [vmem:[%s6944_s24 + $0xf0] sm:$0xff] }
  0x5a   : > { %6621 = vmatpush1.bf16.msra.mxu0 %v10730_v26 }
  0x5b   : > { %6623 = vmatprep.subr.msk.bf16.mxu0 %vm6622_vm15, %v10732_v1 }
  0x5c   : > { %878 = vperm.xlu1 %6778, %v306_v24   ;;  %478 = vperm.xlu0 %6777, %v354_v25   ;;  %v7280_v24 = vsub.s32 1, %v6964_v7  ;;  %v7283_v25 = vsub.s32 2, %v6964_v7 }
  0x5e   : > { %6624 = vmatpush1.bf16.msra.mxu0 %v10730_v26  ;;  %11164 = vst [vmem:[#allocation18_spill] sm:$0xff] %v7280_v24  ;;  %11165 = vst [vmem:[#allocation19_spill] sm:$0xff] %v7283_v25 }
  0x60   : > { %883 = vperm.xlu1 %6778, %v307_v29   ;;  %483 = vperm.xlu0 %6777, %v355_v30   ;;  %v319_v29 = vld [vmem:[%s6949_s27 + $0xf8] sm:$0xff] }
  0x61   : > { %v367_v30 = vld [vmem:[%s6944_s24 + $0xf8] sm:$0xff] }
  0x64   : > { %888 = vperm.xlu1 %6778, %v308_v33   ;;  %488 = vperm.xlu0 %6777, %v356_v34   ;;  %v385_v33 = vld [vmem:[%s279_s11] sm:$0x7]  ;;  %v7292_v34 = vsub.s32 0, %v6964_v7 }
  0x66   : > { %11166 = vst [vmem:[#allocation20_spill] sm:$0xff] %v7292_v34 }
  0x68   : > { %893 = vperm.xlu1 %6778, %v309_v37   ;;  %493 = vperm.xlu0 %6777, %v357_v38   ;;  %v384_v37 = vld [vmem:[%s275_s14] sm:$0x7]  ;;  %v7295_v38 = vrot.slane %v385_v33, %v7280_v24 }
  0x6c   : > { %898 = vperm.xlu1 %6778, %v310_v41   ;;  %498 = vperm.xlu0 %6777, %v358_v42   ;;  %v7298_v41 = vrot.slane %v385_v33, %v7283_v25  ;;  %v320_v42 = vld [vmem:[%s6949_s27 + $0x100] sm:$0xff] }
  0x70   : > { %903 = vperm.xlu1 %6778, %v311_v46   ;;  %503 = vperm.xlu0 %6777, %v359_v47   ;;  %v368_v46 = vld [vmem:[%s6944_s24 + $0x100] sm:$0xff]  ;;  %v7303_v47 = vrot.slane %v385_v33, %v7292_v34 }
  0x74   : > { %908 = vperm.xlu1 %6778, %v312_v50   ;;  %508 = vperm.xlu0 %6777, %v360_v51  }
  0x78   : > { %913 = vperm.xlu1 %6778, %v313_v54   ;;  %513 = vperm.xlu0 %6777, %v361_v55   ;;  %v7308_v54 = vrot.slane %v384_v37, %v7280_v24  ;;  %v7311_v55 = vrot.slane %v384_v37, %v7283_v25  ;;  %v370_v25 = vld [vmem:[%s6944_s24 + $0x110] sm:$0xff] }
  0x7c   : > { %918 = vperm.xlu1 %6778, %v314_v58   ;;  %518 = vperm.xlu0 %6777, %v362_v59   ;;  %v7314_v58 = vrot.slane %v384_v37, %v7292_v34  ;;  %v321_v59 = vld [vmem:[%s6949_s27 + $0x108] sm:$0xff] }
  0x80   : > { %923 = vperm.xlu1 %6778, %v315_v62   ;;  %523 = vperm.xlu0 %6777, %v363_v63   ;;  %v369_v62 = vld [vmem:[%s6944_s24 + $0x108] sm:$0xff] }
  0x84   : > { %928 = vperm.xlu1 %6778, %v316_v4   ;;  %528 = vperm.xlu0 %6777, %v364_v5  }
  0x88   : > { %933 = vperm.xlu1 %6778, %v317_v9   ;;  %533 = vperm.xlu0 %6777, %v365_v14  }
  0x8c   : > { %938 = vperm.xlu1 %6778, %v318_v19   ;;  %538 = vperm.xlu0 %6777, %v366_v20  }
  0x90   : > { %943 = vperm.xlu1 %6778, %v319_v29   ;;  %543 = vperm.xlu0 %6777, %v367_v30  }
  0x93   : > { %v7305_v50 = vpop.permute.xlu1 %393  ;;  %v389_v51 = vpop.permute.xlu0 %388 }
  0x94   : > { %948 = vperm.xlu1 %6778, %v320_v42   ;;  %548 = vperm.xlu0 %6777, %v368_v46   ;;  %v643_v63 = vmin.f32 %v389_v51, %v7295_v38  ;;  %v1331_v4 = vmax.f32 %v389_v51, %v7295_v38  ;;  %v644_v5 = vmin.f32 %v389_v51, %v7298_v41 }
  0x95   : > { %v1332_v9 = vmax.f32 %v389_v51, %v7298_v41  ;;  %v642_v14 = vmin.f32 %v389_v51, %v7303_v47  ;;  %v1330_v19 = vmax.f32 %v389_v51, %v7303_v47  ;;  %v647_v20 = vmin.f32 %v7305_v50, %v7298_v41 }
  0x96   : > { %v1335_v29 = vmax.f32 %v7305_v50, %v7298_v41  ;;  %v646_v37 = vmin.f32 %v7305_v50, %v7295_v38  ;;  %v1334_v42 = vmax.f32 %v7305_v50, %v7295_v38 }
  0x97   : > { %v7330_v30 = vpop.permute.xlu1 %793  ;;  %v789_v33 = vpop.permute.xlu0 %788 }
  0x98   : > { %953 = vperm.xlu1 %6778, %v321_v59   ;;  %553 = vperm.xlu0 %6777, %v369_v62   ;;  %v1043_v2 = vmax.f32 %v789_v33, %v7308_v54  ;;  %v1475_v26 = vmin.f32 %v789_v33, %v7308_v54  ;;  %v1044_v1 = vmax.f32 %v789_v33, %v7311_v55 }
  0x99   : > { %v1476_v24 = vmin.f32 %v789_v33, %v7311_v55  ;;  %v1042_v34 = vmax.f32 %v789_v33, %v7314_v58  ;;  %v1474_v18 = vmin.f32 %v789_v33, %v7314_v58  ;;  %v1047_v46 = vmax.f32 %v7330_v30, %v7311_v55 }
  0x9a   : > { %v1187_v51 = vsub.f32 %v643_v63, %v1043_v2  ;;  %v1619_v59 = vsub.f32 %v1331_v4, %v1475_v26  ;;  %v1188_v62 = vsub.f32 %v644_v5, %v1044_v1  ;;  %v1479_v15 = vmin.f32 %v7330_v30, %v7311_v55  ;;  %v323_v1 = vld [vmem:[%s6949_s27 + $0x118] sm:$0xff] }
  0x9b   : > { %v7352_v8 = vpop.permute.xlu1 %798  ;;  %v7354_v6 = vpop.permute.xlu0 %398  ;;  %v1620_v3 = vsub.f32 %v1332_v9, %v1476_v24  ;;  %v1186_v0 = vsub.f32 %v642_v14, %v1042_v34  ;;  %v1618_v61 = vsub.f32 %v1330_v19, %v1474_v18  ;;  %v1191_v60 = vsub.f32 %v647_v20, %v1047_v46  ;;  %v371_v24 = vld [vmem:[%s6944_s24 + $0x118] sm:$0xff] }
  0x9c   : > { %958 = vperm.xlu1 %6778, %v322_v21   ;;  %558 = vperm.xlu0 %6777, %v370_v25   ;;  %v1816_v33 = vmax.f32 %v1187_v51, 0.0  ;;  %v1960_v57 = vmul.f32 0.5, %v1619_v59  ;;  %v1817_v2 = vmax.f32 %v1188_v62, 0.0  ;;  %v1623_v26 = vsub.f32 %v1335_v29, %v1479_v15  ;;  %v324_v59 = vld [vmem:[%s6949_s27 + $0x120] sm:$0xff] }
  0x9d   : > { %v1961_v63 = vmul.f32 0.5, %v1620_v3  ;;  %v1815_v4 = vmax.f32 %v1186_v0, 0.0  ;;  %v1959_v5 = vmul.f32 0.5, %v1618_v61  ;;  %v1820_v56 = vmax.f32 %v1191_v60, 0.0 }
  0x9e   : > { %vm7357_vm1 = vcmp.gt.f32.partialorder %v1816_v33, %v1960_v57  ;;  %v1964_v9 = vmul.f32 0.5, %v1623_v26  ;;  %v1046_v18 = vmax.f32 %v7330_v30, %v7308_v54  ;;  %v1478_v21 = vmin.f32 %v7330_v30, %v7308_v54  ;;  %v372_v33 = vld [vmem:[%s6944_s24 + $0x120] sm:$0xff] }
  0x9f   : > { %v11168_v53 = vsel %vm7357_vm1, 4294967295, %v11167_v53  ;;  %v7368_v3 = vpop.permute.xlu1 %803  ;;  %v10765_v0 = vmov 1.0   ;;  %vm7373_vm3 = vcmp.gt.f32.partialorder %v1817_v2, %v1961_v63  ;;  %v11170_v57 = vmov 0  ;;  %v7377_v60 = vpop.permute.xlu0 %403 }
  0xa0   : > { %11169 = vst [vmem:[#allocation21_spill] sm:$0xff] %v11168_v53  ;;  %5927 = vmatprep.mubr.msk.f32.mxu0 %vm7357_vm1, %v10765_v0  ;;  %v11171_v57 = vsel %vm7373_vm3, 4294967295, %v11170_v57  ;;  %vm2103_vm4 = vcmp.gt.f32.partialorder %v1815_v4, %v1959_v5  ;;  %v650_v61 = vmin.f32 %v7354_v6, %v7298_v41  ;;  %v1050_v15 = vmax.f32 %v7352_v8, %v7311_v55 }
  0xa1   : > { %11172 = vst [vmem:[#allocation22_spill] sm:$0xff] %v11171_v57  ;;  %6401 = vmatprep.mubr.msk.f32.mxu1 %vm7373_vm3, %v10765_v0  ;;  %963 = vperm.xlu1 %6778, %v323_v1   ;;  %vm7389_vm5 = vmand %vm2103_vm4, %vm2247_vm0  ;;  %v11173_v25 = vmov 0  ;;  %vm7393_vm6 = vcmp.gt.f32.partialorder %v1820_v56, %v1964_v9  ;;  %v11176_v34 = vmov 0  ;;  %v1190_v14 = vsub.f32 %v646_v37, %v1046_v18 }
  0xa2   : > { %v11174_v25 = vsel %vm7389_vm5, 4294967295, %v11173_v25  ;;  %v11177_v34 = vsel %vm7393_vm6, 4294967295, %v11176_v34  ;;  %v1622_v19 = vsub.f32 %v1334_v42, %v1478_v21  ;;  %v11179_v20 = vmov 0.0   ;;  %563 = vperm.xlu0 %6777, %v371_v24   ;;  %5928 = vmatmul.mubr.msk.f32.vlgmr.msra.gmra.mrb[0].mxu0 %vm7389_vm5, %v10765_v0 }
  0xa3   : > { %11175 = vst [vmem:[#allocation23_spill] sm:$0xff] %v11174_v25  ;;  %11178 = vst [vmem:[#allocation24_spill] sm:$0xff] %v11177_v34  ;;  %v5752_v29 = vsel %vm7357_vm1, 1.0, %v11179_v20  ;;  %v1194_v46 = vsub.f32 %v650_v61, %v1050_v15  ;;  %v1338_v51 = vmax.f32 %v7354_v6, %v7298_v41  ;;  %v1482_v56 = vmin.f32 %v7352_v8, %v7311_v55  ;;  %v7419_v63 = vpop.permute.xlu1 %808  ;;  %v7421_v5 = vpop.permute.xlu0 %408 }
  0xa4   : > { %2824 = vst [vmem:[#allocation2 + $0x8] sm:$0xff] %v5752_v29  ;;  %v5751_v37 = vsel %vm7389_vm5, 1.0, %v11179_v20  ;;  %6402 = vmatmul.mubr.msk.f32.vlgmr.msra.gmra.mrb[0].mxu1 %vm7393_vm6, %v10765_v0  ;;  %v1819_v42 = vmax.f32 %v1190_v14, 0.0  ;;  %v1963_v62 = vmul.f32 0.5, %v1622_v19  ;;  %v1045_v2 = vmax.f32 %v7330_v30, %v7314_v58 }
  0xa5   : > { %v1477_v26 = vmin.f32 %v7330_v30, %v7314_v58  ;;  %2823 = vst [vmem:[#allocation2] sm:$0xff] %v5751_v37  ;;  %v1626_v1 = vsub.f32 %v1338_v51, %v1482_v56  ;;  %v1823_v4 = vmax.f32 %v1194_v46, 0.0  ;;  %v649_v24 = vmin.f32 %v7354_v6, %v7295_v38  ;;  %968 = vperm.xlu1 %6778, %v324_v59   ;;  %v325_v56 = vld [vmem:[%s6949_s27 + $0x128] sm:$0xff] }
  0xa6   : > { %v1049_v9 = vmax.f32 %v7352_v8, %v7308_v54  ;;  %v11180_v18 = vmov 1.0|1.0   ;;  %vm7428_vm7 = vcmp.gt.f32.partialorder %v1819_v42, %v1963_v62  ;;  %v11181_v21 = vmov 0  ;;  %568 = vperm.xlu0 %6777, %v372_v33   ;;  %v373_v62 = vld [vmem:[%s6944_s24 + $0x128] sm:$0xff] }
  0xa7   : > { %6626 = vmatpush1.bf16.msra.mxu1 %v11180_v18  ;;  %v11182_v21 = vsel %vm7428_vm7, 4294967295, %v11181_v21  ;;  %v11184_v30 = vmin.f32 %v7305_v50, %v7303_v47  ;;  %v11185_v15 = vmax.f32 %v7305_v50, %v7303_v47  ;;  %v1337_v19 = vmax.f32 %v7354_v6, %v7295_v38  ;;  %5929 = vmatprep.mubr.msk.f32.mxu0 %vm7428_vm7, %v10765_v0 }
  0xa8   : > { %11183 = vst [vmem:[#allocation25_spill] sm:$0xff] %v11182_v21  ;;  %v1967_v20 = vmul.f32 0.5, %v1626_v1  ;;  %v1193_v29 = vsub.f32 %v649_v24, %v1049_v9  ;;  %v1481_v46 = vmin.f32 %v7352_v8, %v7308_v54  ;;  %v653_v51 = vmin.f32 %v7377_v60, %v7298_v41  ;;  %v7460_v24 = vpop.permute.xlu1 %813 }
  0xa9   : > { %v1189_v61 = vsub.f32 %v11184_v30, %v1045_v2  ;;  %v1621_v14 = vsub.f32 %v11185_v15, %v1477_v26  ;;  %v1053_v37 = vmax.f32 %v7368_v3, %v7311_v55  ;;  %v1341_v42 = vmax.f32 %v7377_v60, %v7298_v41  ;;  %v7464_v30 = vpop.permute.xlu0 %413  ;;  %973 = vperm.xlu1 %6778, %v325_v56  }
  0xaa   : > { %v11186_v33 = vmov 0.0|0.0   ;;  %vm7456_vm9 = vcmp.gt.f32.partialorder %v1823_v4, %v1967_v20  ;;  %v11187_v2 = vmov 0  ;;  %v1625_v26 = vsub.f32 %v1337_v19, %v1481_v46  ;;  %573 = vperm.xlu0 %6777, %v373_v62  }
  0xab   : > { %v1818_v59 = vmax.f32 %v1189_v61, 0.0  ;;  %v1962_v50 = vmul.f32 0.5, %v1621_v14  ;;  %6627 = vmatprep.subr.bf16.mxu1 %v11186_v33  ;;  %v11188_v2 = vsel %vm7456_vm9, 4294967295, %v11187_v2  ;;  %v1822_v1 = vmax.f32 %v1193_v29, 0.0  ;;  %6404 = vmatprep.mubr.msk.f32.mxu1 %vm7456_vm9, %v10765_v0 }
  0xac   : > { %11189 = vst [vmem:[#allocation26_spill] sm:$0xff] %v11188_v2  ;;  %v1485_v9 = vmin.f32 %v7368_v3, %v7311_v55  ;;  %6628 = vmatpush1.bf16.msra.mxu1 %v11180_v18  ;;  %v1197_v4 = vsub.f32 %v653_v51, %v1053_v37  ;;  %v648_v61 = vmin.f32 %v7354_v6, %v7303_v47  ;;  %v1966_v14 = vmul.f32 0.5, %v1625_v26  ;;  %v7501_v26 = vpop.permute.xlu1 %818 }
  0xad   : > { %vm2106_vm10 = vcmp.gt.f32.partialorder %v1818_v59, %v1962_v50  ;;  %v1048_v20 = vmax.f32 %v7352_v8, %v7314_v58  ;;  %v1336_v29 = vmax.f32 %v7354_v6, %v7303_v47  ;;  %6629 = vmatprep.subr.bf16.mxu1 %v11186_v33  ;;  %v1480_v46 = vmin.f32 %v7352_v8, %v7314_v58  ;;  %v326_v59 = vld [vmem:[%s6949_s27 + $0x130] sm:$0xff]  ;;  %v7503_v8 = vpop.permute.xlu0 %418 }
  0xae   : > { %vm7475_vm11 = vmand %vm2106_vm10, %vm2250_vm2  ;;  %v1629_v19 = vsub.f32 %v1341_v42, %v1485_v9  ;;  %v1826_v10 = vmax.f32 %v1197_v4, 0.0  ;;  %v652_v51 = vmin.f32 %v7377_v60, %v7295_v38  ;;  %v1052_v56 = vmax.f32 %v7368_v3, %v7308_v54  ;;  %v374_v50 = vld [vmem:[%s6944_s24 + $0x130] sm:$0xff]  ;;  %978 = vperm.xlu1 %6778, %v326_v59  }
  0xaf   : > { %5930 = vmatmul.mubr.msk.f32.gmra.mrb[2].mxu0 %vm7475_vm11, %v10765_v0  ;;  %vm7495_vm12 = vcmp.gt.f32.partialorder %v1822_v1, %v1966_v14  ;;  %v11192_v6 = vmov 0  ;;  %v1192_v42 = vsub.f32 %v648_v61, %v1048_v20  ;;  %v1340_v62 = vmax.f32 %v7377_v60, %v7295_v38  ;;  %578 = vperm.xlu0 %6777, %v374_v50  }
  0xb0   : > { %v11193_v6 = vsel %vm7495_vm12, 4294967295, %v11192_v6  ;;  %v1970_v37 = vmul.f32 0.5, %v1629_v19  ;;  %6630 = vmatpush1.bf16.msra.mxu1 %v11180_v18  ;;  %5931 = vmatprep.mubr.msk.f32.mxu0 %vm7495_vm12, %v10765_v0  ;;  %v1624_v9 = vsub.f32 %v1336_v29, %v1480_v46  ;;  %v1196_v1 = vsub.f32 %v652_v51, %v1052_v56 }
  0xb1   : > { %11194 = vst [vmem:[#allocation27_spill] sm:$0xff] %v11193_v6  ;;  %v1484_v4 = vmin.f32 %v7368_v3, %v7308_v54  ;;  %v656_v61 = vmin.f32 %v7421_v5, %v7298_v41  ;;  %v11195_v14 = vmov 0  ;;  %v1821_v19 = vmax.f32 %v1192_v42, 0.0  ;;  %v375_v42 = vld [vmem:[%s6944_s24 + $0x138] sm:$0xff]  ;;  %6631 = vmatprep.subr.bf16.mxu1 %v11186_v33 }
  0xb2   : > { %vm7515_vm14 = vcmp.gt.f32.partialorder %v1826_v10, %v1970_v37  ;;  %v1056_v20 = vmax.f32 %v7419_v63, %v7311_v55  ;;  %v1344_v29 = vmax.f32 %v7421_v5, %v7298_v41  ;;  %v1965_v46 = vmul.f32 0.5, %v1624_v9  ;;  %v327_v37 = vld [vmem:[%s6949_s27 + $0x138] sm:$0xff]  ;;  %v7537_v9 = vpop.permute.xlu1 %823 }
  0xb3   : > { %v11196_v14 = vsel %vm7515_vm14, 4294967295, %v11195_v14  ;;  %6405 = vmatmul.mubr.msk.f32.gmra.mrb[2].mxu1 %vm7515_vm14, %v10765_v0  ;;  %v1628_v51 = vsub.f32 %v1340_v62, %v1484_v4  ;;  %v1825_v56 = vmax.f32 %v1196_v1, 0.0  ;;  %v1488_v10 = vmin.f32 %v7419_v63, %v7311_v55  ;;  %v7539_v62 = vpop.permute.xlu0 %423  ;;  %983 = vperm.xlu1 %6778, %v327_v37  }
  0xb4   : > { %11197 = vst [vmem:[#allocation28_spill] sm:$0xff] %v11196_v14  ;;  %v1200_v2 = vsub.f32 %v656_v61, %v1056_v20  ;;  %v651_v57 = vmin.f32 %v7377_v60, %v7303_v47  ;;  %v1051_v59 = vmax.f32 %v7368_v3, %v7314_v58  ;;  %v1339_v50 = vmax.f32 %v7377_v60, %v7303_v47 }
  0xb5   : > { %6632 = vmatpush1.bf16.msra.mxu1 %v11180_v18  ;;  %vm2109_vm15 = vcmp.gt.f32.partialorder %v1821_v19, %v1965_v46  ;;  %v1969_v1 = vmul.f32 0.5, %v1628_v51  ;;  %v1632_v4 = vsub.f32 %v1344_v29, %v1488_v10  ;;  %v1483_v61 = vmin.f32 %v7368_v3, %v7314_v58  ;;  %583 = vperm.xlu0 %6777, %v375_v42   ;;  %v328_v51 = vld [vmem:[%s6949_s27 + $0x140] sm:$0xff] }
  0xb6   : > { %6633 = vmatprep.subr.bf16.mxu1 %v11186_v33  ;;  %vm7548_vm0 = vmand %vm2109_vm15, %vm2253_vm8  ;;  %v11198_v60 = vmov 0  ;;  %v1829_v20 = vmax.f32 %v1200_v2, 0.0  ;;  %v1195_v0 = vsub.f32 %v651_v57, %v1051_v59  ;;  %v655_v19 = vmin.f32 %v7421_v5, %v7295_v38  ;;  %v7575_v59 = vpop.permute.xlu1 %828 }
  0xb7   : > { %v11199_v60 = vsel %vm7548_vm0, 4294967295, %v11198_v60  ;;  %v1055_v29 = vmax.f32 %v7419_v63, %v7308_v54  ;;  %v11201_v3 = vmov 1.0   ;;  %vm7559_vm2 = vcmp.gt.f32.partialorder %v1825_v56, %v1969_v1  ;;  %v376_v1 = vld [vmem:[%s6944_s24 + $0x140] sm:$0xff]  ;;  %988 = vperm.xlu1 %6778, %v328_v51  }
  0xb8   : > { %11200 = vst [vmem:[#allocation29_spill] sm:$0xff] %v11199_v60  ;;  %5932 = vmatmul.mubr.msk.f32.gmra.mrb[4].mxu0 %vm7548_vm0, %v11201_v3  ;;  %v11203_v12 = vsel %vm7559_vm2, 4294967295, %v11202_v12  ;;  %v1973_v46 = vmul.f32 0.5, %v1632_v4  ;;  %v1627_v2 = vsub.f32 %v1339_v50, %v1483_v61  ;;  %v1343_v57 = vmax.f32 %v7421_v5, %v7295_v38  ;;  %v7577_v50 = vpop.permute.xlu0 %428 }
  0xb9   : > { %11204 = vst [vmem:[#allocation30_spill] sm:$0xff] %v11203_v12  ;;  %5933 = vmatprep.mubr.msk.f32.mxu0 %vm7559_vm2, %v11201_v3  ;;  %v1824_v10 = vmax.f32 %v1195_v0, 0.0  ;;  %v1199_v37 = vsub.f32 %v655_v19, %v1055_v29  ;;  %v1487_v42 = vmin.f32 %v7419_v63, %v7308_v54  ;;  %v659_v56 = vmin.f32 %v7464_v30, %v7298_v41 }
  0xba   : > { %6634 = vmatpush1.bf16.msra.mxu1 %v11180_v18  ;;  %vm7581_vm8 = vcmp.gt.f32.partialorder %v1829_v20, %v1973_v46  ;;  %v11205_v4 = vmov 0  ;;  %v1968_v0 = vmul.f32 0.5, %v1627_v2  ;;  %v1059_v61 = vmax.f32 %v7460_v24, %v7311_v55  ;;  %588 = vperm.xlu0 %6777, %v376_v1   ;;  %v377_v1 = vld [vmem:[%s6944_s24 + $0x148] sm:$0xff] }
  0xbb   : > { %v11206_v4 = vsel %vm7581_vm8, 4294967295, %v11205_v4  ;;  %v1347_v19 = vmax.f32 %v7464_v30, %v7298_v41  ;;  %6635 = vmatprep.subr.bf16.mxu1 %v11186_v33  ;;  %6407 = vmatprep.mubr.msk.f32.mxu1 %vm7581_vm8, %v11201_v3  ;;  %v1631_v29 = vsub.f32 %v1343_v57, %v1487_v42  ;;  %v1828_v14 = vmax.f32 %v1199_v37, 0.0 }
  0xbc   : > { %11207 = vst [vmem:[#allocation31_spill] sm:$0xff] %v11206_v4  ;;  %v1491_v20 = vmin.f32 %v7460_v24, %v7311_v55  ;;  %v654_v46 = vmin.f32 %v7421_v5, %v7303_v47  ;;  %vm2112_vm10 = vcmp.gt.f32.partialorder %v1824_v10, %v1968_v0  ;;  %v1203_v2 = vsub.f32 %v659_v56, %v1059_v61  ;;  %v329_v4 = vld [vmem:[%s6949_s27 + $0x148] sm:$0xff]  ;;  %v7613_v56 = vpop.permute.xlu1 %833 }
  0xbd   : > { %v1054_v34 = vmax.f32 %v7419_v63, %v7314_v58  ;;  %v1342_v25 = vmax.f32 %v7421_v5, %v7303_v47  ;;  %vm7605_vm15 = vmand %vm2112_vm10, %vm2256_vm13  ;;  %v11208_v57 = vmov 0  ;;  %v1972_v37 = vmul.f32 0.5, %v1631_v29  ;;  %v7615_v5 = vpop.permute.xlu0 %433  ;;  %993 = vperm.xlu1 %6778, %v329_v4  }
  0xbe   : > { %v11209_v57 = vsel %vm7605_vm15, 4294967295, %v11208_v57  ;;  %v1635_v42 = vsub.f32 %v1347_v19, %v1491_v20  ;;  %v1486_v51 = vmin.f32 %v7419_v63, %v7314_v58  ;;  %v658_v10 = vmin.f32 %v7464_v30, %v7295_v38  ;;  %6636 = vmatpush1.bf16.msra.mxu1 %v11180_v18  ;;  %5934 = vmatmul.mubr.msk.f32.gmra.mrb[6].mxu0 %vm7605_vm15, %v11201_v3 }
  0xbf   : > { %11210 = vst [vmem:[#allocation32_spill] sm:$0xff] %v11209_v57  ;;  %v1832_v13 = vmax.f32 %v1203_v2, 0.0  ;;  %v1198_v0 = vsub.f32 %v654_v46, %v1054_v34  ;;  %v1058_v63 = vmax.f32 %v7460_v24, %v7308_v54  ;;  %v1346_v61 = vmax.f32 %v7464_v30, %v7295_v38  ;;  %6637 = vmatprep.subr.bf16.mxu1 %v11186_v33 }
  0xc0   : > { %vm7627_vm13 = vcmp.gt.f32.partialorder %v1828_v14, %v1972_v37  ;;  %v11211_v19 = vmov 0  ;;  %v1976_v29 = vmul.f32 0.5, %v1635_v42  ;;  %v1630_v20 = vsub.f32 %v1342_v25, %v1486_v51  ;;  %593 = vperm.xlu0 %6777, %v377_v1   ;;  %v330_v25 = vld [vmem:[%s6949_s27 + $0x150] sm:$0xff] }
  0xc1   : > { %v11212_v19 = vsel %vm7627_vm13, 4294967295, %v11211_v19  ;;  %v1490_v12 = vmin.f32 %v7460_v24, %v7308_v54  ;;  %5935 = vmatprep.mubr.msk.f32.mxu0 %vm7627_vm13, %v11201_v3  ;;  %v1827_v34 = vmax.f32 %v1198_v0, 0.0  ;;  %v1202_v46 = vsub.f32 %v658_v10, %v1058_v63  ;;  %v7649_v10 = vpop.permute.xlu1 %838  ;;  %v7651_v0 = vpop.permute.xlu0 %438  ;;  %v378_v63 = vld [vmem:[%s6944_s24 + $0x150] sm:$0xff]  ;;  %998 = vperm.xlu1 %6778, %v330_v25  }
  0xc2   : > { %11213 = vst [vmem:[#allocation33_spill] sm:$0xff] %v11212_v19  ;;  %v662_v2 = vmin.f32 %v7503_v8, %v7298_v41  ;;  %v1062_v14 = vmax.f32 %v7501_v26, %v7311_v55  ;;  %vm7643_vm4 = vcmp.gt.f32.partialorder %v1832_v13, %v1976_v29  ;;  %v11214_v37 = vmov 0  ;;  %6638 = vmatpush1.bf16.msra.mxu1 %v11180_v18 }
  0xc3   : > { %v11215_v37 = vsel %vm7643_vm4, 4294967295, %v11214_v37  ;;  %v1971_v4 = vmul.f32 0.5, %v1630_v20  ;;  %v1634_v42 = vsub.f32 %v1346_v61, %v1490_v12  ;;  %v1350_v51 = vmax.f32 %v7503_v8, %v7298_v41  ;;  %6408 = vmatmul.mubr.msk.f32.gmra.mrb[4].mxu1 %vm7643_vm4, %v11201_v3  ;;  %6639 = vmatprep.subr.bf16.mxu1 %v11186_v33 }
  0xc4   : > { %11216 = vst [vmem:[#allocation34_spill] sm:$0xff] %v11215_v37  ;;  %v1831_v1 = vmax.f32 %v1202_v46, 0.0  ;;  %v1206_v13 = vsub.f32 %v662_v2, %v1062_v14  ;;  %v1494_v12 = vmin.f32 %v7501_v26, %v7311_v55  ;;  %v657_v61 = vmin.f32 %v7464_v30, %v7303_v47  ;;  %598 = vperm.xlu0 %6777, %v378_v63   ;;  %v379_v63 = vld [vmem:[%s6944_s24 + $0x158] sm:$0xff] }
  0xc5   : > { %vm2115_vm10 = vcmp.gt.f32.partialorder %v1827_v34, %v1971_v4  ;;  %v1975_v29 = vmul.f32 0.5, %v1634_v42  ;;  %v1057_v20 = vmax.f32 %v7460_v24, %v7314_v58  ;;  %v1345_v37 = vmax.f32 %v7464_v30, %v7303_v47  ;;  %v331_v42 = vld [vmem:[%s6949_s27 + $0x158] sm:$0xff] }
  0xc6   : > { %vm11217_vm4 = vcmp.gt.s32.totalorder %v6972_v11, %v6991_v16  ;;  %v11218_v46 = vmov 0  ;;  %v1638_v2 = vsub.f32 %v1350_v51, %v1494_v12  ;;  %v1835_v14 = vmax.f32 %v1206_v13, 0.0  ;;  %v7690_v51 = vpop.permute.xlu1 %843  ;;  %v7692_v13 = vpop.permute.xlu0 %443  ;;  %6640 = vmatpush1.bf16.msra.mxu1 %v11180_v18  ;;  %1003 = vperm.xlu1 %6778, %v331_v42  }
  0xc7   : > { %vm7670_vm8 = vmand %vm2115_vm10, %vm11217_vm4  ;;  %v1489_v34 = vmin.f32 %v7460_v24, %v7314_v58  ;;  %v661_v4 = vmin.f32 %v7503_v8, %v7295_v38  ;;  %vm7682_vm14 = vcmp.gt.f32.partialorder %v1831_v1, %v1975_v29  ;;  %v11221_v16 = vmov 0  ;;  %6641 = vmatprep.subr.bf16.mxu1 %v11186_v33 }
  0xc8   : > { %v11219_v46 = vsel %vm7670_vm8, 4294967295, %v11218_v46  ;;  %5936 = vmatmul.mubr.msk.f32.gmra.mrb[8].mxu0 %vm7670_vm8, %v11201_v3  ;;  %v11222_v16 = vsel %vm7682_vm14, 4294967295, %v11221_v16  ;;  %v1201_v30 = vsub.f32 %v657_v61, %v1057_v20  ;;  %v1061_v25 = vmax.f32 %v7501_v26, %v7308_v54  ;;  %603 = vperm.xlu0 %6777, %v379_v63  }
  0xc9   : > { %11220 = vst [vmem:[#allocation35_spill] sm:$0xff] %v11219_v46  ;;  %11223 = vst [vmem:[#allocation36_spill] sm:$0xff] %v11222_v16  ;;  %v1349_v24 = vmax.f32 %v7503_v8, %v7295_v38  ;;  %5937 = vmatprep.mubr.msk.f32.mxu0 %vm7682_vm14, %v11201_v3  ;;  %v1979_v1 = vmul.f32 0.5, %v1638_v2  ;;  %v1633_v12 = vsub.f32 %v1345_v37, %v1489_v34  ;;  %v11224_v37 = vmov 0 }
  0xca   : > { %v1493_v61 = vmin.f32 %v7501_v26, %v7308_v54  ;;  %v665_v29 = vmin.f32 %v7539_v62, %v7298_v41  ;;  %v1830_v20 = vmax.f32 %v1201_v30, 0.0  ;;  %v1205_v19 = vsub.f32 %v661_v4, %v1061_v25  ;;  %v332_v30 = vld [vmem:[%s6949_s27 + $0x160] sm:$0xff]  ;;  %6642 = vmatpush1.bf16.msra.mxu1 %v11180_v18 }
  0xcb   : > { %v1065_v46 = vmax.f32 %v7537_v9, %v7311_v55  ;;  %v1353_v16 = vmax.f32 %v7539_v62, %v7298_v41  ;;  %vm7710_vm10 = vcmp.gt.f32.partialorder %v1835_v14, %v1979_v1  ;;  %v1974_v2 = vmul.f32 0.5, %v1633_v12  ;;  %v7724_v1 = vpop.permute.xlu1 %848  ;;  %v380_v12 = vld [vmem:[%s6944_s24 + $0x160] sm:$0xff]  ;;  %1008 = vperm.xlu1 %6778, %v332_v30   ;;  %6643 = vmatprep.subr.bf16.mxu1 %v11186_v33 }
  0xcc   : > { %v11225_v37 = vsel %vm7710_vm10, 4294967295, %v11224_v37  ;;  %v1637_v34 = vsub.f32 %v1349_v24, %v1493_v61  ;;  %v1497_v4 = vmin.f32 %v7537_v9, %v7311_v55  ;;  %6410 = vmatprep.mubr.msk.f32.mxu1 %vm7710_vm10, %v11201_v3  ;;  %v1834_v25 = vmax.f32 %v1205_v19, 0.0  ;;  %v7726_v24 = vpop.permute.xlu0 %448  ;;  %608 = vperm.xlu0 %6777, %v380_v12   ;;  %v381_v12 = vld [vmem:[%s6944_s24 + $0x168] sm:$0xff] }
  0xcd   : > { %11226 = vst [vmem:[#allocation37_spill] sm:$0xff] %v11225_v37  ;;  %v1209_v57 = vsub.f32 %v665_v29, %v1065_v46  ;;  %v660_v42 = vmin.f32 %v7503_v8, %v7303_v47  ;;  %v1060_v14 = vmax.f32 %v7501_v26, %v7314_v58  ;;  %vm2118_vm4 = vcmp.gt.f32.partialorder %v1830_v20, %v1974_v2  ;;  %v333_v2 = vld [vmem:[%s6949_s27 + $0x168] sm:$0xff] }
  0xce   : > { %v1978_v63 = vmul.f32 0.5, %v1637_v34  ;;  %v1641_v61 = vsub.f32 %v1353_v16, %v1497_v4  ;;  %v1348_v37 = vmax.f32 %v7503_v8, %v7303_v47  ;;  %vm11227_vm10 = vcmp.gt.s32.totalorder %v6972_v11, %v6994_v17  ;;  %6644 = vmatpush1.bf16.msra.mxu1 %v11180_v18 }
  0xcf   : > { %vm7735_vm9 = vmand %vm2118_vm4, %vm11227_vm10  ;;  %v11228_v19 = vmov 0  ;;  %v1838_v46 = vmax.f32 %v1209_v57, 0.0  ;;  %v1204_v29 = vsub.f32 %v660_v42, %v1060_v14  ;;  %v1492_v20 = vmin.f32 %v7501_v26, %v7314_v58  ;;  %v7765_v42 = vpop.permute.xlu1 %853  ;;  %1013 = vperm.xlu1 %6778, %v333_v2   ;;  %6645 = vmatprep.subr.bf16.mxu1 %v11186_v33 }
  0xd0   : > { %v11229_v19 = vsel %vm7735_vm9, 4294967295, %v11228_v19  ;;  %v664_v16 = vmin.f32 %v7539_v62, %v7295_v38  ;;  %5938 = vmatmul.mubr.msk.f32.gmra.mrb[10].mxu0 %vm7735_vm9, %v11201_v3  ;;  %vm7747_vm4 = vcmp.gt.f32.partialorder %v1834_v25, %v1978_v63  ;;  %v11231_v17 = vmov 0  ;;  %v7767_v14 = vpop.permute.xlu0 %453  ;;  %613 = vperm.xlu0 %6777, %v381_v12  }
  0xd1   : > { %11230 = vst [vmem:[#allocation38_spill] sm:$0xff] %v11229_v19  ;;  %v11232_v17 = vsel %vm7747_vm4, 4294967295, %v11231_v17  ;;  %v1982_v8 = vmul.f32 0.5, %v1641_v61  ;;  %v1064_v57 = vmax.f32 %v7537_v9, %v7308_v54  ;;  %v1352_v26 = vmax.f32 %v7539_v62, %v7295_v38  ;;  %5939 = vmatprep.mubr.msk.f32.mxu0 %vm7747_vm4, %v11201_v3 }
  0xd2   : > { %11233 = vst [vmem:[#allocation39_spill] sm:$0xff] %v11232_v17  ;;  %v1636_v34 = vsub.f32 %v1348_v37, %v1492_v20  ;;  %v1833_v4 = vmax.f32 %v1204_v29, 0.0  ;;  %v1496_v30 = vmin.f32 %v7537_v9, %v7308_v54  ;;  %v668_v25 = vmin.f32 %v7577_v50, %v7298_v41  ;;  %6646 = vmatpush1.bf16.msra.mxu1 %v11180_v18 }
  0xd3   : > { %vm7770_vm3 = vcmp.gt.f32.partialorder %v1838_v46, %v1982_v8  ;;  %v11234_v63 = vmov 0  ;;  %v1208_v37 = vsub.f32 %v664_v16, %v1064_v57  ;;  %v1068_v61 = vmax.f32 %v7575_v59, %v7311_v55  ;;  %v7794_v6 = vpop.permute.xlu1 %858  ;;  %6647 = vmatprep.subr.bf16.mxu1 %v11186_v33 }
  0xd4   : > { %v11235_v63 = vsel %vm7770_vm3, 4294967295, %v11234_v63  ;;  %v1356_v29 = vmax.f32 %v7577_v50, %v7298_v41  ;;  %6411 = vmatmul.mubr.msk.f32.gmra.mrb[6].mxu1 %vm7770_vm3, %v11201_v3  ;;  %v1977_v20 = vmul.f32 0.5, %v1636_v34  ;;  %v1640_v17 = vsub.f32 %v1352_v26, %v1496_v30  ;;  %v7796_v2 = vpop.permute.xlu0 %458 }
  0xd5   : > { %11236 = vst [vmem:[#allocation40_spill] sm:$0xff] %v11235_v63  ;;  %v1500_v46 = vmin.f32 %v7575_v59, %v7311_v55  ;;  %v663_v16 = vmin.f32 %v7539_v62, %v7303_v47  ;;  %v1837_v8 = vmax.f32 %v1208_v37, 0.0  ;;  %v1212_v57 = vsub.f32 %v668_v25, %v1068_v61  ;;  %v334_v63 = vld [vmem:[%s6949_s27 + $0x170] sm:$0xff] }
  0xd6   : > { %v1063_v19 = vmax.f32 %v7537_v9, %v7314_v58  ;;  %v1351_v53 = vmax.f32 %v7539_v62, %v7303_v47  ;;  %vm2121_vm10 = vcmp.gt.f32.partialorder %v1833_v4, %v1977_v20  ;;  %v1981_v26 = vmul.f32 0.5, %v1640_v17  ;;  %v382_v25 = vld [vmem:[%s6944_s24 + $0x170] sm:$0xff]  ;;  %1018 = vperm.xlu1 %6778, %v334_v63   ;;  %6648 = vmatpush1.bf16.msra.mxu1 %v11180_v18 }
  0xd7   : > { %v1644_v34 = vsub.f32 %v1356_v29, %v1500_v46  ;;  %v1495_v30 = vmin.f32 %v7537_v9, %v7314_v58  ;;  %vm11237_vm3 = vcmp.gt.s32.totalorder %v6972_v11, %v7058_v22  ;;  %v11238_v62 = vmov 0  ;;  %618 = vperm.xlu0 %6777, %v382_v25   ;;  %6649 = vmatprep.subr.bf16.mxu1 %v11186_v33 }
  0xd8   : > { %vm7802_vm6 = vmand %vm2121_vm10, %vm11237_vm3  ;;  %v1841_v12 = vmax.f32 %v1212_v57, 0.0  ;;  %v1207_v37 = vsub.f32 %v663_v16, %v1063_v19  ;;  %v667_v17 = vmin.f32 %v7577_v50, %v7295_v38  ;;  %v1067_v9 = vmax.f32 %v7575_v59, %v7308_v54 }
  0xd9   : > { %v11239_v62 = vsel %vm7802_vm6, 4294967295, %v11238_v62  ;;  %5940 = vmatmul.mubr.msk.f32.gmra.mrb[12].mxu0 %vm7802_vm6, %v11201_v3  ;;  %vm7814_vm5 = vcmp.gt.f32.partialorder %v1837_v8, %v1981_v26  ;;  %v11241_v22 = vmov 0  ;;  %v1985_v4 = vmul.f32 0.5, %v1644_v34  ;;  %v7838_v34 = vpop.permute.xlu1 %863 }
  0xda   : > { %11240 = vst [vmem:[#allocation41_spill] sm:$0xff] %v11239_v62  ;;  %v11242_v22 = vsel %vm7814_vm5, 4294967295, %v11241_v22  ;;  %v1639_v61 = vsub.f32 %v1351_v53, %v1495_v30  ;;  %v1355_v19 = vmax.f32 %v7577_v50, %v7295_v38  ;;  %5941 = vmatprep.mubr.msk.f32.mxu0 %vm7814_vm5, %v11201_v3  ;;  %v1836_v29 = vmax.f32 %v1207_v37, 0.0  ;;  %v335_v53 = vld [vmem:[%s6949_s27 + $0x178] sm:$0xff]  ;;  %v7840_v30 = vpop.permute.xlu0 %463  ;;  %6650 = vmatpush1.bf16.msra.mxu1 %v11180_v18  ;;  %v8483_v62 = vld [vmem:[#allocation2 + $0x180] sm:$0xff] }
  0xdb   : > { %11243 = vst [vmem:[#allocation42_spill] sm:$0xff] %v11242_v22  ;;  %v1211_v20 = vsub.f32 %v667_v17, %v1067_v9  ;;  %v1499_v46 = vmin.f32 %v7575_v59, %v7308_v54  ;;  %v671_v16 = vmin.f32 %v7615_v5, %v7298_v41  ;;  %vm7830_vm10 = vcmp.gt.f32.partialorder %v1841_v12, %v1985_v4  ;;  %v383_v37 = vld [vmem:[%s6944_s24 + $0x178] sm:$0xff] }
  0xdc   : > { %v11244_v8 = vmov 0  ;;  %v1980_v63 = vmul.f32 0.5, %v1639_v61  ;;  %v1071_v57 = vmax.f32 %v7613_v56, %v7311_v55  ;;  %v1359_v26 = vmax.f32 %v7615_v5, %v7298_v41  ;;  %6413 = vmatprep.mubr.msk.f32.mxu1 %vm7830_vm10, %v11201_v3  ;;  %1023 = vperm.xlu1 %6778, %v335_v53  }
  0xdd   : > { %v11245_v8 = vsel %vm7830_vm10, 4294967295, %v11244_v8  ;;  %v1643_v25 = vsub.f32 %v1355_v19, %v1499_v46  ;;  %v1840_v12 = vmax.f32 %v1211_v20, 0.0  ;;  %v1503_v17 = vmin.f32 %v7613_v56, %v7311_v55  ;;  %623 = vperm.xlu0 %6777, %v383_v37   ;;  %6651 = vmatprep.subr.bf16.mxu1 %v11186_v33 }
  0xde   : > { %11246 = vst [vmem:[#allocation43_spill] sm:$0xff] %v11245_v8  ;;  %v666_v9 = vmin.f32 %v7577_v50, %v7303_v47  ;;  %vm2124_vm3 = vcmp.gt.f32.partialorder %v1836_v29, %v1980_v63  ;;  %v1215_v4 = vsub.f32 %v671_v16, %v1071_v57  ;;  %v1066_v61 = vmax.f32 %v7575_v59, %v7314_v58  ;;  %v7875_v57 = vpop.permute.xlu1 %868 }
  0xdf   : > { %v1354_v22 = vmax.f32 %v7577_v50, %v7303_v47  ;;  %vm11247_vm10 = vcmp.gt.s32.totalorder %v6972_v11, %v7061_v23  ;;  %v11248_v19 = vmov 0  ;;  %v1984_v20 = vmul.f32 0.5, %v1643_v25  ;;  %6652 = vmatpush1.bf16.msra.mxu1 %v11180_v18 }
  0xe0   : > { %vm7859_vm5 = vmand %vm2124_vm3, %vm11247_vm10  ;;  %v1647_v46 = vsub.f32 %v1359_v26, %v1503_v17  ;;  %v1498_v29 = vmin.f32 %v7575_v59, %v7314_v58  ;;  %v670_v16 = vmin.f32 %v7615_v5, %v7295_v38  ;;  %v1844_v23 = vmax.f32 %v1215_v4, 0.0  ;;  %v7877_v59 = vpop.permute.xlu0 %468  ;;  %6653 = vmatprep.subr.bf16.mxu1 %v11186_v33 }
  0xe1   : > { %v11249_v19 = vsel %vm7859_vm5, 4294967295, %v11248_v19  ;;  %5942 = vmatmul.mubr.msk.f32.gmra.mrb[14].mxu0 %vm7859_vm5, %v11201_v3  ;;  %v1210_v50 = vsub.f32 %v666_v9, %v1066_v61  ;;  %v1070_v53 = vmax.f32 %v7613_v56, %v7308_v54  ;;  %v1358_v63 = vmax.f32 %v7615_v5, %v7295_v38 }
  0xe2   : > { %11250 = vst [vmem:[#allocation44_spill] sm:$0xff] %v11249_v19  ;;  %vm7879_vm3 = vcmp.gt.f32.partialorder %v1840_v12, %v1984_v20  ;;  %v11251_v26 = vmov 0  ;;  %v1988_v37 = vmul.f32 0.5, %v1647_v46  ;;  %v1642_v25 = vsub.f32 %v1354_v22, %v1498_v29 }
  0xe3   : > { %v11252_v26 = vsel %vm7879_vm3, 4294967295, %v11251_v26  ;;  %v1502_v17 = vmin.f32 %v7613_v56, %v7308_v54  ;;  %5943 = vmatprep.mubr.msk.f32.mxu0 %vm7879_vm3, %v11201_v3  ;;  %v1839_v9 = vmax.f32 %v1210_v50, 0.0  ;;  %v1214_v4 = vsub.f32 %v670_v16, %v1070_v53  ;;  %6654 = vmatpush1.bf16.msra.mxu1 %v11180_v18 }
  0xe4   : > { %11253 = vst [vmem:[#allocation45_spill] sm:$0xff] %v11252_v26  ;;  %v674_v61 = vmin.f32 %v7651_v0, %v7298_v41  ;;  %v1074_v12 = vmax.f32 %v7649_v10, %v7311_v55  ;;  %vm7896_vm5 = vcmp.gt.f32.partialorder %v1844_v23, %v1988_v37  ;;  %v11254_v22 = vmov 0  ;;  %v7909_v37 = vpop.permute.xlu1 %873  ;;  %v7911_v8 = vpop.permute.xlu0 %473  ;;  %6655 = vmatprep.subr.bf16.mxu1 %v11186_v33 }
  0xe5   : > { %v11255_v22 = vsel %vm7896_vm5, 4294967295, %v11254_v22  ;;  %v1983_v20 = vmul.f32 0.5, %v1642_v25  ;;  %v1646_v46 = vsub.f32 %v1358_v63, %v1502_v17  ;;  %v1362_v29 = vmax.f32 %v7651_v0, %v7298_v41  ;;  %6414 = vmatmul.mubr.msk.f32.gmra.mrb[8].mxu1 %vm7896_vm5, %v11201_v3 }
  0xe6   : > { %11256 = vst [vmem:[#allocation46_spill] sm:$0xff] %v11255_v22  ;;  %v1843_v16 = vmax.f32 %v1214_v4, 0.0  ;;  %v1218_v50 = vsub.f32 %v674_v61, %v1074_v12  ;;  %v1506_v53 = vmin.f32 %v7649_v10, %v7311_v55  ;;  %v669_v23 = vmin.f32 %v7615_v5, %v7303_v47 }
  0xe7   : > { %vm2127_vm10 = vcmp.gt.f32.partialorder %v1839_v9, %v1983_v20  ;;  %v1987_v63 = vmul.f32 0.5, %v1646_v46  ;;  %v1069_v25 = vmax.f32 %v7613_v56, %v7314_v58  ;;  %v1357_v17 = vmax.f32 %v7615_v5, %v7303_v47  ;;  %6656 = vmatpush1.bf16.msra.mxu1 %v11180_v18 }
  0xe8   : > { %vm11257_vm5 = vcmp.gt.s32.totalorder %v6972_v11, %v7076_v27  ;;  %v11258_v4 = vmov 0  ;;  %v1650_v61 = vsub.f32 %v1362_v29, %v1506_v53  ;;  %v1847_v12 = vmax.f32 %v1218_v50, 0.0 }
  0xe9   : > { %vm7921_vm3 = vmand %vm2127_vm10, %vm11257_vm5  ;;  %v1501_v9 = vmin.f32 %v7613_v56, %v7314_v58  ;;  %v673_v20 = vmin.f32 %v7651_v0, %v7295_v38  ;;  %vm7933_vm4 = vcmp.gt.f32.partialorder %v1843_v16, %v1987_v63  ;;  %v11261_v27 = vmov 0  ;;  %v7948_v63 = vpop.permute.xlu1 %878 }
  0xea   : > { %v11259_v4 = vsel %vm7921_vm3, 4294967295, %v11258_v4  ;;  %5944 = vmatmul.mubr.msk.f32.gmra.mrb[16].mxu0 %vm7921_vm3, %v11201_v3  ;;  %v11262_v27 = vsel %vm7933_vm4, 4294967295, %v11261_v27  ;;  %v1213_v5 = vsub.f32 %v669_v23, %v1069_v25  ;;  %v1073_v46 = vmax.f32 %v7649_v10, %v7308_v54  ;;  %v7950_v23 = vpop.permute.xlu0 %478 }
  0xeb   : > { %11260 = vst [vmem:[#allocation47_spill] sm:$0xff] %v11259_v4  ;;  %11263 = vst [vmem:[#allocation48_spill] sm:$0xff] %v11262_v27  ;;  %v1361_v56 = vmax.f32 %v7651_v0, %v7295_v38  ;;  %5945 = vmatprep.mubr.msk.f32.mxu0 %vm7933_vm4, %v11201_v3  ;;  %v1991_v29 = vmul.f32 0.5, %v1650_v61  ;;  %v1645_v50 = vsub.f32 %v1357_v17, %v1501_v9  ;;  %v11264_v17 = vmov 0 }
  0xec   : > { %v1505_v53 = vmin.f32 %v7649_v10, %v7308_v54  ;;  %v677_v16 = vmin.f32 %v7692_v13, %v7298_v41  ;;  %v1842_v25 = vmax.f32 %v1213_v5, 0.0  ;;  %v1217_v22 = vsub.f32 %v673_v20, %v1073_v46 }
  0xed   : > { %v1077_v26 = vmax.f32 %v7690_v51, %v7311_v55  ;;  %v1365_v27 = vmax.f32 %v7692_v13, %v7298_v41  ;;  %vm7959_vm10 = vcmp.gt.f32.partialorder %v1847_v12, %v1991_v29  ;;  %v1986_v61 = vmul.f32 0.5, %v1645_v50 }
  0xee   : > { %v11265_v17 = vsel %vm7959_vm10, 4294967295, %v11264_v17  ;;  %v1649_v9 = vsub.f32 %v1361_v56, %v1505_v53  ;;  %v1509_v20 = vmin.f32 %v7690_v51, %v7311_v55  ;;  %6416 = vmatprep.mubr.msk.f32.mxu1 %vm7959_vm10, %v11201_v3  ;;  %v1846_v5 = vmax.f32 %v1217_v22, 0.0  ;;  %v7975_v53 = vpop.permute.xlu1 %883  ;;  %v7977_v33 = vpop.permute.xlu0 %483 }
  0xef   : > { %11266 = vst [vmem:[#allocation49_spill] sm:$0xff] %v11265_v17  ;;  %v1221_v46 = vsub.f32 %v677_v16, %v1077_v26  ;;  %v672_v4 = vmin.f32 %v7651_v0, %v7303_v47  ;;  %v1072_v12 = vmax.f32 %v7649_v10, %v7314_v58  ;;  %vm2130_vm5 = vcmp.gt.f32.partialorder %v1842_v25, %v1986_v61 }
  0xf0   : > { %v1990_v29 = vmul.f32 0.5, %v1649_v9  ;;  %v1653_v56 = vsub.f32 %v1365_v27, %v1509_v20  ;;  %v1360_v50 = vmax.f32 %v7651_v0, %v7303_v47  ;;  %vm11267_vm10 = vcmp.gt.s32.totalorder %v6972_v11, %v7079_v28 }
  0xf1   : > { %vm7982_vm4 = vmand %vm2130_vm5, %vm11267_vm10  ;;  %v11268_v26 = vmov 0  ;;  %v1850_v22 = vmax.f32 %v1221_v46, 0.0  ;;  %v1216_v16 = vsub.f32 %v672_v4, %v1072_v12  ;;  %v1504_v25 = vmin.f32 %v7649_v10, %v7314_v58 }
  0xf2   : > { %v11269_v26 = vsel %vm7982_vm4, 4294967295, %v11268_v26  ;;  %v676_v27 = vmin.f32 %v7692_v13, %v7295_v38  ;;  %5946 = vmatmul.mubr.msk.f32.gmra.mrb[18].mxu0 %vm7982_vm4, %v11201_v3  ;;  %vm7994_vm3 = vcmp.gt.f32.partialorder %v1846_v5, %v1990_v29  ;;  %v11271_v28 = vmov 0 }
  0xf3   : > { %11270 = vst [vmem:[#allocation50_spill] sm:$0xff] %v11269_v26  ;;  %v11272_v28 = vsel %vm7994_vm3, 4294967295, %v11271_v28  ;;  %v1994_v0 = vmul.f32 0.5, %v1653_v56  ;;  %v1076_v4 = vmax.f32 %v7690_v51, %v7308_v54  ;;  %v1364_v10 = vmax.f32 %v7692_v13, %v7295_v38  ;;  %5947 = vmatprep.mubr.msk.f32.mxu0 %vm7994_vm3, %v11201_v3 }
  0xf4   : > { %11273 = vst [vmem:[#allocation51_spill] sm:$0xff] %v11272_v28  ;;  %v1648_v61 = vsub.f32 %v1360_v50, %v1504_v25  ;;  %v1845_v9 = vmax.f32 %v1216_v16, 0.0  ;;  %v1508_v20 = vmin.f32 %v7690_v51, %v7308_v54  ;;  %v680_v5 = vmin.f32 %v7726_v24, %v7298_v41  ;;  %v8019_v50 = vpop.permute.xlu1 %888  ;;  %v8021_v16 = vpop.permute.xlu0 %488 }
  0xf5   : > { %vm8011_vm10 = vcmp.gt.f32.partialorder %v1850_v22, %v1994_v0  ;;  %v11274_v46 = vmov 0  ;;  %v1220_v12 = vsub.f32 %v676_v27, %v1076_v4  ;;  %v1080_v29 = vmax.f32 %v7724_v1, %v7311_v55 }
  0xf6   : > { %v11275_v46 = vsel %vm8011_vm10, 4294967295, %v11274_v46  ;;  %v1368_v56 = vmax.f32 %v7726_v24, %v7298_v41  ;;  %6417 = vmatmul.mubr.msk.f32.gmra.mrb[10].mxu1 %vm8011_vm10, %v11201_v3  ;;  %v1989_v25 = vmul.f32 0.5, %v1648_v61  ;;  %v1652_v22 = vsub.f32 %v1364_v10, %v1508_v20 }
  0xf7   : > { %11276 = vst [vmem:[#allocation52_spill] sm:$0xff] %v11275_v46  ;;  %v1512_v0 = vmin.f32 %v7724_v1, %v7311_v55  ;;  %v675_v27 = vmin.f32 %v7692_v13, %v7303_v47  ;;  %v1849_v4 = vmax.f32 %v1220_v12, 0.0  ;;  %v1224_v17 = vsub.f32 %v680_v5, %v1080_v29 }
  0xf8   : > { %v1075_v28 = vmax.f32 %v7690_v51, %v7314_v58  ;;  %v1363_v26 = vmax.f32 %v7692_v13, %v7303_v47  ;;  %vm2133_vm5 = vcmp.gt.f32.partialorder %v1845_v9, %v1989_v25  ;;  %v1993_v19 = vmul.f32 0.5, %v1652_v22  ;;  %v8047_v9 = vpop.permute.xlu1 %893  ;;  %v8049_v29 = vpop.permute.xlu0 %493 }
  0xf9   : > { %v1656_v46 = vsub.f32 %v1368_v56, %v1512_v0  ;;  %v1507_v10 = vmin.f32 %v7690_v51, %v7314_v58  ;;  %vm11277_vm10 = vcmp.gt.s32.totalorder %v6972_v11, %v7090_v31  ;;  %v11278_v61 = vmov 0 }
  0xfa   : > { %vm8039_vm3 = vmand %vm2133_vm5, %vm11277_vm10  ;;  %v1853_v20 = vmax.f32 %v1224_v17, 0.0  ;;  %v1219_v5 = vsub.f32 %v675_v27, %v1075_v28  ;;  %v679_v12 = vmin.f32 %v7726_v24, %v7295_v38  ;;  %v1079_v13 = vmax.f32 %v7724_v1, %v7308_v54 }
  0xfb   : > { %v11279_v61 = vsel %vm8039_vm3, 4294967295, %v11278_v61  ;;  %5948 = vmatmul.mubr.msk.f32.gmra.mrb[20].mxu0 %vm8039_vm3, %v11201_v3  ;;  %vm8054_vm5 = vcmp.gt.f32.partialorder %v1849_v4, %v1993_v19  ;;  %v11281_v31 = vmov 0  ;;  %v1997_v51 = vmul.f32 0.5, %v1656_v46 }
  0xfc   : > { %11280 = vst [vmem:[#allocation53_spill] sm:$0xff] %v11279_v61  ;;  %v11282_v31 = vsel %vm8054_vm5, 4294967295, %v11281_v31  ;;  %v1651_v17 = vsub.f32 %v1363_v26, %v1507_v10  ;;  %v1367_v28 = vmax.f32 %v7726_v24, %v7295_v38  ;;  %5949 = vmatprep.mubr.msk.f32.mxu0 %vm8054_vm5, %v11201_v3  ;;  %v1848_v56 = vmax.f32 %v1219_v5, 0.0 }
  0xfd   : > { %11283 = vst [vmem:[#allocation54_spill] sm:$0xff] %v11282_v31  ;;  %v1223_v25 = vsub.f32 %v679_v12, %v1079_v13  ;;  %v1511_v22 = vmin.f32 %v7724_v1, %v7308_v54  ;;  %v683_v19 = vmin.f32 %v7767_v14, %v7298_v41  ;;  %vm8069_vm3 = vcmp.gt.f32.partialorder %v1853_v20, %v1997_v51  ;;  %v8084_v12 = vpop.permute.xlu1 %898  ;;  %v8086_v13 = vpop.permute.xlu0 %498 }
  0xfe   : > { %v11284_v26 = vmov 0  ;;  %v1992_v46 = vmul.f32 0.5, %v1651_v17  ;;  %v1083_v0 = vmax.f32 %v7765_v42, %v7311_v55  ;;  %v1371_v27 = vmax.f32 %v7767_v14, %v7298_v41  ;;  %6419 = vmatprep.mubr.msk.f32.mxu1 %vm8069_vm3, %v11201_v3 }
  0xff   : > { %v11285_v26 = vsel %vm8069_vm3, 4294967295, %v11284_v26  ;;  %v1655_v4 = vsub.f32 %v1367_v28, %v1511_v22  ;;  %v1852_v10 = vmax.f32 %v1223_v25, 0.0  ;;  %v1515_v5 = vmin.f32 %v7765_v42, %v7311_v55 }
 0x100   : > { %11286 = vst [vmem:[#allocation55_spill] sm:$0xff] %v11285_v26  ;;  %v678_v20 = vmin.f32 %v7726_v24, %v7303_v47  ;;  %vm2136_vm10 = vcmp.gt.f32.partialorder %v1848_v56, %v1992_v46  ;;  %v1227_v51 = vsub.f32 %v683_v19, %v1083_v0  ;;  %v1078_v17 = vmax.f32 %v7724_v1, %v7314_v58 }
 0x101   : > { %v1366_v26 = vmax.f32 %v7726_v24, %v7303_v47  ;;  %vm11287_vm3 = vcmp.gt.s32.totalorder %v6972_v11, %v7093_v32  ;;  %v11288_v28 = vmov 0  ;;  %v1996_v25 = vmul.f32 0.5, %v1655_v4 }
 0x102   : > { %vm8095_vm5 = vmand %vm2136_vm10, %vm11287_vm3  ;;  %v1659_v22 = vsub.f32 %v1371_v27, %v1515_v5  ;;  %v1510_v31 = vmin.f32 %v7724_v1, %v7314_v58  ;;  %v682_v56 = vmin.f32 %v7767_v14, %v7295_v38  ;;  %v1856_v24 = vmax.f32 %v1227_v51, 0.0  ;;  %v8116_v5 = vpop.permute.xlu1 %903 }
 0x103   : > { %v11289_v28 = vsel %vm8095_vm5, 4294967295, %v11288_v28  ;;  %5950 = vmatmul.mubr.msk.f32.gmra.mrb[22].mxu0 %vm8095_vm5, %v11201_v3  ;;  %v1222_v19 = vsub.f32 %v678_v20, %v1078_v17  ;;  %v1082_v32 = vmax.f32 %v7765_v42, %v7308_v54  ;;  %v1370_v46 = vmax.f32 %v7767_v14, %v7295_v38 }
 0x104   : > { %11290 = vst [vmem:[#allocation56_spill] sm:$0xff] %v11289_v28  ;;  %vm8110_vm3 = vcmp.gt.f32.partialorder %v1852_v10, %v1996_v25  ;;  %v11291_v0 = vmov 0  ;;  %v2000_v1 = vmul.f32 0.5, %v1659_v22  ;;  %v1654_v27 = vsub.f32 %v1366_v26, %v1510_v31  ;;  %v8118_v28 = vpop.permute.xlu0 %503 }
 0x105   : > { %v11292_v0 = vsel %vm8110_vm3, 4294967295, %v11291_v0  ;;  %v1514_v4 = vmin.f32 %v7765_v42, %v7308_v54  ;;  %5951 = vmatprep.mubr.msk.f32.mxu0 %vm8110_vm3, %v11201_v3  ;;  %v1851_v20 = vmax.f32 %v1222_v19, 0.0  ;;  %v1226_v51 = vsub.f32 %v682_v56, %v1082_v32 }
 0x106   : > { %11293 = vst [vmem:[#allocation57_spill] sm:$0xff] %v11292_v0  ;;  %vm8127_vm10 = vcmp.gt.f32.partialorder %v1856_v24, %v2000_v1  ;;  %v11294_v31 = vmov 0  ;;  %v1995_v26 = vmul.f32 0.5, %v1654_v27  ;;  %v686_v32 = vmin.f32 %v7796_v2, %v7298_v41 }
 0x107   : > { %v11295_v31 = vsel %vm8127_vm10, 4294967295, %v11294_v31  ;;  %v1658_v25 = vsub.f32 %v1370_v46, %v1514_v4  ;;  %6420 = vmatmul.mubr.msk.f32.gmra.mrb[12].mxu1 %vm8127_vm10, %v11201_v3  ;;  %v1855_v56 = vmax.f32 %v1226_v51, 0.0  ;;  %v1086_v24 = vmax.f32 %v7794_v6, %v7311_v55  ;;  %v8148_v4 = vpop.permute.xlu1 %908 }
 0x108   : > { %11296 = vst [vmem:[#allocation58_spill] sm:$0xff] %v11295_v31  ;;  %vm2139_vm5 = vcmp.gt.f32.partialorder %v1851_v20, %v1995_v26  ;;  %v1374_v1 = vmax.f32 %v7796_v2, %v7298_v41  ;;  %v1518_v27 = vmin.f32 %v7794_v6, %v7311_v55  ;;  %v8150_v51 = vpop.permute.xlu0 %508  ;;  %vm11297_vm10 = vcmp.gt.s32.totalorder %v6972_v11, %v7104_v35 }
 0x109   : > { %v1999_v46 = vmul.f32 0.5, %v1658_v25  ;;  %vm8155_vm4 = vmand %vm2139_vm5, %vm11297_vm10  ;;  %v11298_v22 = vmov 0  ;;  %v1230_v10 = vsub.f32 %v686_v32, %v1086_v24  ;;  %v11301_v35 = vmov 0 }
 0x10a   : > { %v11299_v22 = vsel %vm8155_vm4, 4294967295, %v11298_v22  ;;  %5952 = vmatmul.mubr.msk.f32.gmra.mrb[24].mxu0 %vm8155_vm4, %v11201_v3  ;;  %v1662_v19 = vsub.f32 %v1374_v1, %v1518_v27  ;;  %v681_v24 = vmin.f32 %v7767_v14, %v7303_v47  ;;  %v1081_v20 = vmax.f32 %v7765_v42, %v7314_v58 }
 0x10b   : > { %11300 = vst [vmem:[#allocation59_spill] sm:$0xff] %v11299_v22  ;;  %vm8168_vm3 = vcmp.gt.f32.partialorder %v1855_v56, %v1999_v46  ;;  %v1859_v25 = vmax.f32 %v1230_v10, 0.0  ;;  %v1369_v56 = vmax.f32 %v7767_v14, %v7303_v47  ;;  %v1513_v46 = vmin.f32 %v7765_v42, %v7314_v58  ;;  %v8191_v10 = vpop.permute.xlu1 %913 }
 0x10c   : > { %v11302_v35 = vsel %vm8168_vm3, 4294967295, %v11301_v35  ;;  %5953 = vmatprep.mubr.msk.f32.mxu0 %vm8168_vm3, %v11201_v3  ;;  %v2003_v1 = vmul.f32 0.5, %v1662_v19  ;;  %v685_v27 = vmin.f32 %v7796_v2, %v7295_v38  ;;  %v1085_v32 = vmax.f32 %v7794_v6, %v7308_v54  ;;  %v8193_v17 = vpop.permute.xlu0 %513 }
 0x10d   : > { %11303 = vst [vmem:[#allocation60_spill] sm:$0xff] %v11302_v35  ;;  %v1373_v26 = vmax.f32 %v7796_v2, %v7295_v38  ;;  %v1225_v31 = vsub.f32 %v681_v24, %v1081_v20  ;;  %v1657_v35 = vsub.f32 %v1369_v56, %v1513_v46  ;;  %v1517_v14 = vmin.f32 %v7794_v6, %v7308_v54 }
 0x10e   : > { %vm8199_vm5 = vcmp.gt.f32.partialorder %v1859_v25, %v2003_v1  ;;  %v11304_v19 = vmov 0  ;;  %v1229_v0 = vsub.f32 %v685_v27, %v1085_v32  ;;  %v689_v32 = vmin.f32 %v7840_v30, %v7298_v41 }
 0x10f   : > { %v11305_v19 = vsel %vm8199_vm5, 4294967295, %v11304_v19  ;;  %6422 = vmatprep.mubr.msk.f32.mxu1 %vm8199_vm5, %v11201_v3  ;;  %v1854_v20 = vmax.f32 %v1225_v31, 0.0  ;;  %v1998_v24 = vmul.f32 0.5, %v1657_v35  ;;  %v1661_v56 = vsub.f32 %v1373_v26, %v1517_v14  ;;  %v8220_v61 = vpop.permute.xlu1 %918 }
 0x110   : > { %11306 = vst [vmem:[#allocation61_spill] sm:$0xff] %v11305_v19  ;;  %v1858_v46 = vmax.f32 %v1229_v0, 0.0  ;;  %v1089_v1 = vmax.f32 %v7838_v34, %v7311_v55  ;;  %v1377_v27 = vmax.f32 %v7840_v30, %v7298_v41  ;;  %v8222_v31 = vpop.permute.xlu0 %518  ;;  %v1521_v0 = vmin.f32 %v7838_v34, %v7311_v55 }
 0x111   : > { %vm2142_vm5 = vcmp.gt.f32.partialorder %v1854_v20, %v1998_v24  ;;  %v2002_v26 = vmul.f32 0.5, %v1661_v56  ;;  %vm11307_vm3 = vcmp.gt.s32.totalorder %v6972_v11, %v7107_v36  ;;  %v11308_v14 = vmov 0 }
 0x112   : > { %vm8231_vm4 = vmand %vm2142_vm5, %vm11307_vm3  ;;  %v1233_v42 = vsub.f32 %v689_v32, %v1089_v1  ;;  %v11311_v36 = vmov 0  ;;  %v1665_v56 = vsub.f32 %v1377_v27, %v1521_v0  ;;  %v684_v32 = vmin.f32 %v7796_v2, %v7303_v47 }
 0x113   : > { %v11309_v14 = vsel %vm8231_vm4, 4294967295, %v11308_v14  ;;  %5954 = vmatmul.mubr.msk.f32.gmra.mrb[26].mxu0 %vm8231_vm4, %v11201_v3  ;;  %vm8244_vm10 = vcmp.gt.f32.partialorder %v1858_v46, %v2002_v26  ;;  %v1084_v1 = vmax.f32 %v7794_v6, %v7314_v58  ;;  %v1372_v35 = vmax.f32 %v7796_v2, %v7303_v47  ;;  %v8261_v26 = vpop.permute.xlu1 %923 }
 0x114   : > { %11310 = vst [vmem:[#allocation62_spill] sm:$0xff] %v11309_v14  ;;  %v11312_v36 = vsel %vm8244_vm10, 4294967295, %v11311_v36  ;;  %5955 = vmatprep.mubr.msk.f32.mxu0 %vm8244_vm10, %v11201_v3  ;;  %v1862_v20 = vmax.f32 %v1233_v42, 0.0  ;;  %v1516_v46 = vmin.f32 %v7794_v6, %v7314_v58  ;;  %v688_v27 = vmin.f32 %v7840_v30, %v7295_v38  ;;  %v8263_v0 = vpop.permute.xlu0 %523 }
 0x115   : > { %11313 = vst [vmem:[#allocation63_spill] sm:$0xff] %v11312_v36  ;;  %v2006_v24 = vmul.f32 0.5, %v1665_v56  ;;  %v1228_v25 = vsub.f32 %v684_v32, %v1084_v1  ;;  %v1088_v22 = vmax.f32 %v7838_v34, %v7308_v54  ;;  %v1376_v42 = vmax.f32 %v7840_v30, %v7295_v38 }
 0x116   : > { %v1660_v19 = vsub.f32 %v1372_v35, %v1516_v46  ;;  %v1520_v2 = vmin.f32 %v7838_v34, %v7308_v54  ;;  %v11314_v14 = vmov 0  ;;  %vm11321_vm10 = vcmp.gt.s32.totalorder %v6972_v11, %v7118_v39 }
 0x117   : > { %vm8275_vm3 = vcmp.gt.f32.partialorder %v1862_v20, %v2006_v24  ;;  %v1857_v56 = vmax.f32 %v1228_v25, 0.0  ;;  %v1232_v32 = vsub.f32 %v688_v27, %v1088_v22  ;;  %v11317_v24 = vmax.f32 %v7875_v57, %v7311_v55  ;;  %v8296_v27 = vpop.permute.xlu1 %928 }
 0x118   : > { %v11315_v14 = vsel %vm8275_vm3, 4294967295, %v11314_v14  ;;  %6423 = vmatmul.mubr.msk.f32.gmra.mrb[14].mxu1 %vm8275_vm3, %v11201_v3  ;;  %v2001_v35 = vmul.f32 0.5, %v1660_v19  ;;  %v1664_v46 = vsub.f32 %v1376_v42, %v1520_v2  ;;  %v11318_v22 = vmin.f32 %v7877_v59, %v7298_v41  ;;  %v8298_v1 = vpop.permute.xlu0 %528 }
 0x119   : > { %11316 = vst [vmem:[#allocation64_spill] sm:$0xff] %v11315_v14  ;;  %v1861_v6 = vmax.f32 %v1232_v32, 0.0  ;;  %v11319_v19 = vmin.f32 %v7875_v57, %v7311_v55  ;;  %v11320_v42 = vmax.f32 %v7877_v59, %v7298_v41  ;;  %v11322_v32 = vmov 0 }
 0x11a   : > { %v1236_v25 = vsub.f32 %v11318_v22, %v11317_v24  ;;  %v698_v24 = vmin.f32 %v7950_v23, %v7298_v41  ;;  %vm2145_vm5 = vcmp.gt.f32.partialorder %v1857_v56, %v2001_v35  ;;  %v2005_v22 = vmul.f32 0.5, %v1664_v46 }
 0x11b   : > { %v1668_v2 = vsub.f32 %v11320_v42, %v11319_v19  ;;  %vm8315_vm3 = vmand %vm2145_vm5, %vm11321_vm10  ;;  %v1386_v42 = vmax.f32 %v7950_v23, %v7298_v41  ;;  %v687_v20 = vmin.f32 %v7840_v30, %v7303_v47  ;;  %v1087_v56 = vmax.f32 %v7838_v34, %v7314_v58 }
 0x11c   : > { %v1865_v36 = vmax.f32 %v1236_v25, 0.0  ;;  %v11323_v32 = vsel %vm8315_vm3, 4294967295, %v11322_v32  ;;  %5956 = vmatmul.mubr.msk.f32.gmra.mrb[28].mxu0 %vm8315_vm3, %v11201_v3  ;;  %vm8328_vm4 = vcmp.gt.f32.partialorder %v1861_v6, %v2005_v22  ;;  %v11325_v39 = vmov 0  ;;  %v8344_v6 = vpop.permute.xlu1 %933 }
 0x11d   : > { %11324 = vst [vmem:[#allocation65_spill] sm:$0xff] %v11323_v32  ;;  %v2009_v19 = vmul.f32 0.5, %v1668_v2  ;;  %v11326_v39 = vsel %vm8328_vm4, 4294967295, %v11325_v39  ;;  %v1375_v35 = vmax.f32 %v7840_v30, %v7303_v47  ;;  %v1519_v46 = vmin.f32 %v7838_v34, %v7314_v58  ;;  %5957 = vmatprep.mubr.msk.f32.mxu0 %vm8328_vm4, %v11201_v3 }
 0x11e   : > { %11327 = vst [vmem:[#allocation66_spill] sm:$0xff] %v11326_v39  ;;  %v11328_v25 = vmax.f32 %v7875_v57, %v7308_v54  ;;  %v11329_v2 = vmin.f32 %v7877_v59, %v7295_v38  ;;  %v11330_v47 = vmov 0  ;;  %v1231_v58 = vsub.f32 %v687_v20, %v1087_v56 }
 0x11f   : > { %vm8349_vm5 = vcmp.gt.f32.partialorder %v1865_v36, %v2009_v19  ;;  %v11333_v34 = vmin.f32 %v7875_v57, %v7308_v54  ;;  %v11334_v30 = vmax.f32 %v7877_v59, %v7295_v38  ;;  %v1663_v36 = vsub.f32 %v1375_v35, %v1519_v46 }
 0x120   : > { %v1235_v14 = vsub.f32 %v11329_v2, %v11328_v25  ;;  %v11331_v47 = vsel %vm8349_vm5, 4294967295, %v11330_v47  ;;  %v8361_v2 = vpop.permute.xlu0 %533  ;;  %6425 = vmatprep.mubr.msk.f32.mxu1 %vm8349_vm5, %v11201_v3  ;;  %v1101_v20 = vmax.f32 %v7975_v53, %v7311_v55  ;;  %v1860_v56 = vmax.f32 %v1231_v58, 0.0 }
 0x121   : > { %11332 = vst [vmem:[#allocation67_spill] sm:$0xff] %v11331_v47  ;;  %v1667_v22 = vsub.f32 %v11334_v30, %v11333_v34  ;;  %v1533_v34 = vmin.f32 %v7975_v53, %v7311_v55  ;;  %v11335_v30 = vmax.f32 %v7909_v37, %v7311_v55  ;;  %v11336_v25 = vmin.f32 %v7911_v8, %v7298_v41 }
 0x122   : > { %v1864_v19 = vmax.f32 %v1235_v14, 0.0  ;;  %v2004_v35 = vmul.f32 0.5, %v1663_v36  ;;  %v11337_v14 = vmin.f32 %v7909_v37, %v7311_v55  ;;  %v11338_v46 = vmax.f32 %v7911_v8, %v7298_v41 }
 0x123   : > { %v2008_v59 = vmul.f32 0.5, %v1667_v22  ;;  %v1239_v47 = vsub.f32 %v11336_v25, %v11335_v30  ;;  %v700_v58 = vmin.f32 %v7977_v33, %v7295_v38  ;;  %v701_v22 = vmin.f32 %v7977_v33, %v7298_v41 }
 0x124   : > { %v1671_v57 = vsub.f32 %v11338_v46, %v11337_v14  ;;  %v1388_v32 = vmax.f32 %v7977_v33, %v7295_v38  ;;  %v1389_v25 = vmax.f32 %v7977_v33, %v7298_v41  ;;  %vm2148_vm4 = vcmp.gt.f32.partialorder %v1860_v56, %v2004_v35 }
 0x125   : > { %vm2152_vm10 = vcmp.gt.f32.partialorder %v1864_v19, %v2008_v59  ;;  %v1868_v39 = vmax.f32 %v1239_v47, 0.0  ;;  %vm11339_vm3 = vcmp.gt.s32.totalorder %v7132_v45, %v7126_v43  ;;  %v11340_v36 = vmov 0  ;;  %v8413_v43 = vpop.permute.xlu1 %938 }
 0x126   : > { %vm8397_vm6 = vmand %vm2152_vm10, %vm11339_vm3  ;;  %v2012_v30 = vmul.f32 0.5, %v1671_v57  ;;  %v11343_v47 = vmax.f32 %v7909_v37, %v7308_v54  ;;  %v11344_v19 = vmin.f32 %v7911_v8, %v7295_v38  ;;  %v11345_v33 = vmin.f32 %v7909_v37, %v7308_v54 }
 0x127   : > { %v11341_v36 = vsel %vm8397_vm6, 4294967295, %v11340_v36  ;;  %v11346_v56 = vmax.f32 %v7911_v8, %v7295_v38  ;;  %vm11347_vm3 = vcmp.gt.s32.totalorder %v6972_v11, %v7121_v40  ;;  %v11348_v57 = vmov 0 }
 0x128   : > { %11342 = vst [vmem:[#allocation68_spill] sm:$0xff] %v11341_v36  ;;  %v1238_v59 = vsub.f32 %v11344_v19, %v11343_v47  ;;  %vm8418_vm10 = vmand %vm2148_vm4, %vm11347_vm3  ;;  %v1104_v46 = vmax.f32 %v8019_v50, %v7311_v55  ;;  %v1536_v8 = vmin.f32 %v8019_v50, %v7311_v55  ;;  %v8430_v47 = vpop.permute.xlu0 %538  ;;  %vm8435_vm4 = vcmp.gt.f32.partialorder %v1868_v39, %v2012_v30 }
 0x129   : > { %v1670_v35 = vsub.f32 %v11346_v56, %v11345_v33  ;;  %v11349_v57 = vsel %vm8418_vm10, 4294967295, %v11348_v57  ;;  %5958 = vmatmul.mubr.msk.f32.gmra.mrb[30].mxu0 %vm8418_vm10, %v11201_v3  ;;  %v11351_v40 = vmov 0  ;;  %v11354_v56 = vmax.f32 %v7948_v63, %v7311_v55  ;;  %6426 = vmatmul.mubr.msk.f32.gmra.mrb[16].mxu1 %vm8435_vm4, %v11201_v3  ;;  %v8492_v60 = vpop.permute.xlu1 %943 }
 0x12a   : > { %11350 = vst [vmem:[#allocation69_spill] sm:$0xff] %v11349_v57  ;;  %v11352_v40 = vsel %vm8435_vm4, 4294967295, %v11351_v40  ;;  %v1867_v19 = vmax.f32 %v1238_v59, 0.0  ;;  %5959 = vmatprep.mubr.msk.f32.mxu0 %vm8397_vm6, %v11201_v3  ;;  %v11355_v39 = vmin.f32 %v7948_v63, %v7311_v55  ;;  %v703_v59 = vmin.f32 %v8021_v16, %v7295_v38 }
 0x12b   : > { %11353 = vst [vmem:[#allocation70_spill] sm:$0xff] %v11352_v40  ;;  %v2011_v33 = vmul.f32 0.5, %v1670_v35  ;;  %v1242_v14 = vsub.f32 %v698_v24, %v11354_v56  ;;  %v704_v35 = vmin.f32 %v8021_v16, %v7298_v41  ;;  %v8456_v24 = vadd.s32 256, %v6964_v7 }
 0x12c   : > { %v1674_v30 = vsub.f32 %v1386_v42, %v11355_v39  ;;  %v1391_v37 = vmax.f32 %v8021_v16, %v7295_v38  ;;  %v1392_v40 = vmax.f32 %v8021_v16, %v7298_v41  ;;  %vm11356_vm5 = vcmp.gt.s32.totalorder %v7132_v45, %v7129_v44  ;;  %v8501_v21 = vpop.permute.xlu0 %543 }
 0x12d   : > { %vm2155_vm3 = vcmp.gt.f32.partialorder %v1867_v19, %v2011_v33  ;;  %v1871_v56 = vmax.f32 %v1242_v14, 0.0  ;;  %v11357_v42 = vmov 0  ;;  %v11360_v36 = vmax.f32 %v7948_v63, %v7308_v54  ;;  %3560 = vmatmul.mubr.f32.gmra.mrb[32].mxu0 %v8483_v62 }
 0x12e   : > { %vm8465_vm4 = vmand %vm2155_vm3, %vm11356_vm5  ;;  %v2015_v39 = vmul.f32 0.5, %v1674_v30  ;;  %v11361_v14 = vmin.f32 %v7950_v23, %v7295_v38  ;;  %v11362_v33 = vmin.f32 %v7948_v63, %v7308_v54  ;;  %v11363_v16 = vmax.f32 %v7950_v23, %v7295_v38 }
 0x12f   : > { %v11358_v42 = vsel %vm8465_vm4, 4294967295, %v11357_v42  ;;  %v1107_v30 = vmax.f32 %v8047_v9, %v7311_v55  ;;  %v1539_v63 = vmin.f32 %v8047_v9, %v7311_v55  ;;  %5960 = vmatprep.mubr.msk.f32.mxu0 %vm8465_vm4, %v11201_v3  ;;  %v11364_v23 = vmov 0 }
 0x130   : > { %11359 = vst [vmem:[#allocation71_spill] sm:$0xff] %v11358_v42  ;;  %v1241_v19 = vsub.f32 %v11361_v14, %v11360_v36  ;;  %v1673_v57 = vsub.f32 %v11363_v16, %v11362_v33  ;;  %v1245_v14 = vsub.f32 %v701_v22, %v1101_v20  ;;  %vm8497_vm5 = vcmp.gt.f32.partialorder %v1871_v56, %v2015_v39 }
 0x131   : > { %v11365_v23 = vsel %vm8497_vm5, 4294967295, %v11364_v23  ;;  %v1677_v44 = vsub.f32 %v1389_v25, %v1533_v34  ;;  %6428 = vmatprep.mubr.msk.f32.mxu1 %vm8497_vm5, %v11201_v3  ;;  %v706_v22 = vmin.f32 %v8049_v29, %v7295_v38  ;;  %v707_v36 = vmin.f32 %v8049_v29, %v7298_v41  ;;  %3566 = vmatmul.mubr.f32.gmra.mrb[34].mxu0 %v8483_v62 }
 0x132   : > { %11366 = vst [vmem:[#allocation72_spill] sm:$0xff] %v11365_v23  ;;  %v1870_v33 = vmax.f32 %v1241_v19, 0.0  ;;  %v2014_v16 = vmul.f32 0.5, %v1673_v57  ;;  %v1874_v20 = vmax.f32 %v1245_v14, 0.0  ;;  %v1394_v56 = vmax.f32 %v8049_v29, %v7295_v38 }
 0x133   : > { %v2018_v39 = vmul.f32 0.5, %v1677_v44  ;;  %v1395_v34 = vmax.f32 %v8049_v29, %v7298_v41  ;;  %v11367_v25 = vmax.f32 %v7975_v53, %v7308_v54  ;;  %vm11368_vm5 = vcmp.gt.s32.totalorder %v7132_v45, %v7147_v48 }
 0x134   : > { %vm2158_vm3 = vcmp.gt.f32.partialorder %v1870_v33, %v2014_v16  ;;  %v11369_v19 = vmov 0  ;;  %v11372_v14 = vmin.f32 %v7975_v53, %v7308_v54  ;;  %vm2305_vm6 = vcmp.gt.s32.totalorder %v7132_v45, %v7150_v49 }
 0x135   : > { %v1244_v57 = vsub.f32 %v700_v58, %v11367_v25  ;;  %vm8521_vm4 = vmand %vm2158_vm3, %vm11368_vm5  ;;  %v1110_v58 = vmax.f32 %v8084_v12, %v7311_v55  ;;  %vm8537_vm5 = vcmp.gt.f32.partialorder %v1874_v20, %v2018_v39  ;;  %v11373_v48 = vmov 0  ;;  %v8550_v39 = vpop.permute.xlu1 %948 }
 0x136   : > { %v11370_v19 = vsel %vm8521_vm4, 4294967295, %v11369_v19  ;;  %v1676_v44 = vsub.f32 %v1388_v32, %v11372_v14  ;;  %5961 = vmatprep.mubr.msk.f32.mxu0 %vm8521_vm4, %v11201_v3  ;;  %v11374_v48 = vsel %vm8537_vm5, 4294967295, %v11373_v48  ;;  %v1542_v32 = vmin.f32 %v8084_v12, %v7311_v55  ;;  %6429 = vmatmul.mubr.msk.f32.gmra.mrb[18].mxu1 %vm8537_vm5, %v11201_v3 }
 0x137   : > { %11371 = vst [vmem:[#allocation73_spill] sm:$0xff] %v11370_v19  ;;  %11375 = vst [vmem:[#allocation74_spill] sm:$0xff] %v11374_v48  ;;  %v1873_v33 = vmax.f32 %v1244_v57, 0.0  ;;  %v1248_v25 = vsub.f32 %v704_v35, %v1104_v46  ;;  %v1680_v14 = vsub.f32 %v1392_v40, %v1536_v8  ;;  %v709_v20 = vmin.f32 %v8086_v13, %v7295_v38  ;;  %v8561_v46 = vpop.permute.xlu0 %548 }
 0x138   : > { %v2017_v16 = vmul.f32 0.5, %v1676_v44  ;;  %v710_v57 = vmin.f32 %v8086_v13, %v7298_v41  ;;  %v1397_v53 = vmax.f32 %v8086_v13, %v7295_v38  ;;  %v1398_v29 = vmax.f32 %v8086_v13, %v7298_v41  ;;  %3572 = vmatmul.mubr.f32.gmra.mrb[36].mxu0 %v8483_v62 }
 0x139   : > { %v11376_v48 = vmax.f32 %v8019_v50, %v7308_v54  ;;  %v1877_v8 = vmax.f32 %v1248_v25, 0.0  ;;  %v2021_v40 = vmul.f32 0.5, %v1680_v14  ;;  %v11377_v35 = vmin.f32 %v8019_v50, %v7308_v54 }
 0x13a   : > { %vm2161_vm3 = vcmp.gt.f32.partialorder %v1873_v33, %v2017_v16  ;;  %v11378_v13 = vmov 0  ;;  %vm2308_vm4 = vcmp.gt.s32.totalorder %v7132_v45, %v7161_v52  ;;  %v11381_v49 = vmov 0 }
 0x13b   : > { %v1247_v44 = vsub.f32 %v703_v59, %v11376_v48  ;;  %v1679_v23 = vsub.f32 %v1391_v37, %v11377_v35  ;;  %vm8570_vm5 = vmand %vm2161_vm3, %vm2305_vm6  ;;  %v1113_v48 = vmax.f32 %v8116_v5, %v7311_v55  ;;  %vm8583_vm10 = vcmp.gt.f32.partialorder %v1877_v8, %v2021_v40  ;;  %v8620_v37 = vpop.permute.xlu0 %553 }
 0x13c   : > { %v11379_v13 = vsel %vm8570_vm5, 4294967295, %v11378_v13  ;;  %5962 = vmatprep.mubr.msk.f32.mxu0 %vm8570_vm5, %v11201_v3  ;;  %v11382_v49 = vsel %vm8583_vm10, 4294967295, %v11381_v49  ;;  %v1545_v33 = vmin.f32 %v8116_v5, %v7311_v55  ;;  %6431 = vmatprep.mubr.msk.f32.mxu1 %vm8583_vm10, %v11201_v3  ;;  %v1251_v16 = vsub.f32 %v707_v36, %v1107_v30  ;;  %v8606_v36 = vpop.permute.xlu1 %953 }
 0x13d   : > { %11380 = vst [vmem:[#allocation75_spill] sm:$0xff] %v11379_v13  ;;  %v1876_v19 = vmax.f32 %v1247_v44, 0.0  ;;  %11383 = vst [vmem:[#allocation76_spill] sm:$0xff] %v11382_v49  ;;  %v2020_v50 = vmul.f32 0.5, %v1679_v23  ;;  %v1683_v25 = vsub.f32 %v1395_v34, %v1539_v63  ;;  %v712_v14 = vmin.f32 %v8118_v28, %v7295_v38  ;;  %3578 = vmatmul.mubr.f32.gmra.mrb[38].mxu0 %v8483_v62 }
 0x13e   : > { %v713_v44 = vmin.f32 %v8118_v28, %v7298_v41  ;;  %v1400_v23 = vmax.f32 %v8118_v28, %v7295_v38  ;;  %v1401_v8 = vmax.f32 %v8118_v28, %v7298_v41  ;;  %v11384_v40 = vmax.f32 %v8047_v9, %v7308_v54  ;;  %v11389_v28 = vld [vmem:[#allocation7_spill] sm:$0xff] }
 0x13f   : > { %vm2164_vm6 = vcmp.gt.f32.partialorder %v1876_v19, %v2020_v50  ;;  %v11385_v63 = vmov 0  ;;  %v1880_v34 = vmax.f32 %v1251_v16, 0.0  ;;  %v2024_v19 = vmul.f32 0.5, %v1683_v25 }
 0x140   : > { %v1250_v30 = vsub.f32 %v706_v22, %v11384_v40  ;;  %vm8611_vm3 = vmand %vm2164_vm6, %vm2308_vm4  ;;  %v11388_v35 = vmin.f32 %v8047_v9, %v7308_v54  ;;  %vm2311_vm10 = vcmp.gt.s32.totalorder %v7132_v45, %v11389_v28  ;;  %v1116_v16 = vmax.f32 %v8148_v4, %v7311_v55 }
 0x141   : > { %v11386_v63 = vsel %vm8611_vm3, 4294967295, %v11385_v63  ;;  %5963 = vmatprep.mubr.msk.f32.mxu0 %vm8611_vm3, %v11201_v3  ;;  %vm8631_vm4 = vcmp.gt.f32.partialorder %v1880_v34, %v2024_v19  ;;  %v1548_v40 = vmin.f32 %v8148_v4, %v7311_v55  ;;  %v715_v22 = vmin.f32 %v8150_v51, %v7295_v38 }
 0x142   : > { %11387 = vst [vmem:[#allocation77_spill] sm:$0xff] %v11386_v63  ;;  %v1682_v50 = vsub.f32 %v1394_v56, %v11388_v35  ;;  %v1879_v52 = vmax.f32 %v1250_v30, 0.0  ;;  %v11390_v56 = vmov 0  ;;  %v1254_v35 = vsub.f32 %v710_v57, %v1110_v58  ;;  %6432 = vmatmul.mubr.msk.f32.gmra.mrb[20].mxu1 %vm8631_vm4, %v11201_v3  ;;  %3584 = vmatmul.mubr.f32.gmra.mrb[40].mxu0 %v8483_v62 }
 0x143   : > { %v11391_v56 = vsel %vm8631_vm4, 4294967295, %v11390_v56  ;;  %v1686_v30 = vsub.f32 %v1398_v29, %v1542_v32  ;;  %v716_v34 = vmin.f32 %v8150_v51, %v7298_v41  ;;  %v8646_v19 = vadd.s32 256, %v6972_v11 }
 0x144   : > { %11392 = vst [vmem:[#allocation7_spill] sm:$0xff] %v11391_v56  ;;  %v2023_v25 = vmul.f32 0.5, %v1682_v50  ;;  %v1883_v50 = vmax.f32 %v1254_v35, 0.0  ;;  %v1403_v58 = vmax.f32 %v8150_v51, %v7295_v38  ;;  %v1404_v57 = vmax.f32 %v8150_v51, %v7298_v41  ;;  %v11399_v35 = vld [vmem:[#allocation8_spill] sm:$0xff]  ;;  %v8667_v51 = vpop.permute.xlu1 %958 }
 0x145   : > { %11393 = vst [vmem:[#allocation78_spill] sm:$0xff] %v8646_v19  ;;  %v11394_v29 = vmov 0  ;;  %v2027_v32 = vmul.f32 0.5, %v1686_v30  ;;  %v11397_v9 = vmax.f32 %v8084_v12, %v7308_v54  ;;  %vm2314_vm3 = vcmp.gt.s32.totalorder %v7132_v45, %v11399_v35 }
 0x146   : > { %vm2167_vm6 = vcmp.gt.f32.partialorder %v1879_v52, %v2023_v25  ;;  %v11398_v52 = vmin.f32 %v8084_v12, %v7308_v54  ;;  %v1119_v30 = vmax.f32 %v8191_v10, %v7311_v55  ;;  %v1551_v12 = vmin.f32 %v8191_v10, %v7311_v55 }
 0x147   : > { %vm8655_vm4 = vmand %vm2167_vm6, %vm2311_vm10  ;;  %v1253_v59 = vsub.f32 %v709_v20, %v11397_v9  ;;  %vm8682_vm10 = vcmp.gt.f32.partialorder %v1883_v50, %v2027_v32  ;;  %v11400_v9 = vmov 0  ;;  %v1257_v28 = vsub.f32 %v713_v44, %v1113_v48 }
 0x148   : > { %v11395_v29 = vsel %vm8655_vm4, 4294967295, %v11394_v29  ;;  %v1685_v25 = vsub.f32 %v1397_v53, %v11398_v52  ;;  %5964 = vmatprep.mubr.msk.f32.mxu0 %vm8655_vm4, %v11201_v3  ;;  %v8680_v53 = vpop.permute.xlu0 %558  ;;  %v11401_v9 = vsel %vm8682_vm10, 4294967295, %v11400_v9  ;;  %6434 = vmatprep.mubr.msk.f32.mxu1 %vm8682_vm10, %v11201_v3  ;;  %v1689_v56 = vsub.f32 %v1401_v8, %v1545_v33 }
 0x149   : > { %11396 = vst [vmem:[#allocation79_spill] sm:$0xff] %v11395_v29  ;;  %11402 = vst [vmem:[#allocation8_spill] sm:$0xff] %v11401_v9  ;;  %3590 = vmatmul.mubr.f32.gmra.mrb[42].mxu0 %v8483_v62  ;;  %v1882_v52 = vmax.f32 %v1253_v59, 0.0  ;;  %v718_v20 = vmin.f32 %v8193_v17, %v7295_v38  ;;  %v719_v49 = vmin.f32 %v8193_v17, %v7298_v41  ;;  %v1886_v32 = vmax.f32 %v1257_v28, 0.0  ;;  %v11408_v28 = vld [vmem:[#allocation9_spill] sm:$0xff]  ;;  %v11417_v29 = vld [vmem:[#allocation10_spill] sm:$0xff] }
 0x14a   : > { %v2026_v11 = vmul.f32 0.5, %v1685_v25  ;;  %v1406_v50 = vmax.f32 %v8193_v17, %v7295_v38  ;;  %v1407_v59 = vmax.f32 %v8193_v17, %v7298_v41  ;;  %v11403_v48 = vmax.f32 %v8116_v5, %v7308_v54 }
 0x14b   : > { %v11404_v33 = vmov 0  ;;  %v2030_v8 = vmul.f32 0.5, %v1689_v56  ;;  %v11407_v25 = vmin.f32 %v8116_v5, %v7308_v54  ;;  %vm2317_vm4 = vcmp.gt.s32.totalorder %v7132_v45, %v11408_v28 }
 0x14c   : > { %vm2170_vm6 = vcmp.gt.f32.partialorder %v1882_v52, %v2026_v11  ;;  %v1256_v44 = vsub.f32 %v712_v14, %v11403_v48  ;;  %v1122_v35 = vmax.f32 %v8220_v61, %v7311_v55  ;;  %v1554_v5 = vmin.f32 %v8220_v61, %v7311_v55  ;;  %v8731_v17 = vpop.permute.xlu0 %563 }
 0x14d   : > { %vm8704_vm10 = vmand %vm2170_vm6, %vm2314_vm3  ;;  %v1688_v11 = vsub.f32 %v1400_v23, %v11407_v25  ;;  %v8724_v23 = vpop.permute.xlu1 %963  ;;  %vm8726_vm3 = vcmp.gt.f32.partialorder %v1886_v32, %v2030_v8  ;;  %v11409_v52 = vmov 0  ;;  %v1260_v25 = vsub.f32 %v716_v34, %v1116_v16 }
 0x14e   : > { %v11405_v33 = vsel %vm8704_vm10, 4294967295, %v11404_v33  ;;  %5965 = vmatprep.mubr.msk.f32.mxu0 %vm8704_vm10, %v11201_v3  ;;  %v1885_v14 = vmax.f32 %v1256_v44, 0.0  ;;  %v11410_v52 = vsel %vm8726_vm3, 4294967295, %v11409_v52  ;;  %v1692_v44 = vsub.f32 %v1404_v57, %v1548_v40  ;;  %6435 = vmatmul.mubr.msk.f32.gmra.mrb[22].mxu1 %vm8726_vm3, %v11201_v3 }
 0x14f   : > { %11406 = vst [vmem:[#allocation80_spill] sm:$0xff] %v11405_v33  ;;  %11411 = vst [vmem:[#allocation9_spill] sm:$0xff] %v11410_v52  ;;  %3596 = vmatmul.mubr.f32.gmra.mrb[44].mxu0 %v8483_v62  ;;  %v2029_v48 = vmul.f32 0.5, %v1688_v11  ;;  %v721_v56 = vmin.f32 %v8222_v31, %v7295_v38  ;;  %v722_v32 = vmin.f32 %v8222_v31, %v7298_v41  ;;  %v1889_v16 = vmax.f32 %v1260_v25, 0.0 }
 0x150   : > { %v1409_v8 = vmax.f32 %v8222_v31, %v7295_v38  ;;  %v1410_v11 = vmax.f32 %v8222_v31, %v7298_v41  ;;  %v2033_v40 = vmul.f32 0.5, %v1692_v44  ;;  %v11412_v34 = vmax.f32 %v8148_v4, %v7308_v54 }
 0x151   : > { %vm2173_vm6 = vcmp.gt.f32.partialorder %v1885_v14, %v2029_v48  ;;  %v11413_v52 = vmov 0  ;;  %v11416_v9 = vmin.f32 %v8148_v4, %v7308_v54  ;;  %vm2320_vm10 = vcmp.gt.s32.totalorder %v7132_v45, %v11417_v29 }
 0x152   : > { %v1259_v57 = vsub.f32 %v715_v22, %v11412_v34  ;;  %vm8750_vm3 = vmand %vm2173_vm6, %vm2317_vm4  ;;  %v1125_v22 = vmax.f32 %v8261_v26, %v7311_v55  ;;  %vm8766_vm4 = vcmp.gt.f32.partialorder %v1889_v16, %v2033_v40  ;;  %v11418_v28 = vmov 0  ;;  %v8780_v16 = vpop.permute.xlu1 %968 }
 0x153   : > { %v11414_v52 = vsel %vm8750_vm3, 4294967295, %v11413_v52  ;;  %v1691_v33 = vsub.f32 %v1403_v58, %v11416_v9  ;;  %5966 = vmatprep.mubr.msk.f32.mxu0 %vm8750_vm3, %v11201_v3  ;;  %v11419_v28 = vsel %vm8766_vm4, 4294967295, %v11418_v28  ;;  %v1557_v58 = vmin.f32 %v8261_v26, %v7311_v55  ;;  %6437 = vmatprep.mubr.msk.f32.mxu1 %vm8766_vm4, %v11201_v3 }
 0x154   : > { %11415 = vst [vmem:[#allocation81_spill] sm:$0xff] %v11414_v52  ;;  %11420 = vst [vmem:[#allocation10_spill] sm:$0xff] %v11419_v28  ;;  %v1888_v14 = vmax.f32 %v1259_v57, 0.0  ;;  %3602 = vmatmul.mubr.f32.gmra.mrb[46].mxu0 %v8483_v62  ;;  %v1263_v48 = vsub.f32 %v719_v49, %v1119_v30  ;;  %v1695_v25 = vsub.f32 %v1407_v59, %v1551_v12  ;;  %v8791_v49 = vpop.permute.xlu0 %568  ;;  %v11423_v28 = vmov 0  ;;  %v11426_v52 = vld [vmem:[#allocation11_spill] sm:$0xff] }
 0x155   : > { %v2032_v9 = vmul.f32 0.5, %v1691_v33  ;;  %v724_v44 = vmin.f32 %v8263_v0, %v7295_v38  ;;  %v725_v40 = vmin.f32 %v8263_v0, %v7298_v41  ;;  %v1412_v34 = vmax.f32 %v8263_v0, %v7295_v38 }
 0x156   : > { %v1413_v57 = vmax.f32 %v8263_v0, %v7298_v41  ;;  %v11421_v4 = vmax.f32 %v8191_v10, %v7308_v54  ;;  %v1892_v30 = vmax.f32 %v1263_v48, 0.0  ;;  %v2036_v12 = vmul.f32 0.5, %v1695_v25 }
 0x157   : > { %vm2176_vm6 = vcmp.gt.f32.partialorder %v1888_v14, %v2032_v9  ;;  %v11422_v59 = vmin.f32 %v8191_v10, %v7308_v54  ;;  %vm2323_vm3 = vcmp.gt.s32.totalorder %v7132_v45, %v11426_v52  ;;  %v1128_v14 = vmax.f32 %v8296_v27, %v7311_v55  ;;  %v11435_v52 = vld [vmem:[#allocation12_spill] sm:$0xff] }
 0x158   : > { %v1262_v33 = vsub.f32 %v718_v20, %v11421_v4  ;;  %vm8799_vm4 = vmand %vm2176_vm6, %vm2320_vm10  ;;  %vm8812_vm5 = vcmp.gt.f32.partialorder %v1892_v30, %v2036_v12  ;;  %v11427_v10 = vmov 0  ;;  %v1560_v4 = vmin.f32 %v8296_v27, %v7311_v55 }
 0x159   : > { %v1694_v31 = vsub.f32 %v1406_v50, %v11422_v59  ;;  %v11424_v28 = vsel %vm8799_vm4, 4294967295, %v11423_v28  ;;  %5967 = vmatprep.mubr.msk.f32.mxu0 %vm8799_vm4, %v11201_v3  ;;  %v11428_v10 = vsel %vm8812_vm5, 4294967295, %v11427_v10  ;;  %6438 = vmatmul.mubr.msk.f32.gmra.mrb[24].mxu1 %vm8812_vm5, %v11201_v3  ;;  %v1266_v9 = vsub.f32 %v722_v32, %v1122_v35  ;;  %v8835_v59 = vpop.permute.xlu1 %973 }
 0x15a   : > { %11425 = vst [vmem:[#allocation82_spill] sm:$0xff] %v11424_v28  ;;  %v1891_v0 = vmax.f32 %v1262_v33, 0.0  ;;  %11429 = vst [vmem:[#allocation11_spill] sm:$0xff] %v11428_v10  ;;  %3608 = vmatmul.mubr.f32.gmra.mrb[48].mxu0 %v8483_v62  ;;  %v1698_v48 = vsub.f32 %v1410_v11, %v1554_v5  ;;  %v727_v25 = vmin.f32 %v8298_v1, %v7295_v38  ;;  %v8827_v33 = vadd.s32 264, %v6964_v7 }
 0x15b   : > { %v2035_v29 = vmul.f32 0.5, %v1694_v31  ;;  %v728_v31 = vmin.f32 %v8298_v1, %v7298_v41  ;;  %v1415_v30 = vmax.f32 %v8298_v1, %v7295_v38  ;;  %v1416_v12 = vmax.f32 %v8298_v1, %v7298_v41  ;;  %v8850_v1 = vpop.permute.xlu0 %573 }
 0x15c   : > { %v11430_v35 = vmov 0  ;;  %v1895_v5 = vmax.f32 %v1266_v9, 0.0  ;;  %v2039_v32 = vmul.f32 0.5, %v1698_v48  ;;  %v11433_v11 = vmax.f32 %v8220_v61, %v7308_v54 }
 0x15d   : > { %vm2179_vm10 = vcmp.gt.f32.partialorder %v1891_v0, %v2035_v29  ;;  %v11434_v29 = vmin.f32 %v8220_v61, %v7308_v54  ;;  %v1131_v48 = vmax.f32 %v8344_v6, %v7311_v55  ;;  %v11436_v61 = vmov 0 }
 0x15e   : > { %vm8840_vm6 = vmand %vm2179_vm10, %vm2323_vm3  ;;  %v1265_v0 = vsub.f32 %v721_v56, %v11433_v11  ;;  %vm8863_vm10 = vcmp.gt.f32.partialorder %v1895_v5, %v2039_v32  ;;  %v1269_v9 = vsub.f32 %v725_v40, %v1125_v22  ;;  %v1701_v20 = vsub.f32 %v1413_v57, %v1557_v58 }
 0x15f   : > { %v11431_v35 = vsel %vm8840_vm6, 4294967295, %v11430_v35  ;;  %v1697_v50 = vsub.f32 %v1409_v8, %v11434_v29  ;;  %5968 = vmatprep.mubr.msk.f32.mxu0 %vm8840_vm6, %v11201_v3  ;;  %v11437_v61 = vsel %vm8863_vm10, 4294967295, %v11436_v61  ;;  %v1563_v29 = vmin.f32 %v8344_v6, %v7311_v55  ;;  %6440 = vmatprep.mubr.msk.f32.mxu1 %vm8863_vm10, %v11201_v3 }
 0x160   : > { %11432 = vst [vmem:[#allocation83_spill] sm:$0xff] %v11431_v35  ;;  %11438 = vst [vmem:[#allocation12_spill] sm:$0xff] %v11437_v61  ;;  %3614 = vmatmul.mubr.f32.gmra.mrb[50].mxu0 %v8483_v62  ;;  %v1894_v8 = vmax.f32 %v1265_v0, 0.0  ;;  %v730_v56 = vmin.f32 %v8361_v2, %v7295_v38  ;;  %v731_v5 = vmin.f32 %v8361_v2, %v7298_v41  ;;  %v11441_v22 = vmov 0  ;;  %v11463_v35 = vld [vmem:[#allocation15_spill] sm:$0xff] }
 0x161   : > { %v2038_v11 = vmul.f32 0.5, %v1697_v50  ;;  %v1418_v32 = vmax.f32 %v8361_v2, %v7295_v38  ;;  %v1419_v50 = vmax.f32 %v8361_v2, %v7298_v41  ;;  %v11439_v0 = vmax.f32 %v8261_v26, %v7308_v54  ;;  %v8896_v2 = vpop.permute.xlu1 %978 }
 0x162   : > { %vm11440_vm10 = vcmp.gt.s32.totalorder %v7132_v45, %v11435_v52  ;;  %v1898_v58 = vmax.f32 %v1269_v9, 0.0  ;;  %v2042_v40 = vmul.f32 0.5, %v1701_v20  ;;  %v11444_v57 = vmin.f32 %v8261_v26, %v7308_v54 }
 0x163   : > { %vm2182_vm3 = vcmp.gt.f32.partialorder %v1894_v8, %v2038_v11  ;;  %v1268_v61 = vsub.f32 %v724_v44, %v11439_v0  ;;  %v11445_v11 = vld [vmem:[#allocation13_spill] sm:$0xff]  ;;  %v1133_v52 = vmax.f32 %v8413_v43, %v7308_v54  ;;  %v1134_v20 = vmax.f32 %v8413_v43, %v7311_v55 }
 0x164   : > { %vm8887_vm5 = vmand %vm2182_vm3, %vm11440_vm10  ;;  %v1700_v8 = vsub.f32 %v1412_v34, %v11444_v57  ;;  %vm2329_vm6 = vcmp.gt.s32.totalorder %v7132_v45, %v11445_v11  ;;  %v1565_v26 = vmin.f32 %v8413_v43, %v7308_v54  ;;  %v8907_v34 = vpop.permute.xlu0 %578  ;;  %vm8909_vm3 = vcmp.gt.f32.partialorder %v1898_v58, %v2042_v40 }
 0x165   : > { %v11442_v22 = vsel %vm8887_vm5, 4294967295, %v11441_v22  ;;  %5969 = vmatprep.mubr.msk.f32.mxu0 %vm8887_vm5, %v11201_v3  ;;  %v1897_v44 = vmax.f32 %v1268_v61, 0.0  ;;  %v11446_v9 = vmov 0  ;;  %v1566_v61 = vmin.f32 %v8413_v43, %v7311_v55  ;;  %6441 = vmatmul.mubr.msk.f32.gmra.mrb[26].mxu1 %vm8909_vm3, %v11201_v3 }
 0x166   : > { %11443 = vst [vmem:[#allocation84_spill] sm:$0xff] %v11442_v22  ;;  %v11447_v9 = vsel %vm8909_vm3, 4294967295, %v11446_v9  ;;  %3620 = vmatmul.mubr.f32.gmra.mrb[52].mxu0 %v8483_v62  ;;  %v2041_v0 = vmul.f32 0.5, %v1700_v8  ;;  %v1272_v57 = vsub.f32 %v728_v31, %v1128_v14  ;;  %v1704_v10 = vsub.f32 %v1416_v12, %v1560_v4 }
 0x167   : > { %11448 = vst [vmem:[#allocation13_spill] sm:$0xff] %v11447_v9  ;;  %v733_v22 = vmin.f32 %v8430_v47, %v7295_v38  ;;  %v734_v58 = vmin.f32 %v8430_v47, %v7298_v41  ;;  %v1421_v40 = vmax.f32 %v8430_v47, %v7295_v38  ;;  %v1422_v43 = vmax.f32 %v8430_v47, %v7298_v41 }
 0x168   : > { %vm2185_vm10 = vcmp.gt.f32.partialorder %v1897_v44, %v2041_v0  ;;  %v1901_v8 = vmax.f32 %v1272_v57, 0.0  ;;  %v11449_v14 = vmax.f32 %v8296_v27, %v7308_v54  ;;  %v11450_v4 = vmov 0  ;;  %v11454_v0 = vld [vmem:[#allocation14_spill] sm:$0xff]  ;;  %v8960_v47 = vpop.permute.xlu0 %583 }
 0x169   : > { %vm8933_vm3 = vmand %vm2185_vm10, %vm2329_vm6  ;;  %v2045_v12 = vmul.f32 0.5, %v1704_v10  ;;  %v11453_v9 = vmin.f32 %v8296_v27, %v7308_v54  ;;  %vm2332_vm5 = vcmp.gt.s32.totalorder %v7132_v45, %v11454_v0  ;;  %v1137_v11 = vmax.f32 %v8492_v60, %v7311_v55 }
 0x16a   : > { %v1271_v31 = vsub.f32 %v727_v25, %v11449_v14  ;;  %v11451_v4 = vsel %vm8933_vm3, 4294967295, %v11450_v4  ;;  %5970 = vmatprep.mubr.msk.f32.mxu0 %vm8933_vm3, %v11201_v3  ;;  %v1569_v27 = vmin.f32 %v8492_v60, %v7311_v55  ;;  %v1275_v14 = vsub.f32 %v731_v5, %v1131_v48 }
 0x16b   : > { %11452 = vst [vmem:[#allocation85_spill] sm:$0xff] %v11451_v4  ;;  %v1703_v44 = vsub.f32 %v1415_v30, %v11453_v9  ;;  %v8953_v30 = vpop.permute.xlu1 %983  ;;  %vm8955_vm6 = vcmp.gt.f32.partialorder %v1901_v8, %v2045_v12  ;;  %v11455_v9 = vmov 0  ;;  %3626 = vmatmul.mubr.f32.gmra.mrb[54].mxu0 %v8483_v62  ;;  %v736_v10 = vmin.f32 %v8501_v21, %v7295_v38 }
 0x16c   : > { %v1900_v25 = vmax.f32 %v1271_v31, 0.0  ;;  %v11456_v9 = vsel %vm8955_vm6, 4294967295, %v11455_v9  ;;  %v1707_v31 = vsub.f32 %v1419_v50, %v1563_v29  ;;  %6443 = vmatprep.mubr.msk.f32.mxu1 %vm8955_vm6, %v11201_v3  ;;  %v737_v8 = vmin.f32 %v8501_v21, %v7298_v41 }
 0x16d   : > { %11457 = vst [vmem:[#allocation14_spill] sm:$0xff] %v11456_v9  ;;  %v2044_v57 = vmul.f32 0.5, %v1703_v44  ;;  %v1424_v12 = vmax.f32 %v8501_v21, %v7295_v38  ;;  %v1425_v44 = vmax.f32 %v8501_v21, %v7298_v41  ;;  %v1904_v48 = vmax.f32 %v1275_v14, 0.0 }
 0x16e   : > { %v2048_v29 = vmul.f32 0.5, %v1707_v31  ;;  %v11458_v5 = vmax.f32 %v8344_v6, %v7308_v54  ;;  %v11459_v9 = vmov 0  ;;  %v11462_v38 = vmin.f32 %v8344_v6, %v7308_v54 }
 0x16f   : > { %vm2188_vm10 = vcmp.gt.f32.partialorder %v1900_v25, %v2044_v57  ;;  %v1140_v21 = vmax.f32 %v8550_v39, %v7311_v55  ;;  %v11464_v0 = vmov 0  ;;  %v1278_v6 = vsub.f32 %v734_v58, %v1134_v20  ;;  %v9011_v58 = vpop.permute.xlu0 %588 }
 0x170   : > { %v1274_v50 = vsub.f32 %v730_v56, %v11458_v5  ;;  %vm8979_vm6 = vmand %vm2188_vm10, %vm2332_vm5  ;;  %v1706_v4 = vsub.f32 %v1418_v32, %v11462_v38  ;;  %v1572_v56 = vmin.f32 %v8550_v39, %v7311_v55  ;;  %vm8995_vm5 = vcmp.gt.f32.partialorder %v1904_v48, %v2048_v29  ;;  %v9007_v48 = vpop.permute.xlu1 %988 }
 0x171   : > { %v11460_v9 = vsel %vm8979_vm6, 4294967295, %v11459_v9  ;;  %5971 = vmatprep.mubr.msk.f32.mxu0 %vm8979_vm6, %v11201_v3  ;;  %v11465_v0 = vsel %vm8995_vm5, 4294967295, %v11464_v0  ;;  %v1710_v32 = vsub.f32 %v1422_v43, %v1566_v61  ;;  %6444 = vmatmul.mubr.msk.f32.gmra.mrb[28].mxu1 %vm8995_vm5, %v11201_v3  ;;  %v740_v39 = vmin.f32 %v8561_v46, %v7298_v41  ;;  %v11466_v61 = vld [vmem:[#allocation16_spill] sm:$0xff] }
 0x172   : > { %11461 = vst [vmem:[#allocation86_spill] sm:$0xff] %v11460_v9  ;;  %v1903_v25 = vmax.f32 %v1274_v50, 0.0  ;;  %3632 = vmatmul.mubr.f32.gmra.mrb[56].mxu0 %v8483_v62  ;;  %v2047_v57 = vmul.f32 0.5, %v1706_v4  ;;  %v1428_v14 = vmax.f32 %v8561_v46, %v7298_v41  ;;  %v1277_v31 = vsub.f32 %v733_v22, %v1133_v52 }
 0x173   : > { %v1907_v29 = vmax.f32 %v1278_v6, 0.0  ;;  %v2051_v5 = vmul.f32 0.5, %v1710_v32  ;;  %v1709_v20 = vsub.f32 %v1421_v40, %v1565_v26  ;;  %vm2338_vm10 = vcmp.gt.s32.totalorder %v7132_v45, %v11466_v61 }
 0x174   : > { %vm2191_vm3 = vcmp.gt.f32.partialorder %v1903_v25, %v2047_v57  ;;  %v1284_v43 = vsub.f32 %v740_v39, %v1140_v21  ;;  %v1716_v4 = vsub.f32 %v1428_v14, %v1572_v56  ;;  %v1906_v50 = vmax.f32 %v1277_v31, 0.0  ;;  %v11478_v39 = vld [vmem:[#allocation17_spill] sm:$0xff] }
 0x175   : > { %vm11467_vm5 = vcmp.gt.s32.totalorder %v7132_v45, %v11463_v35  ;;  %v11468_v46 = vmov 0  ;;  %vm9020_vm4 = vcmp.gt.f32.partialorder %v1907_v29, %v2051_v5  ;;  %v11471_v22 = vmov 0  ;;  %v9061_v5 = vpop.permute.xlu0 %593 }
 0x176   : > { %vm9016_vm6 = vmand %vm2191_vm3, %vm11467_vm5  ;;  %v11472_v22 = vsel %vm9020_vm4, 4294967295, %v11471_v22  ;;  %v2050_v52 = vmul.f32 0.5, %v1709_v20  ;;  %v1143_v26 = vmax.f32 %v8606_v36, %v7311_v55  ;;  %v1575_v40 = vmin.f32 %v8606_v36, %v7311_v55  ;;  %6446 = vmatprep.mubr.msk.f32.mxu1 %vm9020_vm4, %v11201_v3 }
 0x177   : > { %v11469_v46 = vsel %vm9016_vm6, 4294967295, %v11468_v46  ;;  %5972 = vmatprep.mubr.msk.f32.mxu0 %vm9016_vm6, %v11201_v3  ;;  %v1913_v35 = vmax.f32 %v1284_v43, 0.0  ;;  %v2057_v38 = vmul.f32 0.5, %v1716_v4  ;;  %v1281_v21 = vsub.f32 %v737_v8, %v1137_v11 }
 0x178   : > { %11470 = vst [vmem:[#allocation15_spill] sm:$0xff] %v11469_v46  ;;  %v1713_v56 = vsub.f32 %v1425_v44, %v1569_v27  ;;  %3638 = vmatmul.mubr.f32.gmra.mrb[58].mxu0 %v8483_v62  ;;  %vm2194_vm3 = vcmp.gt.f32.partialorder %v1906_v50, %v2050_v52  ;;  %v743_v25 = vmin.f32 %v8620_v37, %v7298_v41  ;;  %v11474_v57 = vmov 0 }
 0x179   : > { %v1431_v36 = vmax.f32 %v8620_v37, %v7298_v41  ;;  %v11473_v6 = vmax.f32 %v8492_v60, %v7308_v54  ;;  %vm9045_vm5 = vmand %vm2194_vm3, %vm2338_vm10  ;;  %v1910_v11 = vmax.f32 %v1281_v21, 0.0  ;;  %v11477_v8 = vmin.f32 %v8492_v60, %v7308_v54  ;;  %v9054_v37 = vpop.permute.xlu1 %993 }
 0x17a   : > { %v11475_v57 = vsel %vm9045_vm5, 4294967295, %v11474_v57  ;;  %v2054_v27 = vmul.f32 0.5, %v1713_v56  ;;  %5973 = vmatprep.mubr.msk.f32.mxu0 %vm9045_vm5, %v11201_v3  ;;  %v1146_v29 = vmax.f32 %v8667_v51, %v7311_v55  ;;  %v11479_v54 = vmov 0 }
 0x17b   : > { %v1280_v32 = vsub.f32 %v736_v10, %v11473_v6  ;;  %11476 = vst [vmem:[#allocation16_spill] sm:$0xff] %v11475_v57  ;;  %v1712_v44 = vsub.f32 %v1424_v12, %v11477_v8  ;;  %v1287_v10 = vsub.f32 %v743_v25, %v1143_v26  ;;  %v1719_v14 = vsub.f32 %v1431_v36, %v1575_v40 }
 0x17c   : > { %vm9063_vm10 = vcmp.gt.f32.partialorder %v1910_v11, %v2054_v27  ;;  %v1578_v12 = vmin.f32 %v8667_v51, %v7311_v55  ;;  %v746_v20 = vmin.f32 %v8680_v53, %v7298_v41  ;;  %3644 = vmatmul.mubr.f32.gmra.mrb[60].mxu0 %v8483_v62  ;;  %v1434_v4 = vmax.f32 %v8680_v53, %v7298_v41  ;;  %v9117_v11 = vpop.permute.xlu0 %598 }
 0x17d   : > { %v1909_v31 = vmax.f32 %v1280_v32, 0.0  ;;  %v11480_v54 = vsel %vm9063_vm10, 4294967295, %v11479_v54  ;;  %v2053_v60 = vmul.f32 0.5, %v1712_v44  ;;  %6447 = vmatmul.mubr.msk.f32.gmra.mrb[30].mxu1 %vm9063_vm10, %v11201_v3  ;;  %v1916_v61 = vmax.f32 %v1287_v10, 0.0  ;;  %v9105_v56 = vpop.permute.xlu1 %998 }
 0x17e   : > { %v2060_v43 = vmul.f32 0.5, %v1719_v14  ;;  %vm2201_vm3 = vcmp.gt.f32.partialorder %v1913_v35, %v2057_v38  ;;  %v1290_v50 = vsub.f32 %v746_v20, %v1146_v29  ;;  %vm2345_vm5 = vcmp.gt.s32.totalorder %v8646_v19, %v8456_v24 }
 0x17f   : > { %vm2197_vm4 = vcmp.gt.f32.partialorder %v1909_v31, %v2053_v60  ;;  %v1149_v51 = vmax.f32 %v8724_v23, %v7311_v55  ;;  %vm11481_vm6 = vcmp.gt.s32.totalorder %v7132_v45, %v11478_v39  ;;  %v11482_v52 = vmov 0  ;;  %vm9097_vm14 = vmand %vm2201_vm3, %vm2345_vm5  ;;  %v11568_v45 = vld [vmem:[#allocation41_spill] sm:$0xff] }
 0x180   : > { %vm9084_vm10 = vmand %vm2197_vm4, %vm11481_vm6  ;;  %v1722_v26 = vsub.f32 %v1434_v4, %v1578_v12  ;;  %v1581_v53 = vmin.f32 %v8724_v23, %v7311_v55  ;;  %v749_v40 = vmin.f32 %v8731_v17, %v7298_v41  ;;  %v1437_v35 = vmax.f32 %v8731_v17, %v7298_v41  ;;  %6449 = vmatprep.mubr.msk.f32.mxu1 %vm9097_vm14, %v11201_v3 }
 0x181   : > { %v11483_v52 = vsel %vm9084_vm10, 4294967295, %v11482_v52  ;;  %5974 = vmatprep.mubr.msk.f32.mxu0 %vm9084_vm10, %v11201_v3  ;;  %v1919_v38 = vmax.f32 %v1290_v50, 0.0  ;;  %v11485_v21 = vmov 0  ;;  %vm2204_vm4 = vcmp.gt.f32.partialorder %v1916_v61, %v2060_v43 }
 0x182   : > { %11484 = vst [vmem:[#allocation17_spill] sm:$0xff] %v11483_v52  ;;  %v11486_v21 = vsel %vm9097_vm14, 4294967295, %v11485_v21  ;;  %vm2348_vm6 = vcmp.gt.s32.totalorder %v8646_v19, %v8827_v33  ;;  %v1152_v23 = vmax.f32 %v8780_v16, %v7311_v55  ;;  %v2063_v25 = vmul.f32 0.5, %v1722_v26  ;;  %3650 = vmatmul.mubr.f32.gmra.mrb[62].mxu0 %v8483_v62 }
 0x183   : > { %v1293_v17 = vsub.f32 %v749_v40, %v1149_v51  ;;  %v1725_v36 = vsub.f32 %v1437_v35, %v1581_v53  ;;  %vm9111_vm5 = vmand %vm2204_vm4, %vm2348_vm6  ;;  %v11487_v6 = vmov 0  ;;  %v1584_v32 = vmin.f32 %v8780_v16, %v7311_v55  ;;  %3655 = vmatprep.mubr.f32.mxu0 %v8483_v62  ;;  %v9160_v51 = vpop.permute.xlu1 %1003  ;;  %v9168_v35 = vpop.permute.xlu0 %603 }
 0x184   : > { %v11488_v6 = vsel %vm9111_vm5, 4294967295, %v11487_v6  ;;  %6450 = vmatmul.mubr.msk.f32.gmra.mrb[32].mxu1 %vm9111_vm5, %v11201_v3  ;;  %v752_v27 = vmin.f32 %v8791_v49, %v7298_v41  ;;  %v1440_v8 = vmax.f32 %v8791_v49, %v7298_v41  ;;  %v9128_v44 = vadd.s32 272, %v6964_v7 }
 0x185   : > { %v1155_v16 = vmax.f32 %v8835_v59, %v7311_v55  ;;  %v1922_v39 = vmax.f32 %v1293_v17, 0.0  ;;  %v2066_v10 = vmul.f32 0.5, %v1725_v36  ;;  %vm2207_vm3 = vcmp.gt.f32.partialorder %v1919_v38, %v2063_v25 }
 0x186   : > { %v1587_v14 = vmin.f32 %v8835_v59, %v7311_v55  ;;  %v1296_v31 = vsub.f32 %v752_v27, %v1152_v23  ;;  %v1728_v29 = vsub.f32 %v1440_v8, %v1584_v32  ;;  %vm2351_vm4 = vcmp.gt.s32.totalorder %v8646_v19, %v9128_v44  ;;  %3656 = vmatmul.mubr.f32.gmra.mrb[64].mxu0 %v8483_v62 }
 0x187   : > { %v755_v49 = vmin.f32 %v8850_v1, %v7298_v41  ;;  %vm9139_vm6 = vmand %vm2207_vm3, %vm2351_vm4  ;;  %v11489_v60 = vmov 0  ;;  %v1443_v12 = vmax.f32 %v8850_v1, %v7298_v41  ;;  %v9146_v20 = vadd.s32 280, %v6964_v7  ;;  %3661 = vmatprep.mubr.f32.mxu0 %v8483_v62 }
 0x188   : > { %v11490_v60 = vsel %vm9139_vm6, 4294967295, %v11489_v60  ;;  %vm9148_vm5 = vcmp.gt.f32.partialorder %v1922_v39, %v2066_v10  ;;  %v1158_v61 = vmax.f32 %v8896_v2, %v7311_v55  ;;  %v1925_v43 = vmax.f32 %v1296_v31, 0.0  ;;  %6452 = vmatprep.mubr.msk.f32.mxu1 %vm9139_vm6, %v11201_v3 }
 0x189   : > { %v2069_v4 = vmul.f32 0.5, %v1728_v29  ;;  %v1299_v50 = vsub.f32 %v755_v49, %v1155_v16  ;;  %v1590_v1 = vmin.f32 %v8896_v2, %v7311_v55  ;;  %v1731_v26 = vsub.f32 %v1443_v12, %v1587_v14  ;;  %v9216_v29 = vpop.permute.xlu1 %1008 }
 0x18a   : > { %vm2354_vm3 = vcmp.gt.s32.totalorder %v8646_v19, %v9146_v20  ;;  %v758_v53 = vmin.f32 %v8907_v34, %v7298_v41  ;;  %v1446_v40 = vmax.f32 %v8907_v34, %v7298_v41  ;;  %v11493_v23 = vmov 0  ;;  %3662 = vmatmul.mubr.f32.gmra.mrb[66].mxu0 %v8483_v62 }
 0x18b   : > { %v1928_v38 = vmax.f32 %v1299_v50, 0.0  ;;  %vm9172_vm4 = vmand %vm9148_vm5, %vm2354_vm3  ;;  %v9177_v2 = vadd.s32 288, %v6964_v7  ;;  %vm9179_vm6 = vcmp.gt.f32.partialorder %v1925_v43, %v2069_v4  ;;  %v1161_v17 = vmax.f32 %v8953_v30, %v7311_v55  ;;  %3667 = vmatprep.mubr.f32.mxu0 %v8483_v62  ;;  %v9231_v43 = vpop.permute.xlu0 %608 }
 0x18c   : > { %v11494_v23 = vsel %vm9172_vm4, 4294967295, %v11493_v23  ;;  %v2072_v34 = vmul.f32 0.5, %v1731_v26  ;;  %6453 = vmatmul.mubr.msk.f32.gmra.mrb[34].mxu1 %vm9172_vm4, %v11201_v3  ;;  %v1302_v36 = vsub.f32 %v758_v53, %v1158_v61  ;;  %v1734_v32 = vsub.f32 %v1446_v40, %v1590_v1 }
 0x18d   : > { %v1593_v27 = vmin.f32 %v8953_v30, %v7311_v55  ;;  %vm2357_vm5 = vcmp.gt.s32.totalorder %v8646_v19, %v9177_v2  ;;  %v761_v8 = vmin.f32 %v8960_v47, %v7298_v41  ;;  %v1449_v16 = vmax.f32 %v8960_v47, %v7298_v41 }
 0x18e   : > { %v9199_v39 = vadd.s32 296, %v6964_v7  ;;  %v1931_v10 = vmax.f32 %v1302_v36, 0.0  ;;  %v2075_v14 = vmul.f32 0.5, %v1734_v32  ;;  %vm9203_vm3 = vmand %vm9179_vm6, %vm2357_vm5  ;;  %v11497_v30 = vmov 0  ;;  %3668 = vmatmul.mubr.f32.gmra.mrb[68].mxu0 %v8483_v62 }
 0x18f   : > { %v11498_v30 = vsel %vm9203_vm3, 4294967295, %v11497_v30  ;;  %vm2216_vm4 = vcmp.gt.f32.partialorder %v1928_v38, %v2072_v34  ;;  %vm3065_vm14 = vcmp.le.s32.totalorder %v8456_v24, %v8646_v19  ;;  %6455 = vmatprep.mubr.msk.f32.mxu1 %vm9203_vm3, %v11201_v3  ;;  %v1305_v47 = vsub.f32 %v761_v8, %v1161_v17  ;;  %3673 = vmatprep.mubr.f32.mxu0 %v8483_v62 }
 0x190   : > { %v1737_v31 = vsub.f32 %v1449_v16, %v1593_v27  ;;  %vm2360_vm10 = vcmp.gt.s32.totalorder %v8646_v19, %v9199_v39  ;;  %vm3068_vm9 = vcmp.le.s32.totalorder %v8827_v33, %v8646_v19  ;;  %v11499_v49 = vmov 0  ;;  %v9291_v16 = vpop.permute.xlu1 %1013 }
 0x191   : > { %vm9219_vm6 = vmand %vm2216_vm4, %vm2360_vm10  ;;  %v1164_v12 = vmax.f32 %v9007_v48, %v7311_v55  ;;  %v1596_v59 = vmin.f32 %v9007_v48, %v7311_v55  ;;  %v764_v61 = vmin.f32 %v9011_v58, %v7298_v41  ;;  %v1452_v33 = vmax.f32 %v9011_v58, %v7298_v41 }
 0x192   : > { %v11500_v49 = vsel %vm9219_vm6, 4294967295, %v11499_v49  ;;  %v1934_v4 = vmax.f32 %v1305_v47, 0.0  ;;  %v2078_v50 = vmul.f32 0.5, %v1737_v31  ;;  %6456 = vmatmul.mubr.msk.f32.gmra.mrb[36].mxu1 %vm9219_vm6, %v11201_v3  ;;  %vm9240_vm10 = vmpackc.low %vm3068_vm9, %vm3065_vm14  ;;  %v11501_v48 = vmov 0  ;;  %3674 = vmatmul.mubr.f32.gmra.mrb[70].mxu0 %v8483_v62 }
 0x193   : > { %v11502_v48 = vsel %vm9240_vm10, 4294967295, %v11501_v48  ;;  %v9245_v1 = vadd.s32 304, %v6964_v7  ;;  %vm9247_vm4 = vcmp.gt.f32.partialorder %v1931_v10, %v2075_v14  ;;  %6658 = vmatprep.subr.msk.bf16.mxu0 %vm9240_vm10, %v11180_v18  ;;  %v1308_v26 = vsub.f32 %v764_v61, %v1164_v12  ;;  %6689 = vmatprep.subr.msk.bf16.mxu1 %vm9240_vm10, %v11180_v18  ;;  %v614_v12 = vpop.permute.xlu0 %613 }
 0x194   : > { %v1740_v53 = vsub.f32 %v1452_v33, %v1596_v59  ;;  %v1167_v24 = vmax.f32 %v9054_v37, %v7311_v55  ;;  %v1599_v40 = vmin.f32 %v9054_v37, %v7311_v55  ;;  %6660 = vmatpush3.bf16.msk.msra.mxu0 %vm9240_vm10, %v11180_v18  ;;  %v767_v38 = vmin.f32 %v9061_v5, %v7298_v41 }
 0x195   : > { %vm2363_vm9 = vcmp.gt.s32.totalorder %v8646_v19, %v9245_v1  ;;  %v1455_v25 = vmax.f32 %v9061_v5, %v7298_v41  ;;  %v9268_v17 = vadd.s32 312, %v6964_v7  ;;  %v1937_v37 = vmax.f32 %v1308_v26, 0.0  ;;  %3679 = vmatprep.mubr.f32.mxu0 %v8483_v62 }
 0x196   : > { %v2081_v34 = vmul.f32 0.5, %v1740_v53  ;;  %vm9276_vm14 = vmand %vm9247_vm4, %vm2363_vm9  ;;  %v11505_v36 = vmov 0  ;;  %vm2222_vm5 = vcmp.gt.f32.partialorder %v1934_v4, %v2078_v50  ;;  %v1170_v5 = vmax.f32 %v9105_v56, %v7311_v55  ;;  %3680 = vmatmul.mubr.f32.gmra.mrb[72].mxu0 %v8483_v62 }
 0x197   : > { %v11506_v36 = vsel %vm9276_vm14, 4294967295, %v11505_v36  ;;  %6458 = vmatprep.mubr.msk.f32.mxu1 %vm9276_vm14, %v11201_v3  ;;  %v1311_v32 = vsub.f32 %v767_v38, %v1167_v24  ;;  %v1743_v27 = vsub.f32 %v1455_v25, %v1599_v40  ;;  %vm2366_vm6 = vcmp.gt.s32.totalorder %v8646_v19, %v9268_v17  ;;  %3685 = vmatprep.mubr.f32.mxu0 %v8483_v62 }
 0x198   : > { %11507 = vst [vmem:[#allocation87_spill] sm:$0xff] %v11506_v36  ;;  %v9289_v8 = vadd.s32 320, %v6964_v7  ;;  %vm9293_vm4 = vmand %vm2222_vm5, %vm2366_vm6  ;;  %v11508_v10 = vmov 0  ;;  %v1602_v14 = vmin.f32 %v9105_v56, %v7311_v55  ;;  %v770_v47 = vmin.f32 %v9117_v11, %v7298_v41 }
 0x199   : > { %v11509_v10 = vsel %vm9293_vm4, 4294967295, %v11508_v10  ;;  %v1458_v31 = vmax.f32 %v9117_v11, %v7298_v41  ;;  %vm2225_vm9 = vcmp.gt.f32.partialorder %v1937_v37, %v2081_v34  ;;  %v1940_v59 = vmax.f32 %v1311_v32, 0.0  ;;  %6459 = vmatmul.mubr.msk.f32.gmra.mrb[38].mxu1 %vm9293_vm4, %v11201_v3 }
 0x19a   : > { %11510 = vst [vmem:[#allocation88_spill] sm:$0xff] %v11509_v10  ;;  %v2084_v61 = vmul.f32 0.5, %v1743_v27  ;;  %vm2369_vm6 = vcmp.gt.s32.totalorder %v8646_v19, %v9289_v8  ;;  %v1173_v56 = vmax.f32 %v9160_v51, %v7311_v55  ;;  %v1314_v33 = vsub.f32 %v770_v47, %v1170_v5  ;;  %v9338_v5 = vpop.permute.xlu1 %1018  ;;  %3686 = vmatmul.mubr.f32.gmra.mrb[74].mxu0 %v8483_v62 }
 0x19b   : > { %v1746_v4 = vsub.f32 %v1458_v31, %v1602_v14  ;;  %vm9311_vm5 = vmand %vm2225_vm9, %vm2369_vm6  ;;  %v11511_v11 = vmov 0  ;;  %v1605_v50 = vmin.f32 %v9160_v51, %v7311_v55  ;;  %v773_v58 = vmin.f32 %v9168_v35, %v7298_v41  ;;  %3691 = vmatprep.mubr.f32.mxu0 %v8483_v62  ;;  %v3465_v14 = vpop.f32.mrb[0].mxu0 }
 0x19c   : > { %v11512_v11 = vsel %vm9311_vm5, 4294967295, %v11511_v11  ;;  %6461 = vmatprep.mubr.msk.f32.mxu1 %vm9311_vm5, %v11201_v3  ;;  %v1461_v26 = vmax.f32 %v9168_v35, %v7298_v41  ;;  %v9326_v53 = vadd.s32 328, %v6964_v7  ;;  %vm2228_vm9 = vcmp.gt.f32.partialorder %v1940_v59, %v2084_v61 }
 0x19d   : > { %11513 = vst [vmem:[#allocation89_spill] sm:$0xff] %v11512_v11  ;;  %v1176_v24 = vmax.f32 %v9216_v29, %v7311_v55  ;;  %v1943_v51 = vmax.f32 %v1314_v33, 0.0  ;;  %v2087_v40 = vmul.f32 0.5, %v1746_v4  ;;  %v1317_v38 = vsub.f32 %v773_v58, %v1173_v56 }
 0x19e   : > { %v1608_v25 = vmin.f32 %v9216_v29, %v7311_v55  ;;  %v1749_v37 = vsub.f32 %v1461_v26, %v1605_v50  ;;  %vm2372_vm6 = vcmp.gt.s32.totalorder %v8646_v19, %v9326_v53  ;;  %v776_v35 = vmin.f32 %v9231_v43, %v7298_v41  ;;  %3692 = vmatmul.mubr.f32.gmra.mrb[76].mxu0 %v8483_v62 }
 0x19f   : > { %v1464_v34 = vmax.f32 %v9231_v43, %v7298_v41  ;;  %v1946_v32 = vmax.f32 %v1317_v38, 0.0  ;;  %vm9341_vm5 = vmand %vm2228_vm9, %vm2372_vm6  ;;  %v11514_v27 = vmov 0  ;;  %v9346_v29 = vadd.s32 336, %v6964_v7  ;;  %v619_v43 = vpop.permute.xlu0 %618 }
 0x1a0   : > { %v11515_v27 = vsel %vm9341_vm5, 4294967295, %v11514_v27  ;;  %vm9348_vm4 = vcmp.gt.f32.partialorder %v1943_v51, %v2087_v40  ;;  %vm3071_vm14 = vcmp.le.s32.totalorder %v9128_v44, %v8646_v19  ;;  %v2090_v47 = vmul.f32 0.5, %v1749_v37  ;;  %6462 = vmatmul.mubr.msk.f32.gmra.mrb[40].mxu1 %vm9341_vm5, %v11201_v3  ;;  %v9393_v51 = vld [vmem:[#allocation2 + $0x180] sm:$0xff] }
 0x1a1   : > { %11516 = vst [vmem:[#allocation90_spill] sm:$0xff] %v11515_v27  ;;  %v1320_v31 = vsub.f32 %v776_v35, %v1176_v24  ;;  %v1752_v59 = vsub.f32 %v1464_v34, %v1608_v25  ;;  %vm3074_vm9 = vcmp.le.s32.totalorder %v9146_v20, %v8646_v19  ;;  %vm2375_vm6 = vcmp.gt.s32.totalorder %v8646_v19, %v9346_v29  ;;  %v11584_v27 = vld [vmem:[#allocation45_spill] sm:$0xff] }
 0x1a2   : > { %vm9362_vm3 = vmpackc.low %vm3074_vm9, %vm3071_vm14  ;;  %v11519_v61 = vmov 0  ;;  %v1179_v44 = vmax.f32 %v9291_v16, %v7311_v55  ;;  %v1611_v56 = vmin.f32 %v9291_v16, %v7311_v55  ;;  %v779_v33 = vmin.f32 %v614_v12, %v7298_v41  ;;  %3697 = vmatprep.mubr.f32.mxu0 %v9393_v51 }
 0x1a3   : > { %v11520_v61 = vsel %vm9362_vm3, 4294967295, %v11519_v61  ;;  %v1949_v4 = vmax.f32 %v1320_v31, 0.0  ;;  %v2093_v50 = vmul.f32 0.5, %v1752_v59  ;;  %vm9373_vm5 = vmand %vm9348_vm4, %vm2375_vm6  ;;  %v11521_v20 = vmov 0  ;;  %6662 = vmatprep.subr.msk.bf16.mxu0 %vm9362_vm3, %v11180_v18  ;;  %v3467_v59 = vpop.f32.mrb[1].mxu0  ;;  %3698 = vmatmul.mubr.f32.gmra.mrb[78].mxu0 %v9393_v51 }
 0x1a4   : > { %v11522_v20 = vsel %vm9373_vm5, 4294967295, %v11521_v20  ;;  %v1467_v58 = vmax.f32 %v614_v12, %v7298_v41  ;;  %v9382_v26 = vadd.s32 344, %v6964_v7  ;;  %6464 = vmatprep.mubr.msk.f32.mxu1 %vm9373_vm5, %v11201_v3  ;;  %v1323_v16 = vsub.f32 %v779_v33, %v1179_v44  ;;  %6664 = vmatpush3.bf16.msk.msra.mxu0 %vm9362_vm3, %v11180_v18  ;;  %v1024_v12 = vpop.permute.xlu1 %1023 }
 0x1a5   : > { %11523 = vst [vmem:[#allocation91_spill] sm:$0xff] %v11522_v20  ;;  %vm2234_vm14 = vcmp.gt.f32.partialorder %v1946_v32, %v2090_v47  ;;  %v9391_v24 = vadd.s32 352, %v6964_v7  ;;  %vm3080_vm6 = vcmp.le.s32.totalorder %v9199_v39, %v8646_v19  ;;  %v9404_v40 = vadd.s32 360, %v6964_v7  ;;  %v624_v32 = vpop.permute.xlu0 %623  ;;  %3703 = vmatprep.mubr.f32.mxu0 %v9393_v51 }
 0x1a6   : > { %v1755_v62 = vsub.f32 %v1467_v58, %v1611_v56  ;;  %vm2378_vm9 = vcmp.gt.s32.totalorder %v8646_v19, %v9382_v26  ;;  %v1952_v38 = vmax.f32 %v1323_v16, 0.0  ;;  %v11524_v25 = vmov 0 }
 0x1a7   : > { %vm9406_vm4 = vmand %vm2234_vm14, %vm2378_vm9  ;;  %v1182_v37 = vmax.f32 %v9338_v5, %v7311_v55  ;;  %v1614_v35 = vmin.f32 %v9338_v5, %v7311_v55  ;;  %v782_v34 = vmin.f32 %v619_v43, %v7298_v41  ;;  %vm11527_vm14 = vcmp.le.s32.totalorder %v9177_v2, %v8646_v19  ;;  %v6403_v5 = vpop.f32.mrb[0].mxu1  ;;  %3704 = vmatmul.mubr.f32.gmra.mrb[80].mxu0 %v9393_v51 }
 0x1a8   : > { %v11525_v25 = vsel %vm9406_vm4, 4294967295, %v11524_v25  ;;  %v2096_v39 = vmul.f32 0.5, %v1755_v62  ;;  %6465 = vmatmul.mubr.msk.f32.gmra.mrb[42].mxu1 %vm9406_vm4, %v11201_v3  ;;  %vm9421_vm9 = vmpackc.low %vm3080_vm6, %vm11527_vm14  ;;  %v11528_v47 = vmov 0  ;;  %v1470_v31 = vmax.f32 %v619_v43, %v7298_v41  ;;  %v3818_v56 = vpop.f32.mrb[1].mxu1  ;;  %3709 = vmatprep.mubr.f32.mxu0 %v9393_v51 }
 0x1a9   : > { %11526 = vst [vmem:[#allocation92_spill] sm:$0xff] %v11525_v25  ;;  %v11529_v47 = vsel %vm9421_vm9, 4294967295, %v11528_v47  ;;  %vm2237_vm5 = vcmp.gt.f32.partialorder %v1949_v4, %v2093_v50  ;;  %vm2381_vm3 = vcmp.gt.s32.totalorder %v8646_v19, %v9391_v24  ;;  %6666 = vmatprep.subr.msk.bf16.mxu0 %vm9421_vm9, %v11180_v18  ;;  %v1326_v44 = vsub.f32 %v782_v34, %v1182_v37  ;;  %v11578_v25 = vld [vmem:[#allocation42_spill] sm:$0xff] }
 0x1aa   : > { %vm9432_vm4 = vmand %vm2237_vm5, %vm2381_vm3  ;;  %v11530_v2 = vmov 0  ;;  %vm3083_vm6 = vcmp.le.s32.totalorder %v9245_v1, %v8646_v19  ;;  %vm3086_vm14 = vcmp.le.s32.totalorder %v9268_v17, %v8646_v19  ;;  %v9441_v43 = vadd.s32 368, %v6964_v7  ;;  %6668 = vmatpush3.bf16.msk.msra.mxu0 %vm9421_vm9, %v11180_v18 }
 0x1ab   : > { %v11531_v2 = vsel %vm9432_vm4, 4294967295, %v11530_v2  ;;  %v1758_v33 = vsub.f32 %v1470_v31, %v1614_v35  ;;  %vm9447_vm3 = vmpackc.low %vm3086_vm14, %vm3083_vm6  ;;  %v1185_v1 = vmax.f32 %v1024_v12, %v7311_v55  ;;  %v1617_v50 = vmin.f32 %v1024_v12, %v7311_v55  ;;  %6467 = vmatprep.mubr.msk.f32.mxu1 %vm9432_vm4, %v11201_v3  ;;  %3710 = vmatmul.mubr.f32.gmra.mrb[82].mxu0 %v9393_v51  ;;  %v6781_v31 = vld [vmem:[#allocation2 + $0x8] sm:$0xff] }
 0x1ac   : > { %11532 = vst [vmem:[#allocation93_spill] sm:$0xff] %v11531_v2  ;;  %v9454_v17 = vadd.s32 376, %v6964_v7  ;;  %v1955_v58 = vmax.f32 %v1326_v44, 0.0  ;;  %6670 = vmatprep.subr.msk.bf16.mxu0 %vm9447_vm3, %v11180_v18  ;;  %v785_v16 = vmin.f32 %v624_v32, %v7298_v41  ;;  %v1473_v62 = vmax.f32 %v624_v32, %v7298_v41  ;;  %3715 = vmatprep.mubr.f32.mxu0 %v9393_v51  ;;  %v11715_v41 = vld [vmem:[#allocation76_spill] sm:$0xff] }
 0x1ad   : > { %vm2240_vm5 = vcmp.gt.f32.partialorder %v1952_v38, %v2096_v39  ;;  %v2099_v37 = vmul.f32 0.5, %v1758_v33  ;;  %vm2384_vm6 = vcmp.gt.s32.totalorder %v8646_v19, %v9404_v40  ;;  %vm3089_vm14 = vcmp.le.s32.totalorder %v9289_v8, %v8646_v19  ;;  %v3471_v39 = vpop.f32.mrb[2].mxu0 }
 0x1ae   : > { %vm3092_vm9 = vcmp.le.s32.totalorder %v9326_v53, %v8646_v19  ;;  %v1329_v55 = vsub.f32 %v785_v16, %v1185_v1  ;;  %v1761_v12 = vsub.f32 %v1473_v62, %v1617_v50  ;;  %vm9471_vm4 = vmand %vm2240_vm5, %vm2384_vm6  ;;  %v11535_v35 = vmov 0  ;;  %6672 = vmatpush3.bf16.msk.msra.mxu0 %vm9447_vm3, %v11180_v18  ;;  %v3473_v33 = vpop.f32.mrb[3].mxu0  ;;  %v11632_v62 = vld [vmem:[#allocation66_spill] sm:$0xff] }
 0x1af   : > { %v11536_v35 = vsel %vm9471_vm4, 4294967295, %v11535_v35  ;;  %vm2387_vm10 = vcmp.gt.s32.totalorder %v8646_v19, %v9441_v43  ;;  %vm3095_vm13 = vcmp.le.s32.totalorder %v9346_v29, %v8646_v19  ;;  %vm9483_vm8 = vmpackc.low %vm3092_vm9, %vm3089_vm14  ;;  %vm2243_vm5 = vcmp.gt.f32.partialorder %v1955_v58, %v2099_v37  ;;  %6468 = vmatmul.mubr.msk.f32.gmra.mrb[44].mxu1 %vm9471_vm4, %v11201_v3  ;;  %3716 = vmatmul.mubr.f32.gmra.mrb[84].mxu0 %v9393_v51  ;;  %v3477_v36 = vpop.f32.mrb[4].mxu0 }
 0x1b0   : > { %11537 = vst [vmem:[#allocation94_spill] sm:$0xff] %v11536_v35  ;;  %vm3098_vm6 = vcmp.le.s32.totalorder %v9382_v26, %v8646_v19  ;;  %vm4716_vm15 = vcmp.le.f32.partialorder %v3467_v59, 16.0  ;;  %v1958_v8 = vmax.f32 %v1329_v55, 0.0  ;;  %v2102_v53 = vmul.f32 0.5, %v1761_v12  ;;  %6674 = vmatprep.subr.msk.bf16.mxu0 %vm9483_vm8, %v11180_v18  ;;  %vm9497_vm9 = vmand %vm2243_vm5, %vm2387_vm10  ;;  %3721 = vmatprep.mubr.f32.mxu0 %v9393_v51  ;;  %v11575_v35 = vld [vmem:[#allocation44_spill] sm:$0xff] }
 0x1b1   : > { %v11540_v38 = vmov 0  ;;  %vm3101_vm14 = vcmp.le.s32.totalorder %v9391_v24, %v8646_v19  ;;  %6470 = vmatprep.mubr.msk.f32.mxu1 %vm9497_vm9, %v11201_v3  ;;  %vm9511_vm4 = vmpackc.low %vm3098_vm6, %vm3095_vm13  ;;  %v11543_v26 = vmov 0  ;;  %v6136_v34 = vsel %vm4716_vm15, 1.0, %v9393_v51  ;;  %v11556_v24 = vld [vmem:[#allocation32_spill] sm:$0xff] }
 0x1b2   : > { %v11541_v38 = vsel %vm9497_vm9, 4294967295, %v11540_v38  ;;  %v11544_v26 = vsel %vm9511_vm4, 4294967295, %v11543_v26  ;;  %v3819_v32 = vadd.f32 %v3818_v56, %v3465_v14  ;;  %vm2246_vm2 = vcmp.gt.f32.partialorder %v1958_v8, %v2102_v53  ;;  %6676 = vmatpush3.bf16.msk.msra.mxu0 %vm9483_vm8, %v11180_v18  ;;  %v6782_v8 = vld [vmem:[#allocation2] sm:$0xff]  ;;  %v11598_v56 = vld [vmem:[#allocation53_spill] sm:$0xff] }
 0x1b3   : > { %11542 = vst [vmem:[#allocation95_spill] sm:$0xff] %v11541_v38  ;;  %v5148_v59 = vmul.f32 %v6781_v31, %v6136_v34  ;;  %v5754_v29 = vsel %vm7475_vm11, 1.0, %v9393_v51  ;;  %v3825_v44 = vadd.f32 %v6403_v5, %v3471_v39  ;;  %vm11545_vm15 = vcmp.gt.s32.totalorder %v8646_v19, %v9454_v17  ;;  %6678 = vmatprep.subr.msk.bf16.mxu0 %vm9511_vm4, %v11180_v18  ;;  %v9571_v39 = vpop.f32.mrb[2].mxu1  ;;  %v11573_v38 = vld [vmem:[#allocation23_spill] sm:$0xff] }
 0x1b4   : > { %vm9531_vm13 = vmand %vm2246_vm2, %vm11545_vm15  ;;  %v11546_v14 = vmov 0  ;;  %vm4715_vm6 = vcmp.le.f32.partialorder %v3819_v32, 16.0  ;;  %2826 = vst [vmem:[#allocation2 + $0x18] sm:$0xff] %v5754_v29  ;;  %v5755_v5 = vsel %vm7428_vm7, 1.0, %v9393_v51  ;;  %vm4719_vm5 = vcmp.le.f32.partialorder %v3473_v33, 16.0  ;;  %3722 = vmatmul.mubr.f32.gmra.mrb[86].mxu0 %v9393_v51 }
 0x1b5   : > { %v11547_v14 = vsel %vm9531_vm13, 4294967295, %v11546_v14  ;;  %v9541_v50 = vsel %vm7548_vm0, 1.0, %v9393_v51  ;;  %6471 = vmatmul.mubr.msk.f32.gmra.mrb[46].mxu1 %vm9531_vm13, %v11201_v3  ;;  %5292 = vst [vmem:[#allocation3 + $0x8] sm:$0xff] %v5148_v59  ;;  %v6135_v58 = vsel %vm4715_vm6, 1.0, %v9393_v51  ;;  %vm4718_vm2 = vcmp.le.f32.partialorder %v3825_v44, 16.0  ;;  %2827 = vst [vmem:[#allocation2 + $0x20] sm:$0xff] %v5755_v5  ;;  %3727 = vmatprep.mubr.f32.mxu0 %v9393_v51 }
 0x1b6   : > { %11548 = vst [vmem:[#allocation96_spill] sm:$0xff] %v11547_v14  ;;  %v6139_v16 = vsel %vm4719_vm5, 1.0, %v9393_v51  ;;  %2829 = vst [vmem:[#allocation2 + $0x30] sm:$0xff] %v9541_v50  ;;  %v9555_v37 = vsel %vm7495_vm12, 1.0, %v9393_v51  ;;  %vm11552_vm15 = vcmp.le.s32.totalorder %v9404_v40, %v8646_v19  ;;  %6023 = vmatprep.mubr.msk.f32.mxu1 %vm7357_vm1, %v11201_v3  ;;  %v5147_v53 = vmul.f32 %v6782_v8, %v6135_v58  ;;  %v3830_v59 = vpop.f32.mrb[3].mxu1  ;;  %v11558_v44 = vld [vmem:[#allocation30_spill] sm:$0xff] }
 0x1b7   : > { %vm9563_vm10 = vmpackc.low %vm11552_vm15, %vm3101_vm14  ;;  %v6138_v34 = vsel %vm4718_vm2, 1.0, %v9393_v51  ;;  %v5151_v32 = vmul.f32 %v6139_v16, %v5755_v5  ;;  %2830 = vst [vmem:[#allocation2 + $0x38] sm:$0xff] %v9555_v37  ;;  %vm11557_vm5 = vnez %v11556_v24  ;;  %vm11559_vm1 = vnez %v11558_v44  ;;  %v11560_v5 = vld [vmem:[#allocation35_spill] sm:$0xff]  ;;  %v11562_v16 = vld [vmem:[#allocation33_spill] sm:$0xff]  ;;  %6680 = vmatpush3.bf16.msk.msra.mxu0 %vm9511_vm4, %v11180_v18 }
 0x1b8   : > { %v9577_v40 = vsel %vm11557_vm5, 1.0, %v9393_v51  ;;  %v5150_v31 = vmul.f32 %v6138_v34, %v5754_v29  ;;  %v9584_v33 = vsel %vm11559_vm1, 1.0, %v9393_v51  ;;  %vm11561_vm14 = vnez %v11560_v5  ;;  %5291 = vst [vmem:[#allocation3] sm:$0xff] %v5147_v53  ;;  %v11564_v29 = vld [vmem:[#allocation38_spill] sm:$0xff]  ;;  %v11566_v34 = vld [vmem:[#allocation36_spill] sm:$0xff]  ;;  %6682 = vmatprep.subr.msk.bf16.mxu0 %vm9563_vm10, %v11180_v18  ;;  %3728 = vmatmul.mubr.f32.gmra.mrb[88].mxu0 %v9393_v51  ;;  %v11680_v24 = vld [vmem:[#allocation31_spill] sm:$0xff] }
 0x1b9   : > { %2832 = vst [vmem:[#allocation2 + $0x48] sm:$0xff] %v9577_v40  ;;  %v9589_v58 = vsel %vm11561_vm14, 1.0, %v9393_v51  ;;  %vm11563_vm6 = vnez %v11562_v16  ;;  %5295 = vst [vmem:[#allocation3 + $0x20] sm:$0xff] %v5151_v32  ;;  %vm11565_vm2 = vnez %v11564_v29  ;;  %vm11567_vm15 = vnez %v11566_v34  ;;  %v11571_v32 = vld [vmem:[#allocation39_spill] sm:$0xff]  ;;  %3733 = vmatprep.mubr.f32.mxu0 %v9393_v51 }
 0x1ba   : > { %v9594_v12 = vsel %vm11563_vm6, 1.0, %v9393_v51  ;;  %2833 = vst [vmem:[#allocation2 + $0x50] sm:$0xff] %v9584_v33  ;;  %2835 = vst [vmem:[#allocation2 + $0x60] sm:$0xff] %v9589_v58  ;;  %v9606_v8 = vsel %vm11565_vm2, 1.0, %v9393_v51  ;;  %v9611_v7 = vsel %vm11567_vm15, 1.0, %v9393_v51  ;;  %vm11569_vm13 = vnez %v11568_v45 }
 0x1bb   : > { %2836 = vst [vmem:[#allocation2 + $0x68] sm:$0xff] %v9594_v12  ;;  %v9616_v53 = vsel %vm11569_vm13, 1.0, %v9393_v51  ;;  %vm11572_vm9 = vnez %v11571_v32  ;;  %vm11574_vm2 = vnez %v11573_v38  ;;  %5294 = vst [vmem:[#allocation3 + $0x18] sm:$0xff] %v5150_v31  ;;  %vm11576_vm13 = vnez %v11575_v35  ;;  %v11581_v38 = vld [vmem:[#allocation47_spill] sm:$0xff]  ;;  %6684 = vmatpush3.bf16.msk.msra.mxu0 %vm9563_vm10, %v11180_v18 }
 0x1bc   : > { %11570 = vst [vmem:[#allocation25_spill] sm:$0xff] %v9616_v53  ;;  %v9621_v14 = vsel %vm11572_vm9, 1.0, %v9393_v51  ;;  %6024 = vmatmul.mubr.msk.f32.vlgmr.msra.gmra.mrb[48].mxu1 %vm11574_vm2, %v11201_v3  ;;  %2838 = vst [vmem:[#allocation2 + $0x78] sm:$0xff] %v9606_v8  ;;  %v9636_v2 = vsel %vm11576_vm13, 1.0, %v9393_v51  ;;  %vm11579_vm9 = vnez %v11578_v25  ;;  %vm11582_vm2 = vnez %v11581_v38  ;;  %3734 = vmatmul.mubr.f32.gmra.mrb[90].mxu0 %v9393_v51 }
 0x1bd   : > { %2839 = vst [vmem:[#allocation2 + $0x80] sm:$0xff] %v9611_v7  ;;  %2841 = vst [vmem:[#allocation2 + $0x90] sm:$0xff] %v9616_v53  ;;  %v9641_v20 = vsel %vm11579_vm9, 1.0, %v9393_v51  ;;  %v9646_v31 = vsel %vm11582_vm2, 1.0, %v9393_v51  ;;  %vm11585_vm4 = vnez %v11584_v27  ;;  %vm11587_vm15 = vnez %v11502_v48  ;;  %6025 = vmatprep.mubr.msk.f32.mxu1 %vm7428_vm7, %v11201_v3  ;;  %v11592_v48 = vld [vmem:[#allocation50_spill] sm:$0xff]  ;;  %3739 = vmatprep.mubr.f32.mxu0 %v9393_v51 }
 0x1be   : > { %2842 = vst [vmem:[#allocation2 + $0x98] sm:$0xff] %v9621_v14  ;;  %11577 = vst [vmem:[#allocation29_spill] sm:$0xff] %v9636_v2  ;;  %v9651_v11 = vsel %vm11585_vm4, 1.0, %v9393_v51  ;;  %6697 = vmatpush3.bf16.msk.msra.mxu1 %vm11587_vm15, %v11180_v18  ;;  %vm11588_vm13 = vcmp.le.s32.totalorder %v9441_v43, %v8646_v19  ;;  %vm11589_vm9 = vcmp.le.s32.totalorder %v9454_v17, %v8646_v19  ;;  %vm11593_vm15 = vnez %v11592_v48  ;;  %v11595_v17 = vld [vmem:[#allocation48_spill] sm:$0xff]  ;;  %v3479_v48 = vpop.f32.mrb[5].mxu0  ;;  %v11608_v53 = vld [vmem:[#allocation54_spill] sm:$0xff] }
 0x1bf   : > { %11580 = vst [vmem:[#allocation27_spill] sm:$0xff] %v9641_v20  ;;  %11583 = vst [vmem:[#allocation21_spill] sm:$0xff] %v9646_v31  ;;  %v9676_v43 = vsel %vm11593_vm15, 1.0, %v9393_v51  ;;  %vm11599_vm7 = vnez %v11598_v56  ;;  %vm11604_vm15 = vnez %v11520_v61  ;;  %v11605_v56 = vld [vmem:[#allocation56_spill] sm:$0xff]  ;;  %vm4722_vm2 = vcmp.le.f32.partialorder %v3479_v48, 16.0 }
 0x1c0   : > { %11586 = vst [vmem:[#allocation32_spill] sm:$0xff] %v9651_v11  ;;  %vm9662_vm14 = vmpackc.low %vm11589_vm9, %vm11588_vm13  ;;  %vm11596_vm9 = vnez %v11595_v17  ;;  %6690 = vmatprep.subr.msk.bf16.mxu1 %vm11604_vm15, %v11180_v18  ;;  %6026 = vmatmul.mubr.msk.f32.gmra.mrb[50].mxu1 %vm7475_vm11, %v11201_v3 }
 0x1c1   : > { %2844 = vst [vmem:[#allocation2 + $0xa8] sm:$0xff] %v9636_v2  ;;  %2845 = vst [vmem:[#allocation2 + $0xb0] sm:$0xff] %v9641_v20  ;;  %v9681_v19 = vsel %vm11596_vm9, 1.0, %v9393_v51  ;;  %v9686_v2 = vsel %vm11599_vm7, 1.0, %v9393_v51  ;;  %v11601_v20 = vld [vmem:[#allocation51_spill] sm:$0xff]  ;;  %vm11606_vm7 = vnez %v11605_v56  ;;  %6686 = vmatprep.subr.msk.bf16.mxu0 %vm9662_vm14, %v11180_v18  ;;  %6027 = vmatprep.mubr.msk.f32.mxu1 %vm7495_vm12, %v11201_v3  ;;  %vm11633_vm12 = vnez %v11632_v62 }
 0x1c2   : > { %2847 = vst [vmem:[#allocation2 + $0xc0] sm:$0xff] %v9646_v31  ;;  %2848 = vst [vmem:[#allocation2 + $0xc8] sm:$0xff] %v9651_v11  ;;  %vm11602_vm13 = vnez %v11601_v20  ;;  %v3831_v11 = vadd.f32 %v3830_v59, %v3477_v36  ;;  %v9704_v20 = vsel %vm11606_vm7, 1.0, %v9393_v51  ;;  %v11611_v36 = vld [vmem:[#allocation59_spill] sm:$0xff]  ;;  %6698 = vmatpush3.bf16.msk.msra.mxu1 %vm11604_vm15, %v11180_v18  ;;  %6688 = vmatpush3.bf16.msk.msra.mxu0 %vm9662_vm14, %v11180_v18 }
 0x1c3   : > { %11594 = vst [vmem:[#allocation30_spill] sm:$0xff] %v9676_v43  ;;  %11597 = vst [vmem:[#allocation35_spill] sm:$0xff] %v9681_v19  ;;  %v9691_v31 = vsel %vm11602_vm13, 1.0, %v9393_v51  ;;  %vm11609_vm13 = vnez %v11608_v53  ;;  %vm11612_vm9 = vnez %v11611_v36  ;;  %v11620_v36 = vld [vmem:[#allocation60_spill] sm:$0xff]  ;;  %3740 = vmatmul.mubr.f32.gmra.mrb[92].mxu0 %v9393_v51 }
 0x1c4   : > { %11600 = vst [vmem:[#allocation33_spill] sm:$0xff] %v9686_v2  ;;  %11603 = vst [vmem:[#allocation38_spill] sm:$0xff] %v9691_v31  ;;  %v9709_v17 = vsel %vm11609_vm13, 1.0, %v9393_v51  ;;  %v9714_v59 = vsel %vm11612_vm9, 1.0, %v9393_v51  ;;  %vm11621_vm13 = vnez %v11620_v36  ;;  %6028 = vmatmul.mubr.msk.f32.gmra.mrb[52].mxu1 %vm7548_vm0, %v11201_v3  ;;  %vm11657_vm0 = vnez %v11424_v28  ;;  %3745 = vmatprep.mubr.f32.mxu0 %v9393_v51 }
 0x1c5   : > { %2850 = vst [vmem:[#allocation2 + $0xd8] sm:$0xff] %v9676_v43  ;;  %2851 = vst [vmem:[#allocation2 + $0xe0] sm:$0xff] %v9681_v19  ;;  %v11617_v43 = vld [vmem:[#allocation62_spill] sm:$0xff]  ;;  %v9736_v48 = vsel %vm11621_vm13, 1.0, %v9393_v51  ;;  %v9843_v1 = vsel %vm11657_vm0, 1.0, %v9393_v51  ;;  %6029 = vmatprep.mubr.msk.f32.mxu1 %vm11559_vm1, %v11201_v3  ;;  %vm11668_vm1 = vnez %v11460_v9 }
 0x1c6   : > { %2853 = vst [vmem:[#allocation2 + $0xf0] sm:$0xff] %v9686_v2  ;;  %2854 = vst [vmem:[#allocation2 + $0xf8] sm:$0xff] %v9691_v31  ;;  %v11614_v2 = vld [vmem:[#allocation57_spill] sm:$0xff]  ;;  %vm11618_vm9 = vnez %v11617_v43  ;;  %v11626_v43 = vld [vmem:[#allocation63_spill] sm:$0xff] }
 0x1c7   : > { %11607 = vst [vmem:[#allocation36_spill] sm:$0xff] %v9704_v20  ;;  %11610 = vst [vmem:[#allocation41_spill] sm:$0xff] %v9709_v17  ;;  %vm11615_vm7 = vnez %v11614_v2  ;;  %v9731_v19 = vsel %vm11618_vm9, 1.0, %v9393_v51  ;;  %vm11627_vm13 = vnez %v11626_v43  ;;  %v11690_v9 = vld [vmem:[#allocation46_spill] sm:$0xff]  ;;  %3746 = vmatmul.mubr.f32.gmra.mrb[94].mxu0 %v9393_v51 }
 0x1c8   : > { %11613 = vst [vmem:[#allocation39_spill] sm:$0xff] %v9714_v59  ;;  %2856 = vst [vmem:[#allocation2 + $0x108] sm:$0xff] %v9704_v20  ;;  %v9726_v31 = vsel %vm11615_vm7, 1.0, %v9393_v51  ;;  %vm4721_vm7 = vcmp.le.f32.partialorder %v3831_v11, 16.0  ;;  %v11623_v20 = vld [vmem:[#allocation65_spill] sm:$0xff]  ;;  %v9756_v36 = vsel %vm11627_vm13, 1.0, %v9393_v51  ;;  %6030 = vmatmul.mubr.msk.f32.gmra.mrb[54].mxu1 %vm11557_vm5, %v11201_v3  ;;  %vm11681_vm5 = vnez %v11680_v24 }
 0x1c9   : > { %2857 = vst [vmem:[#allocation2 + $0x110] sm:$0xff] %v9709_v17  ;;  %2859 = vst [vmem:[#allocation2 + $0x120] sm:$0xff] %v9714_v59  ;;  %v6142_v59 = vsel %vm4722_vm2, 1.0, %v9393_v51  ;;  %vm11624_vm9 = vnez %v11623_v20  ;;  %v6141_v15 = vsel %vm4721_vm7, 1.0, %v9393_v51  ;;  %vm11635_vm2 = vnez %v11529_v47  ;;  %6031 = vmatprep.mubr.msk.f32.mxu1 %vm11563_vm6, %v11201_v3  ;;  %v11751_v24 = vld [vmem:[#allocation25_spill] sm:$0xff] }
 0x1ca   : > { %11616 = vst [vmem:[#allocation23_spill] sm:$0xff] %v9726_v31  ;;  %11619 = vst [vmem:[#allocation44_spill] sm:$0xff] %v9731_v19  ;;  %v9751_v17 = vsel %vm11624_vm9, 1.0, %v9393_v51  ;;  %v5154_v11 = vmul.f32 %v6142_v59, %v9555_v37  ;;  %v5153_v61 = vmul.f32 %v6141_v15, %v9541_v50  ;;  %6691 = vmatprep.subr.msk.bf16.mxu1 %vm11635_vm2, %v11180_v18  ;;  %v11636_v37 = vld [vmem:[#allocation68_spill] sm:$0xff]  ;;  %vm11639_vm7 = vnez %v11358_v42  ;;  %v11641_v50 = vld [vmem:[#allocation73_spill] sm:$0xff] }
 0x1cb   : > { %11622 = vst [vmem:[#allocation42_spill] sm:$0xff] %v9736_v48  ;;  %2860 = vst [vmem:[#allocation2 + $0x128] sm:$0xff] %v9726_v31  ;;  %v9776_v31 = vsel %vm11633_vm12, 1.0, %v9393_v51  ;;  %vm11637_vm15 = vnez %v11636_v37  ;;  %6699 = vmatpush3.bf16.msk.msra.mxu1 %vm11635_vm2, %v11180_v18  ;;  %v11700_v42 = vld [vmem:[#allocation61_spill] sm:$0xff] }
 0x1cc   : > { %2862 = vst [vmem:[#allocation2 + $0x138] sm:$0xff] %v9731_v19  ;;  %2863 = vst [vmem:[#allocation2 + $0x140] sm:$0xff] %v9736_v48  ;;  %v11629_v19 = vld [vmem:[#allocation69_spill] sm:$0xff]  ;;  %v9788_v59 = vsel %vm11637_vm15, 1.0, %v9393_v51  ;;  %6692 = vmatprep.subr.msk.bf16.mxu1 %vm9447_vm3, %v11180_v18 }
 0x1cd   : > { %11625 = vst [vmem:[#allocation47_spill] sm:$0xff] %v9751_v17  ;;  %11628 = vst [vmem:[#allocation45_spill] sm:$0xff] %v9756_v36  ;;  %vm11630_vm11 = vnez %v11629_v19 }
 0x1ce   : > { %2865 = vst [vmem:[#allocation2 + $0x150] sm:$0xff] %v9751_v17  ;;  %2866 = vst [vmem:[#allocation2 + $0x158] sm:$0xff] %v9756_v36  ;;  %v9771_v48 = vsel %vm11630_vm11, 1.0, %v9393_v51  ;;  %v9793_v17 = vsel %vm11639_vm7, 1.0, %v9393_v51  ;;  %vm11642_vm11 = vnez %v11641_v50  ;;  %vm11644_vm7 = vnez %v11379_v13  ;;  %v11648_v50 = vld [vmem:[#allocation79_spill] sm:$0xff] }
 0x1cf   : > { %11631 = vst [vmem:[#allocation56_spill] sm:$0xff] %v9771_v48  ;;  %11634 = vst [vmem:[#allocation54_spill] sm:$0xff] %v9776_v31  ;;  %v9798_v15 = vsel %vm11642_vm11, 1.0, %v9393_v51  ;;  %vm11646_vm11 = vnez %v11386_v63  ;;  %vm11649_vm15 = vnez %v11648_v50  ;;  %6700 = vmatpush3.bf16.msk.msra.mxu1 %vm9447_vm3, %v11180_v18 }
 0x1d0   : > { %2868 = vst [vmem:[#allocation2 + $0x168] sm:$0xff] %v9771_v48  ;;  %2869 = vst [vmem:[#allocation2 + $0x170] sm:$0xff] %v9776_v31  ;;  %v3483_v48 = vpop.f32.mrb[6].mxu0  ;;  %v9810_v31 = vsel %vm11644_vm7, 1.0, %v9393_v51  ;;  %v9815_v36 = vsel %vm11646_vm11, 1.0, %v9393_v51  ;;  %6693 = vmatprep.subr.msk.bf16.mxu1 %vm9483_vm8, %v11180_v18  ;;  %vm11691_vm7 = vnez %v11690_v9 }
 0x1d1   : > { %11638 = vst [vmem:[#allocation57_spill] sm:$0xff] %v9788_v59  ;;  %11640 = vst [vmem:[#allocation65_spill] sm:$0xff] %v9793_v17  ;;  %v3485_v63 = vpop.f32.mrb[7].mxu0 }
 0x1d2   : > { %11643 = vst [vmem:[#allocation63_spill] sm:$0xff] %v9798_v15  ;;  %5298 = vst [vmem:[#allocation3 + $0x38] sm:$0xff] %v5154_v11  ;;  %v9820_v11 = vsel %vm11649_vm15, 1.0, %v9393_v51  ;;  %vm4725_vm11 = vcmp.le.f32.partialorder %v3485_v63, 16.0  ;;  %v5823_v63 = vsel %vm11668_vm1, 1.0, %v9393_v51  ;;  %vm11670_vm1 = vnez %v11475_v57 }
 0x1d3   : > { %2872 = vst [vmem:[#allocation2 + $0x188] sm:$0xff] %v9788_v59  ;;  %2875 = vst [vmem:[#allocation2 + $0x1a0] sm:$0xff] %v9793_v17  ;;  %v11651_v59 = vld [vmem:[#allocation80_spill] sm:$0xff]  ;;  %v6145_v47 = vsel %vm4725_vm11, 1.0, %v9393_v51  ;;  %vm11671_vm11 = vnez %v11483_v52  ;;  %6701 = vmatpush3.bf16.msk.msra.mxu1 %vm9483_vm8, %v11180_v18  ;;  %vm11714_vm8 = vnez %v11544_v26 }
 0x1d4   : > { %2878 = vst [vmem:[#allocation2 + $0x1b8] sm:$0xff] %v9798_v15  ;;  %11645 = vst [vmem:[#allocation66_spill] sm:$0xff] %v9810_v31  ;;  %vm11652_vm12 = vnez %v11651_v59  ;;  %v3837_v15 = vadd.f32 %v9571_v39, %v3483_v48  ;;  %v11654_v59 = vld [vmem:[#allocation81_spill] sm:$0xff]  ;;  %v11659_v39 = vld [vmem:[#allocation83_spill] sm:$0xff]  ;;  %6694 = vmatprep.subr.msk.bf16.mxu1 %vm11714_vm8, %v11180_v18 }
 0x1d5   : > { %11647 = vst [vmem:[#allocation97_spill] sm:$0xff] %v9815_v36  ;;  %11650 = vst [vmem:[#allocation98_spill] sm:$0xff] %v9820_v11  ;;  %v9825_v17 = vsel %vm11652_vm12, 1.0, %v9393_v51  ;;  %vm11655_vm12 = vnez %v11654_v59  ;;  %vm11660_vm15 = vnez %v11659_v39  ;;  %v11678_v52 = vld [vmem:[#allocation28_spill] sm:$0xff]  ;;  %v11698_v59 = vld [vmem:[#allocation58_spill] sm:$0xff] }
 0x1d6   : > { %11653 = vst [vmem:[#allocation99_spill] sm:$0xff] %v9825_v17  ;;  %5297 = vst [vmem:[#allocation3 + $0x30] sm:$0xff] %v5153_v61  ;;  %v9838_v50 = vsel %vm11655_vm12, 1.0, %v9393_v51  ;;  %v9848_v48 = vsel %vm11660_vm15, 1.0, %v9393_v51  ;;  %v11662_v61 = vld [vmem:[#allocation84_spill] sm:$0xff]  ;;  %vm4724_vm2 = vcmp.le.f32.partialorder %v3837_v15, 16.0 }
 0x1d7   : > { %2881 = vst [vmem:[#allocation2 + $0x1d0] sm:$0xff] %v9810_v31  ;;  %2884 = vst [vmem:[#allocation2 + $0x1e8] sm:$0xff] %v9815_v36  ;;  %vm11663_vm0 = vnez %v11662_v61  ;;  %v6144_v15 = vsel %vm4724_vm2, 1.0, %v9393_v51  ;;  %v9888_v36 = vpop.f32.mrb[4].mxu1  ;;  %v11692_v61 = vld [vmem:[#allocation49_spill] sm:$0xff]  ;;  %v11694_v39 = vld [vmem:[#allocation52_spill] sm:$0xff]  ;;  %6702 = vmatpush3.bf16.msk.msra.mxu1 %vm11714_vm8, %v11180_v18  ;;  %vm11739_vm8 = vnez %v11488_v6 }
 0x1d8   : > { %2887 = vst [vmem:[#allocation2 + $0x200] sm:$0xff] %v9820_v11  ;;  %2890 = vst [vmem:[#allocation2 + $0x218] sm:$0xff] %v9825_v17  ;;  %v9862_v17 = vsel %vm11663_vm0, 1.0, %v9393_v51  ;;  %v11665_v11 = vld [vmem:[#allocation85_spill] sm:$0xff]  ;;  %v5156_v57 = vmul.f32 %v6144_v15, %v9577_v40  ;;  %v3842_v31 = vpop.f32.mrb[5].mxu1  ;;  %v5765_v40 = vsel %vm11681_vm5, 1.0, %v9393_v51  ;;  %vm11693_vm9 = vnez %v11692_v61  ;;  %6695 = vmatprep.subr.msk.bf16.mxu1 %vm9563_vm10, %v11180_v18 }
 0x1d9   : > { %11656 = vst [vmem:[#allocation100_spill] sm:$0xff] %v9838_v50  ;;  %11658 = vst [vmem:[#allocation101_spill] sm:$0xff] %v9843_v1  ;;  %vm11666_vm15 = vnez %v11665_v11  ;;  %v5780_v11 = vsel %vm11691_vm7, 1.0, %v9393_v51  ;;  %vm11695_vm13 = vnez %v11694_v39  ;;  %vm11699_vm7 = vnez %v11698_v59 }
 0x1da   : > { %11661 = vst [vmem:[#allocation102_spill] sm:$0xff] %v9848_v48  ;;  %2893 = vst [vmem:[#allocation2 + $0x230] sm:$0xff] %v9838_v50  ;;  %v9867_v44 = vsel %vm11666_vm15, 1.0, %v9393_v51  ;;  %vm11669_vm15 = vnez %v11469_v46  ;;  %v5157_v50 = vmul.f32 %v6145_v47, %v9584_v33  ;;  %v11674_v33 = vld [vmem:[#allocation22_spill] sm:$0xff]  ;;  %v5786_v28 = vsel %vm11695_vm13, 1.0, %v9393_v51 }
 0x1db   : > { %2896 = vst [vmem:[#allocation2 + $0x248] sm:$0xff] %v9843_v1  ;;  %2899 = vst [vmem:[#allocation2 + $0x260] sm:$0xff] %v9848_v48  ;;  %v5825_v48 = vsel %vm11669_vm15, 1.0, %v9393_v51  ;;  %v5827_v1 = vsel %vm11670_vm1, 1.0, %v9393_v51  ;;  %vm11675_vm2 = vnez %v11674_v33  ;;  %vm11679_vm1 = vnez %v11678_v52  ;;  %6703 = vmatpush3.bf16.msk.msra.mxu1 %vm9563_vm10, %v11180_v18 }
 0x1dc   : > { %11664 = vst [vmem:[#allocation103_spill] sm:$0xff] %v9862_v17  ;;  %11667 = vst [vmem:[#allocation104_spill] sm:$0xff] %v9867_v44  ;;  %v5762_v46 = vsel %vm11679_vm1, 1.0, %v9393_v51  ;;  %v5792_v13 = vsel %vm11699_vm7, 1.0, %v9393_v51  ;;  %vm11702_vm13 = vnez %v11560_v5  ;;  %v11710_v5 = vld [vmem:[#allocation72_spill] sm:$0xff]  ;;  %6505 = vmatprep.mubr.msk.f32.mxu0 %vm11675_vm2, %v11201_v3  ;;  %6696 = vmatprep.subr.msk.bf16.mxu1 %vm9662_vm14, %v11180_v18  ;;  %vm11745_vm10 = vnez %v11575_v35 }
 0x1dd   : > { %2902 = vst [vmem:[#allocation2 + $0x278] sm:$0xff] %v9862_v17  ;;  %2905 = vst [vmem:[#allocation2 + $0x290] sm:$0xff] %v9867_v44  ;;  %v11672_v44 = vld [vmem:[#allocation24_spill] sm:$0xff]  ;;  %6032 = vmatmul.mubr.msk.f32.gmra.mrb[56].mxu1 %vm11702_vm13, %v11201_v3 }
 0x1de   : > { %2908 = vst [vmem:[#allocation2 + $0x2a8] sm:$0xff] %v5823_v63  ;;  %2911 = vst [vmem:[#allocation2 + $0x2c0] sm:$0xff] %v5825_v48  ;;  %v5829_v63 = vsel %vm11671_vm11, 1.0, %v9393_v51  ;;  %vm11673_vm15 = vnez %v11672_v44  ;;  %v11676_v48 = vld [vmem:[#allocation26_spill] sm:$0xff]  ;;  %v11749_v35 = vld [vmem:[#allocation48_spill] sm:$0xff] }
 0x1df   : > { %2914 = vst [vmem:[#allocation2 + $0x2d8] sm:$0xff] %v5827_v1  ;;  %v5756_v17 = vsel %vm11673_vm15, 1.0, %v9393_v51  ;;  %2917 = vst [vmem:[#allocation2 + $0x2f0] sm:$0xff] %v5829_v63  ;;  %v5753_v1 = vsel %vm11675_vm2, 1.0, %v9393_v51  ;;  %vm11677_vm11 = vnez %v11676_v48  ;;  %v11684_v63 = vld [vmem:[#allocation37_spill] sm:$0xff]  ;;  %6506 = vmatmul.mubr.msk.f32.vlgmr.msra.gmra.mrb[96].mxu0 %vm11673_vm15, %v11201_v3  ;;  %vm11741_vm15 = vnez %v11490_v60  ;;  %6704 = vmatpush3.bf16.msk.msra.mxu1 %vm9662_vm14, %v11180_v18 }
 0x1e0   : > { %2828 = vst [vmem:[#allocation2 + $0x28] sm:$0xff] %v5756_v17  ;;  %v5759_v47 = vsel %vm11677_vm11, 1.0, %v9393_v51  ;;  %5301 = vst [vmem:[#allocation3 + $0x50] sm:$0xff] %v5157_v50  ;;  %v11682_v17 = vld [vmem:[#allocation34_spill] sm:$0xff]  ;;  %vm11685_vm12 = vnez %v11684_v63  ;;  %v11686_v50 = vld [vmem:[#allocation40_spill] sm:$0xff]  ;;  %6508 = vmatprep.mubr.msk.f32.mxu0 %vm11677_vm11, %v11201_v3  ;;  %vm11744_vm11 = vnez %v11498_v30  ;;  %vm11748_vm14 = vnez %v11581_v38 }
 0x1e1   : > { %2825 = vst [vmem:[#allocation2 + $0x10] sm:$0xff] %v5753_v1  ;;  %2831 = vst [vmem:[#allocation2 + $0x40] sm:$0xff] %v5759_v47  ;;  %vm11683_vm0 = vnez %v11682_v17  ;;  %v5771_v16 = vsel %vm11685_vm12, 1.0, %v9393_v51  ;;  %vm11687_vm6 = vnez %v11686_v50  ;;  %v11688_v1 = vld [vmem:[#allocation43_spill] sm:$0xff] }
 0x1e2   : > { %2834 = vst [vmem:[#allocation2 + $0x58] sm:$0xff] %v5762_v46  ;;  %v5768_v15 = vsel %vm11683_vm0, 1.0, %v9393_v51  ;;  %v5774_v4 = vsel %vm11687_vm6, 1.0, %v9393_v51  ;;  %5300 = vst [vmem:[#allocation3 + $0x48] sm:$0xff] %v5156_v57  ;;  %v3489_v46 = vpop.f32.mrb[8].mxu0  ;;  %vm11689_vm3 = vnez %v11688_v1  ;;  %v5783_v57 = vsel %vm11693_vm9, 1.0, %v9393_v51 }
 0x1e3   : > { %2837 = vst [vmem:[#allocation2 + $0x70] sm:$0xff] %v5765_v40  ;;  %2840 = vst [vmem:[#allocation2 + $0x88] sm:$0xff] %v5768_v15  ;;  %v5777_v47 = vsel %vm11689_vm3, 1.0, %v9393_v51  ;;  %v3843_v40 = vadd.f32 %v3842_v31, %v3489_v46  ;;  %v3491_v15 = vpop.f32.mrb[9].mxu0  ;;  %vm11701_vm9 = vnez %v11700_v42  ;;  %6509 = vmatmul.mubr.msk.f32.gmra.mrb[98].mxu0 %vm11679_vm1, %v11201_v3  ;;  %vm11746_vm1 = vnez %v11500_v49 }
 0x1e4   : > { %2843 = vst [vmem:[#allocation2 + $0xa0] sm:$0xff] %v5771_v16  ;;  %2846 = vst [vmem:[#allocation2 + $0xb8] sm:$0xff] %v5774_v4  ;;  %v11696_v16 = vld [vmem:[#allocation55_spill] sm:$0xff]  ;;  %v5795_v37 = vsel %vm11701_vm9, 1.0, %v9393_v51  ;;  %vm4728_vm6 = vcmp.le.f32.partialorder %v3491_v15, 16.0  ;;  %vm11709_vm9 = vnez %v11566_v34  ;;  %v11712_v15 = vld [vmem:[#allocation74_spill] sm:$0xff]  ;;  %6511 = vmatprep.mubr.msk.f32.mxu0 %vm11681_vm5, %v11201_v3 }
 0x1e5   : > { %2849 = vst [vmem:[#allocation2 + $0xd0] sm:$0xff] %v5777_v47  ;;  %2852 = vst [vmem:[#allocation2 + $0xe8] sm:$0xff] %v5780_v11  ;;  %vm11697_vm3 = vnez %v11696_v16  ;;  %v11705_v11 = vld [vmem:[#allocation67_spill] sm:$0xff]  ;;  %v11707_v47 = vld [vmem:[#allocation70_spill] sm:$0xff]  ;;  %6033 = vmatprep.mubr.msk.f32.mxu1 %vm11709_vm9, %v11201_v3  ;;  %vm4727_vm13 = vcmp.le.f32.partialorder %v3843_v40, 16.0  ;;  %vm11716_vm9 = vnez %v11715_v41 }
 0x1e6   : > { %2855 = vst [vmem:[#allocation2 + $0x100] sm:$0xff] %v5783_v57  ;;  %2858 = vst [vmem:[#allocation2 + $0x118] sm:$0xff] %v5786_v28  ;;  %v5789_v4 = vsel %vm11697_vm3, 1.0, %v9393_v51  ;;  %v11703_v28 = vld [vmem:[#allocation64_spill] sm:$0xff]  ;;  %vm11706_vm3 = vnez %v11705_v11  ;;  %vm11708_vm7 = vnez %v11707_v47  ;;  %v6147_v34 = vsel %vm4727_vm13, 1.0, %v9393_v51  ;;  %v11723_v41 = vld [vmem:[#allocation10_spill] sm:$0xff] }
 0x1e7   : > { %2861 = vst [vmem:[#allocation2 + $0x130] sm:$0xff] %v5789_v4  ;;  %2864 = vst [vmem:[#allocation2 + $0x148] sm:$0xff] %v5792_v13  ;;  %vm11704_vm12 = vnez %v11703_v28  ;;  %v5800_v46 = vsel %vm11706_vm3, 1.0, %v9393_v51  ;;  %v5802_v57 = vsel %vm11708_vm7, 1.0, %v9393_v51  ;;  %v6148_v13 = vsel %vm4728_vm6, 1.0, %v9393_v51  ;;  %6512 = vmatmul.mubr.msk.f32.gmra.mrb[100].mxu0 %vm11683_vm0, %v11201_v3 }
 0x1e8   : > { %2867 = vst [vmem:[#allocation2 + $0x160] sm:$0xff] %v5795_v37  ;;  %v5798_v31 = vsel %vm11704_vm12, 1.0, %v9393_v51  ;;  %2873 = vst [vmem:[#allocation2 + $0x190] sm:$0xff] %v5800_v46  ;;  %vm11711_vm3 = vnez %v11710_v5  ;;  %vm11713_vm7 = vnez %v11712_v15  ;;  %v5160_v40 = vmul.f32 %v6148_v13, %v9594_v12  ;;  %v11717_v46 = vld [vmem:[#allocation7_spill] sm:$0xff]  ;;  %v11719_v13 = vld [vmem:[#allocation8_spill] sm:$0xff] }
 0x1e9   : > { %2870 = vst [vmem:[#allocation2 + $0x178] sm:$0xff] %v5798_v31  ;;  %2876 = vst [vmem:[#allocation2 + $0x1a8] sm:$0xff] %v5802_v57  ;;  %v5804_v37 = vsel %vm11711_vm3, 1.0, %v9393_v51  ;;  %v5806_v4 = vsel %vm11713_vm7, 1.0, %v9393_v51  ;;  %v5808_v31 = vsel %vm11716_vm9, 1.0, %v9393_v51  ;;  %vm11718_vm6 = vnez %v11717_v46 }
 0x1ea   : > { %2879 = vst [vmem:[#allocation2 + $0x1c0] sm:$0xff] %v5804_v37  ;;  %2882 = vst [vmem:[#allocation2 + $0x1d8] sm:$0xff] %v5806_v4  ;;  %v5810_v57 = vsel %vm11718_vm6, 1.0, %v9393_v51  ;;  %v5159_v12 = vmul.f32 %v6147_v34, %v9589_v58  ;;  %vm11720_vm13 = vnez %v11719_v13  ;;  %v11721_v4 = vld [vmem:[#allocation9_spill] sm:$0xff]  ;;  %vm11724_vm9 = vnez %v11723_v41  ;;  %v11726_v58 = vld [vmem:[#allocation11_spill] sm:$0xff] }
 0x1eb   : > { %2885 = vst [vmem:[#allocation2 + $0x1f0] sm:$0xff] %v5808_v31  ;;  %2888 = vst [vmem:[#allocation2 + $0x208] sm:$0xff] %v5810_v57  ;;  %v5812_v37 = vsel %vm11720_vm13, 1.0, %v9393_v51  ;;  %vm11722_vm7 = vnez %v11721_v4  ;;  %v5816_v46 = vsel %vm11724_vm9, 1.0, %v9393_v51  ;;  %vm11725_vm6 = vnez %v11564_v29  ;;  %v11728_v34 = vld [vmem:[#allocation12_spill] sm:$0xff]  ;;  %v11730_v57 = vld [vmem:[#allocation13_spill] sm:$0xff] }
 0x1ec   : > { %v5814_v19 = vsel %vm11722_vm7, 1.0, %v9393_v51  ;;  %6034 = vmatmul.mubr.msk.f32.gmra.mrb[58].mxu1 %vm11725_vm6, %v11201_v3  ;;  %5304 = vst [vmem:[#allocation3 + $0x68] sm:$0xff] %v5160_v40  ;;  %2891 = vst [vmem:[#allocation2 + $0x220] sm:$0xff] %v5812_v37  ;;  %vm11727_vm2 = vnez %v11726_v58  ;;  %vm11729_vm13 = vnez %v11728_v34  ;;  %vm11731_vm7 = vnez %v11730_v57  ;;  %v11732_v4 = vld [vmem:[#allocation14_spill] sm:$0xff] }
 0x1ed   : > { %2894 = vst [vmem:[#allocation2 + $0x238] sm:$0xff] %v5814_v19  ;;  %2897 = vst [vmem:[#allocation2 + $0x250] sm:$0xff] %v5816_v46  ;;  %v5818_v33 = vsel %vm11727_vm2, 1.0, %v9393_v51  ;;  %v5820_v31 = vsel %vm11729_vm13, 1.0, %v9393_v51  ;;  %v5822_v41 = vsel %vm11731_vm7, 1.0, %v9393_v51  ;;  %vm11733_vm9 = vnez %v11732_v4  ;;  %v3495_v19 = vpop.f32.mrb[10].mxu0 }
 0x1ee   : > { %v5824_v29 = vsel %vm11733_vm9, 1.0, %v9393_v51  ;;  %vm11734_vm6 = vnez %v11571_v32  ;;  %5303 = vst [vmem:[#allocation3 + $0x60] sm:$0xff] %v5159_v12  ;;  %2900 = vst [vmem:[#allocation2 + $0x268] sm:$0xff] %v5818_v33  ;;  %vm11735_vm7 = vnez %v11465_v0  ;;  %vm11736_vm9 = vnez %v11472_v22  ;;  %v3497_v12 = vpop.f32.mrb[11].mxu0  ;;  %v11842_v0 = vld [vmem:[#allocation44_spill] sm:$0xff] }
 0x1ef   : > { %6035 = vmatprep.mubr.msk.f32.mxu1 %vm11734_vm6, %v11201_v3  ;;  %2903 = vst [vmem:[#allocation2 + $0x280] sm:$0xff] %v5820_v31  ;;  %2906 = vst [vmem:[#allocation2 + $0x298] sm:$0xff] %v5822_v41  ;;  %v5826_v40 = vsel %vm11735_vm7, 1.0, %v9393_v51  ;;  %v5828_v46 = vsel %vm11736_vm9, 1.0, %v9393_v51  ;;  %vm11737_vm6 = vnez %v11480_v54  ;;  %vm11738_vm13 = vnez %v11486_v21  ;;  %v6412_v31 = vpop.f32.mrb[6].mxu1 }
 0x1f0   : > { %2909 = vst [vmem:[#allocation2 + $0x2b0] sm:$0xff] %v5824_v29  ;;  %v5830_v32 = vsel %vm11737_vm6, 1.0, %v9393_v51  ;;  %v5831_v26 = vsel %vm11738_vm13, 1.0, %v9393_v51  ;;  %v3849_v41 = vadd.f32 %v9888_v36, %v3495_v19  ;;  %2912 = vst [vmem:[#allocation2 + $0x2c8] sm:$0xff] %v5826_v40  ;;  %v5832_v37 = vsel %vm11739_vm8, 1.0, %v9393_v51  ;;  %v3854_v19 = vpop.f32.mrb[7].mxu1 }
 0x1f1   : > { %2915 = vst [vmem:[#allocation2 + $0x2e0] sm:$0xff] %v5828_v46  ;;  %2918 = vst [vmem:[#allocation2 + $0x2f8] sm:$0xff] %v5830_v32  ;;  %vm11740_vm13 = vnez %v11494_v23  ;;  %v5833_v36 = vsel %vm11741_vm15, 1.0, %v9393_v51  ;;  %vm4731_vm6 = vcmp.le.f32.partialorder %v3497_v12, 16.0  ;;  %vm11742_vm9 = vnez %v11568_v45  ;;  %v11756_v32 = vld [vmem:[#allocation50_spill] sm:$0xff] }
 0x1f2   : > { %2921 = vst [vmem:[#allocation2 + $0x310] sm:$0xff] %v5831_v26  ;;  %v5834_v44 = vsel %vm11740_vm13, 1.0, %v9393_v51  ;;  %2924 = vst [vmem:[#allocation2 + $0x328] sm:$0xff] %v5832_v37  ;;  %6036 = vmatmul.mubr.msk.f32.gmra.mrb[60].mxu1 %vm11742_vm9, %v11201_v3  ;;  %vm4730_vm8 = vcmp.le.f32.partialorder %v3849_v41, 16.0  ;;  %v6151_v33 = vsel %vm4731_vm6, 1.0, %v9393_v51  ;;  %vm11743_vm13 = vnez %v11578_v25  ;;  %v11758_v26 = vld [vmem:[#allocation51_spill] sm:$0xff] }
 0x1f3   : > { %2930 = vst [vmem:[#allocation2 + $0x358] sm:$0xff] %v5834_v44  ;;  %2927 = vst [vmem:[#allocation2 + $0x340] sm:$0xff] %v5833_v36  ;;  %6037 = vmatprep.mubr.msk.f32.mxu1 %vm11743_vm13, %v11201_v3  ;;  %v6150_v29 = vsel %vm4730_vm8, 1.0, %v9393_v51  ;;  %v5163_v48 = vmul.f32 %v6151_v33, %v9611_v7  ;;  %v5835_v45 = vsel %vm11744_vm11, 1.0, %v9393_v51  ;;  %v3501_v7 = vpop.f32.mrb[12].mxu0  ;;  %vm11747_vm9 = vnez %v11684_v63  ;;  %v11752_v63 = vld [vmem:[#allocation87_spill] sm:$0xff] }
 0x1f4   : > { %v5162_v25 = vmul.f32 %v6150_v29, %v9606_v8  ;;  %2933 = vst [vmem:[#allocation2 + $0x370] sm:$0xff] %v5835_v45  ;;  %v3855_v52 = vadd.f32 %v3854_v19, %v3501_v7  ;;  %v3503_v55 = vpop.f32.mrb[13].mxu0  ;;  %v5836_v8 = vsel %vm11746_vm1, 1.0, %v9393_v51  ;;  %6514 = vmatprep.mubr.msk.f32.mxu0 %vm11747_vm9, %v11201_v3  ;;  %vm11750_vm0 = vnez %v11749_v35  ;;  %v11760_v41 = vld [vmem:[#allocation88_spill] sm:$0xff]  ;;  %v11763_v37 = vld [vmem:[#allocation27_spill] sm:$0xff]  ;;  %v6415_v36 = vpop.f32.mrb[8].mxu1 }
 0x1f5   : > { %5307 = vst [vmem:[#allocation3 + $0x80] sm:$0xff] %v5163_v48  ;;  %vm4734_vm5 = vcmp.le.f32.partialorder %v3503_v55, 16.0  ;;  %2936 = vst [vmem:[#allocation2 + $0x388] sm:$0xff] %v5836_v8  ;;  %vm11753_vm13 = vnez %v11752_v63  ;;  %vm11754_vm6 = vnez %v11686_v50  ;;  %v3507_v38 = vpop.f32.mrb[14].mxu0  ;;  %vm11755_vm8 = vnez %v11688_v1  ;;  %v11765_v33 = vld [vmem:[#allocation29_spill] sm:$0xff]  ;;  %v3866_v29 = vpop.f32.mrb[9].mxu1 }
 0x1f6   : > { %6038 = vmatmul.mubr.msk.f32.gmra.mrb[62].mxu1 %vm11745_vm10, %v11201_v3  ;;  %5306 = vst [vmem:[#allocation3 + $0x78] sm:$0xff] %v5162_v25  ;;  %v6154_v27 = vsel %vm4734_vm5, 1.0, %v9393_v51  ;;  %v5837_v40 = vsel %vm11753_vm13, 1.0, %v9393_v51  ;;  %6515 = vmatmul.mubr.msk.f32.gmra.mrb[102].mxu0 %vm11754_vm6, %v11201_v3  ;;  %v3509_v46 = vpop.f32.mrb[15].mxu0  ;;  %vm11757_vm10 = vnez %v11756_v32  ;;  %vm11759_vm9 = vnez %v11758_v26  ;;  %v11766_v48 = vld [vmem:[#allocation53_spill] sm:$0xff]  ;;  %v11775_v7 = vld [vmem:[#allocation32_spill] sm:$0xff] }
 0x1f7   : > { %6039 = vmatprep.mubr.msk.f32.mxu1 %vm11585_vm4, %v11201_v3  ;;  %vm4733_vm4 = vcmp.le.f32.partialorder %v3855_v52, 16.0  ;;  %v5166_v10 = vmul.f32 %v6154_v27, %v9621_v14  ;;  %2939 = vst [vmem:[#allocation2 + $0x3a0] sm:$0xff] %v5837_v40  ;;  %6517 = vmatprep.mubr.msk.f32.mxu0 %vm11755_vm8, %v11201_v3  ;;  %v3861_v14 = vadd.f32 %v6412_v31, %v3507_v38  ;;  %vm4737_vm5 = vcmp.le.f32.partialorder %v3509_v46, 16.0  ;;  %v11769_v19 = vld [vmem:[#allocation89_spill] sm:$0xff]  ;;  %v11776_v55 = vld [vmem:[#allocation90_spill] sm:$0xff]  ;;  %v11785_v35 = vld [vmem:[#allocation91_spill] sm:$0xff] }
 0x1f8   : > { %v6153_v18 = vsel %vm4733_vm4, 1.0, %v9393_v51  ;;  %v6157_v50 = vsel %vm4737_vm5, 1.0, %v9393_v51  ;;  %vm11764_vm6 = vnez %v11692_v61  ;;  %vm11767_vm8 = vnez %v11766_v48  ;;  %v11788_v40 = vld [vmem:[#allocation62_spill] sm:$0xff]  ;;  %v11793_v26 = vld [vmem:[#allocation92_spill] sm:$0xff] }
 0x1f9   : > { %v5165_v17 = vmul.f32 %v6153_v18, %v11751_v24  ;;  %5310 = vst [vmem:[#allocation3 + $0x98] sm:$0xff] %v5166_v10  ;;  %vm4736_vm4 = vcmp.le.f32.partialorder %v3861_v14, 16.0  ;;  %v5169_v44 = vmul.f32 %v6157_v50, %v11763_v37  ;;  %vm11770_vm5 = vnez %v11769_v19  ;;  %v11783_v18 = vld [vmem:[#allocation60_spill] sm:$0xff]  ;;  %v11790_v14 = vld [vmem:[#allocation35_spill] sm:$0xff]  ;;  %v11792_v32 = vld [vmem:[#allocation30_spill] sm:$0xff] }
 0x1fa   : > { %6040 = vmatmul.mubr.msk.f32.gmra.mrb[64].mxu1 %vm11748_vm14, %v11201_v3  ;;  %vm11761_vm14 = vnez %v11760_v41  ;;  %v6156_v12 = vsel %vm4736_vm4, 1.0, %v9393_v51  ;;  %v5839_v45 = vsel %vm11770_vm5, 1.0, %v9393_v51  ;;  %vm11772_vm4 = vnez %v11696_v16 }
 0x1fb   : > { %6041 = vmatprep.mubr.msk.f32.mxu1 %vm11750_vm0, %v11201_v3  ;;  %5309 = vst [vmem:[#allocation3 + $0x90] sm:$0xff] %v5165_v17  ;;  %v5838_v1 = vsel %vm11761_vm14, 1.0, %v9393_v51  ;;  %vm11762_vm0 = vnez %v11690_v9  ;;  %v5168_v31 = vmul.f32 %v6156_v12, %v11765_v33  ;;  %5313 = vst [vmem:[#allocation3 + $0xb0] sm:$0xff] %v5169_v44  ;;  %v3513_v9 = vpop.f32.mrb[16].mxu0  ;;  %v6418_v17 = vpop.f32.mrb[10].mxu1  ;;  %v11803_v44 = vld [vmem:[#allocation38_spill] sm:$0xff] }
 0x1fc   : > { %6518 = vmatmul.mubr.msk.f32.gmra.mrb[104].mxu0 %vm11762_vm0, %v11201_v3  ;;  %2942 = vst [vmem:[#allocation2 + $0x3b8] sm:$0xff] %v5838_v1  ;;  %v3867_v61 = vadd.f32 %v3866_v29, %v3513_v9  ;;  %v3515_v25 = vpop.f32.mrb[17].mxu0  ;;  %2945 = vst [vmem:[#allocation2 + $0x3d0] sm:$0xff] %v5839_v45  ;;  %v3878_v28 = vpop.f32.mrb[11].mxu1  ;;  %v11804_v33 = vld [vmem:[#allocation69_spill] sm:$0xff]  ;;  %v11809_v9 = vld [vmem:[#allocation94_spill] sm:$0xff] }
 0x1fd   : > { %6520 = vmatprep.mubr.msk.f32.mxu0 %vm11764_vm6, %v11201_v3  ;;  %5312 = vst [vmem:[#allocation3 + $0xa8] sm:$0xff] %v5168_v31  ;;  %vm4740_vm0 = vcmp.le.f32.partialorder %v3515_v25, 16.0  ;;  %vm11773_vm6 = vnez %v11605_v56  ;;  %v11779_v56 = vld [vmem:[#allocation21_spill] sm:$0xff]  ;;  %v3519_v27 = vpop.f32.mrb[18].mxu0 }
 0x1fe   : > { %6042 = vmatmul.mubr.msk.f32.gmra.mrb[66].mxu1 %vm11757_vm10, %v11201_v3  ;;  %vm11768_vm10 = vnez %v11608_v53  ;;  %v6160_v53 = vsel %vm4740_vm0, 1.0, %v9393_v51  ;;  %vm11780_vm0 = vnez %v11700_v42  ;;  %v3521_v10 = vpop.f32.mrb[19].mxu0  ;;  %v11806_v31 = vld [vmem:[#allocation33_spill] sm:$0xff] }
 0x1ff   : > { %6043 = vmatprep.mubr.msk.f32.mxu1 %vm11759_vm9, %v11201_v3  ;;  %vm11771_vm9 = vnez %v11694_v39  ;;  %v5172_v52 = vmul.f32 %v6160_v53, %v11775_v7  ;;  %v3525_v1 = vpop.f32.mrb[20].mxu0  ;;  %v11814_v7 = vld [vmem:[#allocation71_spill] sm:$0xff] }
 0x200   : > { %6521 = vmatmul.mubr.msk.f32.gmra.mrb[106].mxu0 %vm11771_vm9, %v11201_v3  ;;  %vm11777_vm9 = vnez %v11776_v55  ;;  %v3527_v12 = vpop.f32.mrb[21].mxu0 }
 0x201   : > { %6523 = vmatprep.mubr.msk.f32.mxu0 %vm11772_vm4, %v11201_v3  ;;  %v5840_v16 = vsel %vm11777_vm9, 1.0, %v9393_v51  ;;  %vm11778_vm4 = vnez %v11698_v59  ;;  %5316 = vst [vmem:[#allocation3 + $0xc8] sm:$0xff] %v5172_v52  ;;  %v3873_v59 = vadd.f32 %v6415_v36, %v3519_v27  ;;  %v3531_v48 = vpop.f32.mrb[22].mxu0  ;;  %v11819_v27 = vld [vmem:[#allocation9_spill] sm:$0xff] }
 0x202   : > { %6044 = vmatmul.mubr.msk.f32.gmra.mrb[68].mxu1 %vm11767_vm8, %v11201_v3  ;;  %vm4739_vm8 = vcmp.le.f32.partialorder %v3867_v61, 16.0  ;;  %2948 = vst [vmem:[#allocation2 + $0x3e8] sm:$0xff] %v5840_v16  ;;  %v11811_v61 = vld [vmem:[#allocation7_spill] sm:$0xff]  ;;  %v3885_v25 = vadd.f32 %v6418_v17, %v3531_v48  ;;  %v3533_v53 = vpop.f32.mrb[23].mxu0  ;;  %v11816_v16 = vld [vmem:[#allocation41_spill] sm:$0xff] }
 0x203   : > { %6045 = vmatprep.mubr.msk.f32.mxu1 %vm11768_vm10, %v11201_v3  ;;  %vm11774_vm10 = vnez %v11614_v2  ;;  %v6159_v39 = vsel %vm4739_vm8, 1.0, %v9393_v51  ;;  %v11781_v2 = vld [vmem:[#allocation59_spill] sm:$0xff]  ;;  %vm11784_vm8 = vnez %v11783_v18  ;;  %v11821_v18 = vld [vmem:[#allocation36_spill] sm:$0xff]  ;;  %v11824_v17 = vld [vmem:[#allocation73_spill] sm:$0xff] }
 0x204   : > { %6524 = vmatmul.mubr.msk.f32.gmra.mrb[108].mxu0 %vm11778_vm4, %v11201_v3  ;;  %v5171_v8 = vmul.f32 %v6159_v39, %v11779_v56  ;;  %vm4743_vm4 = vcmp.le.f32.partialorder %v3521_v10, 16.0  ;;  %v11847_v48 = vld [vmem:[#allocation81_spill] sm:$0xff] }
 0x205   : > { %6526 = vmatprep.mubr.msk.f32.mxu0 %vm11780_vm0, %v11201_v3  ;;  %vm11787_vm0 = vnez %v11705_v11  ;;  %v6163_v42 = vsel %vm4743_vm4, 1.0, %v9393_v51  ;;  %vm11795_vm4 = vnez %v11707_v47  ;;  %v11798_v47 = vld [vmem:[#allocation93_spill] sm:$0xff] }
 0x206   : > { %6046 = vmatmul.mubr.msk.f32.gmra.mrb[70].mxu1 %vm11773_vm6, %v11201_v3  ;;  %vm11782_vm6 = vnez %v11781_v2  ;;  %5315 = vst [vmem:[#allocation3 + $0xc0] sm:$0xff] %v5171_v8  ;;  %v5175_v46 = vmul.f32 %v6163_v42, %v11790_v14  ;;  %v6421_v8 = vpop.f32.mrb[12].mxu1  ;;  %v11817_v2 = vld [vmem:[#allocation95_spill] sm:$0xff]  ;;  %v3537_v42 = vpop.f32.mrb[24].mxu0  ;;  %v11826_v14 = vld [vmem:[#allocation96_spill] sm:$0xff] }
 0x207   : > { %6047 = vmatprep.mubr.msk.f32.mxu1 %vm11774_vm10, %v11201_v3  ;;  %vm11786_vm10 = vnez %v11785_v35  ;;  %v3890_v10 = vpop.f32.mrb[13].mxu1 }
 0x208   : > { %v5841_v24 = vsel %vm11786_vm10, 1.0, %v9393_v51  ;;  %6527 = vmatmul.mubr.msk.f32.gmra.mrb[110].mxu0 %vm11704_vm12, %v11201_v3  ;;  %vm11791_vm12 = vnez %v11626_v43  ;;  %5319 = vst [vmem:[#allocation3 + $0xe0] sm:$0xff] %v5175_v46  ;;  %v3879_v43 = vadd.f32 %v3878_v28, %v3525_v1  ;;  %v10271_v1 = vld [vmem:[#allocation2 + $0x180] sm:$0xff] }
 0x209   : > { %2951 = vst [vmem:[#allocation2 + $0x400] sm:$0xff] %v5841_v24  ;;  %6529 = vmatprep.mubr.msk.f32.mxu0 %vm11787_vm0, %v11201_v3  ;;  %vm11794_vm0 = vnez %v11793_v26  ;;  %v11822_v24 = vld [vmem:[#allocation10_spill] sm:$0xff] }
 0x20a   : > { %6048 = vmatmul.mubr.msk.f32.gmra.mrb[72].mxu1 %vm11782_vm6, %v11201_v3  ;;  %vm4742_vm6 = vcmp.le.f32.partialorder %v3873_v59, 16.0  ;;  %v5842_v50 = vsel %vm11794_vm0, 1.0, %v9393_v51  ;;  %vm4745_vm0 = vcmp.le.f32.partialorder %v3879_v43, 16.0  ;;  %v11830_v43 = vld [vmem:[#allocation39_spill] sm:$0xff] }
 0x20b   : > { %6049 = vmatprep.mubr.msk.f32.mxu1 %vm11784_vm8, %v11201_v3  ;;  %vm11789_vm8 = vnez %v11788_v40  ;;  %v6162_v38 = vsel %vm4742_vm6, 1.0, %v9393_v51  ;;  %2954 = vst [vmem:[#allocation2 + $0x418] sm:$0xff] %v5842_v50  ;;  %vm11796_vm6 = vnez %v11623_v20  ;;  %v11801_v20 = vld [vmem:[#allocation76_spill] sm:$0xff]  ;;  %v3891_v40 = vadd.f32 %v3890_v10, %v3537_v42 }
 0x20c   : > { %v5174_v11 = vmul.f32 %v6162_v38, %v11792_v32  ;;  %6530 = vmatmul.mubr.msk.f32.gmra.mrb[112].mxu0 %vm11795_vm4, %v11201_v3  ;;  %vm11799_vm4 = vnez %v11798_v47  ;;  %v3539_v38 = vpop.f32.mrb[25].mxu0  ;;  %v11856_v42 = vld [vmem:[#allocation56_spill] sm:$0xff] }
 0x20d   : > { %6532 = vmatprep.mubr.msk.f32.mxu0 %vm11711_vm3, %v11201_v3  ;;  %v5843_v37 = vsel %vm11799_vm4, 1.0, %v9393_v51  ;;  %vm11800_vm3 = vnez %v11712_v15  ;;  %v11807_v15 = vld [vmem:[#allocation68_spill] sm:$0xff] }
 0x20e   : > { %6050 = vmatmul.mubr.msk.f32.gmra.mrb[74].mxu1 %vm11789_vm8, %v11201_v3  ;;  %5318 = vst [vmem:[#allocation3 + $0xd8] sm:$0xff] %v5174_v11  ;;  %vm11797_vm8 = vnez %v11632_v62  ;;  %2957 = vst [vmem:[#allocation2 + $0x430] sm:$0xff] %v5843_v37  ;;  %v6165_v62 = vsel %vm4745_vm0, 1.0, %v9393_v51  ;;  %vm11812_vm0 = vnez %v11811_v61  ;;  %v11829_v11 = vld [vmem:[#allocation23_spill] sm:$0xff]  ;;  %v11849_v61 = vld [vmem:[#allocation45_spill] sm:$0xff] }
 0x20f   : > { %6051 = vmatprep.mubr.msk.f32.mxu1 %vm11791_vm12, %v11201_v3  ;;  %vm4746_vm12 = vcmp.le.f32.partialorder %v3527_v12, 16.0  ;;  %v5177_v29 = vmul.f32 %v6165_v62, %v11806_v31  ;;  %v11831_v12 = vld [vmem:[#allocation75_spill] sm:$0xff]  ;;  %v11844_v31 = vld [vmem:[#allocation80_spill] sm:$0xff] }
 0x210   : > { %6533 = vmatmul.mubr.msk.f32.gmra.mrb[114].mxu0 %vm11800_vm3, %v11201_v3  ;;  %v6166_v5 = vsel %vm4746_vm12, 1.0, %v9393_v51  ;;  %vm11808_vm3 = vnez %v11807_v15  ;;  %vm11810_vm12 = vnez %v11809_v9 }
 0x211   : > { %v5178_v36 = vmul.f32 %v6166_v5, %v11803_v44  ;;  %v5844_v45 = vsel %vm11810_vm12, 1.0, %v9393_v51  ;;  %5321 = vst [vmem:[#allocation3 + $0xf0] sm:$0xff] %v5177_v29  ;;  %vm11815_vm12 = vnez %v11814_v7  ;;  %v11839_v44 = vld [vmem:[#allocation79_spill] sm:$0xff] }
 0x212   : > { %6052 = vmatmul.mubr.msk.f32.gmra.mrb[76].mxu1 %vm11796_vm6, %v11201_v3  ;;  %vm11802_vm6 = vnez %v11801_v20  ;;  %2960 = vst [vmem:[#allocation2 + $0x448] sm:$0xff] %v5844_v45  ;;  %v11838_v20 = vld [vmem:[#allocation42_spill] sm:$0xff] }
 0x213   : > { %6053 = vmatprep.mubr.msk.f32.mxu1 %vm11797_vm8, %v11201_v3  ;;  %6535 = vmatprep.mubr.msk.f32.mxu0 %vm11802_vm6, %v11201_v3  ;;  %vm11805_vm8 = vnez %v11804_v33  ;;  %5322 = vst [vmem:[#allocation3 + $0xf8] sm:$0xff] %v5178_v36  ;;  %vm11813_vm6 = vnez %v11719_v13  ;;  %v6424_v36 = vpop.f32.mrb[14].mxu1 }
 0x214   : > { %6536 = vmatmul.mubr.msk.f32.gmra.mrb[116].mxu0 %vm11812_vm0, %v11201_v3  ;;  %vm11818_vm0 = vnez %v11817_v2  ;;  %v3902_v33 = vpop.f32.mrb[15].mxu1 }
 0x215   : > { %6538 = vmatprep.mubr.msk.f32.mxu0 %vm11813_vm6, %v11201_v3  ;;  %v5845_v13 = vsel %vm11818_vm0, 1.0, %v9393_v51  ;;  %vm11820_vm6 = vnez %v11819_v27  ;;  %vm4751_vm0 = vcmp.le.f32.partialorder %v3891_v40, 16.0  ;;  %v11853_v27 = vld [vmem:[#allocation83_spill] sm:$0xff] }
 0x216   : > { %6054 = vmatmul.mubr.msk.f32.gmra.mrb[78].mxu1 %vm11805_vm8, %v11201_v3  ;;  %vm4749_vm8 = vcmp.le.f32.partialorder %v3533_v53, 16.0  ;;  %2963 = vst [vmem:[#allocation2 + $0x460] sm:$0xff] %v5845_v13  ;;  %v6171_v32 = vsel %vm4751_vm0, 1.0, %v9393_v51  ;;  %vm11834_vm0 = vnez %v11732_v4  ;;  %v11850_v53 = vld [vmem:[#allocation47_spill] sm:$0xff] }
 0x217   : > { %6055 = vmatprep.mubr.msk.f32.mxu1 %vm11808_vm3, %v11201_v3  ;;  %vm4748_vm3 = vcmp.le.f32.partialorder %v3885_v25, 16.0  ;;  %v6169_v39 = vsel %vm4749_vm8, 1.0, %v9393_v51  ;;  %vm11825_vm8 = vnez %v11824_v17  ;;  %v5183_v58 = vmul.f32 %v6171_v32, %v11830_v43 }
 0x218   : > { %v6168_v52 = vsel %vm4748_vm3, 1.0, %v9393_v51  ;;  %v5181_v56 = vmul.f32 %v6169_v39, %v11816_v16  ;;  %6539 = vmatmul.mubr.msk.f32.gmra.mrb[118].mxu0 %vm11820_vm6, %v11201_v3  ;;  %vm11827_vm3 = vnez %v11826_v14  ;;  %vm4752_vm6 = vcmp.le.f32.partialorder %v3539_v38, 16.0  ;;  %v11851_v39 = vld [vmem:[#allocation82_spill] sm:$0xff] }
 0x219   : > { %v5180_v59 = vmul.f32 %v6168_v52, %v11821_v18  ;;  %v5846_v46 = vsel %vm11827_vm3, 1.0, %v9393_v51  ;;  %v6172_v28 = vsel %vm4752_vm6, 1.0, %v9393_v51  ;;  %5327 = vst [vmem:[#allocation3 + $0x120] sm:$0xff] %v5183_v58 }
 0x21a   : > { %4250 = vmatmul.mubr.f32.gmra.mrb[80].mxu1 %v9393_v51  ;;  %5325 = vst [vmem:[#allocation3 + $0x110] sm:$0xff] %v5181_v56  ;;  %2966 = vst [vmem:[#allocation2 + $0x478] sm:$0xff] %v5846_v46  ;;  %v5184_v50 = vmul.f32 %v6172_v28, %v11829_v11  ;;  %v6427_v56 = vpop.f32.mrb[16].mxu1  ;;  %v11857_v28 = vld [vmem:[#allocation84_spill] sm:$0xff]  ;;  %v11859_v11 = vld [vmem:[#allocation57_spill] sm:$0xff] }
 0x21b   : > { %6056 = vmatprep.mubr.msk.f32.mxu1 %vm11815_vm12, %v11201_v3  ;;  %vm11823_vm12 = vnez %v11822_v24  ;;  %5324 = vst [vmem:[#allocation3 + $0x108] sm:$0xff] %v5180_v59  ;;  %v11855_v59 = vld [vmem:[#allocation54_spill] sm:$0xff] }
 0x21c   : > { %6541 = vmatprep.mubr.msk.f32.mxu0 %vm11823_vm12, %v11201_v3  ;;  %vm11828_vm12 = vnez %v11728_v34  ;;  %5328 = vst [vmem:[#allocation3 + $0x128] sm:$0xff] %v5184_v50  ;;  %v11835_v34 = vld [vmem:[#allocation77_spill] sm:$0xff] }
 0x21d   : > { %6542 = vmatmul.mubr.msk.f32.gmra.mrb[120].mxu0 %vm11727_vm2, %v11201_v3  ;;  %vm11832_vm2 = vnez %v11831_v12  ;;  %vm11836_vm6 = vnez %v11835_v34 }
 0x21e   : > { %4255 = vmatmul.mubr.f32.gmra.mrb[82].mxu1 %v9393_v51  ;;  %6544 = vmatprep.mubr.msk.f32.mxu0 %vm11828_vm12, %v11201_v3  ;;  %v3543_v51 = vpop.f32.mrb[26].mxu0  ;;  %vm11837_vm12 = vnez %v11472_v22 }
 0x21f   : > { %6057 = vmatprep.mubr.msk.f32.mxu1 %vm11825_vm8, %v11201_v3  ;;  %vm11833_vm8 = vnez %v11730_v57  ;;  %v3897_v37 = vadd.f32 %v6421_v8, %v3543_v51  ;;  %v3545_v57 = vpop.f32.mrb[27].mxu0  ;;  %v3914_v8 = vpop.f32.mrb[17].mxu1 }
 0x220   : > { %v6430_v34 = vpop.f32.mrb[18].mxu1 }
 0x221   : > { %6545 = vmatmul.mubr.msk.f32.gmra.mrb[122].mxu0 %vm11833_vm8, %v11201_v3  ;;  %vm4754_vm8 = vcmp.le.f32.partialorder %v3897_v37, 16.0 }
 0x222   : > { %4260 = vmatmul.mubr.f32.gmra.mrb[84].mxu1 %v10271_v1  ;;  %6547 = vmatprep.mubr.msk.f32.mxu0 %vm11834_vm0, %v11201_v3  ;;  %v6174_v5 = vsel %vm4754_vm8, 1.0, %v10271_v1  ;;  %vm11840_vm0 = vnez %v11839_v44 }
 0x223   : > { %6058 = vmatprep.mubr.msk.f32.mxu1 %vm11832_vm2, %v11201_v3  ;;  %vm4755_vm2 = vcmp.le.f32.partialorder %v3545_v57, 16.0  ;;  %v5186_v22 = vmul.f32 %v6174_v5, %v11842_v0  ;;  %v3926_v57 = vpop.f32.mrb[19].mxu1 }
 0x224   : > { %v6175_v4 = vsel %vm4755_vm2, 1.0, %v10271_v1  ;;  %vm11846_vm2 = vnez %v11488_v6 }
 0x225   : > { %6548 = vmatmul.mubr.msk.f32.gmra.mrb[124].mxu0 %vm11735_vm7, %v11201_v3  ;;  %v5187_v62 = vmul.f32 %v6175_v4, %v11838_v20  ;;  %vm11841_vm7 = vnez %v11480_v54  ;;  %5330 = vst [vmem:[#allocation3 + $0x138] sm:$0xff] %v5186_v22  ;;  %v3549_v54 = vpop.f32.mrb[28].mxu0  ;;  %v11860_v4 = vld [vmem:[#allocation85_spill] sm:$0xff] }
 0x226   : > { %4265 = vmatmul.mubr.f32.gmra.mrb[86].mxu1 %v10271_v1  ;;  %6550 = vmatprep.mubr.msk.f32.mxu0 %vm11837_vm12, %v11201_v3  ;;  %vm11845_vm12 = vnez %v11844_v31  ;;  %v3903_v29 = vadd.f32 %v3902_v33, %v3549_v54  ;;  %v3551_v15 = vpop.f32.mrb[29].mxu0  ;;  %v11862_v20 = vld [vmem:[#allocation65_spill] sm:$0xff]  ;;  %v11863_v31 = vld [vmem:[#allocation86_spill] sm:$0xff] }
 0x227   : > { %6059 = vmatprep.mubr.msk.f32.mxu1 %vm11836_vm6, %v11201_v3  ;;  %vm11843_vm6 = vnez %v11486_v21  ;;  %5331 = vst [vmem:[#allocation3 + $0x140] sm:$0xff] %v5187_v62  ;;  %vm4758_vm8 = vcmp.le.f32.partialorder %v3551_v15, 16.0  ;;  %v3555_v7 = vpop.f32.mrb[30].mxu0 }
 0x228   : > { %v6178_v21 = vsel %vm4758_vm8, 1.0, %v10271_v1  ;;  %v3909_v52 = vadd.f32 %v6424_v36, %v3555_v7  ;;  %v3557_v16 = vpop.f32.mrb[31].mxu0  ;;  %vm11854_vm8 = vnez %v11853_v27 }
 0x229   : > { %6551 = vmatmul.mubr.msk.f32.gmra.mrb[126].mxu0 %vm11841_vm7, %v11201_v3  ;;  %vm11848_vm7 = vnez %v11847_v48  ;;  %v5190_v25 = vmul.f32 %v6178_v21, %v11849_v61  ;;  %v3561_v24 = vpop.f32.mrb[32].mxu0 }
 0x22a   : > { %4270 = vmatmul.mubr.f32.gmra.mrb[88].mxu1 %v10271_v1  ;;  %6553 = vmatprep.mubr.msk.f32.mxu0 %vm11843_vm6, %v11201_v3  ;;  %vm11852_vm6 = vnez %v11851_v39  ;;  %v3915_v40 = vadd.f32 %v3914_v8, %v3561_v24  ;;  %v3563_v38 = vpop.f32.mrb[33].mxu0  ;;  %v11868_v39 = vld [vmem:[#allocation66_spill] sm:$0xff] }
 0x22b   : > { %6060 = vmatprep.mubr.msk.f32.mxu1 %vm11840_vm0, %v11201_v3  ;;  %vm4757_vm0 = vcmp.le.f32.partialorder %v3903_v29, 16.0  ;;  %5334 = vst [vmem:[#allocation3 + $0x158] sm:$0xff] %v5190_v25  ;;  %v3567_v43 = vpop.f32.mrb[34].mxu0  ;;  %v11865_v29 = vld [vmem:[#allocation63_spill] sm:$0xff] }
 0x22c   : > { %v6177_v45 = vsel %vm4757_vm0, 1.0, %v10271_v1  ;;  %vm4764_vm0 = vcmp.le.f32.partialorder %v3563_v38, 16.0  ;;  %v3921_v12 = vadd.f32 %v6427_v56, %v3567_v43  ;;  %v3569_v51 = vpop.f32.mrb[35].mxu0 }
 0x22d   : > { %6554 = vmatmul.mubr.msk.f32.gmra.mrb[128].mxu0 %vm11846_vm2, %v11201_v3  ;;  %v5189_v6 = vmul.f32 %v6177_v45, %v11850_v53  ;;  %vm4760_vm2 = vcmp.le.f32.partialorder %v3909_v52, 16.0  ;;  %v6184_v46 = vsel %vm4764_vm0, 1.0, %v10271_v1  ;;  %v3573_v44 = vpop.f32.mrb[36].mxu0  ;;  %v11866_v53 = vld [vmem:[#allocation15_spill] sm:$0xff]  ;;  %v6433_v52 = vpop.f32.mrb[20].mxu1 }
 0x22e   : > { %4275 = vmatmul.mubr.f32.gmra.mrb[90].mxu1 %v10271_v1  ;;  %v6180_v18 = vsel %vm4760_vm2, 1.0, %v10271_v1  ;;  %v5196_v50 = vmul.f32 %v6184_v46, %v11859_v11  ;;  %vm4766_vm2 = vcmp.le.f32.partialorder %v3921_v12, 16.0  ;;  %v3927_v22 = vadd.f32 %v3926_v57, %v3573_v44  ;;  %v3575_v36 = vpop.f32.mrb[37].mxu0  ;;  %v3938_v8 = vpop.f32.mrb[21].mxu1 }
 0x22f   : > { %6061 = vmatprep.mubr.msk.f32.mxu1 %vm11845_vm12, %v11201_v3  ;;  %5333 = vst [vmem:[#allocation3 + $0x150] sm:$0xff] %v5189_v6  ;;  %vm4761_vm12 = vcmp.le.f32.partialorder %v3557_v16, 16.0  ;;  %v5192_v17 = vmul.f32 %v6180_v18, %v11856_v42  ;;  %v6186_v5 = vsel %vm4766_vm2, 1.0, %v10271_v1  ;;  %vm4770_vm0 = vcmp.le.f32.partialorder %v3575_v36, 16.0  ;;  %v3579_v21 = vpop.f32.mrb[38].mxu0 }
 0x230   : > { %v6181_v13 = vsel %vm4761_vm12, 1.0, %v10271_v1  ;;  %5340 = vst [vmem:[#allocation3 + $0x188] sm:$0xff] %v5196_v50  ;;  %vm4767_vm12 = vcmp.le.f32.partialorder %v3569_v51, 16.0  ;;  %v5198_v0 = vmul.f32 0.0, %v6186_v5  ;;  %v6190_v33 = vsel %vm4770_vm0, 1.0, %v10271_v1  ;;  %v3581_v61 = vpop.f32.mrb[39].mxu0 }
 0x231   : > { %v5193_v10 = vmul.f32 %v6181_v13, %v11855_v59  ;;  %5336 = vst [vmem:[#allocation3 + $0x168] sm:$0xff] %v5192_v17  ;;  %v6187_v37 = vsel %vm4767_vm12, 1.0, %v10271_v1  ;;  %v5202_v15 = vmul.f32 %v6190_v33, %v11865_v29  ;;  %v3933_v45 = vadd.f32 %v6430_v34, %v3579_v21  ;;  %v3585_v16 = vpop.f32.mrb[40].mxu0  ;;  %v11869_v59 = vld [vmem:[#allocation16_spill] sm:$0xff]  ;;  %v11874_v50 = vld [vmem:[#allocation98_spill] sm:$0xff]  ;;  %v6436_v51 = vpop.f32.mrb[22].mxu1 }
 0x232   : > { %4280 = vmatmul.mubr.f32.gmra.mrb[92].mxu1 %v10271_v1  ;;  %v5199_v62 = vmul.f32 %v6187_v37, %v11862_v20  ;;  %5342 = vst [vmem:[#allocation3 + $0x198] sm:$0xff] %v5198_v0  ;;  %vm4773_vm12 = vcmp.le.f32.partialorder %v3581_v61, 16.0  ;;  %v3587_v13 = vpop.f32.mrb[41].mxu0  ;;  %v3939_v27 = vadd.f32 %v3938_v8, %v3585_v16  ;;  %v3950_v37 = vpop.f32.mrb[23].mxu1  ;;  %v11875_v5 = vld [vmem:[#allocation99_spill] sm:$0xff] }
 0x233   : > { %6062 = vmatprep.mubr.msk.f32.mxu1 %vm11848_vm7, %v11201_v3  ;;  %5337 = vst [vmem:[#allocation3 + $0x170] sm:$0xff] %v5193_v10  ;;  %vm4763_vm7 = vcmp.le.f32.partialorder %v3915_v40, 16.0  ;;  %5346 = vst [vmem:[#allocation3 + $0x1b8] sm:$0xff] %v5202_v15  ;;  %vm4772_vm2 = vcmp.le.f32.partialorder %v3933_v45, 16.0  ;;  %v6193_v25 = vsel %vm4773_vm12, 1.0, %v10271_v1  ;;  %vm4776_vm0 = vcmp.le.f32.partialorder %v3587_v13, 16.0 }
 0x234   : > { %v6183_v32 = vsel %vm4763_vm7, 1.0, %v10271_v1  ;;  %5343 = vst [vmem:[#allocation3 + $0x1a0] sm:$0xff] %v5199_v62  ;;  %vm4769_vm7 = vcmp.le.f32.partialorder %v3927_v22, 16.0  ;;  %v6192_v6 = vsel %vm4772_vm2, 1.0, %v10271_v1  ;;  %v5205_v7 = vmul.f32 %v6193_v25, %v11868_v39  ;;  %v11871_v10 = vld [vmem:[#allocation97_spill] sm:$0xff]  ;;  %v3591_v42 = vpop.f32.mrb[42].mxu0 }
 0x235   : > { %v5195_v58 = vmul.f32 0.0, %v6183_v32  ;;  %v6189_v54 = vsel %vm4769_vm7, 1.0, %v10271_v1  ;;  %v5204_v56 = vmul.f32 0.0, %v6192_v6  ;;  %v6196_v18 = vsel %vm4776_vm0, 1.0, %v10271_v1  ;;  %v3593_v38 = vpop.f32.mrb[43].mxu0  ;;  %v11872_v32 = vld [vmem:[#allocation17_spill] sm:$0xff] }
 0x236   : > { %4285 = vmatmul.mubr.f32.gmra.mrb[94].mxu1 %v10271_v1  ;;  %v5201_v48 = vmul.f32 0.0, %v6189_v54  ;;  %5349 = vst [vmem:[#allocation3 + $0x1d0] sm:$0xff] %v5205_v7  ;;  %vm11870_vm7 = vnez %v11869_v59  ;;  %v5208_v24 = vmul.f32 %v6196_v18, %v11871_v10  ;;  %v3945_v40 = vadd.f32 %v6433_v52, %v3591_v42  ;;  %v3597_v12 = vpop.f32.mrb[44].mxu0  ;;  %v11876_v54 = vld [vmem:[#allocation100_spill] sm:$0xff]  ;;  %v6439_v21 = vpop.f32.mrb[24].mxu1  ;;  %v11877_v6 = vld [vmem:[#allocation101_spill] sm:$0xff] }
 0x237   : > { %6063 = vmatprep.mubr.msk.f32.mxu1 %vm11852_vm6, %v11201_v3  ;;  %vm11858_vm6 = vnez %v11857_v28  ;;  %5339 = vst [vmem:[#allocation3 + $0x180] sm:$0xff] %v5195_v58  ;;  %5348 = vst [vmem:[#allocation3 + $0x1c8] sm:$0xff] %v5204_v56  ;;  %vm4779_vm12 = vcmp.le.f32.partialorder %v3593_v38, 16.0  ;;  %v3599_v34 = vpop.f32.mrb[45].mxu0  ;;  %v3951_v57 = vadd.f32 %v3950_v37, %v3597_v12  ;;  %v3962_v45 = vpop.f32.mrb[25].mxu1  ;;  %v11878_v18 = vld [vmem:[#allocation102_spill] sm:$0xff] }
 0x238   : > { %5345 = vst [vmem:[#allocation3 + $0x1b0] sm:$0xff] %v5201_v48  ;;  %5352 = vst [vmem:[#allocation3 + $0x1e8] sm:$0xff] %v5208_v24  ;;  %vm4778_vm2 = vcmp.le.f32.partialorder %v3945_v40, 16.0  ;;  %v6199_v28 = vsel %vm4779_vm12, 1.0, %v10271_v1  ;;  %vm4782_vm0 = vcmp.le.f32.partialorder %v3599_v34, 16.0  ;;  %v3603_v62 = vpop.f32.mrb[46].mxu0 }
 0x239   : > { %v6198_v11 = vsel %vm4778_vm2, 1.0, %v10271_v1  ;;  %v5211_v43 = vmul.f32 %v6199_v28, %v11874_v50  ;;  %v3957_v0 = vadd.f32 %v6436_v51, %v3603_v62  ;;  %v3605_v22 = vpop.f32.mrb[47].mxu0  ;;  %v6442_v42 = vpop.f32.mrb[26].mxu1  ;;  %v11879_v28 = vld [vmem:[#allocation103_spill] sm:$0xff]  ;;  %v11880_v37 = vld [vmem:[#allocation104_spill] sm:$0xff] }
 0x23a   : > { %4290 = vmatmul.mubr.f32.gmra.mrb[96].mxu1 %v10271_v1  ;;  %v5210_v58 = vmul.f32 0.0, %v6198_v11  ;;  %v3609_v48 = vpop.f32.mrb[48].mxu0  ;;  %v3974_v40 = vpop.f32.mrb[27].mxu1 }
 0x23b   : > { %6064 = vmatprep.mubr.msk.f32.mxu1 %vm11854_vm8, %v11201_v3  ;;  %vm11861_vm8 = vnez %v11860_v4  ;;  %5355 = vst [vmem:[#allocation3 + $0x200] sm:$0xff] %v5211_v43  ;;  %v6202_v4 = vsel %vm4782_vm0, 1.0, %v10271_v1  ;;  %vm4784_vm12 = vcmp.le.f32.partialorder %v3957_v0, 16.0  ;;  %v3611_v61 = vpop.f32.mrb[49].mxu0  ;;  %v3963_v25 = vadd.f32 %v3962_v45, %v3609_v48 }
 0x23c   : > { %5354 = vst [vmem:[#allocation3 + $0x1f8] sm:$0xff] %v5210_v58  ;;  %v5214_v20 = vmul.f32 %v6202_v4, %v11875_v5  ;;  %vm4788_vm2 = vcmp.le.f32.partialorder %v3611_v61, 16.0  ;;  %v3615_v7 = vpop.f32.mrb[50].mxu0  ;;  %v6785_v61 = vld [vmem:[#allocation2 + $0x2c0] sm:$0xff] }
 0x23d   : > { %v3969_v16 = vadd.f32 %v6439_v21, %v3615_v7  ;;  %v3617_v56 = vpop.f32.mrb[51].mxu0 }
 0x23e   : > { %4295 = vmatmul.mubr.f32.gmra.mrb[98].mxu1 %v10271_v1  ;;  %5358 = vst [vmem:[#allocation3 + $0x218] sm:$0xff] %v5214_v20  ;;  %vm4791_vm0 = vcmp.le.f32.partialorder %v3617_v56, 16.0  ;;  %v3621_v24 = vpop.f32.mrb[52].mxu0 }
 0x23f   : > { %6065 = vmatprep.mubr.msk.f32.mxu1 %vm11858_vm6, %v11201_v3  ;;  %vm11864_vm6 = vnez %v11863_v31  ;;  %v6204_v31 = vsel %vm4784_vm12, 1.0, %v10271_v1  ;;  %v6211_v13 = vsel %vm4791_vm0, 1.0, %v10271_v1  ;;  %v3975_v38 = vadd.f32 %v3974_v40, %v3621_v24 }
 0x240   : > { %v5216_v15 = vmul.f32 0.0, %v6204_v31  ;;  %v5223_v59 = vmul.f32 %v6211_v13, %v11878_v18 }
 0x241   : > { %vm4793_vm12 = vcmp.le.f32.partialorder %v3975_v38, 16.0 }
 0x242   : > { %4300 = vmatmul.mubr.f32.gmra.mrb[100].mxu1 %v10271_v1  ;;  %5360 = vst [vmem:[#allocation3 + $0x228] sm:$0xff] %v5216_v15  ;;  %5367 = vst [vmem:[#allocation3 + $0x260] sm:$0xff] %v5223_v59  ;;  %v6213_v50 = vsel %vm4793_vm12, 1.0, %v10271_v1 }
 0x243   : > { %6066 = vmatprep.mubr.msk.f32.mxu1 %vm11861_vm8, %v11201_v3  ;;  %vm11867_vm8 = vnez %v11866_v53  ;;  %v6208_v53 = vsel %vm4788_vm2, 1.0, %v10271_v1  ;;  %v5225_v12 = vmul.f32 0.0, %v6213_v50 }
 0x244   : > { %v5220_v39 = vmul.f32 %v6208_v53, %v11877_v6  ;;  %v6445_v5 = vpop.f32.mrb[28].mxu1 }
 0x245   : > { %5369 = vst [vmem:[#allocation3 + $0x270] sm:$0xff] %v5225_v12  ;;  %v3986_v62 = vpop.f32.mrb[29].mxu1 }
 0x246   : > { %4305 = vmatmul.mubr.f32.gmra.mrb[102].mxu1 %v10271_v1  ;;  %5364 = vst [vmem:[#allocation3 + $0x248] sm:$0xff] %v5220_v39 }
 0x247   : > { %6067 = vmatprep.mubr.msk.f32.mxu1 %vm11864_vm6, %v11201_v3  ;;  %vm4775_vm6 = vcmp.le.f32.partialorder %v3939_v27, 16.0 }
 0x248   : > { %v6195_v17 = vsel %vm4775_vm6, 1.0, %v10271_v1  ;;  %vm4785_vm6 = vcmp.le.f32.partialorder %v3605_v22, 16.0 }
 0x249   : > { %v5207_v46 = vmul.f32 0.0, %v6195_v17  ;;  %v6205_v33 = vsel %vm4785_vm6, 1.0, %v10271_v1  ;;  %v3623_v17 = vpop.f32.mrb[53].mxu0 }
 0x24a   : > { %4310 = vmatmul.mubr.f32.gmra.mrb[104].mxu1 %v10271_v1  ;;  %v5217_v29 = vmul.f32 %v6205_v33, %v11876_v54  ;;  %vm4794_vm6 = vcmp.le.f32.partialorder %v3623_v17, 16.0  ;;  %v3627_v11 = vpop.f32.mrb[54].mxu0 }
 0x24b   : > { %6068 = vmatprep.mubr.msk.f32.mxu1 %vm11867_vm8, %v11201_v3  ;;  %vm11873_vm8 = vnez %v11872_v32  ;;  %5351 = vst [vmem:[#allocation3 + $0x1e0] sm:$0xff] %v5207_v46  ;;  %v6214_v46 = vsel %vm4794_vm6, 1.0, %v10271_v1  ;;  %v3981_v43 = vadd.f32 %v6442_v42, %v3627_v11  ;;  %v3629_v58 = vpop.f32.mrb[55].mxu0 }
 0x24c   : > { %5361 = vst [vmem:[#allocation3 + $0x230] sm:$0xff] %v5217_v29  ;;  %v5226_v32 = vmul.f32 %v6214_v46, %v11879_v28  ;;  %vm4797_vm2 = vcmp.le.f32.partialorder %v3629_v58, 16.0  ;;  %v3633_v20 = vpop.f32.mrb[56].mxu0  ;;  %v6787_v46 = vld [vmem:[#allocation2 + $0x2f0] sm:$0xff] }
 0x24d   : > { %v6217_v51 = vsel %vm4797_vm2, 1.0, %v10271_v1  ;;  %v3987_v0 = vadd.f32 %v3986_v62, %v3633_v20 }
 0x24e   : > { %4315 = vmatmul.mubr.f32.gmra.mrb[106].mxu1 %v10271_v1  ;;  %5370 = vst [vmem:[#allocation3 + $0x278] sm:$0xff] %v5226_v32 }
 0x24f   : > { %6069 = vmatprep.mubr.msk.f32.mxu1 %vm11870_vm7, %v11201_v3  ;;  %vm4781_vm7 = vcmp.le.f32.partialorder %v3951_v57, 16.0  ;;  %v5229_v57 = vmul.f32 %v6217_v51, %v11880_v37 }
 0x250   : > { %v6201_v44 = vsel %vm4781_vm7, 1.0, %v10271_v1  ;;  %vm4790_vm7 = vcmp.le.f32.partialorder %v3969_v16, 16.0  ;;  %v6448_v53 = vpop.f32.mrb[30].mxu1 }
 0x251   : > { %v5213_v36 = vmul.f32 0.0, %v6201_v44  ;;  %v6210_v27 = vsel %vm4790_vm7, 1.0, %v10271_v1  ;;  %5373 = vst [vmem:[#allocation3 + $0x290] sm:$0xff] %v5229_v57  ;;  %v3635_v44 = vpop.f32.mrb[57].mxu0  ;;  %vm4799_vm7 = vcmp.le.f32.partialorder %v3987_v0, 16.0  ;;  %v3998_v7 = vpop.f32.mrb[31].mxu1 }
 0x252   : > { %4320 = vmatmul.mubr.f32.gmra.mrb[108].mxu1 %v10271_v1  ;;  %v5222_v10 = vmul.f32 0.0, %v6210_v27  ;;  %vm4800_vm0 = vcmp.le.f32.partialorder %v3635_v44, 16.0  ;;  %v6219_v31 = vsel %vm4799_vm7, 1.0, %v10271_v1  ;;  %v3639_v54 = vpop.f32.mrb[58].mxu0 }
 0x253   : > { %6070 = vmatprep.mubr.msk.f32.mxu1 %vm11873_vm8, %v11201_v3  ;;  %5357 = vst [vmem:[#allocation3 + $0x210] sm:$0xff] %v5213_v36  ;;  %vm4787_vm8 = vcmp.le.f32.partialorder %v3963_v25, 16.0  ;;  %v6220_v22 = vsel %vm4800_vm0, 1.0, %v10271_v1  ;;  %v6784_v36 = vld [vmem:[#allocation2 + $0x2a8] sm:$0xff]  ;;  %v5231_v29 = vmul.f32 0.0, %v6219_v31  ;;  %v3993_v15 = vadd.f32 %v6445_v5, %v3639_v54  ;;  %v3641_v21 = vpop.f32.mrb[59].mxu0 }
 0x254   : > { %v6207_v52 = vsel %vm4787_vm8, 1.0, %v10271_v1  ;;  %5366 = vst [vmem:[#allocation3 + $0x258] sm:$0xff] %v5222_v10  ;;  %vm4796_vm8 = vcmp.le.f32.partialorder %v3981_v43, 16.0  ;;  %v5232_v33 = vmul.f32 %v6784_v36, %v6220_v22  ;;  %vm4803_vm6 = vcmp.le.f32.partialorder %v3641_v21, 16.0  ;;  %v3645_v6 = vpop.f32.mrb[60].mxu0 }
 0x255   : > { %v5219_v8 = vmul.f32 0.0, %v6207_v52  ;;  %v6216_v34 = vsel %vm4796_vm8, 1.0, %v10271_v1  ;;  %5375 = vst [vmem:[#allocation3 + $0x2a0] sm:$0xff] %v5231_v29  ;;  %vm4802_vm12 = vcmp.le.f32.partialorder %v3993_v15, 16.0  ;;  %v6223_v48 = vsel %vm4803_vm6, 1.0, %v10271_v1  ;;  %v3647_v52 = vpop.f32.mrb[61].mxu0 }
 0x256   : > { %4325 = vmatmul.mubr.f32.gmra.mrb[110].mxu1 %v10271_v1  ;;  %v5228_v4 = vmul.f32 0.0, %v6216_v34  ;;  %5376 = vst [vmem:[#allocation3 + $0x2a8] sm:$0xff] %v5232_v33  ;;  %v6222_v45 = vsel %vm4802_vm12, 1.0, %v10271_v1  ;;  %v5235_v25 = vmul.f32 %v6785_v61, %v6223_v48  ;;  %v3999_v16 = vadd.f32 %v3998_v7, %v3645_v6  ;;  %v3651_v27 = vpop.f32.mrb[62].mxu0 }
 0x257   : > { %4329 = vmatprep.mubr.f32.mxu1 %v10271_v1  ;;  %5363 = vst [vmem:[#allocation3 + $0x240] sm:$0xff] %v5219_v8  ;;  %v5234_v39 = vmul.f32 0.0, %v6222_v45  ;;  %vm4806_vm2 = vcmp.le.f32.partialorder %v3647_v52, 16.0  ;;  %v6786_v8 = vld [vmem:[#allocation2 + $0x2d8] sm:$0xff]  ;;  %v4005_v59 = vadd.f32 %v6448_v53, %v3651_v27  ;;  %v3653_v10 = vpop.f32.mrb[63].mxu0  ;;  %v6451_v24 = vpop.f32.mrb[32].mxu1 }
 0x258   : > { %5372 = vst [vmem:[#allocation3 + $0x288] sm:$0xff] %v5228_v4  ;;  %5379 = vst [vmem:[#allocation3 + $0x2c0] sm:$0xff] %v5235_v25  ;;  %v6226_v56 = vsel %vm4806_vm2, 1.0, %v10271_v1  ;;  %vm4805_vm8 = vcmp.le.f32.partialorder %v3999_v16, 16.0  ;;  %vm4809_vm0 = vcmp.le.f32.partialorder %v3653_v10, 16.0  ;;  %v4010_v17 = vpop.f32.mrb[33].mxu1 }
 0x259   : > { %5378 = vst [vmem:[#allocation3 + $0x2b8] sm:$0xff] %v5234_v39  ;;  %v5238_v13 = vmul.f32 %v6786_v8, %v6226_v56  ;;  %v6225_v18 = vsel %vm4805_vm8, 1.0, %v10271_v1  ;;  %vm4808_vm7 = vcmp.le.f32.partialorder %v4005_v59, 16.0  ;;  %v6229_v40 = vsel %vm4809_vm0, 1.0, %v10271_v1  ;;  %v3657_v32 = vpop.f32.mrb[64].mxu0 }
 0x25a   : > { %4330 = vmatmul.mubr.f32.gmra.mrb[112].mxu1 %v10271_v1  ;;  %v5237_v42 = vmul.f32 0.0, %v6225_v18  ;;  %v6228_v38 = vsel %vm4808_vm7, 1.0, %v10271_v1  ;;  %v5241_v28 = vmul.f32 %v6787_v46, %v6229_v40  ;;  %v4011_v50 = vadd.f32 %v4010_v17, %v3657_v32  ;;  %v3659_v43 = vpop.f32.mrb[65].mxu0 }
 0x25b   : > { %4334 = vmatprep.mubr.f32.mxu1 %v10271_v1  ;;  %5382 = vst [vmem:[#allocation3 + $0x2d8] sm:$0xff] %v5238_v13  ;;  %v5240_v11 = vmul.f32 0.0, %v6228_v38  ;;  %vm4812_vm6 = vcmp.le.f32.partialorder %v3659_v43, 16.0 }
 0x25c   : > { %5381 = vst [vmem:[#allocation3 + $0x2d0] sm:$0xff] %v5237_v42  ;;  %5385 = vst [vmem:[#allocation3 + $0x2f0] sm:$0xff] %v5241_v28  ;;  %vm4811_vm12 = vcmp.le.f32.partialorder %v4011_v50, 16.0  ;;  %v6232_v58 = vsel %vm4812_vm6, 1.0, %v10271_v1 }
 0x25d   : > { %5384 = vst [vmem:[#allocation3 + $0x2e8] sm:$0xff] %v5240_v11  ;;  %v6231_v12 = vsel %vm4811_vm12, 1.0, %v10271_v1  ;;  %v5244_v51 = vmul.f32 0.0, %v6232_v58  ;;  %v3663_v34 = vpop.f32.mrb[66].mxu0 }
 0x25e   : > { %4335 = vmatmul.mubr.f32.gmra.mrb[114].mxu1 %v10271_v1  ;;  %v5243_v57 = vmul.f32 0.0, %v6231_v12  ;;  %v4017_v4 = vadd.f32 %v6451_v24, %v3663_v34  ;;  %v3665_v5 = vpop.f32.mrb[67].mxu0 }
 0x25f   : > { %4339 = vmatprep.mubr.f32.mxu1 %v10271_v1  ;;  %v6454_v37 = vpop.f32.mrb[34].mxu1  ;;  %5388 = vst [vmem:[#allocation3 + $0x308] sm:$0xff] %v5244_v51  ;;  %vm4815_vm2 = vcmp.le.f32.partialorder %v3665_v5, 16.0 }
 0x260   : > { %v4022_v20 = vpop.f32.mrb[35].mxu1  ;;  %5387 = vst [vmem:[#allocation3 + $0x300] sm:$0xff] %v5243_v57  ;;  %vm4814_vm8 = vcmp.le.f32.partialorder %v4017_v4, 16.0  ;;  %v6235_v62 = vsel %vm4815_vm2, 1.0, %v10271_v1 }
 0x261   : > { %v6234_v44 = vsel %vm4814_vm8, 1.0, %v10271_v1  ;;  %v5247_v0 = vmul.f32 0.0, %v6235_v62  ;;  %v3669_v22 = vpop.f32.mrb[68].mxu0 }
 0x262   : > { %4340 = vmatmul.mubr.f32.gmra.mrb[116].mxu1 %v10271_v1  ;;  %v5246_v36 = vmul.f32 0.0, %v6234_v44  ;;  %v4023_v33 = vadd.f32 %v4022_v20, %v3669_v22  ;;  %v3671_v31 = vpop.f32.mrb[69].mxu0 }
 0x263   : > { %4344 = vmatprep.mubr.f32.mxu1 %v10271_v1  ;;  %5391 = vst [vmem:[#allocation3 + $0x320] sm:$0xff] %v5247_v0  ;;  %vm4818_vm0 = vcmp.le.f32.partialorder %v3671_v31, 16.0 }
 0x264   : > { %5390 = vst [vmem:[#allocation3 + $0x318] sm:$0xff] %v5246_v36  ;;  %vm4817_vm7 = vcmp.le.f32.partialorder %v4023_v33, 16.0  ;;  %v6238_v15 = vsel %vm4818_vm0, 1.0, %v10271_v1 }
 0x265   : > { %v6457_v54 = vpop.f32.mrb[36].mxu1  ;;  %v6237_v21 = vsel %vm4817_vm7, 1.0, %v10271_v1  ;;  %v5250_v48 = vmul.f32 0.0, %v6238_v15  ;;  %v3675_v45 = vpop.f32.mrb[70].mxu0 }
 0x266   : > { %4345 = vmatmul.mubr.f32.gmra.mrb[118].mxu1 %v10271_v1  ;;  %v4034_v29 = vpop.f32.mrb[37].mxu1  ;;  %v5249_v61 = vmul.f32 0.0, %v6237_v21  ;;  %v4029_v25 = vadd.f32 %v6454_v37, %v3675_v45  ;;  %v3677_v53 = vpop.f32.mrb[71].mxu0 }
 0x267   : > { %4349 = vmatprep.mubr.f32.mxu1 %v10271_v1  ;;  %5394 = vst [vmem:[#allocation3 + $0x338] sm:$0xff] %v5250_v48  ;;  %vm4821_vm6 = vcmp.le.f32.partialorder %v3677_v53, 16.0 }
 0x268   : > { %5393 = vst [vmem:[#allocation3 + $0x330] sm:$0xff] %v5249_v61  ;;  %vm4820_vm12 = vcmp.le.f32.partialorder %v4029_v25, 16.0  ;;  %v6241_v6 = vsel %vm4821_vm6, 1.0, %v10271_v1  ;;  %vm11881_vm6 = vnez %v11494_v23 }
 0x269   : > { %v6240_v7 = vsel %vm4820_vm12, 1.0, %v10271_v1  ;;  %v5253_v52 = vmul.f32 0.0, %v6241_v6  ;;  %v3681_v16 = vpop.f32.mrb[72].mxu0 }
 0x26a   : > { %4350 = vmatmul.mubr.f32.gmra.mrb[120].mxu1 %v10271_v1  ;;  %v5252_v8 = vmul.f32 0.0, %v6240_v7  ;;  %v4035_v13 = vadd.f32 %v4034_v29, %v3681_v16  ;;  %v3683_v27 = vpop.f32.mrb[73].mxu0 }
 0x26b   : > { %4354 = vmatprep.mubr.f32.mxu1 %v10271_v1  ;;  %5397 = vst [vmem:[#allocation3 + $0x350] sm:$0xff] %v5253_v52  ;;  %vm4824_vm2 = vcmp.le.f32.partialorder %v3683_v27, 16.0 }
 0x26c   : > { %v6460_v39 = vpop.f32.mrb[38].mxu1  ;;  %5396 = vst [vmem:[#allocation3 + $0x348] sm:$0xff] %v5252_v8  ;;  %vm4823_vm8 = vcmp.le.f32.partialorder %v4035_v13, 16.0  ;;  %v6244_v18 = vsel %vm4824_vm2, 1.0, %v10271_v1 }
 0x26d   : > { %v4046_v56 = vpop.f32.mrb[39].mxu1  ;;  %v6243_v59 = vsel %vm4823_vm8, 1.0, %v10271_v1  ;;  %v5256_v10 = vmul.f32 0.0, %v6244_v18  ;;  %v3687_v24 = vpop.f32.mrb[74].mxu0 }
 0x26e   : > { %4355 = vmatmul.mubr.f32.gmra.mrb[122].mxu1 %v10271_v1  ;;  %v5255_v42 = vmul.f32 0.0, %v6243_v59  ;;  %v4041_v17 = vadd.f32 %v6457_v54, %v3687_v24  ;;  %v3689_v40 = vpop.f32.mrb[75].mxu0 }
 0x26f   : > { %4359 = vmatprep.mubr.f32.mxu1 %v10271_v1  ;;  %5400 = vst [vmem:[#allocation3 + $0x368] sm:$0xff] %v5256_v10  ;;  %vm4827_vm0 = vcmp.le.f32.partialorder %v3689_v40, 16.0 }
 0x270   : > { %5399 = vst [vmem:[#allocation3 + $0x360] sm:$0xff] %v5255_v42  ;;  %vm4826_vm7 = vcmp.le.f32.partialorder %v4041_v17, 16.0  ;;  %v6247_v28 = vsel %vm4827_vm0, 1.0, %v10271_v1  ;;  %vm11883_vm0 = vnez %v11809_v9 }
 0x271   : > { %v6246_v32 = vsel %vm4826_vm7, 1.0, %v10271_v1  ;;  %v5259_v11 = vmul.f32 0.0, %v6247_v28  ;;  %v3693_v60 = vpop.f32.mrb[76].mxu0 }
 0x272   : > { %4360 = vmatmul.mubr.f32.gmra.mrb[124].mxu1 %v10271_v1  ;;  %v5258_v50 = vmul.f32 0.0, %v6246_v32  ;;  %v4047_v43 = vadd.f32 %v4046_v56, %v3693_v60  ;;  %v3695_v58 = vpop.f32.mrb[77].mxu0 }
 0x273   : > { %4364 = vmatprep.mubr.f32.mxu1 %v10271_v1  ;;  %v6463_v38 = vpop.f32.mrb[40].mxu1  ;;  %5403 = vst [vmem:[#allocation3 + $0x380] sm:$0xff] %v5259_v11 }
 0x274   : > { %v4058_v46 = vpop.f32.mrb[41].mxu1  ;;  %5402 = vst [vmem:[#allocation3 + $0x378] sm:$0xff] %v5258_v50  ;;  %vm4829_vm12 = vcmp.le.f32.partialorder %v4047_v43, 16.0 }
 0x275   : > { %v6249_v23 = vsel %vm4829_vm12, 1.0, %v10271_v1 }
 0x276   : > { %4365 = vmatmul.mubr.f32.gmra.mrb[126].mxu1 %v10271_v1  ;;  %v3699_v30 = vpop.f32.mrb[78].mxu0  ;;  %v5261_v57 = vmul.f32 0.0, %v6249_v23 }
 0x277   : > { %4369 = vmatprep.mubr.f32.mxu1 %v10271_v1  ;;  %v4053_v4 = vadd.f32 %v6460_v39, %v3699_v30  ;;  %v3701_v5 = vpop.f32.mrb[79].mxu0 }
 0x278   : > { %5405 = vst [vmem:[#allocation3 + $0x390] sm:$0xff] %v5261_v57 }
 0x279   : > { %vm4832_vm2 = vcmp.le.f32.partialorder %v4053_v4, 16.0 }
 0x27a   : > { %4370 = vmatmul.mubr.f32.gmra.mrb[128].mxu1 %v10271_v1  ;;  %v6252_v49 = vsel %vm4832_vm2, 1.0, %v10271_v1  ;;  %v3705_v44 = vpop.f32.mrb[80].mxu0 }
 0x27b   : > { %4374 = vmatprep.mubr.f32.mxu1 %v10271_v1  ;;  %v10458_v51 = vpop.f32.mrb[42].mxu1  ;;  %v5264_v63 = vmul.f32 0.0, %v6252_v49  ;;  %v4059_v0 = vadd.f32 %v4058_v46, %v3705_v44  ;;  %v3707_v22 = vpop.f32.mrb[81].mxu0 }
 0x27c   : > { %v4070_v37 = vpop.f32.mrb[43].mxu1 }
 0x27d   : > { %5408 = vst [vmem:[#allocation3 + $0x3a8] sm:$0xff] %v5264_v63 }
 0x27e   : > { %4375 = vmatmul.mubr.f32.gmra.mrb[130].mxu1 %v10271_v1  ;;  %v3711_v54 = vpop.f32.mrb[82].mxu0 }
 0x27f   : > { %4379 = vmatprep.mubr.f32.mxu1 %v10271_v1  ;;  %v4065_v15 = vadd.f32 %v6463_v38, %v3711_v54  ;;  %v3713_v21 = vpop.f32.mrb[83].mxu0 }
 0x282   : > { %4380 = vmatmul.mubr.f32.gmra.mrb[132].mxu1 %v10271_v1  ;;  %v10475_v36 = vpop.f32.mrb[44].mxu1  ;;  %v3717_v25 = vpop.f32.mrb[84].mxu0 }
 0x283   : > { %4384 = vmatprep.mubr.f32.mxu1 %v10271_v1  ;;  %v4082_v33 = vpop.f32.mrb[45].mxu1  ;;  %v4071_v6 = vadd.f32 %v4070_v37, %v3717_v25  ;;  %v3719_v39 = vpop.f32.mrb[85].mxu0 }
 0x285   : > { %vm4841_vm8 = vcmp.le.f32.partialorder %v4071_v6, 16.0 }
 0x286   : > { %4385 = vmatmul.mubr.f32.gmra.mrb[134].mxu1 %v10271_v1  ;;  %v6261_v16 = vsel %vm4841_vm8, 1.0, %v10271_v1 }
 0x287   : > { %4389 = vmatprep.mubr.f32.mxu1 %v10271_v1  ;;  %v3723_v56 = vpop.f32.mrb[86].mxu0  ;;  %v5273_v8 = vmul.f32 0.0, %v6261_v16 }
 0x288   : > { %v10485_v48 = vpop.f32.mrb[46].mxu1  ;;  %v4077_v13 = vadd.f32 %v10458_v51, %v3723_v56  ;;  %v3725_v27 = vpop.f32.mrb[87].mxu0 }
 0x289   : > { %v4094_v45 = vpop.f32.mrb[47].mxu1  ;;  %vm4845_vm7 = vcmp.le.f32.partialorder %v3725_v27, 16.0  ;;  %5417 = vst [vmem:[#allocation3 + $0x3f0] sm:$0xff] %v5273_v8 }
 0x28a   : > { %4390 = vmatmul.mubr.f32.gmra.mrb[136].mxu1 %v10271_v1  ;;  %v6265_v9 = vsel %vm4845_vm7, 1.0, %v10271_v1 }
 0x28b   : > { %4394 = vmatprep.mubr.f32.mxu1 %v10271_v1  ;;  %v3729_v24 = vpop.f32.mrb[88].mxu0 }
 0x28c   : > { %v4083_v17 = vadd.f32 %v4082_v33, %v3729_v24  ;;  %v3731_v40 = vpop.f32.mrb[89].mxu0 }
 0x28e   : > { %4395 = vmatmul.mubr.f32.gmra.mrb[138].mxu1 %v10271_v1  ;;  %vm4847_vm12 = vcmp.le.f32.partialorder %v4083_v17, 16.0 }
 0x28f   : > { %4399 = vmatprep.mubr.f32.mxu1 %v10271_v1  ;;  %v10495_v7 = vpop.f32.mrb[48].mxu1  ;;  %v6267_v32 = vsel %vm4847_vm12, 1.0, %v10271_v1 }
 0x290   : > { %v4173_v52 = vpop.f32.mrb[49].mxu1  ;;  %v5279_v11 = vmul.f32 0.0, %v6267_v32 }
 0x291   : > { %v6790_v52 = vld [vmem:[#allocation2 + $0x10] sm:$0xff] }
 0x292   : > { %4400 = vmatmul.mubr.f32.gmra.mrb[140].mxu1 %v10271_v1  ;;  %5423 = vst [vmem:[#allocation3 + $0x420] sm:$0xff] %v5279_v11 }
 0x293   : > { %4404 = vmatprep.mubr.f32.mxu1 %v10271_v1  ;;  %v4176_v18 = vpop.f32.mrb[50].mxu1 }
 0x294   : > { %v4178_v59 = vpop.f32.mrb[51].mxu1 }
 0x296   : > { %4405 = vmatmul.mubr.f32.gmra.mrb[142].mxu1 %v10271_v1 }
 0x297   : > { %6556 = vmatprep.mubr.msk.f32.mxu1 %vm11741_vm15, %v11201_v3  ;;  %vm4830_vm15 = vcmp.le.f32.partialorder %v3695_v58, 16.0  ;;  %v10511_v38 = vpop.f32.mrb[52].mxu1 }
 0x298   : > { %v6250_v12 = vsel %vm4830_vm15, 1.0, %v10271_v1  ;;  %vm4848_vm15 = vcmp.le.f32.partialorder %v3731_v40, 16.0  ;;  %v4183_v28 = vpop.f32.mrb[53].mxu1 }
 0x299   : > { %v5262_v34 = vmul.f32 0.0, %v6250_v12  ;;  %v6268_v46 = vsel %vm4848_vm15, 1.0, %v10271_v1 }
 0x29a   : > { %6557 = vmatmul.mubr.msk.f32.vlgmr.msra.gmra.mrb[144].mxu1 %vm11881_vm6, %v11201_v3  ;;  %vm4844_vm6 = vcmp.le.f32.partialorder %v4077_v13, 16.0  ;;  %v5280_v14 = vmul.f32 0.0, %v6268_v46 }
 0x29b   : > { %6559 = vmatprep.mubr.msk.f32.mxu1 %vm11744_vm11, %v11201_v3  ;;  %5406 = vst [vmem:[#allocation3 + $0x398] sm:$0xff] %v5262_v34  ;;  %vm4833_vm11 = vcmp.le.f32.partialorder %v3701_v5, 16.0  ;;  %v6264_v10 = vsel %vm4844_vm6, 1.0, %v10271_v1  ;;  %v4186_v43 = vpop.f32.mrb[54].mxu1 }
 0x29c   : > { %v6253_v20 = vsel %vm4833_vm11, 1.0, %v10271_v1  ;;  %v5276_v42 = vmul.f32 0.0, %v6264_v10  ;;  %5424 = vst [vmem:[#allocation3 + $0x428] sm:$0xff] %v5280_v14  ;;  %v4188_v12 = vpop.f32.mrb[55].mxu1  ;;  %v6793_v14 = vld [vmem:[#allocation2 + $0x88] sm:$0xff] }
 0x29d   : > { %v5265_v62 = vmul.f32 0.0, %v6253_v20 }
 0x29e   : > { %6560 = vmatmul.mubr.msk.f32.gmra.mrb[146].mxu1 %vm11746_vm1, %v11201_v3  ;;  %vm4836_vm1 = vcmp.le.f32.partialorder %v3707_v22, 16.0  ;;  %5420 = vst [vmem:[#allocation3 + $0x408] sm:$0xff] %v5276_v42 }
 0x29f   : > { %6562 = vmatprep.mubr.msk.f32.mxu1 %vm11753_vm13, %v11201_v3  ;;  %5409 = vst [vmem:[#allocation3 + $0x3b0] sm:$0xff] %v5265_v62  ;;  %vm4835_vm13 = vcmp.le.f32.partialorder %v4059_v0, 16.0  ;;  %v6256_v41 = vsel %vm4836_vm1, 1.0, %v10271_v1 }
 0x2a0   : > { %v6255_v31 = vsel %vm4835_vm13, 1.0, %v10271_v1  ;;  %v5268_v19 = vmul.f32 0.0, %v6256_v41 }
 0x2a1   : > { %v5267_v29 = vmul.f32 0.0, %v6255_v31 }
 0x2a2   : > { %6563 = vmatmul.mubr.msk.f32.gmra.mrb[148].mxu1 %vm11761_vm14, %v11201_v3  ;;  %5412 = vst [vmem:[#allocation3 + $0x3c8] sm:$0xff] %v5268_v19  ;;  %vm4839_vm14 = vcmp.le.f32.partialorder %v3713_v21, 16.0 }
 0x2a3   : > { %6565 = vmatprep.mubr.msk.f32.mxu1 %vm11770_vm5, %v11201_v3  ;;  %5411 = vst [vmem:[#allocation3 + $0x3c0] sm:$0xff] %v5267_v29  ;;  %vm4838_vm5 = vcmp.le.f32.partialorder %v4065_v15, 16.0  ;;  %v6259_v55 = vsel %vm4839_vm14, 1.0, %v10271_v1 }
 0x2a4   : > { %v6258_v61 = vsel %vm4838_vm5, 1.0, %v10271_v1  ;;  %v5271_v35 = vmul.f32 0.0, %v6259_v55 }
 0x2a5   : > { %v5270_v53 = vmul.f32 0.0, %v6258_v61  ;;  %v10524_v61 = vld [vmem:[#allocation2 + $0x180] sm:$0xff] }
 0x2a6   : > { %6566 = vmatmul.mubr.msk.f32.gmra.mrb[150].mxu1 %vm11777_vm9, %v11201_v3  ;;  %vm11882_vm9 = vnez %v11793_v26  ;;  %5415 = vst [vmem:[#allocation3 + $0x3e0] sm:$0xff] %v5271_v35 }
 0x2a7   : > { %6568 = vmatprep.mubr.msk.f32.mxu1 %vm11786_vm10, %v11201_v3  ;;  %vm4842_vm10 = vcmp.le.f32.partialorder %v3719_v39, 16.0  ;;  %5414 = vst [vmem:[#allocation3 + $0x3d8] sm:$0xff] %v5270_v53  ;;  %v6789_v53 = vld [vmem:[#allocation2 + $0x28] sm:$0xff] }
 0x2a8   : > { %v6262_v26 = vsel %vm4842_vm10, 1.0, %v10271_v1 }
 0x2a9   : > { %v5274_v47 = vmul.f32 0.0, %v6262_v26 }
 0x2aa   : > { %6569 = vmatmul.mubr.msk.f32.gmra.mrb[152].mxu1 %vm11882_vm9, %v11201_v3 }
 0x2ab   : > { %6571 = vmatprep.mubr.msk.f32.mxu1 %vm11799_vm4, %v11201_v3  ;;  %vm11884_vm4 = vnez %v11817_v2  ;;  %5418 = vst [vmem:[#allocation3 + $0x3f8] sm:$0xff] %v5274_v47  ;;  %v5277_v2 = vmul.f32 0.0, %v6265_v9 }
 0x2ad   : > { %5421 = vst [vmem:[#allocation3 + $0x410] sm:$0xff] %v5277_v2  ;;  %v6792_v2 = vld [vmem:[#allocation2 + $0x40] sm:$0xff] }
 0x2ae   : > { %6572 = vmatmul.mubr.msk.f32.gmra.mrb[154].mxu1 %vm11883_vm0, %v11201_v3 }
 0x2af   : > { %6574 = vmatprep.mubr.msk.f32.mxu1 %vm11884_vm4, %v11201_v3 }
 0x2b0   : > { %v4191_v4 = vpop.f32.mrb[56].mxu1 }
 0x2b1   : > { %v4193_v20 = vpop.f32.mrb[57].mxu1 }
 0x2b2   : > { %6575 = vmatmul.mubr.msk.f32.gmra.mrb[156].mxu1 %vm11827_vm3, %v11201_v3  ;;  %v3735_v3 = vpop.f32.mrb[90].mxu0 }
 0x2b3   : > { %v4089_v60 = vadd.f32 %v10475_v36, %v3735_v3  ;;  %v3737_v50 = vpop.f32.mrb[91].mxu0 }
 0x2b4   : > { %vm4851_vm3 = vcmp.le.f32.partialorder %v3737_v50, 16.0  ;;  %v3741_v34 = vpop.f32.mrb[92].mxu0 }
 0x2b5   : > { %vm4850_vm11 = vcmp.le.f32.partialorder %v4089_v60, 16.0  ;;  %v6271_v58 = vsel %vm4851_vm3, 1.0, %v10271_v1  ;;  %v4095_v37 = vadd.f32 %v4094_v45, %v3741_v34  ;;  %v3743_v57 = vpop.f32.mrb[93].mxu0  ;;  %v6794_v60 = vld [vmem:[#allocation2 + $0x70] sm:$0xff] }
 0x2b6   : > { %v6270_v51 = vsel %vm4850_vm11, 1.0, %v10271_v1  ;;  %v5283_v23 = vmul.f32 0.0, %v6271_v58  ;;  %vm4854_vm2 = vcmp.le.f32.partialorder %v3743_v57, 16.0  ;;  %v3747_v44 = vpop.f32.mrb[94].mxu0 }
 0x2b7   : > { %v5282_v30 = vmul.f32 0.0, %v6270_v51  ;;  %vm4853_vm1 = vcmp.le.f32.partialorder %v4095_v37, 16.0  ;;  %v6274_v5 = vsel %vm4854_vm2, 1.0, %v10271_v1  ;;  %v4101_v0 = vadd.f32 %v10485_v48, %v3747_v44  ;;  %v3749_v22 = vpop.f32.mrb[95].mxu0  ;;  %v6795_v37 = vld [vmem:[#allocation2 + $0xb8] sm:$0xff] }
 0x2b8   : > { %5427 = vst [vmem:[#allocation3 + $0x440] sm:$0xff] %v5283_v23  ;;  %v6273_v49 = vsel %vm4853_vm1, 1.0, %v10271_v1  ;;  %v5286_v62 = vmul.f32 0.0, %v6274_v5  ;;  %vm4857_vm13 = vcmp.le.f32.partialorder %v3749_v22, 16.0  ;;  %v6507_v54 = vpop.f32.mrb[96].mxu0  ;;  %v6796_v5 = vld [vmem:[#allocation2 + $0xa0] sm:$0xff] }
 0x2b9   : > { %5426 = vst [vmem:[#allocation3 + $0x438] sm:$0xff] %v5282_v30  ;;  %v5285_v63 = vmul.f32 0.0, %v6273_v49  ;;  %vm4856_vm14 = vcmp.le.f32.partialorder %v4101_v0, 16.0  ;;  %v6277_v41 = vsel %vm4857_vm13, 1.0, %v10271_v1  ;;  %v4482_v15 = vadd.f32 %v6507_v54, %v4176_v18  ;;  %v4476_v21 = vpop.f32.mrb[97].mxu0  ;;  %v6791_v18 = vld [vmem:[#allocation2 + $0x58] sm:$0xff] }
 0x2ba   : > { %5430 = vst [vmem:[#allocation3 + $0x458] sm:$0xff] %v5286_v62  ;;  %v6276_v31 = vsel %vm4856_vm14, 1.0, %v10271_v1  ;;  %v5289_v19 = vmul.f32 0.0, %v6277_v41  ;;  %v4477_v55 = vadd.f32 %v4476_v21, %v10495_v7  ;;  %v6510_v25 = vpop.f32.mrb[98].mxu0  ;;  %v6797_v41 = vld [vmem:[#allocation2 + $0xe8] sm:$0xff] }
 0x2bb   : > { %5429 = vst [vmem:[#allocation3 + $0x450] sm:$0xff] %v5285_v63  ;;  %v5288_v29 = vmul.f32 0.0, %v6276_v31  ;;  %vm4720_vm5 = vcmp.le.f32.partialorder %v4482_v15, 16.0  ;;  %v4486_v39 = vpop.f32.mrb[99].mxu0  ;;  %v4492_v26 = vadd.f32 %v6510_v25, %v4186_v43  ;;  %v6798_v31 = vld [vmem:[#allocation2 + $0xd0] sm:$0xff] }
 0x2bc   : > { %5433 = vst [vmem:[#allocation3 + $0x470] sm:$0xff] %v5289_v19  ;;  %v6140_v35 = vsel %vm4720_vm5, 1.0, %v10524_v61  ;;  %vm4717_vm9 = vcmp.le.f32.partialorder %v4477_v55, 16.0  ;;  %v4487_v7 = vadd.f32 %v4486_v39, %v10511_v38  ;;  %v6513_v13 = vpop.f32.mrb[100].mxu0 }
 0x2bd   : > { %5432 = vst [vmem:[#allocation3 + $0x468] sm:$0xff] %v5288_v29  ;;  %v5152_v1 = vmul.f32 %v6789_v53, %v6140_v35  ;;  %v6137_v6 = vsel %vm4717_vm9, 1.0, %v10524_v61  ;;  %vm4726_vm10 = vcmp.le.f32.partialorder %v4492_v26, 16.0  ;;  %v4496_v59 = vpop.f32.mrb[101].mxu0  ;;  %v6799_v35 = vld [vmem:[#allocation2 + $0x100] sm:$0xff] }
 0x2be   : > { %v5149_v16 = vmul.f32 %v6790_v52, %v6137_v6  ;;  %vm4723_vm8 = vcmp.le.f32.partialorder %v4487_v7, 16.0  ;;  %v6146_v8 = vsel %vm4726_vm10, 1.0, %v10524_v61  ;;  %v4497_v42 = vadd.f32 %v4496_v59, %v4191_v4  ;;  %v6800_v6 = vld [vmem:[#allocation2 + $0x118] sm:$0xff] }
 0x2bf   : > { %v4196_v36 = vpop.f32.mrb[58].mxu1  ;;  %5296 = vst [vmem:[#allocation3 + $0x28] sm:$0xff] %v5152_v1  ;;  %v6143_v27 = vsel %vm4723_vm8, 1.0, %v10524_v61  ;;  %v5158_v9 = vmul.f32 %v6791_v18, %v6146_v8  ;;  %v6801_v8 = vld [vmem:[#allocation2 + $0x130] sm:$0xff] }
 0x2c0   : > { %v4198_v33 = vpop.f32.mrb[59].mxu1  ;;  %5293 = vst [vmem:[#allocation3 + $0x10] sm:$0xff] %v5149_v16  ;;  %v4502_v10 = vadd.f32 %v6513_v13, %v4196_v36  ;;  %v5155_v24 = vmul.f32 %v6792_v2, %v6143_v27  ;;  %vm4729_vm4 = vcmp.le.f32.partialorder %v4497_v42, 16.0 }
 0x2c1   : > { %5302 = vst [vmem:[#allocation3 + $0x58] sm:$0xff] %v5158_v9  ;;  %v6149_v28 = vsel %vm4729_vm4, 1.0, %v10524_v61 }
 0x2c2   : > { %vm4732_vm0 = vcmp.le.f32.partialorder %v4502_v10, 16.0  ;;  %5299 = vst [vmem:[#allocation3 + $0x40] sm:$0xff] %v5155_v24  ;;  %v5161_v50 = vmul.f32 %v6794_v60, %v6149_v28  ;;  %v6802_v24 = vld [vmem:[#allocation2 + $0x148] sm:$0xff] }
 0x2c3   : > { %v6152_v46 = vsel %vm4732_vm0, 1.0, %v10524_v61 }
 0x2c4   : > { %v5164_v3 = vmul.f32 %v6793_v14, %v6152_v46  ;;  %5305 = vst [vmem:[#allocation3 + $0x70] sm:$0xff] %v5161_v50  ;;  %v6803_v14 = vld [vmem:[#allocation2 + $0x160] sm:$0xff] }
 0x2c5   : > { %v4201_v48 = vpop.f32.mrb[60].mxu1 }
 0x2c6   : > { %v4203_v45 = vpop.f32.mrb[61].mxu1  ;;  %5308 = vst [vmem:[#allocation3 + $0x88] sm:$0xff] %v5164_v3 }
 0x2c9   : > { %v4206_v47 = vpop.f32.mrb[62].mxu1  ;;  %v6516_v38 = vpop.f32.mrb[102].mxu0 }
 0x2ca   : > { %v4208_v56 = vpop.f32.mrb[63].mxu1  ;;  %v4506_v32 = vpop.f32.mrb[103].mxu0  ;;  %v4512_v11 = vadd.f32 %v6516_v38, %v4206_v47 }
 0x2cb   : > { %v4507_v43 = vadd.f32 %v4506_v32, %v4201_v48 }
 0x2cc   : > { %vm4738_vm7 = vcmp.le.f32.partialorder %v4512_v11, 16.0 }
 0x2cd   : > { %v4211_v17 = vpop.f32.mrb[64].mxu1  ;;  %vm4735_vm6 = vcmp.le.f32.partialorder %v4507_v43, 16.0  ;;  %v6158_v23 = vsel %vm4738_vm7, 1.0, %v10524_v61 }
 0x2ce   : > { %v4213_v40 = vpop.f32.mrb[65].mxu1  ;;  %v6155_v30 = vsel %vm4735_vm6, 1.0, %v10524_v61  ;;  %v5170_v57 = vmul.f32 %v6795_v37, %v6158_v23 }
 0x2cf   : > { %v6519_v51 = vpop.f32.mrb[104].mxu0  ;;  %v5167_v20 = vmul.f32 %v6796_v5, %v6155_v30 }
 0x2d0   : > { %v4516_v34 = vpop.f32.mrb[105].mxu0  ;;  %5314 = vst [vmem:[#allocation3 + $0xb8] sm:$0xff] %v5170_v57 }
 0x2d1   : > { %v4216_v58 = vpop.f32.mrb[66].mxu1  ;;  %v4517_v49 = vadd.f32 %v4516_v34, %v4211_v17  ;;  %5311 = vst [vmem:[#allocation3 + $0xa0] sm:$0xff] %v5167_v20  ;;  %v6805_v20 = vld [vmem:[#allocation2 + $0x190] sm:$0xff] }
 0x2d2   : > { %v4218_v12 = vpop.f32.mrb[67].mxu1  ;;  %v4522_v4 = vadd.f32 %v6519_v51, %v4216_v58  ;;  %v6804_v51 = vld [vmem:[#allocation2 + $0x178] sm:$0xff] }
 0x2d3   : > { %v6522_v63 = vpop.f32.mrb[106].mxu0  ;;  %vm4741_vm12 = vcmp.le.f32.partialorder %v4517_v49, 16.0 }
 0x2d4   : > { %vm4744_vm15 = vcmp.le.f32.partialorder %v4522_v4, 16.0  ;;  %v4526_v22 = vpop.f32.mrb[107].mxu0  ;;  %v6161_v36 = vsel %vm4741_vm12, 1.0, %v10524_v61 }
 0x2d5   : > { %v4221_v62 = vpop.f32.mrb[68].mxu1  ;;  %v6164_v0 = vsel %vm4744_vm15, 1.0, %v10524_v61  ;;  %v5173_v19 = vmul.f32 %v6798_v31, %v6161_v36 }
 0x2d6   : > { %v4223_v44 = vpop.f32.mrb[69].mxu1  ;;  %v5176_v33 = vmul.f32 %v6797_v41, %v6164_v0  ;;  %v4527_v54 = vadd.f32 %v4526_v22, %v4221_v62  ;;  %v6806_v41 = vld [vmem:[#allocation2 + $0x1a8] sm:$0xff] }
 0x2d7   : > { %v6525_v55 = vpop.f32.mrb[108].mxu0  ;;  %5317 = vst [vmem:[#allocation3 + $0xd0] sm:$0xff] %v5173_v19 }
 0x2d8   : > { %5320 = vst [vmem:[#allocation3 + $0xe8] sm:$0xff] %v5176_v33  ;;  %vm4747_vm3 = vcmp.le.f32.partialorder %v4527_v54, 16.0  ;;  %v4536_v48 = vpop.f32.mrb[109].mxu0 }
 0x2d9   : > { %v4226_v29 = vpop.f32.mrb[70].mxu1  ;;  %v6167_v45 = vsel %vm4747_vm3, 1.0, %v10524_v61 }
 0x2da   : > { %v4532_v15 = vadd.f32 %v6522_v63, %v4226_v29  ;;  %v4228_v21 = vpop.f32.mrb[71].mxu1  ;;  %v5179_v25 = vmul.f32 %v6799_v35, %v6167_v45 }
 0x2db   : > { %v6528_v16 = vpop.f32.mrb[110].mxu0 }
 0x2dc   : > { %vm4750_vm11 = vcmp.le.f32.partialorder %v4532_v15, 16.0  ;;  %5323 = vst [vmem:[#allocation3 + $0x100] sm:$0xff] %v5179_v25  ;;  %v4546_v7 = vpop.f32.mrb[111].mxu0 }
 0x2dd   : > { %v6170_v53 = vsel %vm4750_vm11, 1.0, %v10524_v61  ;;  %v4231_v1 = vpop.f32.mrb[72].mxu1 }
 0x2de   : > { %v5182_v39 = vmul.f32 %v6800_v6, %v6170_v53  ;;  %v4537_v26 = vadd.f32 %v4536_v48, %v4231_v1  ;;  %v4233_v52 = vpop.f32.mrb[73].mxu1 }
 0x2df   : > { %v6531_v9 = vpop.f32.mrb[112].mxu0 }
 0x2e0   : > { %5326 = vst [vmem:[#allocation3 + $0x118] sm:$0xff] %v5182_v39  ;;  %vm4753_vm2 = vcmp.le.f32.partialorder %v4537_v26, 16.0  ;;  %v4556_v59 = vpop.f32.mrb[113].mxu0  ;;  %v6808_v39 = vld [vmem:[#allocation2 + $0x1d8] sm:$0xff] }
 0x2e1   : > { %v6173_v47 = vsel %vm4753_vm2, 1.0, %v10524_v61  ;;  %v4236_v56 = vpop.f32.mrb[74].mxu1 }
 0x2e2   : > { %v5185_v13 = vmul.f32 %v6801_v8, %v6173_v47  ;;  %v4542_v27 = vadd.f32 %v6525_v55, %v4236_v56  ;;  %v4238_v18 = vpop.f32.mrb[75].mxu1  ;;  %v6807_v55 = vld [vmem:[#allocation2 + $0x1c0] sm:$0xff] }
 0x2e3   : > { %v6534_v38 = vpop.f32.mrb[114].mxu0 }
 0x2e4   : > { %5329 = vst [vmem:[#allocation3 + $0x130] sm:$0xff] %v5185_v13  ;;  %vm4756_vm1 = vcmp.le.f32.partialorder %v4542_v27, 16.0  ;;  %v4566_v46 = vpop.f32.mrb[115].mxu0  ;;  %v6809_v13 = vld [vmem:[#allocation2 + $0x1f0] sm:$0xff] }
 0x2e5   : > { %v6176_v10 = vsel %vm4756_vm1, 1.0, %v10524_v61  ;;  %v4241_v2 = vpop.f32.mrb[76].mxu1 }
 0x2e6   : > { %v5188_v42 = vmul.f32 %v6802_v24, %v6176_v10  ;;  %v4547_v17 = vadd.f32 %v4546_v7, %v4241_v2  ;;  %v4243_v40 = vpop.f32.mrb[77].mxu1 }
 0x2e7   : > { %v6537_v50 = vpop.f32.mrb[116].mxu0 }
 0x2e8   : > { %5332 = vst [vmem:[#allocation3 + $0x148] sm:$0xff] %v5188_v42  ;;  %vm4759_vm13 = vcmp.le.f32.partialorder %v4547_v17, 16.0  ;;  %v4576_v43 = vpop.f32.mrb[117].mxu0  ;;  %v6810_v42 = vld [vmem:[#allocation2 + $0x208] sm:$0xff] }
 0x2e9   : > { %v6179_v28 = vsel %vm4759_vm13, 1.0, %v10524_v61  ;;  %v4246_v32 = vpop.f32.mrb[78].mxu1 }
 0x2ea   : > { %v5191_v3 = vmul.f32 %v6803_v14, %v6179_v28  ;;  %v4552_v11 = vadd.f32 %v6528_v16, %v4246_v32  ;;  %v4248_v60 = vpop.f32.mrb[79].mxu1  ;;  %v6811_v32 = vld [vmem:[#allocation2 + $0x220] sm:$0xff] }
 0x2eb   : > { %v10543_v37 = vpop.f32.mrb[118].mxu0 }
 0x2ec   : > { %5335 = vst [vmem:[#allocation3 + $0x160] sm:$0xff] %v5191_v3  ;;  %vm4762_vm14 = vcmp.le.f32.partialorder %v4552_v11, 16.0  ;;  %v4586_v57 = vpop.f32.mrb[119].mxu0 }
 0x2ed   : > { %v6182_v58 = vsel %vm4762_vm14, 1.0, %v10524_v61  ;;  %v4251_v12 = vpop.f32.mrb[80].mxu1 }
 0x2ee   : > { %v5194_v23 = vmul.f32 %v6804_v51, %v6182_v58  ;;  %v4557_v34 = vadd.f32 %v4556_v59, %v4251_v12  ;;  %v4253_v30 = vpop.f32.mrb[81].mxu1  ;;  %v6812_v58 = vld [vmem:[#allocation2 + $0x238] sm:$0xff] }
 0x2f0   : > { %5338 = vst [vmem:[#allocation3 + $0x178] sm:$0xff] %v5194_v23  ;;  %vm4765_vm5 = vcmp.le.f32.partialorder %v4557_v34, 16.0  ;;  %v10546_v63 = vpop.f32.mrb[120].mxu0 }
 0x2f1   : > { %v6185_v4 = vsel %vm4765_vm5, 1.0, %v10524_v61  ;;  %v4256_v5 = vpop.f32.mrb[82].mxu1  ;;  %v10548_v0 = vpop.f32.mrb[121].mxu0 }
 0x2f2   : > { %v5197_v49 = vmul.f32 %v6805_v20, %v6185_v4  ;;  %v4562_v62 = vadd.f32 %v6531_v9, %v4256_v5  ;;  %v4258_v44 = vpop.f32.mrb[83].mxu1 }
 0x2f3   : > { %v6814_v44 = vld [vmem:[#allocation2 + $0x268] sm:$0xff] }
 0x2f4   : > { %5341 = vst [vmem:[#allocation3 + $0x190] sm:$0xff] %v5197_v49  ;;  %vm4768_vm9 = vcmp.le.f32.partialorder %v4562_v62, 16.0  ;;  %v10551_v54 = vpop.f32.mrb[122].mxu0 }
 0x2f5   : > { %v6188_v22 = vsel %vm4768_vm9, 1.0, %v10524_v61  ;;  %v4261_v36 = vpop.f32.mrb[84].mxu1  ;;  %v10553_v29 = vpop.f32.mrb[123].mxu0 }
 0x2f6   : > { %v5200_v33 = vmul.f32 %v6806_v41, %v6188_v22  ;;  %v4567_v31 = vadd.f32 %v4566_v46, %v4261_v36  ;;  %v4263_v19 = vpop.f32.mrb[85].mxu1 }
 0x2f8   : > { %5344 = vst [vmem:[#allocation3 + $0x1a8] sm:$0xff] %v5200_v33  ;;  %vm4771_vm10 = vcmp.le.f32.partialorder %v4567_v31, 16.0  ;;  %v10556_v25 = vpop.f32.mrb[124].mxu0  ;;  %v6815_v31 = vld [vmem:[#allocation2 + $0x280] sm:$0xff] }
 0x2f9   : > { %v6191_v15 = vsel %vm4771_vm10, 1.0, %v10524_v61  ;;  %v4266_v21 = vpop.f32.mrb[86].mxu1  ;;  %v10558_v53 = vpop.f32.mrb[125].mxu0 }
 0x2fa   : > { %v5203_v48 = vmul.f32 %v6807_v55, %v6191_v15  ;;  %v4572_v45 = vadd.f32 %v6534_v38, %v4266_v21  ;;  %v4268_v35 = vpop.f32.mrb[87].mxu1 }
 0x2fc   : > { %5347 = vst [vmem:[#allocation3 + $0x1c0] sm:$0xff] %v5203_v48  ;;  %vm4774_vm8 = vcmp.le.f32.partialorder %v4572_v45, 16.0  ;;  %v10561_v7 = vpop.f32.mrb[126].mxu0  ;;  %v6816_v48 = vld [vmem:[#allocation2 + $0x298] sm:$0xff] }
 0x2fd   : > { %v6194_v1 = vsel %vm4774_vm8, 1.0, %v10524_v61  ;;  %v4271_v6 = vpop.f32.mrb[88].mxu1  ;;  %v10563_v47 = vpop.f32.mrb[127].mxu0 }
 0x2fe   : > { %v5206_v26 = vmul.f32 %v6808_v39, %v6194_v1  ;;  %v4577_v52 = vadd.f32 %v4576_v43, %v4271_v6  ;;  %v4273_v16 = vpop.f32.mrb[89].mxu1  ;;  %v11885_v43 = vld [vmem:[#allocation78_spill] sm:$0xff] }
 0x2ff   : > { %vm5437_vm15 = vcmp.ge.s32.totalorder %v11885_v43, 300  ;;  %v6817_v39 = vld [vmem:[#allocation2 + $0x2b0] sm:$0xff] }
 0x300   : > { %5350 = vst [vmem:[#allocation3 + $0x1d8] sm:$0xff] %v5206_v26  ;;  %vm4777_vm0 = vcmp.le.f32.partialorder %v4577_v52, 16.0  ;;  %v10566_v59 = vpop.f32.mrb[128].mxu0  ;;  %v10577_v34 = vsel %vm5437_vm15, 1.0, %v10524_v61  }
 0x301   : > { %v6197_v56 = vsel %vm4777_vm0, 1.0, %v10524_v61  ;;  %v4276_v8 = vpop.f32.mrb[90].mxu1  ;;  %v10568_v10 = vpop.f32.mrb[129].mxu0 }
 0x302   : > { %v5209_v27 = vmul.f32 %v6809_v13, %v6197_v56  ;;  %v4582_v18 = vadd.f32 %v6537_v50, %v4276_v8  ;;  %v4278_v9 = vpop.f32.mrb[91].mxu1  ;;  %v6818_v8 = vld [vmem:[#allocation2 + $0x2c8] sm:$0xff] }
 0x304   : > { %5353 = vst [vmem:[#allocation3 + $0x1f0] sm:$0xff] %v5209_v27  ;;  %vm4780_vm4 = vcmp.le.f32.partialorder %v4582_v18, 16.0 }
 0x305   : > { %v6200_v2 = vsel %vm4780_vm4, 1.0, %v10524_v61  ;;  %v4281_v24 = vpop.f32.mrb[92].mxu1 }
 0x306   : > { %v5212_v17 = vmul.f32 %v6810_v42, %v6200_v2  ;;  %v4587_v40 = vadd.f32 %v4586_v57, %v4281_v24  ;;  %v4283_v38 = vpop.f32.mrb[93].mxu1  ;;  %v6813_v57 = vld [vmem:[#allocation2 + $0x250] sm:$0xff]  ;;  %v6819_v2 = vld [vmem:[#allocation2 + $0x2e0] sm:$0xff] }
 0x307   : > { %v6820_v38 = vld [vmem:[#allocation2 + $0x2f8] sm:$0xff] }
 0x308   : > { %5356 = vst [vmem:[#allocation3 + $0x208] sm:$0xff] %v5212_v17  ;;  %vm4783_vm7 = vcmp.le.f32.partialorder %v4587_v40, 16.0 }
 0x309   : > { %v6203_v46 = vsel %vm4783_vm7, 1.0, %v10524_v61  ;;  %v4286_v28 = vpop.f32.mrb[94].mxu1 }
 0x30a   : > { %v5215_v14 = vmul.f32 %v6811_v32, %v6203_v46  ;;  %v4592_v3 = vadd.f32 %v10543_v37, %v4286_v28  ;;  %v4288_v11 = vpop.f32.mrb[95].mxu1 }
 0x30c   : > { %5359 = vst [vmem:[#allocation3 + $0x220] sm:$0xff] %v5215_v14  ;;  %vm4786_vm6 = vcmp.le.f32.partialorder %v4592_v3, 16.0  ;;  %v6821_v3 = vld [vmem:[#allocation2 + $0x310] sm:$0xff] }
 0x30d   : > { %v6206_v60 = vsel %vm4786_vm6, 1.0, %v10524_v61  ;;  %v4291_v50 = vpop.f32.mrb[96].mxu1 }
 0x30e   : > { %v5218_v12 = vmul.f32 %v6812_v58, %v6206_v60  ;;  %v4597_v51 = vadd.f32 %v10548_v0, %v4291_v50  ;;  %v4293_v23 = vpop.f32.mrb[97].mxu1  ;;  %v6822_v58 = vld [vmem:[#allocation2 + $0x328] sm:$0xff] }
 0x310   : > { %5362 = vst [vmem:[#allocation3 + $0x238] sm:$0xff] %v5218_v12  ;;  %vm4789_vm12 = vcmp.le.f32.partialorder %v4597_v51, 16.0 }
 0x311   : > { %v6209_v30 = vsel %vm4789_vm12, 1.0, %v10524_v61  ;;  %v4296_v37 = vpop.f32.mrb[98].mxu1 }
 0x312   : > { %v5221_v4 = vmul.f32 %v6813_v57, %v6209_v30  ;;  %v4602_v5 = vadd.f32 %v10546_v63, %v4296_v37  ;;  %v4298_v20 = vpop.f32.mrb[99].mxu1 }
 0x314   : > { %5365 = vst [vmem:[#allocation3 + $0x250] sm:$0xff] %v5221_v4  ;;  %vm4792_vm3 = vcmp.le.f32.partialorder %v4602_v5, 16.0 }
 0x315   : > { %v6212_v49 = vsel %vm4792_vm3, 1.0, %v10524_v61  ;;  %v4301_v62 = vpop.f32.mrb[100].mxu1 }
 0x316   : > { %v5224_v0 = vmul.f32 %v6814_v44, %v6212_v49  ;;  %v4607_v22 = vadd.f32 %v10553_v29, %v4301_v62  ;;  %v4303_v36 = vpop.f32.mrb[101].mxu1 }
 0x318   : > { %5368 = vst [vmem:[#allocation3 + $0x268] sm:$0xff] %v5224_v0  ;;  %vm4795_vm11 = vcmp.le.f32.partialorder %v4607_v22, 16.0 }
 0x319   : > { %v6215_v41 = vsel %vm4795_vm11, 1.0, %v10524_v61  ;;  %v4306_v33 = vpop.f32.mrb[102].mxu1 }
 0x31a   : > { %v5227_v19 = vmul.f32 %v6815_v31, %v6215_v41  ;;  %v4612_v63 = vadd.f32 %v10551_v54, %v4306_v33  ;;  %v4308_v15 = vpop.f32.mrb[103].mxu1 }
 0x31c   : > { %5371 = vst [vmem:[#allocation3 + $0x280] sm:$0xff] %v5227_v19  ;;  %vm4798_vm2 = vcmp.le.f32.partialorder %v4612_v63, 16.0 }
 0x31d   : > { %v6218_v21 = vsel %vm4798_vm2, 1.0, %v10524_v61  ;;  %v4311_v55 = vpop.f32.mrb[104].mxu1 }
 0x31e   : > { %v5230_v45 = vmul.f32 %v6816_v48, %v6218_v21  ;;  %v4617_v29 = vadd.f32 %v10558_v53, %v4311_v55  ;;  %v4313_v35 = vpop.f32.mrb[105].mxu1 }
 0x320   : > { %5374 = vst [vmem:[#allocation3 + $0x298] sm:$0xff] %v5230_v45  ;;  %vm4801_vm1 = vcmp.le.f32.partialorder %v4617_v29, 16.0 }
 0x321   : > { %v6221_v1 = vsel %vm4801_vm1, 1.0, %v10524_v61  ;;  %v4316_v6 = vpop.f32.mrb[106].mxu1 }
 0x322   : > { %v5233_v26 = vmul.f32 %v6817_v39, %v6221_v1  ;;  %v4622_v54 = vadd.f32 %v10556_v25, %v4316_v6  ;;  %v4318_v52 = vpop.f32.mrb[107].mxu1 }
 0x323   : > { %v6823_v52 = vld [vmem:[#allocation2 + $0x358] sm:$0xff] }
 0x324   : > { %5377 = vst [vmem:[#allocation3 + $0x2b0] sm:$0xff] %v5233_v26  ;;  %vm4804_vm13 = vcmp.le.f32.partialorder %v4622_v54, 16.0 }
 0x325   : > { %v6224_v16 = vsel %vm4804_vm13, 1.0, %v10524_v61  ;;  %v4321_v56 = vpop.f32.mrb[108].mxu1 }
 0x326   : > { %v5236_v13 = vmul.f32 %v6818_v8, %v6224_v16  ;;  %v4627_v53 = vadd.f32 %v10563_v47, %v4321_v56  ;;  %v4323_v27 = vpop.f32.mrb[109].mxu1 }
 0x328   : > { %5380 = vst [vmem:[#allocation3 + $0x2c8] sm:$0xff] %v5236_v13  ;;  %vm4807_vm14 = vcmp.le.f32.partialorder %v4627_v53, 16.0  ;;  %v6824_v53 = vld [vmem:[#allocation2 + $0x340] sm:$0xff] }
 0x329   : > { %v6227_v18 = vsel %vm4807_vm14, 1.0, %v10524_v61  ;;  %v4326_v9 = vpop.f32.mrb[110].mxu1 }
 0x32a   : > { %v5239_v24 = vmul.f32 %v6819_v2, %v6227_v18  ;;  %v4632_v25 = vadd.f32 %v10561_v7, %v4326_v9  ;;  %v4328_v42 = vpop.f32.mrb[111].mxu1 }
 0x32c   : > { %5383 = vst [vmem:[#allocation3 + $0x2e0] sm:$0xff] %v5239_v24  ;;  %vm4810_vm5 = vcmp.le.f32.partialorder %v4632_v25, 16.0  ;;  %v6825_v24 = vld [vmem:[#allocation2 + $0x388] sm:$0xff] }
 0x32d   : > { %v6230_v17 = vsel %vm4810_vm5, 1.0, %v10524_v61  ;;  %v4331_v40 = vpop.f32.mrb[112].mxu1 }
 0x32e   : > { %v5242_v46 = vmul.f32 %v6820_v38, %v6230_v17  ;;  %v4637_v47 = vadd.f32 %v10568_v10, %v4331_v40  ;;  %v4333_v28 = vpop.f32.mrb[113].mxu1  ;;  %v6826_v38 = vld [vmem:[#allocation2 + $0x370] sm:$0xff] }
 0x330   : > { %5386 = vst [vmem:[#allocation3 + $0x2f8] sm:$0xff] %v5242_v46  ;;  %vm4813_vm9 = vcmp.le.f32.partialorder %v4637_v47, 16.0 }
 0x331   : > { %v6233_v32 = vsel %vm4813_vm9, 1.0, %v10524_v61  ;;  %v4336_v14 = vpop.f32.mrb[114].mxu1 }
 0x332   : > { %v5245_v11 = vmul.f32 %v6821_v3, %v6233_v32  ;;  %v4642_v7 = vadd.f32 %v10566_v59, %v4336_v14  ;;  %v4338_v60 = vpop.f32.mrb[115].mxu1  ;;  %v6827_v14 = vld [vmem:[#allocation2 + $0x3b8] sm:$0xff] }
 0x334   : > { %5389 = vst [vmem:[#allocation3 + $0x310] sm:$0xff] %v5245_v11  ;;  %vm4816_vm10 = vcmp.le.f32.partialorder %v4642_v7, 16.0 }
 0x335   : > { %v6236_v50 = vsel %vm4816_vm10, 1.0, %v10524_v61  ;;  %v4341_v43 = vpop.f32.mrb[116].mxu1 }
 0x336   : > { %v5248_v12 = vmul.f32 %v6822_v58, %v6236_v50  ;;  %v4343_v51 = vpop.f32.mrb[117].mxu1  ;;  %v6828_v50 = vld [vmem:[#allocation2 + $0x3a0] sm:$0xff] }
 0x338   : > { %5392 = vst [vmem:[#allocation3 + $0x328] sm:$0xff] %v5248_v12 }
 0x339   : > { %v4346_v10 = vpop.f32.mrb[118].mxu1 }
 0x33a   : > { %v4348_v23 = vpop.f32.mrb[119].mxu1 }
 0x33d   : > { %v4351_v30 = vpop.f32.mrb[120].mxu1 }
 0x33e   : > { %v4353_v37 = vpop.f32.mrb[121].mxu1 }
 0x341   : > { %v4356_v57 = vpop.f32.mrb[122].mxu1 }
 0x342   : > { %v4358_v4 = vpop.f32.mrb[123].mxu1 }
 0x343   : > { %v6830_v4 = vld [vmem:[#allocation2 + $0x3d0] sm:$0xff] }
 0x345   : > { %v4361_v5 = vpop.f32.mrb[124].mxu1 }
 0x346   : > { %v4363_v20 = vpop.f32.mrb[125].mxu1 }
 0x349   : > { %v4366_v49 = vpop.f32.mrb[126].mxu1 }
 0x34a   : > { %v4368_v59 = vpop.f32.mrb[127].mxu1 }
 0x34d   : > { %v4371_v62 = vpop.f32.mrb[128].mxu1 }
 0x34e   : > { %v4373_v44 = vpop.f32.mrb[129].mxu1 }
 0x351   : > { %v4376_v0 = vpop.f32.mrb[130].mxu1 }
 0x352   : > { %v4378_v22 = vpop.f32.mrb[131].mxu1 }
 0x355   : > { %v10598_v36 = vpop.f32.mrb[132].mxu1 }
 0x356   : > { %v4383_v41 = vpop.f32.mrb[133].mxu1 }
 0x359   : > { %v10600_v33 = vpop.f32.mrb[134].mxu1 }
 0x35a   : > { %v4388_v31 = vpop.f32.mrb[135].mxu1 }
 0x35d   : > { %v10602_v19 = vpop.f32.mrb[136].mxu1 }
 0x35e   : > { %v4393_v63 = vpop.f32.mrb[137].mxu1 }
 0x361   : > { %v10604_v15 = vpop.f32.mrb[138].mxu1 }
 0x362   : > { %v4398_v21 = vpop.f32.mrb[139].mxu1 }
 0x365   : > { %v10606_v55 = vpop.f32.mrb[140].mxu1 }
 0x366   : > { %v4403_v48 = vpop.f32.mrb[141].mxu1 }
 0x367   : > { %v6833_v48 = vld [vmem:[#allocation2 + $0x448] sm:$0xff] }
 0x369   : > { %v10608_v45 = vpop.f32.mrb[142].mxu1 }
 0x36a   : > { %v4408_v29 = vpop.f32.mrb[143].mxu1 }
 0x36d   : > { %v6558_v35 = vpop.f32.mrb[144].mxu1 }
 0x36e   : > { %v4652_v1 = vadd.f32 %v6558_v35, %v4346_v10  ;;  %v4646_v6 = vpop.f32.mrb[145].mxu1  ;;  %v6829_v10 = vld [vmem:[#allocation2 + $0x3e8] sm:$0xff] }
 0x36f   : > { %v4647_v39 = vadd.f32 %v4646_v6, %v4341_v43 }
 0x370   : > { %vm4822_vm8 = vcmp.le.f32.partialorder %v4652_v1, 16.0 }
 0x371   : > { %v6242_v26 = vsel %vm4822_vm8, 1.0, %v10524_v61  ;;  %vm4819_vm0 = vcmp.le.f32.partialorder %v4647_v39, 16.0  ;;  %v6561_v54 = vpop.f32.mrb[146].mxu1 }
 0x372   : > { %v5254_v16 = vmul.f32 %v6823_v52, %v6242_v26  ;;  %v6239_v56 = vsel %vm4819_vm0, 1.0, %v10524_v61  ;;  %v4662_v8 = vadd.f32 %v6561_v54, %v4356_v57  ;;  %v4656_v13 = vpop.f32.mrb[147].mxu1  ;;  %v6835_v54 = vld [vmem:[#allocation2 + $0x478] sm:$0xff] }
 0x373   : > { %v5251_v27 = vmul.f32 %v6824_v53, %v6239_v56  ;;  %v4657_v18 = vadd.f32 %v4656_v13, %v4351_v30  ;;  %v6836_v56 = vld [vmem:[#allocation2 + $0x460] sm:$0xff]  ;;  %v10639_v13 = vmov 0.0  }
 0x374   : > { %5398 = vst [vmem:[#allocation3 + $0x358] sm:$0xff] %v5254_v16  ;;  %vm4828_vm4 = vcmp.le.f32.partialorder %v4662_v8, 16.0 }
 0x375   : > { %5395 = vst [vmem:[#allocation3 + $0x340] sm:$0xff] %v5251_v27  ;;  %v6248_v9 = vsel %vm4828_vm4, 1.0, %v10524_v61  ;;  %vm4825_vm7 = vcmp.le.f32.partialorder %v4657_v18, 16.0  ;;  %v6564_v2 = vpop.f32.mrb[148].mxu1 }
 0x376   : > { %v5260_v25 = vmul.f32 %v6825_v24, %v6248_v9  ;;  %v6245_v42 = vsel %vm4825_vm7, 1.0, %v10524_v61  ;;  %v4672_v17 = vadd.f32 %v6564_v2, %v4366_v49  ;;  %v4666_v40 = vpop.f32.mrb[149].mxu1 }
 0x377   : > { %v5257_v46 = vmul.f32 %v6826_v38, %v6245_v42  ;;  %v4667_v47 = vadd.f32 %v4666_v40, %v4361_v5 }
 0x378   : > { %5404 = vst [vmem:[#allocation3 + $0x388] sm:$0xff] %v5260_v25  ;;  %vm4834_vm6 = vcmp.le.f32.partialorder %v4672_v17, 16.0 }
 0x379   : > { %5401 = vst [vmem:[#allocation3 + $0x370] sm:$0xff] %v5257_v46  ;;  %v6254_v28 = vsel %vm4834_vm6, 1.0, %v10524_v61  ;;  %vm4831_vm15 = vcmp.le.f32.partialorder %v4667_v47, 16.0  ;;  %v6567_v32 = vpop.f32.mrb[150].mxu1 }
 0x37a   : > { %v5266_v3 = vmul.f32 %v6827_v14, %v6254_v28  ;;  %v6251_v11 = vsel %vm4831_vm15, 1.0, %v10524_v61  ;;  %v4682_v7 = vadd.f32 %v6567_v32, %v4376_v0  ;;  %v4676_v60 = vpop.f32.mrb[151].mxu1 }
 0x37b   : > { %v5263_v43 = vmul.f32 %v6828_v50, %v6251_v11  ;;  %v4677_v58 = vadd.f32 %v4676_v60, %v4371_v62  ;;  %v6831_v62 = vld [vmem:[#allocation2 + $0x418] sm:$0xff] }
 0x37c   : > { %5410 = vst [vmem:[#allocation3 + $0x3b8] sm:$0xff] %v5266_v3  ;;  %vm4840_vm12 = vcmp.le.f32.partialorder %v4682_v7, 16.0 }
 0x37d   : > { %5407 = vst [vmem:[#allocation3 + $0x3a0] sm:$0xff] %v5263_v43  ;;  %v6260_v12 = vsel %vm4840_vm12, 1.0, %v10524_v61  ;;  %vm4837_vm3 = vcmp.le.f32.partialorder %v4677_v58, 16.0  ;;  %v6570_v51 = vpop.f32.mrb[152].mxu1 }
 0x37e   : > { %v5272_v23 = vmul.f32 %v6829_v10, %v6260_v12  ;;  %v6257_v30 = vsel %vm4837_vm3, 1.0, %v10524_v61  ;;  %v4692_v37 = vadd.f32 %v6570_v51, %v10600_v33  ;;  %v4686_v57 = vpop.f32.mrb[153].mxu1  ;;  %v6832_v33 = vld [vmem:[#allocation2 + $0x400] sm:$0xff] }
 0x37f   : > { %v5269_v5 = vmul.f32 %v6830_v4, %v6257_v30  ;;  %v4687_v20 = vadd.f32 %v4686_v57, %v10598_v36 }
 0x380   : > { %5416 = vst [vmem:[#allocation3 + $0x3e8] sm:$0xff] %v5272_v23  ;;  %vm4846_vm11 = vcmp.le.f32.partialorder %v4692_v37, 16.0 }
 0x381   : > { %5413 = vst [vmem:[#allocation3 + $0x3d0] sm:$0xff] %v5269_v5  ;;  %v6266_v49 = vsel %vm4846_vm11, 1.0, %v10524_v61  ;;  %vm4843_vm2 = vcmp.le.f32.partialorder %v4687_v20, 16.0  ;;  %v6573_v59 = vpop.f32.mrb[154].mxu1 }
 0x382   : > { %v5278_v44 = vmul.f32 %v6831_v62, %v6266_v49  ;;  %v6263_v0 = vsel %vm4843_vm2, 1.0, %v10524_v61  ;;  %v4702_v22 = vadd.f32 %v6573_v59, %v10604_v15  ;;  %v4696_v41 = vpop.f32.mrb[155].mxu1  ;;  %v6834_v15 = vld [vmem:[#allocation2 + $0x430] sm:$0xff] }
 0x383   : > { %v5275_v31 = vmul.f32 %v6832_v33, %v6263_v0  ;;  %v4697_v63 = vadd.f32 %v4696_v41, %v10602_v19 }
 0x384   : > { %5422 = vst [vmem:[#allocation3 + $0x418] sm:$0xff] %v5278_v44  ;;  %vm4852_vm1 = vcmp.le.f32.partialorder %v4702_v22, 16.0 }
 0x385   : > { %5419 = vst [vmem:[#allocation3 + $0x400] sm:$0xff] %v5275_v31  ;;  %v6272_v36 = vsel %vm4852_vm1, 1.0, %v10524_v61  ;;  %vm4849_vm13 = vcmp.le.f32.partialorder %v4697_v63, 16.0  ;;  %v6576_v21 = vpop.f32.mrb[156].mxu1 }
 0x386   : > { %v5284_v29 = vmul.f32 %v6833_v48, %v6272_v36  ;;  %v6269_v35 = vsel %vm4849_vm13, 1.0, %v10524_v61  ;;  %v4712_v1 = vadd.f32 %v6576_v21, %v10608_v45  ;;  %v4706_v6 = vpop.f32.mrb[157].mxu1  ;;  %v10632_v45 = vmov 0.0  }
 0x387   : > { %v5281_v39 = vmul.f32 %v6834_v15, %v6269_v35  ;;  %v4707_v26 = vadd.f32 %v4706_v6, %v10606_v55  ;;  %v10637_v55 = vmov 0.0  }
 0x388   : > { %5428 = vst [vmem:[#allocation3 + $0x448] sm:$0xff] %v5284_v29  ;;  %vm4858_vm14 = vcmp.le.f32.partialorder %v4712_v1, 16.0 }
 0x389   : > { %5425 = vst [vmem:[#allocation3 + $0x430] sm:$0xff] %v5281_v39  ;;  %v6278_v19 = vsel %vm4858_vm14, 1.0, %v10524_v61  ;;  %vm4855_vm5 = vcmp.le.f32.partialorder %v4707_v26, 16.0 }
 0x38a   : > { %v5290_v52 = vmul.f32 %v6835_v54, %v6278_v19  ;;  %v6275_v16 = vsel %vm4855_vm5, 1.0, %v10524_v61 }
 0x38b   : > { %v5287_v8 = vmul.f32 %v6836_v56, %v6275_v16 }
 0x38c   : > { %5434 = vst [vmem:[#allocation3 + $0x478] sm:$0xff] %v5290_v52 }
 0x38d   : > { %5431 = vst [vmem:[#allocation3 + $0x460] sm:$0xff] %v5287_v8 }
 0x38e LB: >> { %v5455_v61 = vstv %s6891_s16  ;;  %s5490_s17 = sshra.s32 %s6891_s16, 3  ;;  %v11886_v53 = vld [vmem:[#allocation5_spill] sm:$0xff]  ;;  %v11887_v27 = vld [vmem:[#allocation6_spill] sm:$0xff]  ;;  %v6898_v9 = vmov 1966171168   ;;  %v6899_v24 = vmov 0.0   ;;  %s6891_s16 = sphi %s10641_s16, %s5449_s16   ;;  %v6887_v13 = vphi %v10639_v13, %v11896_v13   ;;  %v6883_v55 = vphi %v10637_v55, %v11895_v55   ;;  %v6879_v34 = vphi %v10577_v34, %v11894_v34   ;;  %v6875_v45 = vphi %v10632_v45, %v11893_v45   ;;  %s6871_s15 = sphi %s10630_s15, %s5564_s15  }
 0x38f   : >> { %vm5456_vm9 = vcmp.eq.s32.totalorder %v11886_v53, %v5455_v61  ;;  %vm5457_vm10 = vcmp.eq.s32.totalorder %v11887_v27, %v5455_v61  ;;  %v11888_v18 = vld [vmem:[#allocation78_spill] sm:$0xff]  ;;  %s6283_s19 = smul.u32 24, %s5490_s17  ;;  %v5506_v2 = vunpack.c.l.s4 %v6898_v9  ;;  %vm5468_vm0 = vcmask 1040384   ;;  %s5493_s20 = sand.u32 7, %s6891_s16  ;;  %v11889_v7 = vld [vmem:[#allocation4_spill] sm:$0xff]  ;;  %v11892_v33 = vld [vmem:[#allocation19_spill] sm:$0xff] }
 0x390   : >> { %vm5458_vm8 = vcmp.eq.s32.totalorder %v11888_v18, %v5455_v61  ;;  %v6280_v25 = vsel %vm5456_vm9, 1.0, %v6899_v24  ;;  %v6281_v42 = vsel %vm5457_vm10, 1.0, %v6899_v24  ;;  %p5486_p4 = scmp.lt.s32.totalorder %s6871_s15, 5  ;;  %v11890_v44 = vld [vmem:[#allocation20_spill] sm:$0xff]  ;;  %v11891_v22 = vld [vmem:[#allocation18_spill] sm:$0xff]  ;;  %s5449_s16 = sadd.s32 1, %s6891_s16  }
 0x391   : >> { %v6282_v17 = vsel %vm5458_vm8, 1.0, %v6899_v24  ;;  %v5465_v40 = vmul.f32 %v6887_v13, %v6280_v25  ;;  %v5466_v38 = vmul.f32 %v6883_v55, %v6281_v42  ;;  %v5504_v47 = vcombine.low %v6280_v25, %v6281_v42  ;;  %s5496_s22 = sadd.s32 %s6283_s19, %s5493_s20  ;;  %p5446_p7 = scmp.ge.s32.totalorder %s5449_s16, 299  }
 0x392   : >> { %v5467_v46 = vmul.f32 %v6879_v34, %v6282_v17  ;;  %v5507_v28 = vunpack.c.0.s8 %v5506_v2  ;;  %s5497_s23 = scalar_lea.vmem [#allocation2], %s5496_s22  ;;  %s5499_s24 = scalar_lea.vmem [#allocation3], %s5496_s22  ;;  %v11897_v53 = vlaneseq (%p5446_p7) }
 0x393   : >> { %v5469_v32 = vsel %vm5468_vm0, %v5465_v40, 0.0  ;;  %v5470_v14 = vsel %vm5468_vm0, %v5466_v38, 0.0  ;;  %v5498_v51 = vld [vmem:[%s5497_s23] ss:$8 sm:$0x7] }
 0x394   : >> { %v5472_v3 = vsel %vm5468_vm0, %v5467_v46, 0.0  ;;  %v5471_v11 = vadd.f32 %v5470_v14, %v5469_v32  ;;  %v10671_v60 = vsub.s32 %v5507_v28, %v11889_v7  ;;  %v5500_v10 = vld [vmem:[%s5499_s24] ss:$8 sm:$0x7]  ;;  %s5487_s25 = scalar_select %p5486_p4, 1, 0 }
 0x395   : > { %vm5594_vm4 = vcmp.lt.s32.totalorder (%p5446_p7), %v11897_v53, 384 }
 0x396   : >> { %v5473_v50 = vadd.f32 %v5472_v3, %v5471_v11  ;;  %v5511_v43 = vrot.slane %v5504_v47, %v10671_v60  ;;  %v5518_v58 = vrot.slane %v6282_v17, %v10671_v60  ;;  %s5488_s27 = scvt.s32.f32 %s5487_s25 }
 0x398   : >> { %5474 = vadd.xlane.f32.xlu0 %v5473_v50  ;;  %v5519_v12 = vcombine.low %v5511_v43, %v5518_v58 }
 0x39a   : >> { %v5526_v23 = vrot.slane %v5519_v12, %v10671_v60 }
 0x39c   : >> { %v5528_v30 = vmax.f32 %v5498_v51, %v5526_v23  ;;  %v5548_v37 = vmax.f32 %v5500_v10, %v5526_v23 }
 0x39e   : >> { %v5533_v0 = vrot.slane %v5528_v30, %v11890_v44  ;;  %v5537_v41 = vrot.slane %v5528_v30, %v11891_v22  ;;  %v5541_v31 = vrot.slane %v5528_v30, %v11892_v33  ;;  %v5549_v48 = vmax.f32 %v6875_v45, %v5548_v37 }
 0x3a0   : >> { %v5545_v63 = vmax.f32 %v6887_v13, %v5533_v0  ;;  %v5546_v36 = vmax.f32 %v6883_v55, %v5537_v41  ;;  %v5547_v21 = vmax.f32 %v6879_v34, %v5541_v31  ;;  %v5560_v6 = vsub.f32 %v5549_v48, %v6875_v45 }
 0x3a2   : >> { %v5550_v29 = vsub.f32 %v5545_v63, %v6887_v13  ;;  %v5551_v35 = vsub.f32 %v5546_v36, %v6883_v55  ;;  %v5552_v1 = vsub.f32 %v5547_v21, %v6879_v34 }
 0x425   : >> { %v5475_v57 = vpop.xlane.xlu0 %5474 }
 0x426   : >> { %v5476_v4 = vrot.slane %v5475_v57, 4 }
 0x428   : >> { %v5477_v5 = vadd.f32 %v5476_v4, %v5475_v57 }
 0x42a   : >> { %v5478_v20 = vrot.slane %v5477_v5, 2 }
 0x42c   : >> { %v5479_v49 = vadd.f32 %v5478_v20, %v5477_v5 }
 0x42e   : >> { %v5480_v59 = vrot.slane %v5479_v49, 1 }
 0x430   : >> { %v5481_v62 = vadd.f32 %v5480_v59, %v5479_v49 }
 0x432   : >> { %6707 = vpush %v5481_v62 }
 0x463   : >> { %s6708_s26 = spop %6707 }
 0x464   : >> { %p5483_p5 = scmp.lt.f32.partialorder %s6708_s26, 0.5 }
 0x466   : >> { %s5484_s28 = scalar_select %p5483_p5, 1, 0 }
 0x468   : >> { %s5485_s29 = scvt.s32.f32 %s5484_s28 }
 0x46a   : >> { %s5489_s6 = smul.f32 %s5488_s27, %s5485_s29 }
 0x46b   : > { %5448 = sbr.rel (!%p5446_p7) target bundleno = 910 (0x38e), region = 96 }
 0x46c   : >> { %v5553_v15 = vstv %s5489_s6  ;;  %p6709_p6 = scmp.lt.s32.totalorder %s5489_s6, 0  ;;  %s6710_s7 = sceil.f32 %s5489_s6 }
 0x46d   : >> { %v5554_v39 = vmul.f32 %v5553_v15, %v5550_v29  ;;  %v5555_v26 = vmul.f32 %v5553_v15, %v5551_v35  ;;  %v5556_v19 = vmul.f32 %v5553_v15, %v5552_v1  ;;  %v5561_v54 = vmul.f32 %v5560_v6, %v5553_v15  ;;  %s6711_s9 = sfloor.f32 %s5489_s6 }
 0x46e   : >> { %s11901_s7 = smov (!%p6709_p6, %s6710_s7), %s6711_s9 }
 0x46f   : >> { %v5557_v52 = vadd.f32 %v6887_v13, %v5554_v39   ;;  %v5558_v16 = vadd.f32 %v6883_v55, %v5555_v26   ;;  %v5559_v56 = vadd.f32 %v6879_v34, %v5556_v19   ;;  %v5562_v8 = vadd.f32 %v6875_v45, %v5561_v54   ;;  %s6713_s10 = scvt.f32.s32 %s11901_s7 }
 0x471   : >> { %s5564_s15 = sadd.s32 %s6871_s15, %s6713_s10   ;;  %v11893_v45 = vmov %v5562_v8  ;;  %v11894_v34 = vmov %v5559_v56  ;;  %v11895_v55 = vmov %v5558_v16  ;;  %v11896_v13 = vmov %v5557_v52  ;;  %5597 = vst.msk [vmem:[%s287_s8] sm:$0x7] (%p5446_p7), %vm5594_vm4, %v5562_v8 }
 0x472   : > { %v5568_v13 = vcombine.low %v5557_v52, %v5558_v16  ;;  %v5582_v61 = vrot.slane %v5559_v56, %v10671_v60 }
 0x474   : > { %v5575_v27 = vrot.slane %v5568_v13, %v10671_v60 }
 0x476   : > { %v5583_v18 = vcombine.low %v5575_v27, %v5582_v61 }
 0x478   : > { %v5590_v9 = vrot.slane %v5583_v18, %v10671_v60 }
 0x47a   : > { %5596 = vst.msk [vmem:[%s283_s30] sm:$0x7] %vm5594_vm4, %v5590_v9 }
 0x47b PF: > { %s16_s18 = sadd.s32 1, %s6867_s18  }
 0x47c   : > { %p13_p8 = scmp.ge.s32.totalorder %s16_s18, 4  }
 0x47e   :  { %15 = sbr.rel (!%p13_p8) target bundleno = 1 (0x1), region = 107 }

// kernel: squeeze.5
= control target key start
LH: loop header
LB: loop body
LE: loop exit
PB: predicated region body
PF: predicated region fallthrough
CT: control target
= control target key end

     0   :  { %s92_s0 = inlined_call_operand.vmem [shape: f32[2,101], index: 0, kind: input, shape index: {}]   ;;  %s93_s1 = inlined_call_operand.hbm [shape: f32[202], index: 1, kind: output, shape index: {}]  }
   0x1   :  { %v5_v0 = vld [vmem:[%s92_s0] sm:$0x3] }
   0x2   :  { %6 = vst [vmem:[#allocation3] sm:$0x3] %v5_v0 }
   0x3   :  { %2 = vsyncpa [#allocation1], 0  ;;  %vm14_vm0 = vcmask 220160   ;;  %vm8_vm1 = vcmask 826368   ;;  %s65_s0 = smov 101   ;;  %vm18_vm2 = vcmask 605184  }
   0x4   :  { %vm21_vm3 = vcmask 1048360   ;;  %s66_s8 = smov [#allocation0]  }
   0x5   :  { %s33_s9 = sshll.u32 %s66_s8, 4  ;;  %s34_s9 = int_to_ptr.vmem [resolvable:$true] %s33_s9 }
   0x6   :  { %s41_s10 = scalar_lea.vmem %s34_s9, 32  ;;  %p46_p1 = scmp.lt.s32.totalorder %s34_s9, %s34_s9 }
   0x7   :  { %p42_p0 = scmp.ne.s32.totalorder %s34_s9, %s41_s10  ;;  %p47_p2 = scmp.lt.s32.totalorder %s41_s10, %s41_s10 }
   0x9   :  { %v11_v1 = vld [vmem:[#allocation3 + $0x1] sm:$0x1]   ;;  %v7_v3 = vld [vmem:[#allocation3] sm:$0x1]   ;;  %p48_p3 = por %p47_p2, %p46_p1 }
   0xa   :  { %v13_v2 = vld [vmem:[#allocation3 + $0x1] sm:$0x1]   ;;  %9 = vst.msk [vmem:[#allocation2] sm:$0x1] %vm8_vm1, %v7_v3  }
   0xb   :  { %v15_v4 = vsel %vm14_vm0, %v13_v2, %v11_v1  ;;  %p49_p4 = pnand %p48_p3, %p42_p0 }
   0xc   :  { %16 = vrot.lane.b32.xlu0 %v15_v4, %s65_s0 }
  0x7e   :  { %v17_v5 = vpop.permute.xlu0 %16  }
  0x7f   :  { %20 = vst.msk [vmem:[#allocation2 + $0x1] sm:$0x1] %vm18_vm2, %v17_v5  }
  0x80   :  { %22 = vst.msk [vmem:[#allocation2] sm:$0x1] %vm21_vm3, %v17_v5  }
  0x87   :  { %v26_v6 = vld [vmem:[#allocation2] sm:$0x3] }
  0x88   :  { %28 = vst [vmem:[#allocation0] sm:$0x3] %v26_v6 }
  0x89   :  { %52 = shalt.err (!%p49_p4)
}
  0x8a   :  { %s53_s13 = scalar_lea.hbm %s93_s1, 32 }
  0x8b   :  { %p54_p5 = scmp.ne.s32.totalorder %s93_s1, %s53_s13  ;;  %p57_p6 = scmp.lt.u32.totalorder %s53_s13, %s93_s1 }
  0x8d   :  { %p59_p7 = pnand %p57_p6, %p54_p5 }
  0x8f   :  { %62 = shalt.err (!%p59_p7)
}
  0x90   :  { %36 = dma.vmem_to_hbm [thread:$0]  %s34_s9, 32, %s93_s1, [#allocation1]  }
  0x91   :  { %63 = dma.done.wait [#allocation1], 32  }
  0x92   :  { %64 = vsyncadd [#allocation1], 4294967264 }
  0x93   :  { %38 = vsyncpa [#allocation1], 1 }

// kernel: _forward.3
= control target key start
LH: loop header
LB: loop body
LE: loop exit
PB: predicated region body
PF: predicated region fallthrough
CT: control target
= control target key end

     0   :  { %s1417_s0 = inlined_call_operand.vmem [shape: s32[2,128], index: 0, kind: input, shape index: {}]   ;;  %s1418_s1 = inlined_call_operand.vmem [shape: f32[2,576,128], index: 1, kind: input, shape index: {}]   ;;  %s1419_s2 = inlined_call_operand.vmem [shape: f32[2,128,128], index: 2, kind: output, shape index: {}]  }
   0x1   :  { %s7_s11 = sshll.u32 %s1417_s0, 4  ;;  %s8_s11 = int_to_ptr.vmem [resolvable:$true] %s7_s11 }
   0x2   :  { %s969_s12 = scalar_lea.vmem %s8_s11, 32  ;;  %p974_p1 = scmp.lt.s32.totalorder %s8_s11, %s8_s11 }
   0x3   :  { %p970_p0 = scmp.ne.s32.totalorder %s8_s11, %s969_s12  ;;  %p975_p2 = scmp.lt.s32.totalorder %s969_s12, %s969_s12 }
   0x5   :  { %p976_p3 = por %p975_p2, %p974_p1 }
   0x7   :  { %p977_p4 = pnand %p976_p3, %p970_p0 }
   0x9   :  { %980 = shalt.err (!%p977_p4)  }
   0xa   :  { %s991_s13 = smov [#allocation3]  }
   0xb   :  { %10 = dma.vmem_to_smem %s8_s11, 32, %s991_s13, [#allocation2] }
   0xc   :  { %985 = dma.done.wait [#allocation2], 32 }
   0xd   :  { %986 = vsyncadd [#allocation2], 4294967264 }
   0xe   :  { %12 = sfence }
   0xf   :  { %s1010_s14 = smov 0  }
  0x10 LB: > { %s947_s0 = sadd.s32 4294967295, %s989_s14   ;;  %p951_p5 = scmp.ge.s32.totalorder %s989_s14, 1  ;;  %s989_s14 = sphi %s1010_s14, %s18_s14  }
  0x11   : > { %p94_p6 = scmp.lt.s32.totalorder %s989_s14, 3 }
  0x13   : > { %p95_p7 = pnand %p951_p5, %p94_p6 }
  0x14   : > { %p114_p8 = scmp.lt.s32.totalorder (!%p95_p7), %s947_s0, 1  ;;  %s1018_s15 = sshll.u32 (!%p95_p7), %s947_s0, 7 }
  0x15   : > { %98 = sbr.rel (%p95_p7) target bundleno = 222 (0xde), region = 24  ;;  %s125_s16 = sld [smem:[#allocation3 + %s1018_s15]] (!%p95_p7) }
  0x16   : > { %s129_s17 = sadd.s32 (!%p95_p7), 1, %s1018_s15  ;;  %s134_s19 = sadd.s32 (!%p95_p7), 2, %s1018_s15 }
  0x17   : > { %s130_s18 = sld [smem:[#allocation3 + %s129_s17]] (!%p95_p7)  ;;  %s139_s29 = sadd.s32 (!%p95_p7), 3, %s1018_s15 }
  0x18   : > { %s135_s25 = sld [smem:[#allocation3 + %s134_s19]] (!%p95_p7)  ;;  %s144_s4 = sadd.s32 (!%p95_p7), 4, %s1018_s15 }
  0x19   : > { %s140_s3 = sld [smem:[#allocation3 + %s139_s29]] (!%p95_p7)  ;;  %s149_s5 = sadd.s32 (!%p95_p7), 5, %s1018_s15 }
  0x1a   : > { %s145_s7 = sld [smem:[#allocation3 + %s144_s4]] (!%p95_p7)  ;;  %s154_s9 = sadd.s32 (!%p95_p7), 6, %s1018_s15 }
  0x1b   : > { %s150_s8 = sld [smem:[#allocation3 + %s149_s5]] (!%p95_p7)  ;;  %s159_s12 = sadd.s32 (!%p95_p7), 7, %s1018_s15 }
  0x1c   : > { %s1421_s0 = smov (!%p114_p8, %s947_s0), 1  ;;  %s155_s11 = sld [smem:[#allocation3 + %s154_s9]] }
  0x1d   : > { %s959_s20 = smul.u32 576, %s1421_s0  ;;  %s958_s21 = sshll.u32 %s1421_s0, 7 }
  0x1e   : > { %s1026_s24 = scalar_lea.vmem %s1419_s2, %s958_s21  ;;  %s164_s13 = sadd.s32 8, %s1018_s15 }
  0x1f   : > { %s1031_s28 = scalar_lea.vmem %s1418_s1, %s959_s20  ;;  %s165_s17 = sld [smem:[#allocation3 + %s164_s13]] }
  0x20   : > { %s126_s30 = scalar_lea.vmem %s1031_s28, %s125_s16  ;;  %s131_s6 = scalar_lea.vmem %s1031_s28, %s130_s18 }
  0x21   : > { %v127_v0 = vld [vmem:[%s126_s30] sm:$0x1]  ;;  %s136_s10 = scalar_lea.vmem %s1031_s28, %s135_s25  ;;  %s141_s0 = scalar_lea.vmem %s1031_s28, %s140_s3 }
  0x22   : > { %128 = vst [vmem:[%s1026_s24] sm:$0x1] %v127_v0  ;;  %v132_v1 = vld [vmem:[%s131_s6] sm:$0x1]  ;;  %s160_s16 = sld [smem:[#allocation3 + %s159_s12]]  ;;  %s169_s18 = sadd.s32 9, %s1018_s15 }
  0x23   : > { %133 = vst [vmem:[%s1026_s24 + $0x1] sm:$0x1] %v132_v1  ;;  %v137_v2 = vld [vmem:[%s136_s10] sm:$0x1]  ;;  %s146_s19 = scalar_lea.vmem %s1031_s28, %s145_s7  ;;  %s170_s20 = sld [smem:[#allocation3 + %s169_s18]] }
  0x24   : > { %138 = vst [vmem:[%s1026_s24 + $0x2] sm:$0x1] %v137_v2  ;;  %v142_v3 = vld [vmem:[%s141_s0] sm:$0x1]  ;;  %s151_s21 = scalar_lea.vmem %s1031_s28, %s150_s8  ;;  %s174_s22 = sadd.s32 10, %s1018_s15 }
  0x25   : > { %143 = vst [vmem:[%s1026_s24 + $0x3] sm:$0x1] %v142_v3  ;;  %v147_v4 = vld [vmem:[%s146_s19] sm:$0x1]  ;;  %s156_s23 = scalar_lea.vmem %s1031_s28, %s155_s11  ;;  %s175_s25 = sld [smem:[#allocation3 + %s174_s22]] }
  0x26   : > { %148 = vst [vmem:[%s1026_s24 + $0x4] sm:$0x1] %v147_v4  ;;  %v152_v5 = vld [vmem:[%s151_s21] sm:$0x1]  ;;  %s179_s26 = sadd.s32 11, %s1018_s15  ;;  %s184_s27 = sadd.s32 12, %s1018_s15 }
  0x27   : > { %153 = vst [vmem:[%s1026_s24 + $0x5] sm:$0x1] %v152_v5  ;;  %v157_v6 = vld [vmem:[%s156_s23] sm:$0x1]  ;;  %s180_s30 = sld [smem:[#allocation3 + %s179_s26]]  ;;  %s166_s3 = scalar_lea.vmem %s1031_s28, %s165_s17 }
  0x28   : > { %158 = vst [vmem:[%s1026_s24 + $0x6] sm:$0x1] %v157_v6  ;;  %s161_s29 = scalar_lea.vmem %s1031_s28, %s160_s16  ;;  %s185_s4 = sld [smem:[#allocation3 + %s184_s27]]  ;;  %v167_v8 = vld [vmem:[%s166_s3] sm:$0x1] }
  0x29   : > { %v162_v7 = vld [vmem:[%s161_s29] sm:$0x1]  ;;  %s171_s5 = scalar_lea.vmem %s1031_s28, %s170_s20  ;;  %s189_s6 = sadd.s32 13, %s1018_s15  ;;  %168 = vst [vmem:[%s1026_s24 + $0x8] sm:$0x1] %v167_v8 }
  0x2a   : > { %163 = vst [vmem:[%s1026_s24 + $0x7] sm:$0x1] %v162_v7  ;;  %v172_v9 = vld [vmem:[%s171_s5] sm:$0x1]  ;;  %s190_s7 = sld [smem:[#allocation3 + %s189_s6]]  ;;  %s194_s8 = sadd.s32 14, %s1018_s15 }
  0x2b   : > { %173 = vst [vmem:[%s1026_s24 + $0x9] sm:$0x1] %v172_v9  ;;  %s176_s9 = scalar_lea.vmem %s1031_s28, %s175_s25  ;;  %s195_s10 = sld [smem:[#allocation3 + %s194_s8]] }
  0x2c   : > { %v177_v10 = vld [vmem:[%s176_s9] sm:$0x1]  ;;  %s199_s11 = sadd.s32 15, %s1018_s15  ;;  %s204_s12 = sadd.s32 16, %s1018_s15 }
  0x2d   : > { %178 = vst [vmem:[%s1026_s24 + $0xa] sm:$0x1] %v177_v10  ;;  %s181_s13 = scalar_lea.vmem %s1031_s28, %s180_s30  ;;  %s200_s0 = sld [smem:[#allocation3 + %s199_s11]] }
  0x2e   : > { %v182_v11 = vld [vmem:[%s181_s13] sm:$0x1]  ;;  %s186_s16 = scalar_lea.vmem %s1031_s28, %s185_s4  ;;  %s205_s17 = sld [smem:[#allocation3 + %s204_s12]] }
  0x2f   : > { %183 = vst [vmem:[%s1026_s24 + $0xb] sm:$0x1] %v182_v11  ;;  %v187_v12 = vld [vmem:[%s186_s16] sm:$0x1]  ;;  %s209_s18 = sadd.s32 17, %s1018_s15  ;;  %s214_s19 = sadd.s32 18, %s1018_s15 }
  0x30   : > { %188 = vst [vmem:[%s1026_s24 + $0xc] sm:$0x1] %v187_v12  ;;  %s191_s20 = scalar_lea.vmem %s1031_s28, %s190_s7  ;;  %s210_s21 = sld [smem:[#allocation3 + %s209_s18]] }
  0x31   : > { %v192_v13 = vld [vmem:[%s191_s20] sm:$0x1]  ;;  %s196_s22 = scalar_lea.vmem %s1031_s28, %s195_s10  ;;  %s215_s23 = sld [smem:[#allocation3 + %s214_s19]] }
  0x32   : > { %193 = vst [vmem:[%s1026_s24 + $0xd] sm:$0x1] %v192_v13  ;;  %v197_v14 = vld [vmem:[%s196_s22] sm:$0x1]  ;;  %s219_s25 = sadd.s32 19, %s1018_s15  ;;  %s224_s26 = sadd.s32 20, %s1018_s15 }
  0x33   : > { %198 = vst [vmem:[%s1026_s24 + $0xe] sm:$0x1] %v197_v14  ;;  %s201_s27 = scalar_lea.vmem %s1031_s28, %s200_s0  ;;  %s220_s29 = sld [smem:[#allocation3 + %s219_s25]] }
  0x34   : > { %v202_v15 = vld [vmem:[%s201_s27] sm:$0x1]  ;;  %s206_s30 = scalar_lea.vmem %s1031_s28, %s205_s17  ;;  %s225_s3 = sld [smem:[#allocation3 + %s224_s26]] }
  0x35   : > { %203 = vst [vmem:[%s1026_s24 + $0xf] sm:$0x1] %v202_v15  ;;  %v207_v16 = vld [vmem:[%s206_s30] sm:$0x1]  ;;  %s229_s4 = sadd.s32 21, %s1018_s15  ;;  %s234_s5 = sadd.s32 22, %s1018_s15 }
  0x36   : > { %208 = vst [vmem:[%s1026_s24 + $0x10] sm:$0x1] %v207_v16  ;;  %s211_s6 = scalar_lea.vmem %s1031_s28, %s210_s21  ;;  %s230_s7 = sld [smem:[#allocation3 + %s229_s4]] }
  0x37   : > { %v212_v17 = vld [vmem:[%s211_s6] sm:$0x1]  ;;  %s216_s8 = scalar_lea.vmem %s1031_s28, %s215_s23  ;;  %s235_s9 = sld [smem:[#allocation3 + %s234_s5]] }
  0x38   : > { %213 = vst [vmem:[%s1026_s24 + $0x11] sm:$0x1] %v212_v17  ;;  %v217_v18 = vld [vmem:[%s216_s8] sm:$0x1]  ;;  %s239_s10 = sadd.s32 23, %s1018_s15  ;;  %s244_s11 = sadd.s32 24, %s1018_s15 }
  0x39   : > { %218 = vst [vmem:[%s1026_s24 + $0x12] sm:$0x1] %v217_v18  ;;  %s221_s12 = scalar_lea.vmem %s1031_s28, %s220_s29  ;;  %s240_s13 = sld [smem:[#allocation3 + %s239_s10]] }
  0x3a   : > { %v222_v19 = vld [vmem:[%s221_s12] sm:$0x1]  ;;  %s226_s0 = scalar_lea.vmem %s1031_s28, %s225_s3  ;;  %s245_s16 = sld [smem:[#allocation3 + %s244_s11]] }
  0x3b   : > { %223 = vst [vmem:[%s1026_s24 + $0x13] sm:$0x1] %v222_v19  ;;  %v227_v20 = vld [vmem:[%s226_s0] sm:$0x1]  ;;  %s249_s17 = sadd.s32 25, %s1018_s15  ;;  %s254_s18 = sadd.s32 26, %s1018_s15 }
  0x3c   : > { %228 = vst [vmem:[%s1026_s24 + $0x14] sm:$0x1] %v227_v20  ;;  %s231_s19 = scalar_lea.vmem %s1031_s28, %s230_s7  ;;  %s250_s20 = sld [smem:[#allocation3 + %s249_s17]] }
  0x3d   : > { %v232_v21 = vld [vmem:[%s231_s19] sm:$0x1]  ;;  %s236_s21 = scalar_lea.vmem %s1031_s28, %s235_s9  ;;  %s255_s22 = sld [smem:[#allocation3 + %s254_s18]] }
  0x3e   : > { %233 = vst [vmem:[%s1026_s24 + $0x15] sm:$0x1] %v232_v21  ;;  %v237_v22 = vld [vmem:[%s236_s21] sm:$0x1]  ;;  %s259_s23 = sadd.s32 27, %s1018_s15  ;;  %s264_s25 = sadd.s32 28, %s1018_s15 }
  0x3f   : > { %238 = vst [vmem:[%s1026_s24 + $0x16] sm:$0x1] %v237_v22  ;;  %s241_s26 = scalar_lea.vmem %s1031_s28, %s240_s13  ;;  %s260_s27 = sld [smem:[#allocation3 + %s259_s23]] }
  0x40   : > { %v242_v23 = vld [vmem:[%s241_s26] sm:$0x1]  ;;  %s246_s29 = scalar_lea.vmem %s1031_s28, %s245_s16  ;;  %s265_s30 = sld [smem:[#allocation3 + %s264_s25]] }
  0x41   : > { %243 = vst [vmem:[%s1026_s24 + $0x17] sm:$0x1] %v242_v23  ;;  %v247_v24 = vld [vmem:[%s246_s29] sm:$0x1]  ;;  %s269_s3 = sadd.s32 29, %s1018_s15  ;;  %s274_s4 = sadd.s32 30, %s1018_s15 }
  0x42   : > { %248 = vst [vmem:[%s1026_s24 + $0x18] sm:$0x1] %v247_v24  ;;  %s251_s5 = scalar_lea.vmem %s1031_s28, %s250_s20  ;;  %s270_s6 = sld [smem:[#allocation3 + %s269_s3]] }
  0x43   : > { %v252_v25 = vld [vmem:[%s251_s5] sm:$0x1]  ;;  %s256_s7 = scalar_lea.vmem %s1031_s28, %s255_s22  ;;  %s275_s8 = sld [smem:[#allocation3 + %s274_s4]] }
  0x44   : > { %253 = vst [vmem:[%s1026_s24 + $0x19] sm:$0x1] %v252_v25  ;;  %v257_v26 = vld [vmem:[%s256_s7] sm:$0x1]  ;;  %s279_s9 = sadd.s32 31, %s1018_s15  ;;  %s284_s10 = sadd.s32 32, %s1018_s15 }
  0x45   : > { %258 = vst [vmem:[%s1026_s24 + $0x1a] sm:$0x1] %v257_v26  ;;  %s261_s11 = scalar_lea.vmem %s1031_s28, %s260_s27  ;;  %s280_s12 = sld [smem:[#allocation3 + %s279_s9]] }
  0x46   : > { %v262_v27 = vld [vmem:[%s261_s11] sm:$0x1]  ;;  %s266_s13 = scalar_lea.vmem %s1031_s28, %s265_s30  ;;  %s285_s0 = sld [smem:[#allocation3 + %s284_s10]] }
  0x47   : > { %263 = vst [vmem:[%s1026_s24 + $0x1b] sm:$0x1] %v262_v27  ;;  %v267_v28 = vld [vmem:[%s266_s13] sm:$0x1]  ;;  %s289_s16 = sadd.s32 33, %s1018_s15  ;;  %s294_s17 = sadd.s32 34, %s1018_s15 }
  0x48   : > { %268 = vst [vmem:[%s1026_s24 + $0x1c] sm:$0x1] %v267_v28  ;;  %s271_s18 = scalar_lea.vmem %s1031_s28, %s270_s6  ;;  %s290_s19 = sld [smem:[#allocation3 + %s289_s16]] }
  0x49   : > { %v272_v29 = vld [vmem:[%s271_s18] sm:$0x1]  ;;  %s276_s20 = scalar_lea.vmem %s1031_s28, %s275_s8  ;;  %s295_s21 = sld [smem:[#allocation3 + %s294_s17]] }
  0x4a   : > { %273 = vst [vmem:[%s1026_s24 + $0x1d] sm:$0x1] %v272_v29  ;;  %v277_v30 = vld [vmem:[%s276_s20] sm:$0x1]  ;;  %s299_s22 = sadd.s32 35, %s1018_s15  ;;  %s304_s23 = sadd.s32 36, %s1018_s15 }
  0x4b   : > { %278 = vst [vmem:[%s1026_s24 + $0x1e] sm:$0x1] %v277_v30  ;;  %s281_s25 = scalar_lea.vmem %s1031_s28, %s280_s12  ;;  %s300_s26 = sld [smem:[#allocation3 + %s299_s22]] }
  0x4c   : > { %v282_v31 = vld [vmem:[%s281_s25] sm:$0x1]  ;;  %s286_s27 = scalar_lea.vmem %s1031_s28, %s285_s0  ;;  %s305_s29 = sld [smem:[#allocation3 + %s304_s23]] }
  0x4d   : > { %283 = vst [vmem:[%s1026_s24 + $0x1f] sm:$0x1] %v282_v31  ;;  %v287_v32 = vld [vmem:[%s286_s27] sm:$0x1]  ;;  %s309_s30 = sadd.s32 37, %s1018_s15  ;;  %s314_s3 = sadd.s32 38, %s1018_s15 }
  0x4e   : > { %288 = vst [vmem:[%s1026_s24 + $0x20] sm:$0x1] %v287_v32  ;;  %s291_s4 = scalar_lea.vmem %s1031_s28, %s290_s19  ;;  %s310_s5 = sld [smem:[#allocation3 + %s309_s30]] }
  0x4f   : > { %v292_v33 = vld [vmem:[%s291_s4] sm:$0x1]  ;;  %s296_s6 = scalar_lea.vmem %s1031_s28, %s295_s21  ;;  %s315_s7 = sld [smem:[#allocation3 + %s314_s3]] }
  0x50   : > { %293 = vst [vmem:[%s1026_s24 + $0x21] sm:$0x1] %v292_v33  ;;  %v297_v34 = vld [vmem:[%s296_s6] sm:$0x1]  ;;  %s319_s8 = sadd.s32 39, %s1018_s15  ;;  %s324_s9 = sadd.s32 40, %s1018_s15 }
  0x51   : > { %298 = vst [vmem:[%s1026_s24 + $0x22] sm:$0x1] %v297_v34  ;;  %s301_s10 = scalar_lea.vmem %s1031_s28, %s300_s26  ;;  %s320_s11 = sld [smem:[#allocation3 + %s319_s8]] }
  0x52   : > { %v302_v35 = vld [vmem:[%s301_s10] sm:$0x1]  ;;  %s306_s12 = scalar_lea.vmem %s1031_s28, %s305_s29  ;;  %s325_s13 = sld [smem:[#allocation3 + %s324_s9]] }
  0x53   : > { %303 = vst [vmem:[%s1026_s24 + $0x23] sm:$0x1] %v302_v35  ;;  %v307_v36 = vld [vmem:[%s306_s12] sm:$0x1]  ;;  %s329_s0 = sadd.s32 41, %s1018_s15  ;;  %s334_s16 = sadd.s32 42, %s1018_s15 }
  0x54   : > { %308 = vst [vmem:[%s1026_s24 + $0x24] sm:$0x1] %v307_v36  ;;  %s311_s17 = scalar_lea.vmem %s1031_s28, %s310_s5  ;;  %s330_s18 = sld [smem:[#allocation3 + %s329_s0]] }
  0x55   : > { %v312_v37 = vld [vmem:[%s311_s17] sm:$0x1]  ;;  %s316_s19 = scalar_lea.vmem %s1031_s28, %s315_s7  ;;  %s335_s20 = sld [smem:[#allocation3 + %s334_s16]] }
  0x56   : > { %313 = vst [vmem:[%s1026_s24 + $0x25] sm:$0x1] %v312_v37  ;;  %v317_v38 = vld [vmem:[%s316_s19] sm:$0x1]  ;;  %s339_s21 = sadd.s32 43, %s1018_s15  ;;  %s344_s22 = sadd.s32 44, %s1018_s15 }
  0x57   : > { %318 = vst [vmem:[%s1026_s24 + $0x26] sm:$0x1] %v317_v38  ;;  %s321_s23 = scalar_lea.vmem %s1031_s28, %s320_s11  ;;  %s340_s25 = sld [smem:[#allocation3 + %s339_s21]] }
  0x58   : > { %v322_v39 = vld [vmem:[%s321_s23] sm:$0x1]  ;;  %s326_s26 = scalar_lea.vmem %s1031_s28, %s325_s13  ;;  %s345_s27 = sld [smem:[#allocation3 + %s344_s22]] }
  0x59   : > { %323 = vst [vmem:[%s1026_s24 + $0x27] sm:$0x1] %v322_v39  ;;  %v327_v40 = vld [vmem:[%s326_s26] sm:$0x1]  ;;  %s349_s29 = sadd.s32 45, %s1018_s15  ;;  %s354_s30 = sadd.s32 46, %s1018_s15 }
  0x5a   : > { %328 = vst [vmem:[%s1026_s24 + $0x28] sm:$0x1] %v327_v40  ;;  %s331_s3 = scalar_lea.vmem %s1031_s28, %s330_s18  ;;  %s350_s4 = sld [smem:[#allocation3 + %s349_s29]] }
  0x5b   : > { %v332_v41 = vld [vmem:[%s331_s3] sm:$0x1]  ;;  %s336_s5 = scalar_lea.vmem %s1031_s28, %s335_s20  ;;  %s355_s6 = sld [smem:[#allocation3 + %s354_s30]] }
  0x5c   : > { %333 = vst [vmem:[%s1026_s24 + $0x29] sm:$0x1] %v332_v41  ;;  %v337_v42 = vld [vmem:[%s336_s5] sm:$0x1]  ;;  %s359_s7 = sadd.s32 47, %s1018_s15  ;;  %s364_s8 = sadd.s32 48, %s1018_s15 }
  0x5d   : > { %338 = vst [vmem:[%s1026_s24 + $0x2a] sm:$0x1] %v337_v42  ;;  %s341_s9 = scalar_lea.vmem %s1031_s28, %s340_s25  ;;  %s360_s10 = sld [smem:[#allocation3 + %s359_s7]] }
  0x5e   : > { %v342_v43 = vld [vmem:[%s341_s9] sm:$0x1]  ;;  %s346_s11 = scalar_lea.vmem %s1031_s28, %s345_s27  ;;  %s365_s12 = sld [smem:[#allocation3 + %s364_s8]] }
  0x5f   : > { %343 = vst [vmem:[%s1026_s24 + $0x2b] sm:$0x1] %v342_v43  ;;  %v347_v44 = vld [vmem:[%s346_s11] sm:$0x1]  ;;  %s369_s13 = sadd.s32 49, %s1018_s15  ;;  %s374_s0 = sadd.s32 50, %s1018_s15 }
  0x60   : > { %348 = vst [vmem:[%s1026_s24 + $0x2c] sm:$0x1] %v347_v44  ;;  %s351_s16 = scalar_lea.vmem %s1031_s28, %s350_s4  ;;  %s370_s17 = sld [smem:[#allocation3 + %s369_s13]] }
  0x61   : > { %v352_v45 = vld [vmem:[%s351_s16] sm:$0x1]  ;;  %s356_s18 = scalar_lea.vmem %s1031_s28, %s355_s6  ;;  %s375_s19 = sld [smem:[#allocation3 + %s374_s0]] }
  0x62   : > { %353 = vst [vmem:[%s1026_s24 + $0x2d] sm:$0x1] %v352_v45  ;;  %v357_v46 = vld [vmem:[%s356_s18] sm:$0x1]  ;;  %s379_s20 = sadd.s32 51, %s1018_s15  ;;  %s384_s21 = sadd.s32 52, %s1018_s15 }
  0x63   : > { %358 = vst [vmem:[%s1026_s24 + $0x2e] sm:$0x1] %v357_v46  ;;  %s361_s22 = scalar_lea.vmem %s1031_s28, %s360_s10  ;;  %s380_s23 = sld [smem:[#allocation3 + %s379_s20]] }
  0x64   : > { %v362_v47 = vld [vmem:[%s361_s22] sm:$0x1]  ;;  %s366_s25 = scalar_lea.vmem %s1031_s28, %s365_s12  ;;  %s385_s26 = sld [smem:[#allocation3 + %s384_s21]] }
  0x65   : > { %363 = vst [vmem:[%s1026_s24 + $0x2f] sm:$0x1] %v362_v47  ;;  %v367_v48 = vld [vmem:[%s366_s25] sm:$0x1]  ;;  %s389_s27 = sadd.s32 53, %s1018_s15  ;;  %s394_s29 = sadd.s32 54, %s1018_s15 }
  0x66   : > { %368 = vst [vmem:[%s1026_s24 + $0x30] sm:$0x1] %v367_v48  ;;  %s371_s30 = scalar_lea.vmem %s1031_s28, %s370_s17  ;;  %s390_s3 = sld [smem:[#allocation3 + %s389_s27]] }
  0x67   : > { %v372_v49 = vld [vmem:[%s371_s30] sm:$0x1]  ;;  %s376_s4 = scalar_lea.vmem %s1031_s28, %s375_s19  ;;  %s395_s5 = sld [smem:[#allocation3 + %s394_s29]] }
  0x68   : > { %373 = vst [vmem:[%s1026_s24 + $0x31] sm:$0x1] %v372_v49  ;;  %v377_v50 = vld [vmem:[%s376_s4] sm:$0x1]  ;;  %s399_s6 = sadd.s32 55, %s1018_s15  ;;  %s404_s7 = sadd.s32 56, %s1018_s15 }
  0x69   : > { %378 = vst [vmem:[%s1026_s24 + $0x32] sm:$0x1] %v377_v50  ;;  %s381_s8 = scalar_lea.vmem %s1031_s28, %s380_s23  ;;  %s400_s9 = sld [smem:[#allocation3 + %s399_s6]] }
  0x6a   : > { %v382_v51 = vld [vmem:[%s381_s8] sm:$0x1]  ;;  %s386_s10 = scalar_lea.vmem %s1031_s28, %s385_s26  ;;  %s405_s11 = sld [smem:[#allocation3 + %s404_s7]] }
  0x6b   : > { %383 = vst [vmem:[%s1026_s24 + $0x33] sm:$0x1] %v382_v51  ;;  %v387_v52 = vld [vmem:[%s386_s10] sm:$0x1]  ;;  %s409_s12 = sadd.s32 57, %s1018_s15  ;;  %s414_s13 = sadd.s32 58, %s1018_s15 }
  0x6c   : > { %388 = vst [vmem:[%s1026_s24 + $0x34] sm:$0x1] %v387_v52  ;;  %s391_s0 = scalar_lea.vmem %s1031_s28, %s390_s3  ;;  %s410_s16 = sld [smem:[#allocation3 + %s409_s12]] }
  0x6d   : > { %v392_v53 = vld [vmem:[%s391_s0] sm:$0x1]  ;;  %s396_s17 = scalar_lea.vmem %s1031_s28, %s395_s5  ;;  %s415_s18 = sld [smem:[#allocation3 + %s414_s13]] }
  0x6e   : > { %393 = vst [vmem:[%s1026_s24 + $0x35] sm:$0x1] %v392_v53  ;;  %v397_v54 = vld [vmem:[%s396_s17] sm:$0x1]  ;;  %s419_s19 = sadd.s32 59, %s1018_s15  ;;  %s424_s20 = sadd.s32 60, %s1018_s15 }
  0x6f   : > { %398 = vst [vmem:[%s1026_s24 + $0x36] sm:$0x1] %v397_v54  ;;  %s401_s21 = scalar_lea.vmem %s1031_s28, %s400_s9  ;;  %s420_s22 = sld [smem:[#allocation3 + %s419_s19]] }
  0x70   : > { %v402_v55 = vld [vmem:[%s401_s21] sm:$0x1]  ;;  %s406_s23 = scalar_lea.vmem %s1031_s28, %s405_s11  ;;  %s425_s25 = sld [smem:[#allocation3 + %s424_s20]] }
  0x71   : > { %403 = vst [vmem:[%s1026_s24 + $0x37] sm:$0x1] %v402_v55  ;;  %v407_v56 = vld [vmem:[%s406_s23] sm:$0x1]  ;;  %s429_s26 = sadd.s32 61, %s1018_s15  ;;  %s434_s27 = sadd.s32 62, %s1018_s15 }
  0x72   : > { %408 = vst [vmem:[%s1026_s24 + $0x38] sm:$0x1] %v407_v56  ;;  %s411_s29 = scalar_lea.vmem %s1031_s28, %s410_s16  ;;  %s430_s30 = sld [smem:[#allocation3 + %s429_s26]] }
  0x73   : > { %v412_v57 = vld [vmem:[%s411_s29] sm:$0x1]  ;;  %s416_s3 = scalar_lea.vmem %s1031_s28, %s415_s18  ;;  %s435_s4 = sld [smem:[#allocation3 + %s434_s27]] }
  0x74   : > { %413 = vst [vmem:[%s1026_s24 + $0x39] sm:$0x1] %v412_v57  ;;  %v417_v58 = vld [vmem:[%s416_s3] sm:$0x1]  ;;  %s439_s5 = sadd.s32 63, %s1018_s15  ;;  %s444_s6 = sadd.s32 64, %s1018_s15 }
  0x75   : > { %418 = vst [vmem:[%s1026_s24 + $0x3a] sm:$0x1] %v417_v58  ;;  %s421_s7 = scalar_lea.vmem %s1031_s28, %s420_s22  ;;  %s440_s8 = sld [smem:[#allocation3 + %s439_s5]] }
  0x76   : > { %v422_v59 = vld [vmem:[%s421_s7] sm:$0x1]  ;;  %s426_s9 = scalar_lea.vmem %s1031_s28, %s425_s25  ;;  %s445_s10 = sld [smem:[#allocation3 + %s444_s6]] }
  0x77   : > { %423 = vst [vmem:[%s1026_s24 + $0x3b] sm:$0x1] %v422_v59  ;;  %v427_v60 = vld [vmem:[%s426_s9] sm:$0x1]  ;;  %s449_s11 = sadd.s32 65, %s1018_s15  ;;  %s454_s12 = sadd.s32 66, %s1018_s15 }
  0x78   : > { %428 = vst [vmem:[%s1026_s24 + $0x3c] sm:$0x1] %v427_v60  ;;  %s431_s13 = scalar_lea.vmem %s1031_s28, %s430_s30  ;;  %s450_s0 = sld [smem:[#allocation3 + %s449_s11]] }
  0x79   : > { %v432_v61 = vld [vmem:[%s431_s13] sm:$0x1]  ;;  %s436_s16 = scalar_lea.vmem %s1031_s28, %s435_s4  ;;  %s455_s17 = sld [smem:[#allocation3 + %s454_s12]] }
  0x7a   : > { %433 = vst [vmem:[%s1026_s24 + $0x3d] sm:$0x1] %v432_v61  ;;  %v437_v62 = vld [vmem:[%s436_s16] sm:$0x1]  ;;  %s459_s18 = sadd.s32 67, %s1018_s15  ;;  %s464_s19 = sadd.s32 68, %s1018_s15 }
  0x7b   : > { %438 = vst [vmem:[%s1026_s24 + $0x3e] sm:$0x1] %v437_v62  ;;  %s441_s20 = scalar_lea.vmem %s1031_s28, %s440_s8  ;;  %s460_s21 = sld [smem:[#allocation3 + %s459_s18]] }
  0x7c   : > { %v442_v63 = vld [vmem:[%s441_s20] sm:$0x1]  ;;  %s446_s22 = scalar_lea.vmem %s1031_s28, %s445_s10  ;;  %s465_s23 = sld [smem:[#allocation3 + %s464_s19]] }
  0x7d   : > { %443 = vst [vmem:[%s1026_s24 + $0x3f] sm:$0x1] %v442_v63  ;;  %v447_v0 = vld [vmem:[%s446_s22] sm:$0x1]  ;;  %s469_s25 = sadd.s32 69, %s1018_s15  ;;  %s474_s26 = sadd.s32 70, %s1018_s15 }
  0x7e   : > { %448 = vst [vmem:[%s1026_s24 + $0x40] sm:$0x1] %v447_v0  ;;  %s451_s27 = scalar_lea.vmem %s1031_s28, %s450_s0  ;;  %s470_s29 = sld [smem:[#allocation3 + %s469_s25]] }
  0x7f   : > { %v452_v1 = vld [vmem:[%s451_s27] sm:$0x1]  ;;  %s456_s30 = scalar_lea.vmem %s1031_s28, %s455_s17  ;;  %s475_s3 = sld [smem:[#allocation3 + %s474_s26]] }
  0x80   : > { %453 = vst [vmem:[%s1026_s24 + $0x41] sm:$0x1] %v452_v1  ;;  %v457_v2 = vld [vmem:[%s456_s30] sm:$0x1]  ;;  %s479_s4 = sadd.s32 71, %s1018_s15  ;;  %s484_s5 = sadd.s32 72, %s1018_s15 }
  0x81   : > { %458 = vst [vmem:[%s1026_s24 + $0x42] sm:$0x1] %v457_v2  ;;  %s461_s6 = scalar_lea.vmem %s1031_s28, %s460_s21  ;;  %s480_s7 = sld [smem:[#allocation3 + %s479_s4]] }
  0x82   : > { %v462_v3 = vld [vmem:[%s461_s6] sm:$0x1]  ;;  %s466_s8 = scalar_lea.vmem %s1031_s28, %s465_s23  ;;  %s485_s9 = sld [smem:[#allocation3 + %s484_s5]] }
  0x83   : > { %463 = vst [vmem:[%s1026_s24 + $0x43] sm:$0x1] %v462_v3  ;;  %v467_v4 = vld [vmem:[%s466_s8] sm:$0x1]  ;;  %s489_s10 = sadd.s32 73, %s1018_s15  ;;  %s494_s11 = sadd.s32 74, %s1018_s15 }
  0x84   : > { %468 = vst [vmem:[%s1026_s24 + $0x44] sm:$0x1] %v467_v4  ;;  %s471_s12 = scalar_lea.vmem %s1031_s28, %s470_s29  ;;  %s490_s13 = sld [smem:[#allocation3 + %s489_s10]] }
  0x85   : > { %v472_v5 = vld [vmem:[%s471_s12] sm:$0x1]  ;;  %s476_s0 = scalar_lea.vmem %s1031_s28, %s475_s3  ;;  %s495_s16 = sld [smem:[#allocation3 + %s494_s11]] }
  0x86   : > { %473 = vst [vmem:[%s1026_s24 + $0x45] sm:$0x1] %v472_v5  ;;  %v477_v6 = vld [vmem:[%s476_s0] sm:$0x1]  ;;  %s499_s17 = sadd.s32 75, %s1018_s15  ;;  %s504_s18 = sadd.s32 76, %s1018_s15 }
  0x87   : > { %478 = vst [vmem:[%s1026_s24 + $0x46] sm:$0x1] %v477_v6  ;;  %s481_s19 = scalar_lea.vmem %s1031_s28, %s480_s7  ;;  %s500_s20 = sld [smem:[#allocation3 + %s499_s17]] }
  0x88   : > { %v482_v7 = vld [vmem:[%s481_s19] sm:$0x1]  ;;  %s486_s21 = scalar_lea.vmem %s1031_s28, %s485_s9  ;;  %s505_s22 = sld [smem:[#allocation3 + %s504_s18]] }
  0x89   : > { %483 = vst [vmem:[%s1026_s24 + $0x47] sm:$0x1] %v482_v7  ;;  %v487_v8 = vld [vmem:[%s486_s21] sm:$0x1]  ;;  %s509_s23 = sadd.s32 77, %s1018_s15  ;;  %s514_s25 = sadd.s32 78, %s1018_s15 }
  0x8a   : > { %488 = vst [vmem:[%s1026_s24 + $0x48] sm:$0x1] %v487_v8  ;;  %s491_s26 = scalar_lea.vmem %s1031_s28, %s490_s13  ;;  %s510_s27 = sld [smem:[#allocation3 + %s509_s23]] }
  0x8b   : > { %v492_v9 = vld [vmem:[%s491_s26] sm:$0x1]  ;;  %s496_s29 = scalar_lea.vmem %s1031_s28, %s495_s16  ;;  %s515_s30 = sld [smem:[#allocation3 + %s514_s25]] }
  0x8c   : > { %493 = vst [vmem:[%s1026_s24 + $0x49] sm:$0x1] %v492_v9  ;;  %v497_v10 = vld [vmem:[%s496_s29] sm:$0x1]  ;;  %s519_s3 = sadd.s32 79, %s1018_s15  ;;  %s524_s4 = sadd.s32 80, %s1018_s15 }
  0x8d   : > { %498 = vst [vmem:[%s1026_s24 + $0x4a] sm:$0x1] %v497_v10  ;;  %s501_s5 = scalar_lea.vmem %s1031_s28, %s500_s20  ;;  %s520_s6 = sld [smem:[#allocation3 + %s519_s3]] }
  0x8e   : > { %v502_v11 = vld [vmem:[%s501_s5] sm:$0x1]  ;;  %s506_s7 = scalar_lea.vmem %s1031_s28, %s505_s22  ;;  %s525_s8 = sld [smem:[#allocation3 + %s524_s4]] }
  0x8f   : > { %503 = vst [vmem:[%s1026_s24 + $0x4b] sm:$0x1] %v502_v11  ;;  %v507_v12 = vld [vmem:[%s506_s7] sm:$0x1]  ;;  %s529_s9 = sadd.s32 81, %s1018_s15  ;;  %s534_s10 = sadd.s32 82, %s1018_s15 }
  0x90   : > { %508 = vst [vmem:[%s1026_s24 + $0x4c] sm:$0x1] %v507_v12  ;;  %s511_s11 = scalar_lea.vmem %s1031_s28, %s510_s27  ;;  %s530_s12 = sld [smem:[#allocation3 + %s529_s9]] }
  0x91   : > { %v512_v13 = vld [vmem:[%s511_s11] sm:$0x1]  ;;  %s516_s13 = scalar_lea.vmem %s1031_s28, %s515_s30  ;;  %s535_s0 = sld [smem:[#allocation3 + %s534_s10]] }
  0x92   : > { %513 = vst [vmem:[%s1026_s24 + $0x4d] sm:$0x1] %v512_v13  ;;  %v517_v14 = vld [vmem:[%s516_s13] sm:$0x1]  ;;  %s539_s16 = sadd.s32 83, %s1018_s15  ;;  %s544_s17 = sadd.s32 84, %s1018_s15 }
  0x93   : > { %518 = vst [vmem:[%s1026_s24 + $0x4e] sm:$0x1] %v517_v14  ;;  %s521_s18 = scalar_lea.vmem %s1031_s28, %s520_s6  ;;  %s540_s19 = sld [smem:[#allocation3 + %s539_s16]] }
  0x94   : > { %v522_v15 = vld [vmem:[%s521_s18] sm:$0x1]  ;;  %s526_s20 = scalar_lea.vmem %s1031_s28, %s525_s8  ;;  %s545_s21 = sld [smem:[#allocation3 + %s544_s17]] }
  0x95   : > { %523 = vst [vmem:[%s1026_s24 + $0x4f] sm:$0x1] %v522_v15  ;;  %v527_v16 = vld [vmem:[%s526_s20] sm:$0x1]  ;;  %s549_s22 = sadd.s32 85, %s1018_s15  ;;  %s554_s23 = sadd.s32 86, %s1018_s15 }
  0x96   : > { %528 = vst [vmem:[%s1026_s24 + $0x50] sm:$0x1] %v527_v16  ;;  %s531_s25 = scalar_lea.vmem %s1031_s28, %s530_s12  ;;  %s550_s26 = sld [smem:[#allocation3 + %s549_s22]] }
  0x97   : > { %v532_v17 = vld [vmem:[%s531_s25] sm:$0x1]  ;;  %s536_s27 = scalar_lea.vmem %s1031_s28, %s535_s0  ;;  %s555_s29 = sld [smem:[#allocation3 + %s554_s23]] }
  0x98   : > { %533 = vst [vmem:[%s1026_s24 + $0x51] sm:$0x1] %v532_v17  ;;  %v537_v18 = vld [vmem:[%s536_s27] sm:$0x1]  ;;  %s559_s30 = sadd.s32 87, %s1018_s15  ;;  %s564_s3 = sadd.s32 88, %s1018_s15 }
  0x99   : > { %538 = vst [vmem:[%s1026_s24 + $0x52] sm:$0x1] %v537_v18  ;;  %s541_s4 = scalar_lea.vmem %s1031_s28, %s540_s19  ;;  %s560_s5 = sld [smem:[#allocation3 + %s559_s30]] }
  0x9a   : > { %v542_v19 = vld [vmem:[%s541_s4] sm:$0x1]  ;;  %s546_s6 = scalar_lea.vmem %s1031_s28, %s545_s21  ;;  %s565_s7 = sld [smem:[#allocation3 + %s564_s3]] }
  0x9b   : > { %543 = vst [vmem:[%s1026_s24 + $0x53] sm:$0x1] %v542_v19  ;;  %v547_v20 = vld [vmem:[%s546_s6] sm:$0x1]  ;;  %s569_s8 = sadd.s32 89, %s1018_s15  ;;  %s574_s9 = sadd.s32 90, %s1018_s15 }
  0x9c   : > { %548 = vst [vmem:[%s1026_s24 + $0x54] sm:$0x1] %v547_v20  ;;  %s551_s10 = scalar_lea.vmem %s1031_s28, %s550_s26  ;;  %s570_s11 = sld [smem:[#allocation3 + %s569_s8]] }
  0x9d   : > { %v552_v21 = vld [vmem:[%s551_s10] sm:$0x1]  ;;  %s556_s12 = scalar_lea.vmem %s1031_s28, %s555_s29  ;;  %s575_s13 = sld [smem:[#allocation3 + %s574_s9]] }
  0x9e   : > { %553 = vst [vmem:[%s1026_s24 + $0x55] sm:$0x1] %v552_v21  ;;  %v557_v22 = vld [vmem:[%s556_s12] sm:$0x1]  ;;  %s579_s0 = sadd.s32 91, %s1018_s15  ;;  %s584_s16 = sadd.s32 92, %s1018_s15 }
  0x9f   : > { %558 = vst [vmem:[%s1026_s24 + $0x56] sm:$0x1] %v557_v22  ;;  %s561_s17 = scalar_lea.vmem %s1031_s28, %s560_s5  ;;  %s580_s18 = sld [smem:[#allocation3 + %s579_s0]] }
  0xa0   : > { %v562_v23 = vld [vmem:[%s561_s17] sm:$0x1]  ;;  %s566_s19 = scalar_lea.vmem %s1031_s28, %s565_s7  ;;  %s585_s20 = sld [smem:[#allocation3 + %s584_s16]] }
  0xa1   : > { %563 = vst [vmem:[%s1026_s24 + $0x57] sm:$0x1] %v562_v23  ;;  %v567_v24 = vld [vmem:[%s566_s19] sm:$0x1]  ;;  %s589_s21 = sadd.s32 93, %s1018_s15  ;;  %s594_s22 = sadd.s32 94, %s1018_s15 }
  0xa2   : > { %568 = vst [vmem:[%s1026_s24 + $0x58] sm:$0x1] %v567_v24  ;;  %s571_s23 = scalar_lea.vmem %s1031_s28, %s570_s11  ;;  %s590_s25 = sld [smem:[#allocation3 + %s589_s21]] }
  0xa3   : > { %v572_v25 = vld [vmem:[%s571_s23] sm:$0x1]  ;;  %s576_s26 = scalar_lea.vmem %s1031_s28, %s575_s13  ;;  %s595_s27 = sld [smem:[#allocation3 + %s594_s22]] }
  0xa4   : > { %573 = vst [vmem:[%s1026_s24 + $0x59] sm:$0x1] %v572_v25  ;;  %v577_v26 = vld [vmem:[%s576_s26] sm:$0x1]  ;;  %s599_s29 = sadd.s32 95, %s1018_s15  ;;  %s604_s30 = sadd.s32 96, %s1018_s15 }
  0xa5   : > { %578 = vst [vmem:[%s1026_s24 + $0x5a] sm:$0x1] %v577_v26  ;;  %s581_s3 = scalar_lea.vmem %s1031_s28, %s580_s18  ;;  %s600_s4 = sld [smem:[#allocation3 + %s599_s29]] }
  0xa6   : > { %v582_v27 = vld [vmem:[%s581_s3] sm:$0x1]  ;;  %s586_s5 = scalar_lea.vmem %s1031_s28, %s585_s20  ;;  %s605_s6 = sld [smem:[#allocation3 + %s604_s30]] }
  0xa7   : > { %583 = vst [vmem:[%s1026_s24 + $0x5b] sm:$0x1] %v582_v27  ;;  %v587_v28 = vld [vmem:[%s586_s5] sm:$0x1]  ;;  %s609_s7 = sadd.s32 97, %s1018_s15  ;;  %s614_s8 = sadd.s32 98, %s1018_s15 }
  0xa8   : > { %588 = vst [vmem:[%s1026_s24 + $0x5c] sm:$0x1] %v587_v28  ;;  %s591_s9 = scalar_lea.vmem %s1031_s28, %s590_s25  ;;  %s610_s10 = sld [smem:[#allocation3 + %s609_s7]] }
  0xa9   : > { %v592_v29 = vld [vmem:[%s591_s9] sm:$0x1]  ;;  %s596_s11 = scalar_lea.vmem %s1031_s28, %s595_s27  ;;  %s615_s12 = sld [smem:[#allocation3 + %s614_s8]] }
  0xaa   : > { %593 = vst [vmem:[%s1026_s24 + $0x5d] sm:$0x1] %v592_v29  ;;  %v597_v30 = vld [vmem:[%s596_s11] sm:$0x1]  ;;  %s619_s13 = sadd.s32 99, %s1018_s15  ;;  %s624_s0 = sadd.s32 100, %s1018_s15 }
  0xab   : > { %598 = vst [vmem:[%s1026_s24 + $0x5e] sm:$0x1] %v597_v30  ;;  %s601_s16 = scalar_lea.vmem %s1031_s28, %s600_s4  ;;  %s620_s17 = sld [smem:[#allocation3 + %s619_s13]] }
  0xac   : > { %v602_v31 = vld [vmem:[%s601_s16] sm:$0x1]  ;;  %s606_s18 = scalar_lea.vmem %s1031_s28, %s605_s6  ;;  %s625_s19 = sld [smem:[#allocation3 + %s624_s0]] }
  0xad   : > { %603 = vst [vmem:[%s1026_s24 + $0x5f] sm:$0x1] %v602_v31  ;;  %v607_v32 = vld [vmem:[%s606_s18] sm:$0x1]  ;;  %s629_s20 = sadd.s32 101, %s1018_s15  ;;  %s634_s21 = sadd.s32 102, %s1018_s15 }
  0xae   : > { %608 = vst [vmem:[%s1026_s24 + $0x60] sm:$0x1] %v607_v32  ;;  %s611_s22 = scalar_lea.vmem %s1031_s28, %s610_s10  ;;  %s630_s23 = sld [smem:[#allocation3 + %s629_s20]] }
  0xaf   : > { %v612_v33 = vld [vmem:[%s611_s22] sm:$0x1]  ;;  %s616_s25 = scalar_lea.vmem %s1031_s28, %s615_s12  ;;  %s635_s26 = sld [smem:[#allocation3 + %s634_s21]] }
  0xb0   : > { %613 = vst [vmem:[%s1026_s24 + $0x61] sm:$0x1] %v612_v33  ;;  %v617_v34 = vld [vmem:[%s616_s25] sm:$0x1]  ;;  %s639_s27 = sadd.s32 103, %s1018_s15  ;;  %s644_s29 = sadd.s32 104, %s1018_s15 }
  0xb1   : > { %618 = vst [vmem:[%s1026_s24 + $0x62] sm:$0x1] %v617_v34  ;;  %s621_s30 = scalar_lea.vmem %s1031_s28, %s620_s17  ;;  %s640_s3 = sld [smem:[#allocation3 + %s639_s27]] }
  0xb2   : > { %v622_v35 = vld [vmem:[%s621_s30] sm:$0x1]  ;;  %s626_s4 = scalar_lea.vmem %s1031_s28, %s625_s19  ;;  %s645_s5 = sld [smem:[#allocation3 + %s644_s29]] }
  0xb3   : > { %623 = vst [vmem:[%s1026_s24 + $0x63] sm:$0x1] %v622_v35  ;;  %v627_v36 = vld [vmem:[%s626_s4] sm:$0x1]  ;;  %s649_s6 = sadd.s32 105, %s1018_s15  ;;  %s654_s7 = sadd.s32 106, %s1018_s15 }
  0xb4   : > { %628 = vst [vmem:[%s1026_s24 + $0x64] sm:$0x1] %v627_v36  ;;  %s631_s8 = scalar_lea.vmem %s1031_s28, %s630_s23  ;;  %s650_s9 = sld [smem:[#allocation3 + %s649_s6]] }
  0xb5   : > { %v632_v37 = vld [vmem:[%s631_s8] sm:$0x1]  ;;  %s636_s10 = scalar_lea.vmem %s1031_s28, %s635_s26  ;;  %s655_s11 = sld [smem:[#allocation3 + %s654_s7]] }
  0xb6   : > { %633 = vst [vmem:[%s1026_s24 + $0x65] sm:$0x1] %v632_v37  ;;  %v637_v38 = vld [vmem:[%s636_s10] sm:$0x1]  ;;  %s659_s12 = sadd.s32 107, %s1018_s15  ;;  %s664_s13 = sadd.s32 108, %s1018_s15 }
  0xb7   : > { %638 = vst [vmem:[%s1026_s24 + $0x66] sm:$0x1] %v637_v38  ;;  %s641_s0 = scalar_lea.vmem %s1031_s28, %s640_s3  ;;  %s660_s16 = sld [smem:[#allocation3 + %s659_s12]] }
  0xb8   : > { %v642_v39 = vld [vmem:[%s641_s0] sm:$0x1]  ;;  %s646_s17 = scalar_lea.vmem %s1031_s28, %s645_s5  ;;  %s665_s18 = sld [smem:[#allocation3 + %s664_s13]] }
  0xb9   : > { %643 = vst [vmem:[%s1026_s24 + $0x67] sm:$0x1] %v642_v39  ;;  %v647_v40 = vld [vmem:[%s646_s17] sm:$0x1]  ;;  %s669_s19 = sadd.s32 109, %s1018_s15  ;;  %s674_s20 = sadd.s32 110, %s1018_s15 }
  0xba   : > { %648 = vst [vmem:[%s1026_s24 + $0x68] sm:$0x1] %v647_v40  ;;  %s651_s21 = scalar_lea.vmem %s1031_s28, %s650_s9  ;;  %s670_s22 = sld [smem:[#allocation3 + %s669_s19]] }
  0xbb   : > { %v652_v41 = vld [vmem:[%s651_s21] sm:$0x1]  ;;  %s656_s23 = scalar_lea.vmem %s1031_s28, %s655_s11  ;;  %s675_s25 = sld [smem:[#allocation3 + %s674_s20]] }
  0xbc   : > { %653 = vst [vmem:[%s1026_s24 + $0x69] sm:$0x1] %v652_v41  ;;  %v657_v42 = vld [vmem:[%s656_s23] sm:$0x1]  ;;  %s679_s26 = sadd.s32 111, %s1018_s15  ;;  %s684_s27 = sadd.s32 112, %s1018_s15 }
  0xbd   : > { %658 = vst [vmem:[%s1026_s24 + $0x6a] sm:$0x1] %v657_v42  ;;  %s661_s29 = scalar_lea.vmem %s1031_s28, %s660_s16  ;;  %s680_s30 = sld [smem:[#allocation3 + %s679_s26]] }
  0xbe   : > { %v662_v43 = vld [vmem:[%s661_s29] sm:$0x1]  ;;  %s666_s3 = scalar_lea.vmem %s1031_s28, %s665_s18  ;;  %s685_s4 = sld [smem:[#allocation3 + %s684_s27]] }
  0xbf   : > { %663 = vst [vmem:[%s1026_s24 + $0x6b] sm:$0x1] %v662_v43  ;;  %v667_v44 = vld [vmem:[%s666_s3] sm:$0x1]  ;;  %s689_s5 = sadd.s32 113, %s1018_s15  ;;  %s694_s6 = sadd.s32 114, %s1018_s15 }
  0xc0   : > { %668 = vst [vmem:[%s1026_s24 + $0x6c] sm:$0x1] %v667_v44  ;;  %s671_s7 = scalar_lea.vmem %s1031_s28, %s670_s22  ;;  %s690_s8 = sld [smem:[#allocation3 + %s689_s5]] }
  0xc1   : > { %v672_v45 = vld [vmem:[%s671_s7] sm:$0x1]  ;;  %s676_s9 = scalar_lea.vmem %s1031_s28, %s675_s25  ;;  %s695_s10 = sld [smem:[#allocation3 + %s694_s6]] }
  0xc2   : > { %673 = vst [vmem:[%s1026_s24 + $0x6d] sm:$0x1] %v672_v45  ;;  %v677_v46 = vld [vmem:[%s676_s9] sm:$0x1]  ;;  %s699_s11 = sadd.s32 115, %s1018_s15  ;;  %s704_s12 = sadd.s32 116, %s1018_s15 }
  0xc3   : > { %678 = vst [vmem:[%s1026_s24 + $0x6e] sm:$0x1] %v677_v46  ;;  %s681_s13 = scalar_lea.vmem %s1031_s28, %s680_s30  ;;  %s700_s0 = sld [smem:[#allocation3 + %s699_s11]] }
  0xc4   : > { %v682_v47 = vld [vmem:[%s681_s13] sm:$0x1]  ;;  %s686_s16 = scalar_lea.vmem %s1031_s28, %s685_s4  ;;  %s705_s17 = sld [smem:[#allocation3 + %s704_s12]] }
  0xc5   : > { %683 = vst [vmem:[%s1026_s24 + $0x6f] sm:$0x1] %v682_v47  ;;  %v687_v48 = vld [vmem:[%s686_s16] sm:$0x1]  ;;  %s709_s18 = sadd.s32 117, %s1018_s15  ;;  %s714_s19 = sadd.s32 118, %s1018_s15 }
  0xc6   : > { %688 = vst [vmem:[%s1026_s24 + $0x70] sm:$0x1] %v687_v48  ;;  %s691_s20 = scalar_lea.vmem %s1031_s28, %s690_s8  ;;  %s710_s21 = sld [smem:[#allocation3 + %s709_s18]] }
  0xc7   : > { %v692_v49 = vld [vmem:[%s691_s20] sm:$0x1]  ;;  %s696_s22 = scalar_lea.vmem %s1031_s28, %s695_s10  ;;  %s715_s23 = sld [smem:[#allocation3 + %s714_s19]] }
  0xc8   : > { %693 = vst [vmem:[%s1026_s24 + $0x71] sm:$0x1] %v692_v49  ;;  %v697_v50 = vld [vmem:[%s696_s22] sm:$0x1]  ;;  %s719_s25 = sadd.s32 119, %s1018_s15  ;;  %s724_s26 = sadd.s32 120, %s1018_s15 }
  0xc9   : > { %698 = vst [vmem:[%s1026_s24 + $0x72] sm:$0x1] %v697_v50  ;;  %s701_s27 = scalar_lea.vmem %s1031_s28, %s700_s0  ;;  %s720_s29 = sld [smem:[#allocation3 + %s719_s25]] }
  0xca   : > { %v702_v51 = vld [vmem:[%s701_s27] sm:$0x1]  ;;  %s706_s30 = scalar_lea.vmem %s1031_s28, %s705_s17  ;;  %s725_s3 = sld [smem:[#allocation3 + %s724_s26]] }
  0xcb   : > { %703 = vst [vmem:[%s1026_s24 + $0x73] sm:$0x1] %v702_v51  ;;  %v707_v52 = vld [vmem:[%s706_s30] sm:$0x1]  ;;  %s729_s4 = sadd.s32 121, %s1018_s15  ;;  %s734_s5 = sadd.s32 122, %s1018_s15 }
  0xcc   : > { %708 = vst [vmem:[%s1026_s24 + $0x74] sm:$0x1] %v707_v52  ;;  %s711_s6 = scalar_lea.vmem %s1031_s28, %s710_s21  ;;  %s730_s7 = sld [smem:[#allocation3 + %s729_s4]] }
  0xcd   : > { %v712_v53 = vld [vmem:[%s711_s6] sm:$0x1]  ;;  %s716_s8 = scalar_lea.vmem %s1031_s28, %s715_s23  ;;  %s735_s9 = sld [smem:[#allocation3 + %s734_s5]] }
  0xce   : > { %713 = vst [vmem:[%s1026_s24 + $0x75] sm:$0x1] %v712_v53  ;;  %v717_v54 = vld [vmem:[%s716_s8] sm:$0x1]  ;;  %s739_s10 = sadd.s32 123, %s1018_s15  ;;  %s744_s11 = sadd.s32 124, %s1018_s15 }
  0xcf   : > { %718 = vst [vmem:[%s1026_s24 + $0x76] sm:$0x1] %v717_v54  ;;  %s721_s12 = scalar_lea.vmem %s1031_s28, %s720_s29  ;;  %s740_s13 = sld [smem:[#allocation3 + %s739_s10]] }
  0xd0   : > { %v722_v55 = vld [vmem:[%s721_s12] sm:$0x1]  ;;  %s726_s0 = scalar_lea.vmem %s1031_s28, %s725_s3  ;;  %s745_s16 = sld [smem:[#allocation3 + %s744_s11]] }
  0xd1   : > { %723 = vst [vmem:[%s1026_s24 + $0x77] sm:$0x1] %v722_v55  ;;  %v727_v56 = vld [vmem:[%s726_s0] sm:$0x1]  ;;  %s749_s17 = sadd.s32 125, %s1018_s15  ;;  %s754_s18 = sadd.s32 126, %s1018_s15 }
  0xd2   : > { %728 = vst [vmem:[%s1026_s24 + $0x78] sm:$0x1] %v727_v56  ;;  %s731_s19 = scalar_lea.vmem %s1031_s28, %s730_s7  ;;  %s750_s20 = sld [smem:[#allocation3 + %s749_s17]] }
  0xd3   : > { %v732_v57 = vld [vmem:[%s731_s19] sm:$0x1]  ;;  %s736_s21 = scalar_lea.vmem %s1031_s28, %s735_s9  ;;  %s755_s22 = sld [smem:[#allocation3 + %s754_s18]] }
  0xd4   : > { %733 = vst [vmem:[%s1026_s24 + $0x79] sm:$0x1] %v732_v57  ;;  %v737_v58 = vld [vmem:[%s736_s21] sm:$0x1]  ;;  %s759_s23 = sadd.s32 127, %s1018_s15 }
  0xd5   : > { %738 = vst [vmem:[%s1026_s24 + $0x7a] sm:$0x1] %v737_v58  ;;  %s741_s25 = scalar_lea.vmem %s1031_s28, %s740_s13  ;;  %s760_s26 = sld [smem:[#allocation3 + %s759_s23]] }
  0xd6   : > { %v742_v59 = vld [vmem:[%s741_s25] sm:$0x1]  ;;  %s746_s27 = scalar_lea.vmem %s1031_s28, %s745_s16 }
  0xd7   : > { %743 = vst [vmem:[%s1026_s24 + $0x7b] sm:$0x1] %v742_v59  ;;  %v747_v60 = vld [vmem:[%s746_s27] sm:$0x1] }
  0xd8   : > { %748 = vst [vmem:[%s1026_s24 + $0x7c] sm:$0x1] %v747_v60  ;;  %s751_s29 = scalar_lea.vmem %s1031_s28, %s750_s20 }
  0xd9   : > { %v752_v61 = vld [vmem:[%s751_s29] sm:$0x1]  ;;  %s756_s30 = scalar_lea.vmem %s1031_s28, %s755_s22 }
  0xda   : > { %753 = vst [vmem:[%s1026_s24 + $0x7d] sm:$0x1] %v752_v61  ;;  %v757_v62 = vld [vmem:[%s756_s30] sm:$0x1] }
  0xdb   : > { %758 = vst [vmem:[%s1026_s24 + $0x7e] sm:$0x1] %v757_v62  ;;  %s761_s3 = scalar_lea.vmem %s1031_s28, %s760_s26 }
  0xdc   : > { %v762_v63 = vld [vmem:[%s761_s3] sm:$0x1] }
  0xdd   : > { %763 = vst [vmem:[%s1026_s24 + $0x7f] sm:$0x1] %v762_v63 }
  0xde PF: > { %s18_s14 = sadd.s32 1, %s989_s14  }
  0xdf   : > { %p15_p9 = scmp.ge.s32.totalorder %s18_s14, 4  }
  0xe1   :  { %17 = sbr.rel (!%p15_p9) target bundleno = 16 (0x10), region = 182 }

</bundles_post_ra>
